<compile_context>
chip_gen: v5e
topology: v5e:2x2
jax: 0.10.0
libtpu: 0.0.40
codegen_flags: <defaults>
</compile_context>

<pallas_src>
import functools

import numpy as np
import jax
import jax.numpy as jnp
from jax.experimental import pallas as pl
from jax.experimental.pallas import tpu as pltpu

EPS = 1e-7                      # matches safe_log(x) = log(x + 1e-7)
MXU_DTYPE = jnp.bfloat16        # MXU operand dtype (f32 accumulation via
                                # preferred_element_type); set jnp.float32 for
                                # bit-faithful matmuls at lower MXU rate.
_SUBLANE = 16 if MXU_DTYPE == jnp.bfloat16 else 8


def _round_up(x, m):
    return ((x + m - 1) // m) * m


# ----------------------------------------------------------------------------
# Generation-dependent VMEM budget / tile caps
# ----------------------------------------------------------------------------
def _vmem_capacity_bytes():
    try:
        return int(pltpu.get_tpu_info().vmem_capacity_bytes)
    except Exception:
        return 64 * 1024 * 1024      # conservative (v7x per-TC) fallback


_VMEM_CAP = _vmem_capacity_bytes()
if _VMEM_CAP >= 96 * 1024 * 1024:    # v5e / v6e: 128 MiB VMEM
    _VMEM_LIMIT = 96 * 1024 * 1024
    _TN_CAP_SMALL = 512              # n_fft <= 1024
    _TN_CAP_LARGE = 256              # n_fft == 2048
else:                                # v7x: 64 MiB per TensorCore
    _VMEM_LIMIT = 56 * 1024 * 1024
    _TN_CAP_SMALL = 256
    _TN_CAP_LARGE = 256              # OK now that constants are single-buffered


# ----------------------------------------------------------------------------
# Deterministic constants (no trainable parameters in this module)
# ----------------------------------------------------------------------------
def _hann_window(n_fft):
    # torch.hann_window(n_fft), periodic
    n = np.arange(n_fft)
    return 0.5 - 0.5 * np.cos(2.0 * np.pi * n / n_fft)


def _windowed_dft_basis(n_fft, n_freq, f_pad):
    # Fused one-sided DFT basis [cos | -sin] with the Hann window folded in:
    # (x * w) @ C == x @ (diag(w) @ C).  Padded frequency columns are zero so
    # they contribute nothing to the distance sums.
    k = np.arange(n_fft, dtype=np.float64)[:, None]
    f = np.arange(n_freq, dtype=np.float64)[None, :]
    ang = 2.0 * np.pi * k * f / n_fft
    w = _hann_window(n_fft)[:, None]
    basis = np.zeros((n_fft, 2 * f_pad), np.float32)
    basis[:, :n_freq] = (w * np.cos(ang)).astype(np.float32)
    basis[:, f_pad:f_pad + n_freq] = (w * -np.sin(ang)).astype(np.float32)
    return basis


def _melscale_fbanks(n_freqs, f_min, f_max, n_mels, sample_rate):
    # torchaudio.functional.melscale_fbanks, mel_scale="htk", norm=None
    def hz_to_mel(f):
        return 2595.0 * np.log10(1.0 + f / 700.0)

    def mel_to_hz(m):
        return 700.0 * (10.0 ** (m / 2595.0) - 1.0)

    all_freqs = np.linspace(0.0, sample_rate // 2, n_freqs)
    m_pts = np.linspace(hz_to_mel(f_min), hz_to_mel(f_max), n_mels + 2)
    f_pts = mel_to_hz(m_pts)
    f_diff = f_pts[1:] - f_pts[:-1]                       # (n_mels + 1,)
    slopes = f_pts[None, :] - all_freqs[:, None]          # (n_freqs, n_mels+2)
    down = (-1.0 * slopes[:, :-2]) / f_diff[:-1]
    up = slopes[:, 2:] / f_diff[1:]
    fb = np.maximum(0.0, np.minimum(down, up))
    return fb.astype(np.float32)                          # (n_freqs, n_mels)


def _frame_pair(x_inp, x_tar, n_fft, hop, n_frames, n_pad):
    # torch.stft(center=True, pad_mode="reflect") framing of BOTH signals in a
    # single gather; padded audio is cast to bf16 before the gather so the
    # framed HBM traffic is halved.
    # TODO(synk): frame in-kernel (basis split into 4 hop-sized K-chunks
    # against a contiguous audio block DMA'd per tile) to remove the 4x
    # overlapped-frame duplication entirely (largest win on v5e HBM BW).
    B, L = x_inp.shape
    pad = n_fft // 2
    if L <= pad:
        raise ValueError(
            f"reflect padding needs signal length > n_fft//2 ({L} <= {pad})")
    x2 = jnp.stack([x_inp, x_tar], axis=0)                      # (2, B, L)
    xp = jnp.pad(x2, ((0, 0), (0, 0), (pad, pad)), mode="reflect")
    xp = xp.astype(MXU_DTYPE)
    idx = np.arange(n_frames)[:, None] * hop + np.arange(n_fft)[None, :]
    frames = xp[:, :, idx]                                      # (2,B,T,n_fft)
    frames = frames.reshape(2, B * n_frames, n_fft)
    frames = jnp.pad(frames, ((0, 0), (0, n_pad - B * n_frames), (0, 0)))
    return frames                                               # (2,n_pad,n_fft)


# ----------------------------------------------------------------------------
# Pallas kernel: per frame tile, fused-DFT matmuls on the MXU, magnitude,
# optional mel projection, and |diff| partial sums accumulated into lane-dense
# (8, W) resident output blocks (one block per megacore half).
# ----------------------------------------------------------------------------
def _make_kernel(compute_mel, compute_log, tn, f_pad, n_fft):
    def _rowsum8(x):
        # (tn, W) -> (8, W) via a pairwise tree of tile-aligned static slices
        # (pure VPU adds, lets the 4 VALU slots overlap instead of a
        # tn//8-deep serial dependency).  Cross-lane reduction is deferred to
        # XLA outside the kernel.
        parts = [x[r * 8:(r + 1) * 8, :] for r in range(x.shape[0] // 8)]
        while len(parts) > 1:
            nxt = [parts[i] + parts[i + 1]
                   for i in range(0, len(parts) - 1, 2)]
            if len(parts) % 2:
                nxt.append(parts[-1])
            parts = nxt
        return parts[0]

    def kernel(fr_ref, basis_ref, *rest):
        rest = list(rest)
        fb_ref = rest.pop(0) if compute_mel else None
        s_lin_ref = rest.pop(0)
        s_log_ref = rest.pop(0) if compute_log else None
        m_lin_ref = rest.pop(0) if compute_mel else None
        m_log_ref = rest.pop(0) if (compute_mel and compute_log) else None

        @pl.when(pl.program_id(1) == 0)
        def _():
            s_lin_ref[...] = jnp.zeros_like(s_lin_ref)
            if compute_log:
                s_log_ref[...] = jnp.zeros_like(s_log_ref)
            if compute_mel:
                m_lin_ref[...] = jnp.zeros_like(m_lin_ref)
                if compute_log:
                    m_log_ref[...] = jnp.zeros_like(m_log_ref)

        basis = basis_ref[...]                       # (n_fft, 2*F_pad) bf16
        # TODO(synk): stack both signals' frame tiles into one (2*tn, n_fft)
        # LHS so the basis is staged into the MXU once per step (needs a
        # validated layout-preserving (2,tn,K)->(2tn,K) merge).
        zi = jnp.dot(fr_ref[0], basis, preferred_element_type=jnp.float32)
        zt = jnp.dot(fr_ref[1], basis, preferred_element_type=jnp.float32)

        re_i = zi[:, :f_pad]
        im_i = zi[:, f_pad:]
        re_t = zt[:, :f_pad]
        im_t = zt[:, f_pad:]
        mag_i = jnp.sqrt(re_i * re_i + im_i * im_i)  # power = 1 (magnitude)
        mag_t = jnp.sqrt(re_t * re_t + im_t * im_t)

        s_lin_ref[...] = s_lin_ref[...] + _rowsum8(jnp.abs(mag_i - mag_t))
        if compute_log:
            s_log_ref[...] = s_log_ref[...] + _rowsum8(
                jnp.abs(jnp.log(mag_i + EPS) - jnp.log(mag_t + EPS)))

        if compute_mel:
            fb = fb_ref[...]                         # (F_pad, M_pad) bf16
            mel_i = jnp.dot(mag_i.astype(fb.dtype), fb,
                            preferred_element_type=jnp.float32)
            mel_t = jnp.dot(mag_t.astype(fb.dtype), fb,
                            preferred_element_type=jnp.float32)
            m_lin_ref[...] = m_lin_ref[...] + _rowsum8(jnp.abs(mel_i - mel_t))
            if compute_log:
                m_log_ref[...] = m_log_ref[...] + _rowsum8(
                    jnp.abs(jnp.log(mel_i + EPS) - jnp.log(mel_t + EPS)))

    return kernel


def _const_spec(block_shape):
    # Constant (index_map == (0,...,0)) operands don't need double-buffering;
    # Buffered(1) reclaims one full copy of the basis/fbank in VMEM.
    index_map = lambda c, i: (0,) * len(block_shape)
    try:
        return pl.BlockSpec(block_shape, index_map,
                            pipeline_mode=pl.Buffered(1))
    except (TypeError, AttributeError):   # older jax without pipeline_mode
        return pl.BlockSpec(block_shape, index_map)


def _scale_distance_sums(x_inp, x_tar, n_fft, hop, sr,
                         compute_mel, compute_log, f_min=50.0):
    B, L = x_inp.shape
    n_freq = n_fft // 2 + 1
    f_pad = _round_up(n_freq, 128)
    n_mels = n_fft // 4
    m_pad = _round_up(n_mels, 128)

    n_frames = 1 + L // hop
    N = B * n_frames

    # Frame tile: big enough to keep the MXU busy; generation dependent so the
    # v7x 64 MiB/TC budget doesn't throttle v5e/v6e (128 MiB VMEM).
    tn_cap = _TN_CAP_SMALL if n_fft <= 1024 else _TN_CAP_LARGE
    tn = min(tn_cap, _round_up(N, _SUBLANE))
    n_pad = _round_up(N, 2 * tn)          # leading size-2 "parallel" axis
    n_half = n_pad // (2 * tn)

    # zero-padded frames give zero magnitude for both inp/tar -> zero |diff|
    # (and log(eps) - log(eps) = 0), so padding never changes the sums.
    frames = _frame_pair(x_inp, x_tar, n_fft, hop, n_frames, n_pad)

    basis = jnp.asarray(_windowed_dft_basis(n_fft, n_freq, f_pad),
                        dtype=MXU_DTYPE)               # (n_fft, 2*F_pad)

    inputs = [frames, basis]
    in_specs = [
        pl.BlockSpec((2, tn, n_fft), lambda c, i: (0, c * n_half + i, 0)),
        _const_spec((n_fft, 2 * f_pad)),
    ]
    fb_size = 0
    if compute_mel:
        # f_max default in torchaudio MelSpectrogram is float(sr // 2).
        fb = np.zeros((f_pad, m_pad), np.float32)
        fb[:n_freq, :n_mels] = _melscale_fbanks(
            n_freq, f_min, float(sr // 2), n_mels, sr)
        fb_j = jnp.asarray(fb, dtype=MXU_DTYPE)
        fb_size = fb_j.size
        inputs.append(fb_j)
        in_specs.append(_const_spec((f_pad, m_pad)))

    def _part_out(width):
        return (jax.ShapeDtypeStruct((2, 8, width), jnp.float32),
                pl.BlockSpec((None, 8, width), lambda c, i: (c, 0, 0)))

    out_shape, out_specs = [], []
    for need, width in ((True, f_pad),
                        (compute_log, f_pad),
                        (compute_mel, m_pad),
                        (compute_mel and compute_log, m_pad)):
        if need:
            sh, sp = _part_out(width)
            out_shape.append(sh)
            out_specs.append(sp)

    kernel = _make_kernel(compute_mel, compute_log, tn, f_pad, n_fft)

    # Advisory cost estimate so XLA schedules the framing glue and the final
    # cross-lane reductions well around the sequential per-scale pallas_calls.
    dft_flops = 2 * (2 * n_pad) * n_fft * (2 * f_pad)
    mel_flops = (2 * (2 * n_pad) * f_pad * m_pad) if compute_mel else 0
    transcendentals = (2 * n_pad) * f_pad                         # sqrt
    if compute_log:
        transcendentals += (2 * n_pad) * f_pad
        if compute_mel:
            transcendentals += (2 * n_pad) * m_pad
    itemsize = jnp.dtype(MXU_DTYPE).itemsize
    bytes_accessed = (frames.size * itemsize + basis.size * itemsize
                      + fb_size * itemsize
                      + sum(int(np.prod(s.shape)) * 4 for s in out_shape))

    outs = pl.pallas_call(
        kernel,
        out_shape=out_shape,
        grid_spec=pltpu.PrefetchScalarGridSpec(
            num_scalar_prefetch=0,
            grid=(2, n_half),
            in_specs=in_specs,
            out_specs=out_specs,
        ),
        compiler_params=pltpu.CompilerParams(
            # TODO(synk): use pltpu.CORE_PARALLEL for the leading axis on v7x
            # (2 TCs) once verified; generic "parallel" is the portable choice
            # and a no-op on single-TC v5e/v6e.
            dimension_semantics=("parallel", "arbitrary"),
            vmem_limit_bytes=_VMEM_LIMIT,
        ),
        cost_estimate=pl.CostEstimate(
            flops=int(dft_flops + mel_flops),
            transcendentals=int(transcendentals),
            bytes_accessed=int(bytes_accessed)),
    )(*inputs)

    if not isinstance(outs, (list, tuple)):
        outs = [outs]
    outs = list(outs)
    s_lin = jnp.sum(outs.pop(0))
    s_log = jnp.sum(outs.pop(0)) if compute_log else jnp.float32(0.0)
    m_lin = jnp.sum(outs.pop(0)) if compute_mel else jnp.float32(0.0)
    m_log = (jnp.sum(outs.pop(0))
             if (compute_mel and compute_log) else jnp.float32(0.0))

    stft_numel = float(B * n_freq * n_frames)   # torch spec shape (B, F, T)
    mel_numel = float(B * n_mels * n_frames)    # torch mel shape (B, M, T)
    return s_lin, s_log, m_lin, m_log, stft_numel, mel_numel


# ----------------------------------------------------------------------------
# Forward of spectral_distances
# ----------------------------------------------------------------------------
def spectral_distances_forward(x_inp, x_tar,
                               stft_scales=(2048, 1024, 512, 256, 128),
                               mel_scales=(2048, 1024),
                               spec_power=1, mel_dist=True, log_dist=0,
                               sr=16000):
    assert spec_power == 1  # module default; magnitude spectrogram
    # compute each distinct scale once (scales shared by both lists reuse the
    # same magnitude spectrogram, like-for-like with the reference math).
    all_scales = sorted(set(list(stft_scales) +
                            (list(mel_scales) if mel_dist else [])),
                        reverse=True)
    results = {}
    for scale in all_scales:
        results[scale] = _scale_distance_sums(
            x_inp, x_tar, n_fft=scale, hop=scale // 4, sr=sr,
            compute_mel=(mel_dist and scale in mel_scales),
            compute_log=(log_dist > 0))

    loss = jnp.float32(0.0)
    n_scales = 0
    for scale in stft_scales:
        s_lin, s_log, _, _, stft_n, _ = results[scale]
        loss = loss + s_lin / stft_n
        n_scales += 1
        if log_dist > 0:
            loss = loss + (s_log / stft_n) * log_dist
            n_scales += log_dist
    if mel_dist:
        for scale in mel_scales:
            _, _, m_lin, m_log, _, mel_n = results[scale]
            loss = loss + m_lin / mel_n
            n_scales += 1
            if log_dist > 0:
                loss = loss + (m_log / mel_n) * log_dist
                n_scales += log_dist
    return loss / n_scales


if __name__ == "__main__":
    key = jax.random.PRNGKey(0)
    k1, k2 = jax.random.split(key)
    B, L = 2, 1024
    x_inp = jax.random.normal(k1, (B, L), dtype=jnp.float32)
    x_tar = jax.random.normal(k2, (B, L), dtype=jnp.float32)

    # small-scale instantiation of the module (constructor args)
    fwd = jax.jit(functools.partial(
        spectral_distances_forward,
        stft_scales=(512, 256, 128),
        mel_scales=(512, 256),
        spec_power=1, mel_dist=True, log_dist=0, sr=16000))

    loss = jax.block_until_ready(fwd(x_inp, x_tar))
    assert loss.shape == () and bool(jnp.isfinite(loss))
    print("KERNEL_OK")
</pallas_src>

<mosaic_0001>
module attributes {stable_mosaic.version = 11 : i64} {
  func.func @kernel(%arg0: i32, %arg1: i32, %arg2: memref<2x32x512xbf16, #tpu.memory_space<vmem>>, %arg3: memref<512x768xbf16, #tpu.memory_space<vmem>>, %arg4: memref<384x128xbf16, #tpu.memory_space<vmem>>, %arg5: memref<1x8x384xf32, #tpu.memory_space<vmem>>, %arg6: memref<1x8x128xf32, #tpu.memory_space<vmem>>) attributes {dimension_semantics = [#tpu.dimension_semantics<parallel>, #tpu.dimension_semantics<arbitrary>], iteration_bounds = array<i64: 2, 1>, scalar_prefetch = 0 : i64, scratch_operands = 0 : i64, tpu.core_type = #tpu.core_type<tc>, window_params = [{transform_indices = @transform_0, window_bounds = array<i64: 2, 32, 512>}, {pipeline_mode = #tpu.pipeline_mode<synchronous>, transform_indices = @transform_1, window_bounds = array<i64: 512, 768>}, {pipeline_mode = #tpu.pipeline_mode<synchronous>, transform_indices = @transform_2, window_bounds = array<i64: 384, 128>}, {transform_indices = @transform_3, window_bounds = array<i64: 1, 8, 384>}, {transform_indices = @transform_4, window_bounds = array<i64: 1, 8, 128>}]} {
    %c0_i32 = arith.constant 0 : i32
    %0 = arith.cmpi eq, %arg1, %c0_i32 : i32
    %1 = arith.extui %0 : i1 to i32
    %c0_i32_0 = arith.constant 0 : i32
    %2 = arith.cmpi ne, %1, %c0_i32_0 : i32
    scf.if %2 {
      %cst_24 = arith.constant 0.000000e+00 : f32
      %57 = vector.broadcast %cst_24 : f32 to vector<8x384xf32>
      %c0_25 = arith.constant 0 : index
      %c0_26 = arith.constant 0 : index
      %c0_27 = arith.constant 0 : index
      %58 = vector.load %arg5[%c0_25, %c0_26, %c0_27] : memref<1x8x384xf32, #tpu.memory_space<vmem>>, vector<1x8x384xf32>
      %59 = vector.shape_cast %58 : vector<1x8x384xf32> to vector<8x384xf32>
      %60 = vector.shape_cast %57 : vector<8x384xf32> to vector<1x8x384xf32>
      tpu.vector_store %arg5[%c0_25, %c0_26, %c0_27], %60 {strides = array<i32>} : memref<1x8x384xf32, #tpu.memory_space<vmem>>, vector<1x8x384xf32>,
      %cst_28 = arith.constant 0.000000e+00 : f32
      %61 = vector.broadcast %cst_28 : f32 to vector<8x128xf32>
      %c0_29 = arith.constant 0 : index
      %c0_30 = arith.constant 0 : index
      %c0_31 = arith.constant 0 : index
      %62 = vector.load %arg6[%c0_29, %c0_30, %c0_31] : memref<1x8x128xf32, #tpu.memory_space<vmem>>, vector<1x8x128xf32>
      %63 = vector.shape_cast %62 : vector<1x8x128xf32> to vector<8x128xf32>
      %64 = vector.shape_cast %61 : vector<8x128xf32> to vector<1x8x128xf32>
      tpu.vector_store %arg6[%c0_29, %c0_30, %c0_31], %64 {strides = array<i32>} : memref<1x8x128xf32, #tpu.memory_space<vmem>>, vector<1x8x128xf32>,
    } else {
    }
    %c0 = arith.constant 0 : index
    %c0_1 = arith.constant 0 : index
    %3 = vector.load %arg3[%c0, %c0_1] : memref<512x768xbf16, #tpu.memory_space<vmem>>, vector<512x768xbf16>
    %c0_2 = arith.constant 0 : index
    %c0_3 = arith.constant 0 : index
    %c0_4 = arith.constant 0 : index
    %4 = vector.load %arg2[%c0_2, %c0_3, %c0_4] : memref<2x32x512xbf16, #tpu.memory_space<vmem>>, vector<1x32x512xbf16>
    %5 = vector.shape_cast %4 : vector<1x32x512xbf16> to vector<32x512xbf16>
    %cst = arith.constant dense<0.000000e+00> : vector<32x768xf32>
    %6 = tpu.matmul %5, %3, %cst {dimension_numbers = #tpu.dot_dimension_numbers<[1], [0], [0], [1], [0, 0, 1, 1], [], []>} : vector<32x512xbf16>, vector<512x768xbf16>, vector<32x768xf32> -> vector<32x768xf32>
    %c1 = arith.constant 1 : index
    %c0_5 = arith.constant 0 : index
    %c0_6 = arith.constant 0 : index
    %7 = vector.load %arg2[%c1, %c0_5, %c0_6] : memref<2x32x512xbf16, #tpu.memory_space<vmem>>, vector<1x32x512xbf16>
    %8 = vector.shape_cast %7 : vector<1x32x512xbf16> to vector<32x512xbf16>
    %cst_7 = arith.constant dense<0.000000e+00> : vector<32x768xf32>
    %9 = tpu.matmul %8, %3, %cst_7 {dimension_numbers = #tpu.dot_dimension_numbers<[1], [0], [0], [1], [0, 0, 1, 1], [], []>} : vector<32x512xbf16>, vector<512x768xbf16>, vector<32x768xf32> -> vector<32x768xf32>
    %10 = vector.extract_strided_slice %6 {offsets = [0, 0], sizes = [32, 384], strides = [1, 1]} : vector<32x768xf32> to vector<32x384xf32>
    %11 = vector.extract_strided_slice %6 {offsets = [0, 384], sizes = [32, 384], strides = [1, 1]} : vector<32x768xf32> to vector<32x384xf32>
    %12 = vector.extract_strided_slice %9 {offsets = [0, 0], sizes = [32, 384], strides = [1, 1]} : vector<32x768xf32> to vector<32x384xf32>
    %13 = vector.extract_strided_slice %9 {offsets = [0, 384], sizes = [32, 384], strides = [1, 1]} : vector<32x768xf32> to vector<32x384xf32>
    %14 = arith.mulf %10, %10 : vector<32x384xf32>
    %15 = arith.mulf %11, %11 : vector<32x384xf32>
    %16 = arith.addf %14, %15 : vector<32x384xf32>
    %17 = math.sqrt %16 : vector<32x384xf32>
    %18 = arith.mulf %12, %12 : vector<32x384xf32>
    %19 = arith.mulf %13, %13 : vector<32x384xf32>
    %20 = arith.addf %18, %19 : vector<32x384xf32>
    %21 = math.sqrt %20 : vector<32x384xf32>
    %c0_8 = arith.constant 0 : index
    %c0_9 = arith.constant 0 : index
    %c0_10 = arith.constant 0 : index
    %22 = vector.load %arg5[%c0_8, %c0_9, %c0_10] : memref<1x8x384xf32, #tpu.memory_space<vmem>>, vector<1x8x384xf32>
    %23 = vector.shape_cast %22 : vector<1x8x384xf32> to vector<8x384xf32>
    %24 = arith.subf %17, %21 : vector<32x384xf32>
    %25 = math.absf %24 : vector<32x384xf32>
    %26 = vector.extract_strided_slice %25 {offsets = [0, 0], sizes = [8, 384], strides = [1, 1]} : vector<32x384xf32> to vector<8x384xf32>
    %27 = vector.extract_strided_slice %25 {offsets = [8, 0], sizes = [8, 384], strides = [1, 1]} : vector<32x384xf32> to vector<8x384xf32>
    %28 = vector.extract_strided_slice %25 {offsets = [16, 0], sizes = [8, 384], strides = [1, 1]} : vector<32x384xf32> to vector<8x384xf32>
    %29 = vector.extract_strided_slice %25 {offsets = [24, 0], sizes = [8, 384], strides = [1, 1]} : vector<32x384xf32> to vector<8x384xf32>
    %30 = arith.addf %26, %27 : vector<8x384xf32>
    %31 = arith.addf %28, %29 : vector<8x384xf32>
    %32 = arith.addf %30, %31 : vector<8x384xf32>
    %33 = arith.addf %23, %32 : vector<8x384xf32>
    %c0_11 = arith.constant 0 : index
    %c0_12 = arith.constant 0 : index
    %c0_13 = arith.constant 0 : index
    %34 = vector.load %arg5[%c0_11, %c0_12, %c0_13] : memref<1x8x384xf32, #tpu.memory_space<vmem>>, vector<1x8x384xf32>
    %35 = vector.shape_cast %34 : vector<1x8x384xf32> to vector<8x384xf32>
    %36 = vector.shape_cast %33 : vector<8x384xf32> to vector<1x8x384xf32>
    tpu.vector_store %arg5[%c0_11, %c0_12, %c0_13], %36 {strides = array<i32>} : memref<1x8x384xf32, #tpu.memory_space<vmem>>, vector<1x8x384xf32>,
    %c0_14 = arith.constant 0 : index
    %c0_15 = arith.constant 0 : index
    %37 = vector.load %arg4[%c0_14, %c0_15] : memref<384x128xbf16, #tpu.memory_space<vmem>>, vector<384x128xbf16>
    %38 = arith.truncf %17 : vector<32x384xf32> to vector<32x384xbf16>
    %cst_16 = arith.constant dense<0.000000e+00> : vector<32x128xf32>
    %39 = tpu.matmul %38, %37, %cst_16 {dimension_numbers = #tpu.dot_dimension_numbers<[1], [0], [0], [1], [0, 0, 1, 1], [], []>} : vector<32x384xbf16>, vector<384x128xbf16>, vector<32x128xf32> -> vector<32x128xf32>
    %40 = arith.truncf %21 : vector<32x384xf32> to vector<32x384xbf16>
    %cst_17 = arith.constant dense<0.000000e+00> : vector<32x128xf32>
    %41 = tpu.matmul %40, %37, %cst_17 {dimension_numbers = #tpu.dot_dimension_numbers<[1], [0], [0], [1], [0, 0, 1, 1], [], []>} : vector<32x384xbf16>, vector<384x128xbf16>, vector<32x128xf32> -> vector<32x128xf32>
    %c0_18 = arith.constant 0 : index
    %c0_19 = arith.constant 0 : index
    %c0_20 = arith.constant 0 : index
    %42 = vector.load %arg6[%c0_18, %c0_19, %c0_20] : memref<1x8x128xf32, #tpu.memory_space<vmem>>, vector<1x8x128xf32>
    %43 = vector.shape_cast %42 : vector<1x8x128xf32> to vector<8x128xf32>
    %44 = arith.subf %39, %41 : vector<32x128xf32>
    %45 = math.absf %44 : vector<32x128xf32>
    %46 = vector.extract_strided_slice %45 {offsets = [0, 0], sizes = [8, 128], strides = [1, 1]} : vector<32x128xf32> to vector<8x128xf32>
    %47 = vector.extract_strided_slice %45 {offsets = [8, 0], sizes = [8, 128], strides = [1, 1]} : vector<32x128xf32> to vector<8x128xf32>
    %48 = vector.extract_strided_slice %45 {offsets = [16, 0], sizes = [8, 128], strides = [1, 1]} : vector<32x128xf32> to vector<8x128xf32>
    %49 = vector.extract_strided_slice %45 {offsets = [24, 0], sizes = [8, 128], strides = [1, 1]} : vector<32x128xf32> to vector<8x128xf32>
    %50 = arith.addf %46, %47 : vector<8x128xf32>
    %51 = arith.addf %48, %49 : vector<8x128xf32>
    %52 = arith.addf %50, %51 : vector<8x128xf32>
    %53 = arith.addf %43, %52 : vector<8x128xf32>
    %c0_21 = arith.constant 0 : index
    %c0_22 = arith.constant 0 : index
    %c0_23 = arith.constant 0 : index
    %54 = vector.load %arg6[%c0_21, %c0_22, %c0_23] : memref<1x8x128xf32, #tpu.memory_space<vmem>>, vector<1x8x128xf32>
    %55 = vector.shape_cast %54 : vector<1x8x128xf32> to vector<8x128xf32>
    %56 = vector.shape_cast %53 : vector<8x128xf32> to vector<1x8x128xf32>
    tpu.vector_store %arg6[%c0_21, %c0_22, %c0_23], %56 {strides = array<i32>} : memref<1x8x128xf32, #tpu.memory_space<vmem>>, vector<1x8x128xf32>,
    return
  }
  func.func @transform_0(%arg0: i32, %arg1: i32) -> (i32, i32, i32) {
    %c1_i32 = arith.constant 1 : i32
    %0 = arith.muli %arg0, %c1_i32 : i32
    %1 = arith.addi %0, %arg1 : i32
    %c0_i32 = arith.constant 0 : i32
    %c0_i32_0 = arith.constant 0 : i32
    %c0_i32_1 = arith.constant 0 : i32
    return %c0_i32, %1, %c0_i32_0 : i32, i32, i32
  }
  func.func @transform_1(%arg0: i32, %arg1: i32) -> (i32, i32) {
    %c0_i32 = arith.constant 0 : i32
    %c0_i32_0 = arith.constant 0 : i32
    %c0_i32_1 = arith.constant 0 : i32
    return %c0_i32, %c0_i32_0 : i32, i32
  }
  func.func @transform_2(%arg0: i32, %arg1: i32) -> (i32, i32) {
    %c0_i32 = arith.constant 0 : i32
    %c0_i32_0 = arith.constant 0 : i32
    %c0_i32_1 = arith.constant 0 : i32
    return %c0_i32, %c0_i32_0 : i32, i32
  }
  func.func @transform_3(%arg0: i32, %arg1: i32) -> (i32, i32, i32) {
    %c0_i32 = arith.constant 0 : i32
    %c0_i32_0 = arith.constant 0 : i32
    %c0_i32_1 = arith.constant 0 : i32
    return %arg0, %c0_i32, %c0_i32_0 : i32, i32, i32
  }
  func.func @transform_4(%arg0: i32, %arg1: i32) -> (i32, i32, i32) {
    %c0_i32 = arith.constant 0 : i32
    %c0_i32_0 = arith.constant 0 : i32
    %c0_i32_1 = arith.constant 0 : i32
    return %arg0, %c0_i32, %c0_i32_0 : i32, i32, i32
  }
}

module attributes {stable_mosaic.version = 11 : i64} {
  func.func @kernel(%arg0: i32, %arg1: i32, %arg2: memref<2x48x256xbf16, #tpu.memory_space<vmem>>, %arg3: memref<256x512xbf16, #tpu.memory_space<vmem>>, %arg4: memref<256x128xbf16, #tpu.memory_space<vmem>>, %arg5: memref<1x8x256xf32, #tpu.memory_space<vmem>>, %arg6: memref<1x8x128xf32, #tpu.memory_space<vmem>>) attributes {dimension_semantics = [#tpu.dimension_semantics<parallel>, #tpu.dimension_semantics<arbitrary>], iteration_bounds = array<i64: 2, 1>, scalar_prefetch = 0 : i64, scratch_operands = 0 : i64, tpu.core_type = #tpu.core_type<tc>, window_params = [{transform_indices = @transform_0, window_bounds = array<i64: 2, 48, 256>}, {pipeline_mode = #tpu.pipeline_mode<synchronous>, transform_indices = @transform_1, window_bounds = array<i64: 256, 512>}, {pipeline_mode = #tpu.pipeline_mode<synchronous>, transform_indices = @transform_2, window_bounds = array<i64: 256, 128>}, {transform_indices = @transform_3, window_bounds = array<i64: 1, 8, 256>}, {transform_indices = @transform_4, window_bounds = array<i64: 1, 8, 128>}]} {
    %c0_i32 = arith.constant 0 : i32
    %0 = arith.cmpi eq, %arg1, %c0_i32 : i32
    %1 = arith.extui %0 : i1 to i32
    %c0_i32_0 = arith.constant 0 : i32
    %2 = arith.cmpi ne, %1, %c0_i32_0 : i32
    scf.if %2 {
      %cst_24 = arith.constant 0.000000e+00 : f32
      %65 = vector.broadcast %cst_24 : f32 to vector<8x256xf32>
      %c0_25 = arith.constant 0 : index
      %c0_26 = arith.constant 0 : index
      %c0_27 = arith.constant 0 : index
      %66 = vector.load %arg5[%c0_25, %c0_26, %c0_27] : memref<1x8x256xf32, #tpu.memory_space<vmem>>, vector<1x8x256xf32>
      %67 = vector.shape_cast %66 : vector<1x8x256xf32> to vector<8x256xf32>
      %68 = vector.shape_cast %65 : vector<8x256xf32> to vector<1x8x256xf32>
      tpu.vector_store %arg5[%c0_25, %c0_26, %c0_27], %68 {strides = array<i32>} : memref<1x8x256xf32, #tpu.memory_space<vmem>>, vector<1x8x256xf32>,
      %cst_28 = arith.constant 0.000000e+00 : f32
      %69 = vector.broadcast %cst_28 : f32 to vector<8x128xf32>
      %c0_29 = arith.constant 0 : index
      %c0_30 = arith.constant 0 : index
      %c0_31 = arith.constant 0 : index
      %70 = vector.load %arg6[%c0_29, %c0_30, %c0_31] : memref<1x8x128xf32, #tpu.memory_space<vmem>>, vector<1x8x128xf32>
      %71 = vector.shape_cast %70 : vector<1x8x128xf32> to vector<8x128xf32>
      %72 = vector.shape_cast %69 : vector<8x128xf32> to vector<1x8x128xf32>
      tpu.vector_store %arg6[%c0_29, %c0_30, %c0_31], %72 {strides = array<i32>} : memref<1x8x128xf32, #tpu.memory_space<vmem>>, vector<1x8x128xf32>,
    } else {
    }
    %c0 = arith.constant 0 : index
    %c0_1 = arith.constant 0 : index
    %3 = vector.load %arg3[%c0, %c0_1] : memref<256x512xbf16, #tpu.memory_space<vmem>>, vector<256x512xbf16>
    %c0_2 = arith.constant 0 : index
    %c0_3 = arith.constant 0 : index
    %c0_4 = arith.constant 0 : index
    %4 = vector.load %arg2[%c0_2, %c0_3, %c0_4] : memref<2x48x256xbf16, #tpu.memory_space<vmem>>, vector<1x48x256xbf16>
    %5 = vector.shape_cast %4 : vector<1x48x256xbf16> to vector<48x256xbf16>
    %cst = arith.constant dense<0.000000e+00> : vector<48x512xf32>
    %6 = tpu.matmul %5, %3, %cst {dimension_numbers = #tpu.dot_dimension_numbers<[1], [0], [0], [1], [0, 0, 1, 1], [], []>} : vector<48x256xbf16>, vector<256x512xbf16>, vector<48x512xf32> -> vector<48x512xf32>
    %c1 = arith.constant 1 : index
    %c0_5 = arith.constant 0 : index
    %c0_6 = arith.constant 0 : index
    %7 = vector.load %arg2[%c1, %c0_5, %c0_6] : memref<2x48x256xbf16, #tpu.memory_space<vmem>>, vector<1x48x256xbf16>
    %8 = vector.shape_cast %7 : vector<1x48x256xbf16> to vector<48x256xbf16>
    %cst_7 = arith.constant dense<0.000000e+00> : vector<48x512xf32>
    %9 = tpu.matmul %8, %3, %cst_7 {dimension_numbers = #tpu.dot_dimension_numbers<[1], [0], [0], [1], [0, 0, 1, 1], [], []>} : vector<48x256xbf16>, vector<256x512xbf16>, vector<48x512xf32> -> vector<48x512xf32>
    %10 = vector.extract_strided_slice %6 {offsets = [0, 0], sizes = [48, 256], strides = [1, 1]} : vector<48x512xf32> to vector<48x256xf32>
    %11 = vector.extract_strided_slice %6 {offsets = [0, 256], sizes = [48, 256], strides = [1, 1]} : vector<48x512xf32> to vector<48x256xf32>
    %12 = vector.extract_strided_slice %9 {offsets = [0, 0], sizes = [48, 256], strides = [1, 1]} : vector<48x512xf32> to vector<48x256xf32>
    %13 = vector.extract_strided_slice %9 {offsets = [0, 256], sizes = [48, 256], strides = [1, 1]} : vector<48x512xf32> to vector<48x256xf32>
    %14 = arith.mulf %10, %10 : vector<48x256xf32>
    %15 = arith.mulf %11, %11 : vector<48x256xf32>
    %16 = arith.addf %14, %15 : vector<48x256xf32>
    %17 = math.sqrt %16 : vector<48x256xf32>
    %18 = arith.mulf %12, %12 : vector<48x256xf32>
    %19 = arith.mulf %13, %13 : vector<48x256xf32>
    %20 = arith.addf %18, %19 : vector<48x256xf32>
    %21 = math.sqrt %20 : vector<48x256xf32>
    %c0_8 = arith.constant 0 : index
    %c0_9 = arith.constant 0 : index
    %c0_10 = arith.constant 0 : index
    %22 = vector.load %arg5[%c0_8, %c0_9, %c0_10] : memref<1x8x256xf32, #tpu.memory_space<vmem>>, vector<1x8x256xf32>
    %23 = vector.shape_cast %22 : vector<1x8x256xf32> to vector<8x256xf32>
    %24 = arith.subf %17, %21 : vector<48x256xf32>
    %25 = math.absf %24 : vector<48x256xf32>
    %26 = vector.extract_strided_slice %25 {offsets = [0, 0], sizes = [8, 256], strides = [1, 1]} : vector<48x256xf32> to vector<8x256xf32>
    %27 = vector.extract_strided_slice %25 {offsets = [8, 0], sizes = [8, 256], strides = [1, 1]} : vector<48x256xf32> to vector<8x256xf32>
    %28 = vector.extract_strided_slice %25 {offsets = [16, 0], sizes = [8, 256], strides = [1, 1]} : vector<48x256xf32> to vector<8x256xf32>
    %29 = vector.extract_strided_slice %25 {offsets = [24, 0], sizes = [8, 256], strides = [1, 1]} : vector<48x256xf32> to vector<8x256xf32>
    %30 = vector.extract_strided_slice %25 {offsets = [32, 0], sizes = [8, 256], strides = [1, 1]} : vector<48x256xf32> to vector<8x256xf32>
    %31 = vector.extract_strided_slice %25 {offsets = [40, 0], sizes = [8, 256], strides = [1, 1]} : vector<48x256xf32> to vector<8x256xf32>
    %32 = arith.addf %26, %27 : vector<8x256xf32>
    %33 = arith.addf %28, %29 : vector<8x256xf32>
    %34 = arith.addf %30, %31 : vector<8x256xf32>
    %35 = arith.addf %32, %33 : vector<8x256xf32>
    %36 = arith.addf %35, %34 : vector<8x256xf32>
    %37 = arith.addf %23, %36 : vector<8x256xf32>
    %c0_11 = arith.constant 0 : index
    %c0_12 = arith.constant 0 : index
    %c0_13 = arith.constant 0 : index
    %38 = vector.load %arg5[%c0_11, %c0_12, %c0_13] : memref<1x8x256xf32, #tpu.memory_space<vmem>>, vector<1x8x256xf32>
    %39 = vector.shape_cast %38 : vector<1x8x256xf32> to vector<8x256xf32>
    %40 = vector.shape_cast %37 : vector<8x256xf32> to vector<1x8x256xf32>
    tpu.vector_store %arg5[%c0_11, %c0_12, %c0_13], %40 {strides = array<i32>} : memref<1x8x256xf32, #tpu.memory_space<vmem>>, vector<1x8x256xf32>,
    %c0_14 = arith.constant 0 : index
    %c0_15 = arith.constant 0 : index
    %41 = vector.load %arg4[%c0_14, %c0_15] : memref<256x128xbf16, #tpu.memory_space<vmem>>, vector<256x128xbf16>
    %42 = arith.truncf %17 : vector<48x256xf32> to vector<48x256xbf16>
    %cst_16 = arith.constant dense<0.000000e+00> : vector<48x128xf32>
    %43 = tpu.matmul %42, %41, %cst_16 {dimension_numbers = #tpu.dot_dimension_numbers<[1], [0], [0], [1], [0, 0, 1, 1], [], []>} : vector<48x256xbf16>, vector<256x128xbf16>, vector<48x128xf32> -> vector<48x128xf32>
    %44 = arith.truncf %21 : vector<48x256xf32> to vector<48x256xbf16>
    %cst_17 = arith.constant dense<0.000000e+00> : vector<48x128xf32>
    %45 = tpu.matmul %44, %41, %cst_17 {dimension_numbers = #tpu.dot_dimension_numbers<[1], [0], [0], [1], [0, 0, 1, 1], [], []>} : vector<48x256xbf16>, vector<256x128xbf16>, vector<48x128xf32> -> vector<48x128xf32>
    %c0_18 = arith.constant 0 : index
    %c0_19 = arith.constant 0 : index
    %c0_20 = arith.constant 0 : index
    %46 = vector.load %arg6[%c0_18, %c0_19, %c0_20] : memref<1x8x128xf32, #tpu.memory_space<vmem>>, vector<1x8x128xf32>
    %47 = vector.shape_cast %46 : vector<1x8x128xf32> to vector<8x128xf32>
    %48 = arith.subf %43, %45 : vector<48x128xf32>
    %49 = math.absf %48 : vector<48x128xf32>
    %50 = vector.extract_strided_slice %49 {offsets = [0, 0], sizes = [8, 128], strides = [1, 1]} : vector<48x128xf32> to vector<8x128xf32>
    %51 = vector.extract_strided_slice %49 {offsets = [8, 0], sizes = [8, 128], strides = [1, 1]} : vector<48x128xf32> to vector<8x128xf32>
    %52 = vector.extract_strided_slice %49 {offsets = [16, 0], sizes = [8, 128], strides = [1, 1]} : vector<48x128xf32> to vector<8x128xf32>
    %53 = vector.extract_strided_slice %49 {offsets = [24, 0], sizes = [8, 128], strides = [1, 1]} : vector<48x128xf32> to vector<8x128xf32>
    %54 = vector.extract_strided_slice %49 {offsets = [32, 0], sizes = [8, 128], strides = [1, 1]} : vector<48x128xf32> to vector<8x128xf32>
    %55 = vector.extract_strided_slice %49 {offsets = [40, 0], sizes = [8, 128], strides = [1, 1]} : vector<48x128xf32> to vector<8x128xf32>
    %56 = arith.addf %50, %51 : vector<8x128xf32>
    %57 = arith.addf %52, %53 : vector<8x128xf32>
    %58 = arith.addf %54, %55 : vector<8x128xf32>
    %59 = arith.addf %56, %57 : vector<8x128xf32>
    %60 = arith.addf %59, %58 : vector<8x128xf32>
    %61 = arith.addf %47, %60 : vector<8x128xf32>
    %c0_21 = arith.constant 0 : index
    %c0_22 = arith.constant 0 : index
    %c0_23 = arith.constant 0 : index
    %62 = vector.load %arg6[%c0_21, %c0_22, %c0_23] : memref<1x8x128xf32, #tpu.memory_space<vmem>>, vector<1x8x128xf32>
    %63 = vector.shape_cast %62 : vector<1x8x128xf32> to vector<8x128xf32>
    %64 = vector.shape_cast %61 : vector<8x128xf32> to vector<1x8x128xf32>
    tpu.vector_store %arg6[%c0_21, %c0_22, %c0_23], %64 {strides = array<i32>} : memref<1x8x128xf32, #tpu.memory_space<vmem>>, vector<1x8x128xf32>,
    return
  }
  func.func @transform_0(%arg0: i32, %arg1: i32) -> (i32, i32, i32) {
    %c1_i32 = arith.constant 1 : i32
    %0 = arith.muli %arg0, %c1_i32 : i32
    %1 = arith.addi %0, %arg1 : i32
    %c0_i32 = arith.constant 0 : i32
    %c0_i32_0 = arith.constant 0 : i32
    %c0_i32_1 = arith.constant 0 : i32
    return %c0_i32, %1, %c0_i32_0 : i32, i32, i32
  }
  func.func @transform_1(%arg0: i32, %arg1: i32) -> (i32, i32) {
    %c0_i32 = arith.constant 0 : i32
    %c0_i32_0 = arith.constant 0 : i32
    %c0_i32_1 = arith.constant 0 : i32
    return %c0_i32, %c0_i32_0 : i32, i32
  }
  func.func @transform_2(%arg0: i32, %arg1: i32) -> (i32, i32) {
    %c0_i32 = arith.constant 0 : i32
    %c0_i32_0 = arith.constant 0 : i32
    %c0_i32_1 = arith.constant 0 : i32
    return %c0_i32, %c0_i32_0 : i32, i32
  }
  func.func @transform_3(%arg0: i32, %arg1: i32) -> (i32, i32, i32) {
    %c0_i32 = arith.constant 0 : i32
    %c0_i32_0 = arith.constant 0 : i32
    %c0_i32_1 = arith.constant 0 : i32
    return %arg0, %c0_i32, %c0_i32_0 : i32, i32, i32
  }
  func.func @transform_4(%arg0: i32, %arg1: i32) -> (i32, i32, i32) {
    %c0_i32 = arith.constant 0 : i32
    %c0_i32_0 = arith.constant 0 : i32
    %c0_i32_1 = arith.constant 0 : i32
    return %arg0, %c0_i32, %c0_i32_0 : i32, i32, i32
  }
}

module attributes {stable_mosaic.version = 11 : i64} {
  func.func @kernel(%arg0: i32, %arg1: i32, %arg2: memref<2x80x128xbf16, #tpu.memory_space<vmem>>, %arg3: memref<128x256xbf16, #tpu.memory_space<vmem>>, %arg4: memref<1x8x128xf32, #tpu.memory_space<vmem>>) attributes {dimension_semantics = [#tpu.dimension_semantics<parallel>, #tpu.dimension_semantics<arbitrary>], iteration_bounds = array<i64: 2, 1>, scalar_prefetch = 0 : i64, scratch_operands = 0 : i64, tpu.core_type = #tpu.core_type<tc>, window_params = [{transform_indices = @transform_0, window_bounds = array<i64: 2, 80, 128>}, {pipeline_mode = #tpu.pipeline_mode<synchronous>, transform_indices = @transform_1, window_bounds = array<i64: 128, 256>}, {transform_indices = @transform_2, window_bounds = array<i64: 1, 8, 128>}]} {
    %c0_i32 = arith.constant 0 : i32
    %0 = arith.cmpi eq, %arg1, %c0_i32 : i32
    %1 = arith.extui %0 : i1 to i32
    %c0_i32_0 = arith.constant 0 : i32
    %2 = arith.cmpi ne, %1, %c0_i32_0 : i32
    scf.if %2 {
      %cst_14 = arith.constant 0.000000e+00 : f32
      %49 = vector.broadcast %cst_14 : f32 to vector<8x128xf32>
      %c0_15 = arith.constant 0 : index
      %c0_16 = arith.constant 0 : index
      %c0_17 = arith.constant 0 : index
      %50 = vector.load %arg4[%c0_15, %c0_16, %c0_17] : memref<1x8x128xf32, #tpu.memory_space<vmem>>, vector<1x8x128xf32>
      %51 = vector.shape_cast %50 : vector<1x8x128xf32> to vector<8x128xf32>
      %52 = vector.shape_cast %49 : vector<8x128xf32> to vector<1x8x128xf32>
      tpu.vector_store %arg4[%c0_15, %c0_16, %c0_17], %52 {strides = array<i32>} : memref<1x8x128xf32, #tpu.memory_space<vmem>>, vector<1x8x128xf32>,
    } else {
    }
    %c0 = arith.constant 0 : index
    %c0_1 = arith.constant 0 : index
    %3 = vector.load %arg3[%c0, %c0_1] : memref<128x256xbf16, #tpu.memory_space<vmem>>, vector<128x256xbf16>
    %c0_2 = arith.constant 0 : index
    %c0_3 = arith.constant 0 : index
    %c0_4 = arith.constant 0 : index
    %4 = vector.load %arg2[%c0_2, %c0_3, %c0_4] : memref<2x80x128xbf16, #tpu.memory_space<vmem>>, vector<1x80x128xbf16>
    %5 = vector.shape_cast %4 : vector<1x80x128xbf16> to vector<80x128xbf16>
    %cst = arith.constant dense<0.000000e+00> : vector<80x256xf32>
    %6 = tpu.matmul %5, %3, %cst {dimension_numbers = #tpu.dot_dimension_numbers<[1], [0], [0], [1], [0, 0, 1, 1], [], []>} : vector<80x128xbf16>, vector<128x256xbf16>, vector<80x256xf32> -> vector<80x256xf32>
    %c1 = arith.constant 1 : index
    %c0_5 = arith.constant 0 : index
    %c0_6 = arith.constant 0 : index
    %7 = vector.load %arg2[%c1, %c0_5, %c0_6] : memref<2x80x128xbf16, #tpu.memory_space<vmem>>, vector<1x80x128xbf16>
    %8 = vector.shape_cast %7 : vector<1x80x128xbf16> to vector<80x128xbf16>
    %cst_7 = arith.constant dense<0.000000e+00> : vector<80x256xf32>
    %9 = tpu.matmul %8, %3, %cst_7 {dimension_numbers = #tpu.dot_dimension_numbers<[1], [0], [0], [1], [0, 0, 1, 1], [], []>} : vector<80x128xbf16>, vector<128x256xbf16>, vector<80x256xf32> -> vector<80x256xf32>
    %10 = vector.extract_strided_slice %6 {offsets = [0, 0], sizes = [80, 128], strides = [1, 1]} : vector<80x256xf32> to vector<80x128xf32>
    %11 = vector.extract_strided_slice %6 {offsets = [0, 128], sizes = [80, 128], strides = [1, 1]} : vector<80x256xf32> to vector<80x128xf32>
    %12 = vector.extract_strided_slice %9 {offsets = [0, 0], sizes = [80, 128], strides = [1, 1]} : vector<80x256xf32> to vector<80x128xf32>
    %13 = vector.extract_strided_slice %9 {offsets = [0, 128], sizes = [80, 128], strides = [1, 1]} : vector<80x256xf32> to vector<80x128xf32>
    %14 = arith.mulf %10, %10 : vector<80x128xf32>
    %15 = arith.mulf %11, %11 : vector<80x128xf32>
    %16 = arith.addf %14, %15 : vector<80x128xf32>
    %17 = math.sqrt %16 : vector<80x128xf32>
    %18 = arith.mulf %12, %12 : vector<80x128xf32>
    %19 = arith.mulf %13, %13 : vector<80x128xf32>
    %20 = arith.addf %18, %19 : vector<80x128xf32>
    %21 = math.sqrt %20 : vector<80x128xf32>
    %c0_8 = arith.constant 0 : index
    %c0_9 = arith.constant 0 : index
    %c0_10 = arith.constant 0 : index
    %22 = vector.load %arg4[%c0_8, %c0_9, %c0_10] : memref<1x8x128xf32, #tpu.memory_space<vmem>>, vector<1x8x128xf32>
    %23 = vector.shape_cast %22 : vector<1x8x128xf32> to vector<8x128xf32>
    %24 = arith.subf %17, %21 : vector<80x128xf32>
    %25 = math.absf %24 : vector<80x128xf32>
    %26 = vector.extract_strided_slice %25 {offsets = [0, 0], sizes = [8, 128], strides = [1, 1]} : vector<80x128xf32> to vector<8x128xf32>
    %27 = vector.extract_strided_slice %25 {offsets = [8, 0], sizes = [8, 128], strides = [1, 1]} : vector<80x128xf32> to vector<8x128xf32>
    %28 = vector.extract_strided_slice %25 {offsets = [16, 0], sizes = [8, 128], strides = [1, 1]} : vector<80x128xf32> to vector<8x128xf32>
    %29 = vector.extract_strided_slice %25 {offsets = [24, 0], sizes = [8, 128], strides = [1, 1]} : vector<80x128xf32> to vector<8x128xf32>
    %30 = vector.extract_strided_slice %25 {offsets = [32, 0], sizes = [8, 128], strides = [1, 1]} : vector<80x128xf32> to vector<8x128xf32>
    %31 = vector.extract_strided_slice %25 {offsets = [40, 0], sizes = [8, 128], strides = [1, 1]} : vector<80x128xf32> to vector<8x128xf32>
    %32 = vector.extract_strided_slice %25 {offsets = [48, 0], sizes = [8, 128], strides = [1, 1]} : vector<80x128xf32> to vector<8x128xf32>
    %33 = vector.extract_strided_slice %25 {offsets = [56, 0], sizes = [8, 128], strides = [1, 1]} : vector<80x128xf32> to vector<8x128xf32>
    %34 = vector.extract_strided_slice %25 {offsets = [64, 0], sizes = [8, 128], strides = [1, 1]} : vector<80x128xf32> to vector<8x128xf32>
    %35 = vector.extract_strided_slice %25 {offsets = [72, 0], sizes = [8, 128], strides = [1, 1]} : vector<80x128xf32> to vector<8x128xf32>
    %36 = arith.addf %26, %27 : vector<8x128xf32>
    %37 = arith.addf %28, %29 : vector<8x128xf32>
    %38 = arith.addf %30, %31 : vector<8x128xf32>
    %39 = arith.addf %32, %33 : vector<8x128xf32>
    %40 = arith.addf %34, %35 : vector<8x128xf32>
    %41 = arith.addf %36, %37 : vector<8x128xf32>
    %42 = arith.addf %38, %39 : vector<8x128xf32>
    %43 = arith.addf %41, %42 : vector<8x128xf32>
    %44 = arith.addf %43, %40 : vector<8x128xf32>
    %45 = arith.addf %23, %44 : vector<8x128xf32>
    %c0_11 = arith.constant 0 : index
    %c0_12 = arith.constant 0 : index
    %c0_13 = arith.constant 0 : index
    %46 = vector.load %arg4[%c0_11, %c0_12, %c0_13] : memref<1x8x128xf32, #tpu.memory_space<vmem>>, vector<1x8x128xf32>
    %47 = vector.shape_cast %46 : vector<1x8x128xf32> to vector<8x128xf32>
    %48 = vector.shape_cast %45 : vector<8x128xf32> to vector<1x8x128xf32>
    tpu.vector_store %arg4[%c0_11, %c0_12, %c0_13], %48 {strides = array<i32>} : memref<1x8x128xf32, #tpu.memory_space<vmem>>, vector<1x8x128xf32>,
    return
  }
  func.func @transform_0(%arg0: i32, %arg1: i32) -> (i32, i32, i32) {
    %c1_i32 = arith.constant 1 : i32
    %0 = arith.muli %arg0, %c1_i32 : i32
    %1 = arith.addi %0, %arg1 : i32
    %c0_i32 = arith.constant 0 : i32
    %c0_i32_0 = arith.constant 0 : i32
    %c0_i32_1 = arith.constant 0 : i32
    return %c0_i32, %1, %c0_i32_0 : i32, i32, i32
  }
  func.func @transform_1(%arg0: i32, %arg1: i32) -> (i32, i32) {
    %c0_i32 = arith.constant 0 : i32
    %c0_i32_0 = arith.constant 0 : i32
    %c0_i32_1 = arith.constant 0 : i32
    return %c0_i32, %c0_i32_0 : i32, i32
  }
  func.func @transform_2(%arg0: i32, %arg1: i32) -> (i32, i32, i32) {
    %c0_i32 = arith.constant 0 : i32
    %c0_i32_0 = arith.constant 0 : i32
    %c0_i32_1 = arith.constant 0 : i32
    return %arg0, %c0_i32, %c0_i32_0 : i32, i32, i32
  }
}

</mosaic_0001>

<bundles_post_ra>
// kernel: spectral_distances_forward.3
= control target key start
LH: loop header
LB: loop body
LE: loop exit
PB: predicated region body
PF: predicated region fallthrough
CT: control target
= control target key end

     0   :  { %s4636_s15 = smov 0   ;;  %s4638_s16 = smov 0   ;;  %s7435_s0 = inlined_call_operand.vmem [shape: bf16[2,64,512], index: 0, kind: input, shape index: {}]   ;;  %s7436_s1 = inlined_call_operand.vmem [shape: bf16[512,768], index: 1, kind: input, shape index: {}]   ;;  %s7437_s2 = inlined_call_operand.vmem [shape: bf16[384,128], index: 2, kind: input, shape index: {}]   ;;  %s7438_s3 = inlined_call_operand.vmem [shape: f32[2,8,384], index: 3, kind: output, shape index: {0}]   ;;  %s7439_s4 = inlined_call_operand.vmem [shape: f32[2,8,128], index: 4, kind: output, shape index: {1}]  }
   0x1   :  { %s4640_s17 = smov 0   ;;  %s4642_s18 = smov 0  }
   0x2   :  { %s4644_s19 = smov 0  }
   0x3 LB: > { %s27_s20 = sadd.s32 1, %s4605_s18  ;;  %p43_p1 = scmp.ne.s32.totalorder %s4597_s16, %s4593_s15  ;;  %s4609_s19 = sphi %s4644_s19, %s15_s19   ;;  %s4605_s18 = sphi %s4642_s18, %s7916_s18   ;;  %s4601_s17 = sphi %s4640_s17, %s7915_s17   ;;  %s4597_s16 = sphi %s4638_s16, %s7914_s16   ;;  %s4593_s15 = sphi %s4636_s15, %s7913_s15  }
   0x4   : > { %p29_p0 = scmp.ge.s32.totalorder %s27_s20, 2  ;;  %p44_p2 = scmp.eq.s32.totalorder %s4609_s19, 0 }
   0x5   : > { %s36_s22 = sadd.s32 1, %s4597_s16  ;;  %p3284_p5 = scmp.ge.s32.totalorder %s4609_s19, 2 }
   0x6   : > { %s7918_s20 = smov (%p29_p0, %s27_s20), 0  ;;  %p45_p3 = por %p44_p2, %p43_p1 }
   0x7   : > { %s33_s21 = ssub.s32 %s4605_s18, %s7918_s20  ;;  %169 = sbr.rel (%p3284_p5) target bundleno = 32 (0x20), region = 24 }
   0x8   : > { %p34_p4 = scmp.eq.s32.totalorder %s33_s21, 0 }
   0xa   : > { %s4671_s23 = scalar_select %p34_p4, %s4597_s16, %s36_s22  }
   0xc   : > { %172 = sbr.rel (!%p45_p3) target bundleno = 32 (0x20), region = 28  ;;  %s174_s24 = sand.u32 (%p45_p3), 1, %s4597_s16  }
   0xd   : > { %s4232_s25 = sshll.u32 (%p45_p3), %s4605_s18, 6  ;;  %s3285_s26 = sshll.u32 (%p45_p3), %s174_s24, 7 }
   0xe   : > { %s4679_s29 = scalar_lea.vmem (%p45_p3), %s7435_s0, %s4232_s25  ;;  %s176_s30 = scalar_lea.vmem (%p45_p3), [#allocation2], %s3285_s26 }
   0xf   : > { %v194_v0 = vld [vmem:[%s4679_s29] sm:$0xff] (%p45_p3)  ;;  %v196_v1 = vld [vmem:[%s4679_s29 + $0x8] sm:$0xff] (%p45_p3)  ;;  %v198_v2 = vld [vmem:[%s4679_s29 + $0x10] sm:$0xff] (%p45_p3) }
  0x10   : > { %195 = vst [vmem:[%s176_s30] sm:$0xff] (%p45_p3), %v194_v0  ;;  %v200_v3 = vld [vmem:[%s4679_s29 + $0x18] sm:$0xff] (%p45_p3)  ;;  %v202_v4 = vld [vmem:[%s4679_s29 + $0x20] sm:$0xff] (%p45_p3)  ;;  %v204_v5 = vld [vmem:[%s4679_s29 + $0x28] sm:$0xff] (%p45_p3) }
  0x11   : > { %197 = vst [vmem:[%s176_s30 + $0x8] sm:$0xff] %v196_v1  ;;  %v206_v6 = vld [vmem:[%s4679_s29 + $0x30] sm:$0xff]  ;;  %v208_v7 = vld [vmem:[%s4679_s29 + $0x38] sm:$0xff]  ;;  %v210_v8 = vld [vmem:[%s4679_s29 + $0x80] sm:$0xff] }
  0x12   : > { %199 = vst [vmem:[%s176_s30 + $0x10] sm:$0xff] %v198_v2  ;;  %v212_v9 = vld [vmem:[%s4679_s29 + $0x88] sm:$0xff]  ;;  %v214_v10 = vld [vmem:[%s4679_s29 + $0x90] sm:$0xff]  ;;  %v216_v11 = vld [vmem:[%s4679_s29 + $0x98] sm:$0xff] }
  0x13   : > { %201 = vst [vmem:[%s176_s30 + $0x18] sm:$0xff] %v200_v3  ;;  %v218_v12 = vld [vmem:[%s4679_s29 + $0xa0] sm:$0xff]  ;;  %v220_v13 = vld [vmem:[%s4679_s29 + $0xa8] sm:$0xff]  ;;  %v222_v14 = vld [vmem:[%s4679_s29 + $0xb0] sm:$0xff] }
  0x14   : > { %203 = vst [vmem:[%s176_s30 + $0x20] sm:$0xff] %v202_v4  ;;  %v224_v15 = vld [vmem:[%s4679_s29 + $0xb8] sm:$0xff] }
  0x15   : > { %205 = vst [vmem:[%s176_s30 + $0x28] sm:$0xff] %v204_v5 }
  0x16   : > { %207 = vst [vmem:[%s176_s30 + $0x30] sm:$0xff] %v206_v6 }
  0x17   : > { %209 = vst [vmem:[%s176_s30 + $0x38] sm:$0xff] %v208_v7 }
  0x18   : > { %211 = vst [vmem:[%s176_s30 + $0x40] sm:$0xff] %v210_v8 }
  0x19   : > { %213 = vst [vmem:[%s176_s30 + $0x48] sm:$0xff] %v212_v9 }
  0x1a   : > { %215 = vst [vmem:[%s176_s30 + $0x50] sm:$0xff] %v214_v10 }
  0x1b   : > { %217 = vst [vmem:[%s176_s30 + $0x58] sm:$0xff] %v216_v11 }
  0x1c   : > { %219 = vst [vmem:[%s176_s30 + $0x60] sm:$0xff] %v218_v12 }
  0x1d   : > { %221 = vst [vmem:[%s176_s30 + $0x68] sm:$0xff] %v220_v13 }
  0x1e   : > { %223 = vst [vmem:[%s176_s30 + $0x70] sm:$0xff] %v222_v14 }
  0x1f   : > { %225 = vst [vmem:[%s176_s30 + $0x78] sm:$0xff] %v224_v15 }
  0x20 PF: > { %p3289_p6 = scmp.ge.s32.totalorder %s4609_s19, 1  ;;  %p230_p7 = scmp.lt.s32.totalorder %s4609_s19, 3 }
  0x22   : > { %p231_p8 = pnand %p3289_p6, %p230_p7 }
  0x24   : > { %234 = sbr.rel (%p231_p8) target bundleno = 772 (0x304), region = 51 }
  0x29   : > { %v3495_v16 = vld [vmem:[%s7436_s1 + $0x150] sm:$0xf]  ;;  %v4278_v17 = vld [vmem:[%s7436_s1 + $0x164] sm:$0xf0]  ;;  %v3471_v27 = vld [vmem:[%s7436_s1 + $0x120] sm:$0xf] }
  0x2a   : > { %v3687_v18 = vld [vmem:[%s7436_s1 + $0x2d0] sm:$0xf]  ;;  %v4708_v19 = vor.u32 %v4278_v17, %v3495_v16  ;;  %v4326_v20 = vld [vmem:[%s7436_s1 + $0x2e4] sm:$0xf0]  ;;  %v4272_v29 = vld [vmem:[%s7436_s1 + $0x134] sm:$0xf0] }
  0x2b   : > { %v3879_v21 = vld [vmem:[%s7436_s1 + $0x450] sm:$0xf]  ;;  %v4374_v22 = vld [vmem:[%s7436_s1 + $0x464] sm:$0xf0]  ;;  %v4719_v23 = vor.u32 %v4326_v20, %v3687_v18  ;;  %v3663_v30 = vld [vmem:[%s7436_s1 + $0x2a0] sm:$0xf]  ;;  %v4746_v32 = vor.u32 %v4272_v29, %v3471_v27 }
  0x2c   : > { %v4721_v24 = vor.u32 %v4374_v22, %v3879_v21  ;;  %v4071_v25 = vld [vmem:[%s7436_s1 + $0x5d0] sm:$0xf]  ;;  %v4422_v26 = vld [vmem:[%s7436_s1 + $0x5e4] sm:$0xf0]  ;;  %1485 = vmatpush.bf16.msra.mxu0 %v4708_v19  ;;  %v4320_v31 = vld [vmem:[%s7436_s1 + $0x2b4] sm:$0xf0] }
  0x2d   : > { %v4733_v28 = vor.u32 %v4422_v26, %v4071_v25  ;;  %1504 = vmatpush.bf16.msra.mxu1 %v4719_v23  ;;  %v4748_v33 = vor.u32 %v4320_v31, %v3663_v30  ;;  %v3855_v34 = vld [vmem:[%s7436_s1 + $0x420] sm:$0xf]  ;;  %v4368_v35 = vld [vmem:[%s7436_s1 + $0x434] sm:$0xf0]  ;;  %v3447_v39 = vld [vmem:[%s7436_s1 + $0xf0] sm:$0xf] }
  0x2e   : > { %1523 = vmatpush.bf16.msra.mxu2 %v4721_v24  ;;  %v4047_v36 = vld [vmem:[%s7436_s1 + $0x5a0] sm:$0xf]  ;;  %v4760_v37 = vor.u32 %v4368_v35, %v3855_v34  ;;  %v4416_v38 = vld [vmem:[%s7436_s1 + $0x5b4] sm:$0xf0]  ;;  %v4266_v40 = vld [vmem:[%s7436_s1 + $0x104] sm:$0xf0] }
  0x2f   : > { %1542 = vmatpush.bf16.msra.mxu3 %v4733_v28  ;;  %v4771_v41 = vor.u32 %v4416_v38, %v4047_v36  ;;  %v3639_v42 = vld [vmem:[%s7436_s1 + $0x270] sm:$0xf]  ;;  %v4314_v43 = vld [vmem:[%s7436_s1 + $0x284] sm:$0xf0]  ;;  %v4783_v45 = vor.u32 %v4266_v40, %v3447_v39  ;;  %v3423_v51 = vld [vmem:[%s7436_s1 + $0xc0] sm:$0xf] }
  0x30   : > { %v3831_v44 = vld [vmem:[%s7436_s1 + $0x3f0] sm:$0xf]  ;;  %1486 = vmatpush.bf16.msra.mxu0 %v4746_v32  ;;  %v4362_v46 = vld [vmem:[%s7436_s1 + $0x404] sm:$0xf0]  ;;  %v4796_v49 = vor.u32 %v4314_v43, %v3639_v42  ;;  %v4260_v52 = vld [vmem:[%s7436_s1 + $0xd4] sm:$0xf0] }
  0x31   : > { %v4023_v47 = vld [vmem:[%s7436_s1 + $0x570] sm:$0xf]  ;;  %v4410_v48 = vld [vmem:[%s7436_s1 + $0x584] sm:$0xf0]  ;;  %1505 = vmatpush.bf16.msra.mxu1 %v4748_v33  ;;  %v4798_v50 = vor.u32 %v4362_v46, %v3831_v44  ;;  %v3615_v53 = vld [vmem:[%s7436_s1 + $0x240] sm:$0xf]  ;;  %v4828_v60 = vor.u32 %v4260_v52, %v3423_v51 }
  0x32   : > { %1524 = vmatpush.bf16.msra.mxu2 %v4760_v37  ;;  %v4810_v54 = vor.u32 %v4410_v48, %v4023_v47  ;;  %v4308_v55 = vld [vmem:[%s7436_s1 + $0x254] sm:$0xf0]  ;;  %v3807_v56 = vld [vmem:[%s7436_s1 + $0x3c0] sm:$0xf]  ;;  %v3399_v63 = vld [vmem:[%s7436_s1 + $0x90] sm:$0xf] }
  0x33   : > { %1543 = vmatpush.bf16.msra.mxu3 %v4771_v41  ;;  %v4356_v57 = vld [vmem:[%s7436_s1 + $0x3d4] sm:$0xf0]  ;;  %v3999_v58 = vld [vmem:[%s7436_s1 + $0x540] sm:$0xf]  ;;  %v4832_v61 = vor.u32 %v4308_v55, %v3615_v53  ;;  %v4254_v0 = vld [vmem:[%s7436_s1 + $0xa4] sm:$0xf0] }
  0x34   : > { %v4404_v59 = vld [vmem:[%s7436_s1 + $0x554] sm:$0xf0]  ;;  %1487 = vmatpush.bf16.msra.mxu0 %v4783_v45  ;;  %v4834_v62 = vor.u32 %v4356_v57, %v3807_v56  ;;  %v3591_v1 = vld [vmem:[%s7436_s1 + $0x210] sm:$0xf]  ;;  %v4302_v3 = vld [vmem:[%s7436_s1 + $0x224] sm:$0xf0]  ;;  %v4864_v8 = vor.u32 %v4254_v0, %v3399_v63 }
  0x35   : > { %1506 = vmatpush.bf16.msra.mxu1 %v4796_v49  ;;  %v4846_v2 = vor.u32 %v4404_v59, %v3999_v58  ;;  %v3783_v4 = vld [vmem:[%s7436_s1 + $0x390] sm:$0xf]  ;;  %v4350_v5 = vld [vmem:[%s7436_s1 + $0x3a4] sm:$0xf0]  ;;  %v4868_v9 = vor.u32 %v4302_v3, %v3591_v1  ;;  %v3375_v11 = vld [vmem:[%s7436_s1 + $0x60] sm:$0xf] }
  0x36   : > { %1525 = vmatpush.bf16.msra.mxu2 %v4798_v50  ;;  %v3975_v6 = vld [vmem:[%s7436_s1 + $0x510] sm:$0xf]  ;;  %v4398_v7 = vld [vmem:[%s7436_s1 + $0x524] sm:$0xf0]  ;;  %v4870_v10 = vor.u32 %v4350_v5, %v3783_v4  ;;  %v4248_v12 = vld [vmem:[%s7436_s1 + $0x74] sm:$0xf0] }
  0x37   : > { %1544 = vmatpush.bf16.msra.mxu3 %v4810_v54  ;;  %v3567_v13 = vld [vmem:[%s7436_s1 + $0x1e0] sm:$0xf]  ;;  %v4882_v14 = vor.u32 %v4398_v7, %v3975_v6  ;;  %v4296_v15 = vld [vmem:[%s7436_s1 + $0x1f4] sm:$0xf0]  ;;  %v4900_v21 = vor.u32 %v4248_v12, %v3375_v11  ;;  %v3351_v22 = vld [vmem:[%s7436_s1 + $0x30] sm:$0xf] }
  0x38   : > { %1488 = vmatpush.bf16.msra.mxu0 %v4828_v60  ;;  %v3759_v16 = vld [vmem:[%s7436_s1 + $0x360] sm:$0xf]  ;;  %v4344_v17 = vld [vmem:[%s7436_s1 + $0x374] sm:$0xf0]  ;;  %v4242_v25 = vld [vmem:[%s7436_s1 + $0x44] sm:$0xf0]  ;;  %v4910_v26 = vor.u32 %v4296_v15, %v3567_v13 }
  0x39   : > { %1507 = vmatpush.bf16.msra.mxu1 %v4832_v61  ;;  %v3951_v18 = vld [vmem:[%s7436_s1 + $0x4e0] sm:$0xf]  ;;  %v4392_v20 = vld [vmem:[%s7436_s1 + $0x4f4] sm:$0xf0]  ;;  %v4912_v27 = vor.u32 %v4344_v17, %v3759_v16  ;;  %v3543_v29 = vld [vmem:[%s7436_s1 + $0x1b0] sm:$0xf]  ;;  %v4940_v40 = vor.u32 %v4242_v25, %v3351_v22 }
  0x3a   : > { %1526 = vmatpush.bf16.msra.mxu2 %v4834_v62  ;;  %v4290_v30 = vld [vmem:[%s7436_s1 + $0x1c4] sm:$0xf0]  ;;  %v3735_v31 = vld [vmem:[%s7436_s1 + $0x330] sm:$0xf]  ;;  %v4924_v34 = vor.u32 %v4392_v20, %v3951_v18  ;;  %s237_s27 = sand.u32 1, %s4593_s15   ;;  %p268_p9 = scmp.lt.s32.totalorder %s4601_s17, 1 }
  0x3b   : > { %1545 = vmatpush.bf16.msra.mxu3 %v4846_v2  ;;  %v4338_v35 = vld [vmem:[%s7436_s1 + $0x344] sm:$0xf0]  ;;  %v3927_v36 = vld [vmem:[%s7436_s1 + $0x4b0] sm:$0xf]  ;;  %v3327_v39 = vld [vmem:[%s7436_s1] sm:$0xf]  ;;  %v4950_v44 = vor.u32 %v4290_v30, %v3543_v29 }
  0x3c   : > { %1489 = vmatpush.bf16.msra.mxu0 %v4864_v8  ;;  %v4386_v38 = vld [vmem:[%s7436_s1 + $0x4c4] sm:$0xf0]  ;;  %s3290_s6 = sshll.u32 %s237_s27, 7  ;;  %v4236_v42 = vld [vmem:[%s7436_s1 + $0x14] sm:$0xf0]  ;;  %v4952_v46 = vor.u32 %v4338_v35, %v3735_v31  ;;  %s7920_s17 = smov (!%p268_p9, %s4601_s17), 1 }
  0x3d   : > { %1508 = vmatpush.bf16.msra.mxu1 %v4868_v9  ;;  %v3519_v43 = vld [vmem:[%s7436_s1 + $0x180] sm:$0xf]  ;;  %v4284_v47 = vld [vmem:[%s7436_s1 + $0x194] sm:$0xf0]  ;;  %v4964_v52 = vor.u32 %v4386_v38, %v3927_v36  ;;  %v4371_v56 = vld [vmem:[%s7436_s1 + $0x454] sm:$0xf]  ;;  %v4985_v63 = vor.u32 %v4236_v42, %v3327_v39 }
  0x3e   : > { %1527 = vmatpush.bf16.msra.mxu2 %v4870_v10  ;;  %v3711_v48 = vld [vmem:[%s7436_s1 + $0x300] sm:$0xf]  ;;  %v4332_v51 = vld [vmem:[%s7436_s1 + $0x314] sm:$0xf0]  ;;  %s4975_s29 = scalar_lea.vmem [#allocation2], %s3290_s6  ;;  %v5000_v6 = vor.u32 %v4284_v47, %v3519_v43  ;;  %s4481_s28 = smul.u32 24, %s7920_s17 }
  0x3f   : > { %1546 = vmatpush.bf16.msra.mxu3 %v4882_v14  ;;  %v3903_v53 = vld [vmem:[%s7436_s1 + $0x480] sm:$0xf]  ;;  %v4380_v55 = vld [vmem:[%s7436_s1 + $0x494] sm:$0xf0]  ;;  %v3881_v58 = vld [vmem:[%s7436_s1 + $0x468] sm:$0xf0]  ;;  %v5002_v7 = vor.u32 %v4332_v51, %v3711_v48 }
  0x40   : > { %1490 = vmatpush.bf16.msra.mxu0 %v4900_v21  ;;  %v3295_v57 = vld [vmem:[%s4975_s29] sm:$0xf]  ;;  %v4323_v59 = vld [vmem:[%s7436_s1 + $0x2d4] sm:$0xf]  ;;  %v4427_v0 = vld [vmem:[%s4975_s29 + $0xc] sm:$0xf0]  ;;  %v5008_v15 = vor.u32 %v4380_v55, %v3903_v53  ;;  %v5012_v18 = vor.u32 %v4371_v56, %v3881_v58  ;;  %s7352_s7 = scalar_lea.vmem %s7438_s3, %s4481_s28 }
  0x41   : > { %1509 = vmatpush.bf16.msra.mxu1 %v4910_v26  ;;  %v4425_v1 = vld [vmem:[%s4975_s29 + $0x4] sm:$0xf]  ;;  %v4275_v3 = vld [vmem:[%s7436_s1 + $0x154] sm:$0xf]  ;;  %v3497_v4 = vld [vmem:[%s7436_s1 + $0x168] sm:$0xf0]  ;;  %v5017_v22 = vor.u32 %v4427_v0, %v3295_v57 }
  0x42   : > { %1528 = vmatpush.bf16.msra.mxu2 %v4912_v27  ;;  %v3689_v5 = vld [vmem:[%s7436_s1 + $0x2e8] sm:$0xf0]  ;;  %v3297_v11 = vld [vmem:[%s4975_s29 + $0x10] sm:$0xf0]  ;;  %v3303_v12 = vld [vmem:[%s4975_s29 + $0x8] sm:$0xf]  ;;  %v5045_v43 = vor.u32 %v4275_v3, %v3497_v4 }
  0x43   : > { %1547 = vmatpush.bf16.msra.mxu3 %v4924_v34  ;;  %v4428_v13 = vld [vmem:[%s4975_s29 + $0x14] sm:$0xf0]  ;;  %v4426_v16 = vld [vmem:[%s4975_s29 + $0xc] sm:$0xf]  ;;  %v3305_v17 = vld [vmem:[%s4975_s29 + $0x18] sm:$0xf0]  ;;  %v5019_v25 = vor.u32 %v4323_v59, %v3689_v5  ;;  %v5031_v35 = vor.u32 %v4425_v1, %v3297_v11 }
  0x44   : > { %1491 = vmatpush.bf16.msra.mxu0 %v4940_v40  ;;  %v4419_v20 = vld [vmem:[%s7436_s1 + $0x5d4] sm:$0xf]  ;;  %v4073_v29 = vld [vmem:[%s7436_s1 + $0x5e8] sm:$0xf0]  ;;  %v4365_v30 = vld [vmem:[%s7436_s1 + $0x424] sm:$0xf]  ;;  %v5033_v36 = vor.u32 %v4428_v13, %v3303_v12  ;;  %v5043_v42 = vor.u32 %v4426_v16, %v3305_v17 }
  0x45   : > { %1510 = vmatpush.bf16.msra.mxu1 %v4950_v44  ;;  %7593 = vst [vmem:[#allocation3_spill] sm:$0xff] %v5019_v25  ;;  %v3857_v31 = vld [vmem:[%s7436_s1 + $0x438] sm:$0xf0]  ;;  %v4317_v38 = vld [vmem:[%s7436_s1 + $0x2a4] sm:$0xf]  ;;  %v5049_v47 = vor.u32 %v4419_v20, %v4073_v29  ;;  %s3292_s8 = sshll.u32 %s7920_s17, 3 }
  0x46   : > { %1529 = vmatpush.bf16.msra.mxu2 %v4952_v46  ;;  %v3665_v39 = vld [vmem:[%s7436_s1 + $0x2b8] sm:$0xf0]  ;;  %7594 = vst [vmem:[#allocation4_spill] sm:$0xff] %v5045_v43  ;;  %v5051_v48 = vor.u32 %v4365_v30, %v3857_v31  ;;  %v4269_v51 = vld [vmem:[%s7436_s1 + $0x124] sm:$0xf]  ;;  %s276_s10 = scalar_lea.vmem %s7439_s4, %s3292_s8 }
  0x47   : > { %1548 = vmatpush.bf16.msra.mxu3 %v4964_v52  ;;  %7595 = vst [vmem:[#allocation5_spill] sm:$0xff] %v5049_v47  ;;  %v3473_v53 = vld [vmem:[%s7436_s1 + $0x138] sm:$0xf0]  ;;  %v4413_v55 = vld [vmem:[%s7436_s1 + $0x5a4] sm:$0xf]  ;;  %v5064_v56 = vor.u32 %v4317_v38, %v3665_v39 }
  0x48   : > { %1492 = vmatpush.bf16.msra.mxu0 %v4985_v63  ;;  %7596 = vst [vmem:[#allocation6_spill] sm:$0xff] %v5051_v48  ;;  %v4049_v57 = vld [vmem:[%s7436_s1 + $0x5b8] sm:$0xf0]  ;;  %v4359_v58 = vld [vmem:[%s7436_s1 + $0x3f4] sm:$0xf]  ;;  %v5085_v3 = vor.u32 %v4269_v51, %v3473_v53 }
  0x49   : > { %1511 = vmatpush.bf16.msra.mxu1 %v5000_v6  ;;  %7597 = vst [vmem:[#allocation7_spill] sm:$0xff] %v5064_v56  ;;  %v3833_v59 = vld [vmem:[%s7436_s1 + $0x408] sm:$0xf0]  ;;  %v4311_v0 = vld [vmem:[%s7436_s1 + $0x274] sm:$0xf]  ;;  %v5089_v4 = vor.u32 %v4413_v55, %v4049_v57 }
  0x4a   : > { %1530 = vmatpush.bf16.msra.mxu2 %v5002_v7  ;;  %v3641_v1 = vld [vmem:[%s7436_s1 + $0x288] sm:$0xf0]  ;;  %7598 = vst [vmem:[#allocation8_spill] sm:$0xff] %v5085_v3  ;;  %v5091_v5 = vor.u32 %v4359_v58, %v3833_v59  ;;  %v4263_v11 = vld [vmem:[%s7436_s1 + $0xf4] sm:$0xf] }
  0x4b   : > { %1549 = vmatpush.bf16.msra.mxu3 %v5008_v15  ;;  %1493 = vmatmul.bf16.vlgmr.msra.gmra.mxu0 %v5017_v22  ;;  %7599 = vst [vmem:[#allocation9_spill] sm:$0xff] %v5089_v4  ;;  %v3449_v12 = vld [vmem:[%s7436_s1 + $0x108] sm:$0xf0]  ;;  %v4407_v13 = vld [vmem:[%s7436_s1 + $0x574] sm:$0xf]  ;;  %v5103_v16 = vor.u32 %v4311_v0, %v3641_v1 }
  0x4c   : > { %1512 = vmatmul.bf16.vlgmr.msra.gmra.mxu1 %v5031_v35  ;;  %1561 = vmatpush.bf16.msrb.mxu0 %v5045_v43  ;;  %7600 = vst [vmem:[#allocation10_spill] sm:$0xff] %v5091_v5  ;;  %v4025_v17 = vld [vmem:[%s7436_s1 + $0x588] sm:$0xf0]  ;;  %v4353_v20 = vld [vmem:[%s7436_s1 + $0x3c4] sm:$0xf]  ;;  %v5121_v38 = vor.u32 %v4263_v11, %v3449_v12 }
  0x4d   : > { %1580 = vmatpush.bf16.msrb.mxu1 %v5019_v25  ;;  %1531 = vmatmul.bf16.vlgmr.msra.gmra.mxu2 %v5033_v36  ;;  %7601 = vst [vmem:[#allocation11_spill] sm:$0xff] %v5103_v16  ;;  %v3809_v29 = vld [vmem:[%s7436_s1 + $0x3d8] sm:$0xf0]  ;;  %v4305_v30 = vld [vmem:[%s7436_s1 + $0x244] sm:$0xf]  ;;  %v5134_v55 = vor.u32 %v4407_v13, %v4025_v17 }
  0x4e   : > { %1599 = vmatpush.bf16.msrb.mxu2 %v5012_v18  ;;  %1550 = vmatmul.bf16.vlgmr.msra.gmra.mxu3 %v5043_v42  ;;  %v3617_v31 = vld [vmem:[%s7436_s1 + $0x258] sm:$0xf0]  ;;  %7602 = vst [vmem:[#allocation12_spill] sm:$0xff] %v5121_v38  ;;  %v4257_v39 = vld [vmem:[%s7436_s1 + $0xc4] sm:$0xf]  ;;  %v5136_v57 = vor.u32 %v4353_v20, %v3809_v29 }
  0x4f   : > { %1618 = vmatpush.bf16.msrb.mxu3 %v5049_v47  ;;  %v3425_v51 = vld [vmem:[%s7436_s1 + $0xd8] sm:$0xf0]  ;;  %v4401_v53 = vld [vmem:[%s7436_s1 + $0x544] sm:$0xf]  ;;  %7603 = vst [vmem:[#allocation13_spill] sm:$0xff] %v5134_v55  ;;  %v5144_v1 = vor.u32 %v4305_v30, %v3617_v31 }
  0x50   : > { %1562 = vmatpush.bf16.msrb.mxu0 %v5085_v3  ;;  %7604 = vst [vmem:[#allocation14_spill] sm:$0xff] %v5136_v57  ;;  %v4001_v58 = vld [vmem:[%s7436_s1 + $0x558] sm:$0xf0]  ;;  %v3311_v59 = vld [vmem:[%s4975_s29 + $0x20] sm:$0xf]  ;;  %v5162_v31 = vor.u32 %v4257_v39, %v3425_v51 }
  0x51   : > { %1581 = vmatpush.bf16.msrb.mxu1 %v5064_v56  ;;  %v4431_v0 = vld [vmem:[%s4975_s29 + $0x2c] sm:$0xf0]  ;;  %7605 = vst [vmem:[#allocation15_spill] sm:$0xff] %v5144_v1  ;;  %v4429_v11 = vld [vmem:[%s4975_s29 + $0x24] sm:$0xf]  ;;  %v5169_v56 = vor.u32 %v4401_v53, %v4001_v58 }
  0x52   : > { %1600 = vmatpush.bf16.msrb.mxu2 %v5051_v48  ;;  %v3313_v12 = vld [vmem:[%s4975_s29 + $0x30] sm:$0xf0]  ;;  %v3785_v17 = vld [vmem:[%s7436_s1 + $0x3a8] sm:$0xf0]  ;;  %v3319_v20 = vld [vmem:[%s4975_s29 + $0x28] sm:$0xf] }
  0x53   : > { %1619 = vmatpush.bf16.msrb.mxu3 %v5089_v4  ;;  %v4347_v13 = vld [vmem:[%s7436_s1 + $0x394] sm:$0xf]  ;;  %v3593_v30 = vld [vmem:[%s7436_s1 + $0x228] sm:$0xf0]  ;;  %7606 = vst [vmem:[#allocation16_spill] sm:$0xff] %v5162_v31 }
  0x54   : > { %v4299_v29 = vld [vmem:[%s7436_s1 + $0x214] sm:$0xf]  ;;  %1563 = vmatpush.bf16.msrb.mxu0 %v5121_v38  ;;  %v3321_v4 = vld [vmem:[%s4975_s29 + $0x38] sm:$0xf0]  ;;  %7607 = vst [vmem:[#allocation17_spill] sm:$0xff] %v5169_v56  ;;  %v5171_v3 = vor.u32 %v4347_v13, %v3785_v17 }
  0x55   : > { %1582 = vmatpush.bf16.msrb.mxu1 %v5103_v16  ;;  %v4432_v16 = vld [vmem:[%s4975_s29 + $0x34] sm:$0xf0]  ;;  %v4251_v48 = vld [vmem:[%s7436_s1 + $0x94] sm:$0xf]  ;;  %v3401_v39 = vld [vmem:[%s7436_s1 + $0xa8] sm:$0xf0]  ;;  %v5185_v53 = vor.u32 %v4299_v29, %v3593_v30 }
  0x56   : > { %1601 = vmatpush.bf16.msrb.mxu2 %v5091_v5  ;;  %v4430_v5 = vld [vmem:[%s4975_s29 + $0x2c] sm:$0xf]  ;;  %7608 = vst [vmem:[#allocation18_spill] sm:$0xff] %v5171_v3  ;;  %v4395_v51 = vld [vmem:[%s7436_s1 + $0x514] sm:$0xf]  ;;  %v5198_v38 = vor.u32 %v4432_v16, %v3319_v20  ;;  %v5209_v30 = vor.u32 %v4251_v48, %v3401_v39 }
  0x57   : > { %1620 = vmatpush.bf16.msrb.mxu3 %v5134_v55  ;;  %v5183_v55 = vor.u32 %v4431_v0, %v3311_v59  ;;  %7609 = vst [vmem:[#allocation19_spill] sm:$0xff] %v5185_v53  ;;  %v3977_v58 = vld [vmem:[%s7436_s1 + $0x528] sm:$0xf0]  ;;  %v4341_v13 = vld [vmem:[%s7436_s1 + $0x364] sm:$0xf]  ;;  %v5207_v29 = vor.u32 %v4430_v5, %v3321_v4 }
  0x58   : > { %v3761_v17 = vld [vmem:[%s7436_s1 + $0x378] sm:$0xf0]  ;;  %v4293_v59 = vld [vmem:[%s7436_s1 + $0x1e4] sm:$0xf]  ;;  %1564 = vmatpush.bf16.msrb.mxu0 %v5162_v31  ;;  %7610 = vst [vmem:[#allocation20_spill] sm:$0xff] %v5209_v30  ;;  %v5213_v16 = vor.u32 %v4395_v51, %v3977_v58 }
  0x59   : > { %1583 = vmatpush.bf16.msrb.mxu1 %v5144_v1  ;;  %v3569_v0 = vld [vmem:[%s7436_s1 + $0x1f8] sm:$0xf0]  ;;  %v4389_v48 = vld [vmem:[%s7436_s1 + $0x4e4] sm:$0xf]  ;;  %v4335_v39 = vld [vmem:[%s7436_s1 + $0x334] sm:$0xf] }
  0x5a   : > { %1602 = vmatpush.bf16.msrb.mxu2 %v5136_v57  ;;  %v5196_v57 = vor.u32 %v4429_v11, %v3313_v12  ;;  %7611 = vst [vmem:[#allocation21_spill] sm:$0xff] %v5213_v16  ;;  %v5215_v11 = vor.u32 %v4341_v13, %v3761_v17  ;;  %v4245_v12 = vld [vmem:[%s7436_s1 + $0x64] sm:$0xf]  ;;  %v3377_v20 = vld [vmem:[%s7436_s1 + $0x78] sm:$0xf0]  ;;  %v5228_v4 = vor.u32 %v4293_v59, %v3569_v0 }
  0x5b   : > { %1621 = vmatpush.bf16.msrb.mxu3 %v5169_v56  ;;  %1498 = vmatmul.bf16.gmra.mxu0 %v5183_v55  ;;  %v3953_v5 = vld [vmem:[%s7436_s1 + $0x4f8] sm:$0xf0]  ;;  %v3737_v51 = vld [vmem:[%s7436_s1 + $0x348] sm:$0xf0]  ;;  %v4287_v58 = vld [vmem:[%s7436_s1 + $0x1b4] sm:$0xf]  ;;  %v5249_v17 = vor.u32 %v4245_v12, %v3377_v20 }
  0x5c   : > { %7612 = vst [vmem:[#allocation22_spill] sm:$0xff] %v5215_v11  ;;  %1517 = vmatmul.bf16.gmra.mxu1 %v5196_v57  ;;  %v3545_v13 = vld [vmem:[%s7436_s1 + $0x1c8] sm:$0xf0]  ;;  %1565 = vmatpush.bf16.msrb.mxu0 %v5209_v30  ;;  %v4239_v59 = vld [vmem:[%s7436_s1 + $0x34] sm:$0xf]  ;;  %v5256_v0 = vor.u32 %v4389_v48, %v3953_v5 }
  0x5d   : > { %1584 = vmatpush.bf16.msrb.mxu1 %v5185_v53  ;;  %7613 = vst [vmem:[#allocation23_spill] sm:$0xff] %v5228_v4  ;;  %1536 = vmatmul.bf16.gmra.mxu2 %v5198_v38  ;;  %v5258_v53 = vor.u32 %v4335_v39, %v3737_v51  ;;  %v4383_v12 = vld [vmem:[%s7436_s1 + $0x4b4] sm:$0xf]  ;;  %v3929_v20 = vld [vmem:[%s7436_s1 + $0x4c8] sm:$0xf0] }
  0x5e   : > { %1603 = vmatpush.bf16.msrb.mxu2 %v5171_v3  ;;  %1555 = vmatmul.bf16.gmra.mxu3 %v5207_v29  ;;  %7614 = vst [vmem:[#allocation24_spill] sm:$0xff] %v5249_v17  ;;  %v3353_v3 = vld [vmem:[%s7436_s1 + $0x48] sm:$0xf0]  ;;  %v4329_v48 = vld [vmem:[%s7436_s1 + $0x304] sm:$0xf]  ;;  %v5304_v1 = vor.u32 %v4383_v12, %v3929_v20 }
  0x5f   : > { %1622 = vmatpush.bf16.msrb.mxu3 %v5213_v16  ;;  %7615 = vst [vmem:[#allocation25_spill] sm:$0xff] %v5256_v0  ;;  %v5270_v16 = vor.u32 %v4287_v58, %v3545_v13  ;;  %v3713_v5 = vld [vmem:[%s7436_s1 + $0x318] sm:$0xf0]  ;;  %v4281_v39 = vld [vmem:[%s7436_s1 + $0x184] sm:$0xf] }
  0x60   : > { %7616 = vst [vmem:[#allocation26_spill] sm:$0xff] %v5258_v53  ;;  %v3521_v51 = vld [vmem:[%s7436_s1 + $0x198] sm:$0xf0]  ;;  %v3887_v58 = vld [vmem:[%s7436_s1 + $0x458] sm:$0xf]  ;;  %1566 = vmatpush.bf16.msrb.mxu0 %v5249_v17 }
  0x61   : > { %1585 = vmatpush.bf16.msrb.mxu1 %v5228_v4  ;;  %7617 = vst [vmem:[#allocation27_spill] sm:$0xff] %v5270_v16  ;;  %v4375_v13 = vld [vmem:[%s7436_s1 + $0x46c] sm:$0xf0]  ;;  %v5291_v4 = vor.u32 %v4239_v59, %v3353_v3  ;;  %v3695_v30 = vld [vmem:[%s7436_s1 + $0x2d8] sm:$0xf]  ;;  %v5306_v3 = vor.u32 %v4329_v48, %v3713_v5 }
  0x62   : > { %1604 = vmatpush.bf16.msrb.mxu2 %v5215_v11  ;;  %v4233_v11 = vld [vmem:[%s7436_s1 + $0x4] sm:$0xf]  ;;  %v4327_v56 = vld [vmem:[%s7436_s1 + $0x2ec] sm:$0xf0]  ;;  %7619 = vst [vmem:[#allocation29_spill] sm:$0xff] %v5304_v1  ;;  %v5320_v12 = vor.u32 %v4375_v13, %v3887_v58 }
  0x63   : > { %7618 = vst [vmem:[#allocation28_spill] sm:$0xff] %v5291_v4  ;;  %1623 = vmatpush.bf16.msrb.mxu3 %v5256_v0  ;;  %v3329_v59 = vld [vmem:[%s7436_s1 + $0x18] sm:$0xf0]  ;;  %v4377_v17 = vld [vmem:[%s7436_s1 + $0x484] sm:$0xf]  ;;  %v5318_v0 = vor.u32 %v4281_v39, %v3521_v51 }
  0x64   : > { %7620 = vst [vmem:[#allocation30_spill] sm:$0xff] %v5306_v3  ;;  %v3905_v31 = vld [vmem:[%s7436_s1 + $0x498] sm:$0xf0]  ;;  %v3503_v20 = vld [vmem:[%s7436_s1 + $0x158] sm:$0xf]  ;;  %1567 = vmatpush.bf16.msrb.mxu0 %v5291_v4  ;;  %v5343_v13 = vor.u32 %v4233_v11, %v3329_v59 }
  0x65   : > { %1586 = vmatpush.bf16.msrb.mxu1 %v5270_v16  ;;  %7621 = vst [vmem:[#allocation31_spill] sm:$0xff] %v5318_v0  ;;  %v4279_v48 = vld [vmem:[%s7436_s1 + $0x16c] sm:$0xf0]  ;;  %v4079_v5 = vld [vmem:[%s7436_s1 + $0x5d8] sm:$0xf] }
  0x66   : > { %1605 = vmatpush.bf16.msrb.mxu2 %v5258_v53  ;;  %7622 = vst [vmem:[#allocation32_spill] sm:$0xff] %v5320_v12  ;;  %v5331_v53 = vor.u32 %v4327_v56, %v3695_v30  ;;  %v4423_v39 = vld [vmem:[%s7436_s1 + $0x5ec] sm:$0xf0]  ;;  %v3863_v51 = vld [vmem:[%s7436_s1 + $0x428] sm:$0xf]  ;;  %v5347_v56 = vor.u32 %v4377_v17, %v3905_v31  ;;  %v5349_v30 = vor.u32 %v4279_v48, %v3503_v20 }
  0x67   : > { %v4369_v58 = vld [vmem:[%s7436_s1 + $0x43c] sm:$0xf0]  ;;  %7624 = vst [vmem:[#allocation34_spill] sm:$0xff] %v5343_v13  ;;  %1624 = vmatpush.bf16.msrb.mxu3 %v5304_v1  ;;  %v3479_v16 = vld [vmem:[%s7436_s1 + $0x128] sm:$0xf]  ;;  %v5359_v11 = vor.u32 %v4423_v39, %v4079_v5 }
  0x68   : > { %7623 = vst [vmem:[#allocation33_spill] sm:$0xff] %v5331_v53  ;;  %v4273_v47 = vld [vmem:[%s7436_s1 + $0x13c] sm:$0xf0]  ;;  %v5361_v59 = vor.u32 %v4369_v58, %v3863_v51  ;;  %v3671_v31 = vld [vmem:[%s7436_s1 + $0x2a8] sm:$0xf]  ;;  %1568 = vmatpush.bf16.msrb.mxu0 %v5343_v13 }
  0x69   : > { %7625 = vst [vmem:[#allocation35_spill] sm:$0xff] %v5347_v56  ;;  %1587 = vmatpush.bf16.msrb.mxu1 %v5318_v0  ;;  %v4321_v17 = vld [vmem:[%s7436_s1 + $0x2bc] sm:$0xf0]  ;;  %v4055_v20 = vld [vmem:[%s7436_s1 + $0x5a8] sm:$0xf]  ;;  %v5385_v51 = vor.u32 %v4273_v47, %v3479_v16 }
  0x6a   : > { %1606 = vmatpush.bf16.msrb.mxu2 %v5306_v3  ;;  %7626 = vst [vmem:[#allocation36_spill] sm:$0xff] %v5349_v30  ;;  %v4417_v48 = vld [vmem:[%s7436_s1 + $0x5bc] sm:$0xf0]  ;;  %v3839_v5 = vld [vmem:[%s7436_s1 + $0x3f8] sm:$0xf]  ;;  %v5387_v58 = vor.u32 %v4321_v17, %v3671_v31 }
  0x6b   : > { %7627 = vst [vmem:[#allocation37_spill] sm:$0xff] %v5359_v11  ;;  %v4363_v39 = vld [vmem:[%s7436_s1 + $0x40c] sm:$0xf0]  ;;  %1625 = vmatpush.bf16.msrb.mxu3 %v5347_v56  ;;  %v5397_v0 = vor.u32 %v4417_v48, %v4055_v20  ;;  %v3647_v47 = vld [vmem:[%s7436_s1 + $0x278] sm:$0xf]  ;;  %1569 = vmatmul.bf16.vlgmr.msrb.gmra.mxu0 %v5017_v22 }
  0x6c   : > { %7628 = vst [vmem:[#allocation38_spill] sm:$0xff] %v5361_v59  ;;  %1637 = vmatpush.bf16.msra.mxu0 %v5349_v30  ;;  %v5399_v56 = vor.u32 %v4363_v39, %v3839_v5  ;;  %v4315_v16 = vld [vmem:[%s7436_s1 + $0x28c] sm:$0xf0]  ;;  %v4031_v31 = vld [vmem:[%s7436_s1 + $0x578] sm:$0xf]  ;;  %1588 = vmatmul.bf16.vlgmr.msrb.gmra.mxu1 %v5031_v35 }
  0x6d   : > { %1656 = vmatpush.bf16.msra.mxu1 %v5331_v53  ;;  %7629 = vst [vmem:[#allocation39_spill] sm:$0xff] %v5385_v51  ;;  %v3455_v53 = vld [vmem:[%s7436_s1 + $0xf8] sm:$0xf]  ;;  %v4411_v17 = vld [vmem:[%s7436_s1 + $0x58c] sm:$0xf0]  ;;  %1607 = vmatmul.bf16.vlgmr.msrb.gmra.mxu2 %v5033_v36  ;;  %v5427_v39 = vor.u32 %v4315_v16, %v3647_v47 }
  0x6e   : > { %1675 = vmatpush.bf16.msra.mxu2 %v5320_v12  ;;  %7630 = vst [vmem:[#allocation40_spill] sm:$0xff] %v5387_v58  ;;  %v4267_v12 = vld [vmem:[%s7436_s1 + $0x10c] sm:$0xf0]  ;;  %v3815_v20 = vld [vmem:[%s7436_s1 + $0x3c8] sm:$0xf]  ;;  %1626 = vmatmul.bf16.vlgmr.msrb.gmra.mxu3 %v5043_v42  ;;  %v5437_v30 = vor.u32 %v4411_v17, %v4031_v31 }
  0x6f   : > { %1694 = vmatpush.bf16.msra.mxu3 %v5359_v11  ;;  %7631 = vst [vmem:[#allocation41_spill] sm:$0xff] %v5397_v0  ;;  %v4357_v48 = vld [vmem:[%s7436_s1 + $0x3dc] sm:$0xf0]  ;;  %v5425_v5 = vor.u32 %v4267_v12, %v3455_v53  ;;  %v3623_v53 = vld [vmem:[%s7436_s1 + $0x248] sm:$0xf] }
  0x70   : > { %7632 = vst [vmem:[#allocation42_spill] sm:$0xff] %v5399_v56  ;;  %1638 = vmatpush.bf16.msra.mxu0 %v5385_v51  ;;  %v4261_v11 = vld [vmem:[%s7436_s1 + $0xdc] sm:$0xf0]  ;;  %v5439_v51 = vor.u32 %v4357_v48, %v3815_v20  ;;  %v4007_v47 = vld [vmem:[%s7436_s1 + $0x548] sm:$0xf] }
  0x71   : > { %1657 = vmatpush.bf16.msra.mxu1 %v5387_v58  ;;  %7633 = vst [vmem:[#allocation43_spill] sm:$0xff] %v5425_v5  ;;  %v4309_v12 = vld [vmem:[%s7436_s1 + $0x25c] sm:$0xf0]  ;;  %v3791_v31 = vld [vmem:[%s7436_s1 + $0x398] sm:$0xf] }
  0x72   : > { %1676 = vmatpush.bf16.msra.mxu2 %v5361_v59  ;;  %7634 = vst [vmem:[#allocation44_spill] sm:$0xff] %v5427_v39  ;;  %v3431_v59 = vld [vmem:[%s7436_s1 + $0xc8] sm:$0xf]  ;;  %v4405_v16 = vld [vmem:[%s7436_s1 + $0x55c] sm:$0xf0]  ;;  %v5463_v48 = vor.u32 %v4309_v12, %v3623_v53 }
  0x73   : > { %1695 = vmatpush.bf16.msra.mxu3 %v5397_v0  ;;  %7635 = vst [vmem:[#allocation45_spill] sm:$0xff] %v5437_v30  ;;  %v4351_v17 = vld [vmem:[%s7436_s1 + $0x3ac] sm:$0xf0]  ;;  %v5461_v20 = vor.u32 %v4261_v11, %v3431_v59  ;;  %v5473_v58 = vor.u32 %v4405_v16, %v4007_v47  ;;  %v3599_v11 = vld [vmem:[%s7436_s1 + $0x218] sm:$0xf] }
  0x74   : > { %7636 = vst [vmem:[#allocation46_spill] sm:$0xff] %v5439_v51  ;;  %1639 = vmatpush.bf16.msra.mxu0 %v5425_v5  ;;  %v4255_v0 = vld [vmem:[%s7436_s1 + $0xac] sm:$0xf0]  ;;  %v5475_v5 = vor.u32 %v4351_v17, %v3791_v31  ;;  %v3983_v53 = vld [vmem:[%s7436_s1 + $0x518] sm:$0xf] }
  0x75   : > { %1658 = vmatpush.bf16.msra.mxu1 %v5427_v39  ;;  %7637 = vst [vmem:[#allocation47_spill] sm:$0xff] %v5461_v20  ;;  %v4303_v59 = vld [vmem:[%s7436_s1 + $0x22c] sm:$0xf0]  ;;  %v3767_v47 = vld [vmem:[%s7436_s1 + $0x368] sm:$0xf] }
  0x76   : > { %1677 = vmatpush.bf16.msra.mxu2 %v5399_v56  ;;  %7638 = vst [vmem:[#allocation48_spill] sm:$0xff] %v5463_v48  ;;  %v3407_v56 = vld [vmem:[%s7436_s1 + $0x98] sm:$0xf]  ;;  %v4399_v12 = vld [vmem:[%s7436_s1 + $0x52c] sm:$0xf0]  ;;  %v5499_v17 = vor.u32 %v4303_v59, %v3599_v11 }
  0x77   : > { %1696 = vmatpush.bf16.msra.mxu3 %v5437_v30  ;;  %7639 = vst [vmem:[#allocation49_spill] sm:$0xff] %v5473_v58  ;;  %v4345_v16 = vld [vmem:[%s7436_s1 + $0x37c] sm:$0xf0]  ;;  %v5497_v31 = vor.u32 %v4255_v0, %v3407_v56  ;;  %v5509_v39 = vor.u32 %v4399_v12, %v3983_v53  ;;  %v3575_v0 = vld [vmem:[%s7436_s1 + $0x1e8] sm:$0xf] }
  0x78   : > { %7640 = vst [vmem:[#allocation50_spill] sm:$0xff] %v5475_v5  ;;  %1640 = vmatpush.bf16.msra.mxu0 %v5461_v20  ;;  %v4249_v30 = vld [vmem:[%s7436_s1 + $0x7c] sm:$0xf0]  ;;  %v5511_v20 = vor.u32 %v4345_v16, %v3767_v47  ;;  %v3959_v11 = vld [vmem:[%s7436_s1 + $0x4e8] sm:$0xf] }
  0x79   : > { %1659 = vmatpush.bf16.msra.mxu1 %v5463_v48  ;;  %7641 = vst [vmem:[#allocation51_spill] sm:$0xff] %v5497_v31  ;;  %v4297_v56 = vld [vmem:[%s7436_s1 + $0x1fc] sm:$0xf0]  ;;  %v3743_v53 = vld [vmem:[%s7436_s1 + $0x338] sm:$0xf] }
  0x7a   : > { %1678 = vmatpush.bf16.msra.mxu2 %v5439_v51  ;;  %7642 = vst [vmem:[#allocation52_spill] sm:$0xff] %v5499_v17  ;;  %v3383_v51 = vld [vmem:[%s7436_s1 + $0x68] sm:$0xf]  ;;  %v4393_v59 = vld [vmem:[%s7436_s1 + $0x4fc] sm:$0xf0]  ;;  %v5535_v16 = vor.u32 %v4297_v56, %v3575_v0 }
  0x7b   : > { %1697 = vmatpush.bf16.msra.mxu3 %v5473_v58  ;;  %7643 = vst [vmem:[#allocation53_spill] sm:$0xff] %v5509_v39  ;;  %v4339_v12 = vld [vmem:[%s7436_s1 + $0x34c] sm:$0xf0]  ;;  %v5533_v47 = vor.u32 %v4249_v30, %v3383_v51  ;;  %v5545_v48 = vor.u32 %v4393_v59, %v3959_v11  ;;  %v3551_v30 = vld [vmem:[%s7436_s1 + $0x1b8] sm:$0xf]  ;;  %1574 = vmatmul.bf16.gmra.mxu0 %v5183_v55 }
  0x7c   : > { %7644 = vst [vmem:[#allocation54_spill] sm:$0xff] %v5511_v20  ;;  %1641 = vmatpush.bf16.msra.mxu0 %v5497_v31  ;;  %v4243_v58 = vld [vmem:[%s7436_s1 + $0x4c] sm:$0xf0]  ;;  %v5547_v31 = vor.u32 %v4339_v12, %v3743_v53  ;;  %v3935_v0 = vld [vmem:[%s7436_s1 + $0x4b8] sm:$0xf]  ;;  %1593 = vmatmul.bf16.gmra.mxu1 %v5196_v57 }
  0x7d   : > { %1660 = vmatpush.bf16.msra.mxu1 %v5499_v17  ;;  %7645 = vst [vmem:[#allocation55_spill] sm:$0xff] %v5533_v47  ;;  %v4291_v51 = vld [vmem:[%s7436_s1 + $0x1cc] sm:$0xf0]  ;;  %v3719_v11 = vld [vmem:[%s7436_s1 + $0x308] sm:$0xf]  ;;  %1612 = vmatmul.bf16.gmra.mxu2 %v5198_v38 }
  0x7e   : > { %1679 = vmatpush.bf16.msra.mxu2 %v5475_v5  ;;  %7646 = vst [vmem:[#allocation56_spill] sm:$0xff] %v5535_v16  ;;  %v3359_v5 = vld [vmem:[%s7436_s1 + $0x38] sm:$0xf]  ;;  %v4387_v56 = vld [vmem:[%s7436_s1 + $0x4cc] sm:$0xf0]  ;;  %1631 = vmatmul.bf16.gmra.mxu3 %v5207_v29 }
  0x7f   : > { %1698 = vmatpush.bf16.msra.mxu3 %v5509_v39  ;;  %7647 = vst [vmem:[#allocation57_spill] sm:$0xff] %v5545_v48  ;;  %v4333_v59 = vld [vmem:[%s7436_s1 + $0x31c] sm:$0xf0]  ;;  %v4372_v53 = vld [vmem:[%s7436_s1 + $0x45c] sm:$0xf]  ;;  %v5581_v39 = vor.u32 %v4291_v51, %v3551_v30 }
  0x80   : > { %7648 = vst [vmem:[#allocation58_spill] sm:$0xff] %v5547_v31  ;;  %v3889_v12 = vld [vmem:[%s7436_s1 + $0x470] sm:$0xf0]  ;;  %1642 = vmatpush.bf16.msra.mxu0 %v5533_v47  ;;  %v3335_v17 = vld [vmem:[%s7436_s1 + $0x8] sm:$0xf] }
  0x81   : > { %1661 = vmatpush.bf16.msra.mxu1 %v5535_v16  ;;  %7650 = vst [vmem:[#allocation60_spill] sm:$0xff] %v5581_v39  ;;  %v4237_v13 = vld [vmem:[%s7436_s1 + $0x1c] sm:$0xf0]  ;;  %v3527_v3 = vld [vmem:[%s7436_s1 + $0x188] sm:$0xf]  ;;  %v5607_v47 = vor.u32 %v4372_v53, %v3889_v12 }
  0x82   : > { %1680 = vmatpush.bf16.msra.mxu2 %v5511_v20  ;;  %v5579_v20 = vor.u32 %v4243_v58, %v3359_v5  ;;  %v5594_v58 = vor.u32 %v4387_v56, %v3935_v0  ;;  %v5596_v5 = vor.u32 %v4333_v59, %v3719_v11  ;;  %v4285_v30 = vld [vmem:[%s7436_s1 + $0x19c] sm:$0xf0]  ;;  %v3911_v51 = vld [vmem:[%s7436_s1 + $0x488] sm:$0xf]  ;;  %v4276_v0 = vld [vmem:[%s7436_s1 + $0x15c] sm:$0xf] }
  0x83   : > { %1699 = vmatpush.bf16.msra.mxu3 %v5545_v48  ;;  %v4381_v16 = vld [vmem:[%s7436_s1 + $0x49c] sm:$0xf0]  ;;  %7653 = vst [vmem:[#allocation63_spill] sm:$0xff] %v5607_v47  ;;  %v3505_v56 = vld [vmem:[%s7436_s1 + $0x170] sm:$0xf0]  ;;  %v5631_v48 = vor.u32 %v4285_v30, %v3527_v3 }
  0x84   : > { %7649 = vst [vmem:[#allocation59_spill] sm:$0xff] %v5579_v20  ;;  %v4324_v11 = vld [vmem:[%s7436_s1 + $0x2dc] sm:$0xf]  ;;  %v3697_v59 = vld [vmem:[%s7436_s1 + $0x2f0] sm:$0xf0]  ;;  %1643 = vmatpush.bf16.msra.mxu0 %v5579_v20  ;;  %v5641_v25 = vor.u32 %v4381_v16, %v3911_v51  ;;  %v5643_v20 = vor.u32 %v4276_v0, %v3505_v56 }
  0x85   : > { %7651 = vst [vmem:[#allocation61_spill] sm:$0xff] %v5594_v58  ;;  %v4420_v53 = vld [vmem:[%s7436_s1 + $0x5dc] sm:$0xf]  ;;  %v4081_v12 = vld [vmem:[%s7436_s1 + $0x5f0] sm:$0xf0]  ;;  %1662 = vmatpush.bf16.msra.mxu1 %v5581_v39  ;;  %v5646_v3 = vor.u32 %v4324_v11, %v3697_v59 }
  0x86   : > { %1681 = vmatpush.bf16.msra.mxu2 %v5547_v31  ;;  %7652 = vst [vmem:[#allocation62_spill] sm:$0xff] %v5596_v5  ;;  %v5629_v31 = vor.u32 %v4237_v13, %v3335_v17  ;;  %v4366_v1 = vld [vmem:[%s7436_s1 + $0x42c] sm:$0xf]  ;;  %v3865_v4 = vld [vmem:[%s7436_s1 + $0x440] sm:$0xf0]  ;;  %v5648_v13 = vor.u32 %v4420_v53, %v4081_v12 }
  0x87   : > { %7655 = vst [vmem:[#allocation65_spill] sm:$0xff] %v5631_v48  ;;  %1700 = vmatpush.bf16.msra.mxu3 %v5594_v58  ;;  %v4270_v17 = vld [vmem:[%s7436_s1 + $0x12c] sm:$0xf]  ;;  %v3481_v30 = vld [vmem:[%s7436_s1 + $0x140] sm:$0xf0]  ;;  %v5656_v58 = vor.u32 %v4366_v1, %v3865_v4 }
  0x88   : > { %7654 = vst [vmem:[#allocation64_spill] sm:$0xff] %v5629_v31  ;;  %1644 = vmatpush.bf16.msra.mxu0 %v5629_v31  ;;  %v4318_v16 = vld [vmem:[%s7436_s1 + $0x2ac] sm:$0xf]  ;;  %v3673_v51 = vld [vmem:[%s7436_s1 + $0x2c0] sm:$0xf0]  ;;  %v5668_v0 = vor.u32 %v4270_v17, %v3481_v30 }
  0x89   : > { %7656 = vst [vmem:[#allocation66_spill] sm:$0xff] %v5641_v25  ;;  %1663 = vmatpush.bf16.msra.mxu1 %v5631_v48  ;;  %v4414_v1 = vld [vmem:[%s7436_s1 + $0x5ac] sm:$0xf]  ;;  %v4057_v4 = vld [vmem:[%s7436_s1 + $0x5c0] sm:$0xf0]  ;;  %v5691_v12 = vor.u32 %v4318_v16, %v3673_v51 }
  0x8a   : > { %1682 = vmatpush.bf16.msra.mxu2 %v5596_v5  ;;  %7657 = vst [vmem:[#allocation67_spill] sm:$0xff] %v5643_v20  ;;  %v4360_v56 = vld [vmem:[%s7436_s1 + $0x3fc] sm:$0xf]  ;;  %v3841_v11 = vld [vmem:[%s7436_s1 + $0x410] sm:$0xf0]  ;;  %v5693_v17 = vor.u32 %v4414_v1, %v4057_v4 }
  0x8b   : > { %7658 = vst [vmem:[#allocation68_spill] sm:$0xff] %v5646_v3  ;;  %1701 = vmatpush.bf16.msra.mxu3 %v5641_v25  ;;  %v4264_v59 = vld [vmem:[%s7436_s1 + $0xfc] sm:$0xf]  ;;  %v3457_v53 = vld [vmem:[%s7436_s1 + $0x110] sm:$0xf0]  ;;  %1645 = vmatmul.bf16.vlgmr.msra.gmra.mxu0 %v5017_v22 }
  0x8c   : > { %7659 = vst [vmem:[#allocation69_spill] sm:$0xff] %v5648_v13  ;;  %1713 = vmatpush.bf16.msrb.mxu0 %v5643_v20  ;;  %v4312_v30 = vld [vmem:[%s7436_s1 + $0x27c] sm:$0xf]  ;;  %v5704_v20 = vor.u32 %v4264_v59, %v3457_v53  ;;  %v4033_v51 = vld [vmem:[%s7436_s1 + $0x590] sm:$0xf0]  ;;  %1664 = vmatmul.bf16.vlgmr.msra.gmra.mxu1 %v5031_v35 }
  0x8d   : > { %7660 = vst [vmem:[#allocation70_spill] sm:$0xff] %v5656_v58  ;;  %1732 = vmatpush.bf16.msrb.mxu1 %v5646_v3  ;;  %v5702_v3 = vor.u32 %v4360_v56, %v3841_v11  ;;  %v4408_v16 = vld [vmem:[%s7436_s1 + $0x57c] sm:$0xf]  ;;  %v4354_v1 = vld [vmem:[%s7436_s1 + $0x3cc] sm:$0xf]  ;;  %1683 = vmatmul.bf16.vlgmr.msra.gmra.mxu2 %v5033_v36 }
  0x8e   : > { %1751 = vmatpush.bf16.msrb.mxu2 %v5607_v47  ;;  %7661 = vst [vmem:[#allocation71_spill] sm:$0xff] %v5668_v0  ;;  %v3817_v4 = vld [vmem:[%s7436_s1 + $0x3e0] sm:$0xf0]  ;;  %v4258_v56 = vld [vmem:[%s7436_s1 + $0xcc] sm:$0xf]  ;;  %1702 = vmatmul.bf16.vlgmr.msra.gmra.mxu3 %v5043_v42  ;;  %v5732_v53 = vor.u32 %v4408_v16, %v4033_v51 }
  0x8f   : > { %1770 = vmatpush.bf16.msrb.mxu3 %v5648_v13  ;;  %7662 = vst [vmem:[#allocation72_spill] sm:$0xff] %v5691_v12  ;;  %v3649_v13 = vld [vmem:[%s7436_s1 + $0x290] sm:$0xf0]  ;;  %v3433_v11 = vld [vmem:[%s7436_s1 + $0xe0] sm:$0xf0]  ;;  %v5742_v47 = vor.u32 %v4354_v1, %v3817_v4 }
  0x90   : > { %7663 = vst [vmem:[#allocation73_spill] sm:$0xff] %v5693_v17  ;;  %1714 = vmatpush.bf16.msrb.mxu0 %v5668_v0  ;;  %v5730_v59 = vor.u32 %v4312_v30, %v3649_v13  ;;  %v4306_v0 = vld [vmem:[%s7436_s1 + $0x24c] sm:$0xf]  ;;  %v4009_v30 = vld [vmem:[%s7436_s1 + $0x560] sm:$0xf0] }
  0x91   : > { %7664 = vst [vmem:[#allocation74_spill] sm:$0xff] %v5702_v3  ;;  %1733 = vmatpush.bf16.msrb.mxu1 %v5691_v12  ;;  %v5744_v12 = vor.u32 %v4258_v56, %v3433_v11  ;;  %v4402_v13 = vld [vmem:[%s7436_s1 + $0x54c] sm:$0xf]  ;;  %v4348_v16 = vld [vmem:[%s7436_s1 + $0x39c] sm:$0xf] }
  0x92   : > { %1752 = vmatpush.bf16.msrb.mxu2 %v5656_v58  ;;  %7665 = vst [vmem:[#allocation75_spill] sm:$0xff] %v5704_v20  ;;  %v3625_v58 = vld [vmem:[%s7436_s1 + $0x260] sm:$0xf0]  ;;  %v3793_v51 = vld [vmem:[%s7436_s1 + $0x3b0] sm:$0xf0]  ;;  %v5768_v11 = vor.u32 %v4402_v13, %v4009_v30 }
  0x93   : > { %1771 = vmatpush.bf16.msrb.mxu3 %v5693_v17  ;;  %7666 = vst [vmem:[#allocation76_spill] sm:$0xff] %v5730_v59  ;;  %v4252_v1 = vld [vmem:[%s7436_s1 + $0x9c] sm:$0xf]  ;;  %v3409_v4 = vld [vmem:[%s7436_s1 + $0xb0] sm:$0xf0]  ;;  %v5766_v56 = vor.u32 %v4306_v0, %v3625_v58  ;;  %v5778_v17 = vor.u32 %v4348_v16, %v3793_v51 }
  0x94   : > { %7667 = vst [vmem:[#allocation77_spill] sm:$0xff] %v5732_v53  ;;  %1715 = vmatpush.bf16.msrb.mxu0 %v5704_v20  ;;  %v4300_v20 = vld [vmem:[%s7436_s1 + $0x21c] sm:$0xf]  ;;  %v3985_v0 = vld [vmem:[%s7436_s1 + $0x530] sm:$0xf0] }
  0x95   : > { %7668 = vst [vmem:[#allocation78_spill] sm:$0xff] %v5742_v47  ;;  %1734 = vmatpush.bf16.msrb.mxu1 %v5730_v59  ;;  %v5780_v59 = vor.u32 %v4252_v1, %v3409_v4  ;;  %v4396_v58 = vld [vmem:[%s7436_s1 + $0x51c] sm:$0xf]  ;;  %v4342_v13 = vld [vmem:[%s7436_s1 + $0x36c] sm:$0xf] }
  0x96   : > { %1753 = vmatpush.bf16.msrb.mxu2 %v5702_v3  ;;  %7669 = vst [vmem:[#allocation79_spill] sm:$0xff] %v5744_v12  ;;  %v3601_v3 = vld [vmem:[%s7436_s1 + $0x230] sm:$0xf0]  ;;  %v3769_v30 = vld [vmem:[%s7436_s1 + $0x380] sm:$0xf0]  ;;  %v5804_v4 = vor.u32 %v4396_v58, %v3985_v0 }
  0x97   : > { %1772 = vmatpush.bf16.msrb.mxu3 %v5732_v53  ;;  %7670 = vst [vmem:[#allocation80_spill] sm:$0xff] %v5766_v56  ;;  %v4246_v16 = vld [vmem:[%s7436_s1 + $0x6c] sm:$0xf]  ;;  %v3385_v51 = vld [vmem:[%s7436_s1 + $0x80] sm:$0xf0]  ;;  %v5802_v1 = vor.u32 %v4300_v20, %v3601_v3  ;;  %v5814_v53 = vor.u32 %v4342_v13, %v3769_v30 }
  0x98   : > { %7671 = vst [vmem:[#allocation81_spill] sm:$0xff] %v5768_v11  ;;  %1716 = vmatpush.bf16.msrb.mxu0 %v5744_v12  ;;  %v4294_v12 = vld [vmem:[%s7436_s1 + $0x1ec] sm:$0xf]  ;;  %v3961_v3 = vld [vmem:[%s7436_s1 + $0x500] sm:$0xf0] }
  0x99   : > { %7672 = vst [vmem:[#allocation82_spill] sm:$0xff] %v5778_v17  ;;  %1735 = vmatpush.bf16.msrb.mxu1 %v5766_v56  ;;  %v5816_v56 = vor.u32 %v4246_v16, %v3385_v51  ;;  %v4390_v20 = vld [vmem:[%s7436_s1 + $0x4ec] sm:$0xf]  ;;  %v4336_v58 = vld [vmem:[%s7436_s1 + $0x33c] sm:$0xf] }
  0x9a   : > { %1754 = vmatpush.bf16.msrb.mxu2 %v5742_v47  ;;  %7673 = vst [vmem:[#allocation83_spill] sm:$0xff] %v5780_v59  ;;  %v3577_v47 = vld [vmem:[%s7436_s1 + $0x200] sm:$0xf0]  ;;  %v3745_v0 = vld [vmem:[%s7436_s1 + $0x350] sm:$0xf0]  ;;  %v5840_v51 = vor.u32 %v4390_v20, %v3961_v3 }
  0x9b   : > { %1773 = vmatpush.bf16.msrb.mxu3 %v5768_v11  ;;  %7674 = vst [vmem:[#allocation84_spill] sm:$0xff] %v5802_v1  ;;  %v4240_v13 = vld [vmem:[%s7436_s1 + $0x3c] sm:$0xf]  ;;  %v3361_v30 = vld [vmem:[%s7436_s1 + $0x50] sm:$0xf0]  ;;  %v5838_v16 = vor.u32 %v4294_v12, %v3577_v47  ;;  %v5853_v47 = vor.u32 %v4336_v58, %v3745_v0  ;;  %1650 = vmatmul.bf16.gmra.mxu0 %v5183_v55 }
  0x9c   : > { %7675 = vst [vmem:[#allocation85_spill] sm:$0xff] %v5804_v4  ;;  %1717 = vmatpush.bf16.msrb.mxu0 %v5780_v59  ;;  %v4288_v59 = vld [vmem:[%s7436_s1 + $0x1bc] sm:$0xf]  ;;  %v5855_v12 = vor.u32 %v4240_v13, %v3361_v30  ;;  %v3937_v20 = vld [vmem:[%s7436_s1 + $0x4d0] sm:$0xf0]  ;;  %1669 = vmatmul.bf16.gmra.mxu1 %v5196_v57 }
  0x9d   : > { %7676 = vst [vmem:[#allocation86_spill] sm:$0xff] %v5814_v53  ;;  %1736 = vmatpush.bf16.msrb.mxu1 %v5802_v1  ;;  %v4384_v11 = vld [vmem:[%s7436_s1 + $0x4bc] sm:$0xf]  ;;  %v4330_v3 = vld [vmem:[%s7436_s1 + $0x30c] sm:$0xf]  ;;  %1688 = vmatmul.bf16.gmra.mxu2 %v5198_v38 }
  0x9e   : > { %1755 = vmatpush.bf16.msrb.mxu2 %v5778_v17  ;;  %7677 = vst [vmem:[#allocation87_spill] sm:$0xff] %v5816_v56  ;;  %v3553_v17 = vld [vmem:[%s7436_s1 + $0x1d0] sm:$0xf0]  ;;  %v4234_v58 = vld [vmem:[%s7436_s1 + $0xc] sm:$0xf]  ;;  %1707 = vmatmul.bf16.gmra.mxu3 %v5207_v29  ;;  %v5892_v25 = vor.u32 %v4384_v11, %v3937_v20 }
  0x9f   : > { %1774 = vmatpush.bf16.msrb.mxu3 %v5804_v4  ;;  %7678 = vst [vmem:[#allocation88_spill] sm:$0xff] %v5838_v16  ;;  %v3721_v4 = vld [vmem:[%s7436_s1 + $0x320] sm:$0xf0]  ;;  %v3895_v13 = vld [vmem:[%s7436_s1 + $0x460] sm:$0xf]  ;;  %v5890_v1 = vor.u32 %v4288_v59, %v3553_v17 }
  0xa0   : > { %7679 = vst [vmem:[#allocation89_spill] sm:$0xff] %v5840_v51  ;;  %1718 = vmatpush.bf16.msrb.mxu0 %v5816_v56  ;;  %v3337_v0 = vld [vmem:[%s7436_s1 + $0x20] sm:$0xf0]  ;;  %v4376_v30 = vld [vmem:[%s7436_s1 + $0x474] sm:$0xf0]  ;;  %v5905_v17 = vor.u32 %v4330_v3, %v3721_v4 }
  0xa1   : > { %7680 = vst [vmem:[#allocation90_spill] sm:$0xff] %v5853_v47  ;;  %v3511_v56 = vld [vmem:[%s7436_s1 + $0x160] sm:$0xf]  ;;  %1737 = vmatpush.bf16.msrb.mxu1 %v5838_v16  ;;  %v4282_v48 = vld [vmem:[%s7436_s1 + $0x18c] sm:$0xf]  ;;  %v5907_v59 = vor.u32 %v4234_v58, %v3337_v0  ;;  %v5918_v16 = vor.u32 %v4376_v30, %v3895_v13 }
  0xa2   : > { %1756 = vmatpush.bf16.msrb.mxu2 %v5814_v53  ;;  %7681 = vst [vmem:[#allocation91_spill] sm:$0xff] %v5855_v12  ;;  %v4280_v53 = vld [vmem:[%s7436_s1 + $0x174] sm:$0xf0]  ;;  %v3529_v31 = vld [vmem:[%s7436_s1 + $0x1a0] sm:$0xf0] }
  0xa3   : > { %1775 = vmatpush.bf16.msrb.mxu3 %v5840_v51  ;;  %7682 = vst [vmem:[#allocation92_spill] sm:$0xff] %v5890_v1  ;;  %v4378_v5 = vld [vmem:[%s7436_s1 + $0x48c] sm:$0xf]  ;;  %v3913_v11 = vld [vmem:[%s7436_s1 + $0x4a0] sm:$0xf0]  ;;  %v5942_v13 = vor.u32 %v4282_v48, %v3529_v31 }
  0xa4   : > { %7683 = vst [vmem:[#allocation93_spill] sm:$0xff] %v5892_v25  ;;  %1719 = vmatpush.bf16.msrb.mxu0 %v5855_v12  ;;  %v3703_v20 = vld [vmem:[%s7436_s1 + $0x2e0] sm:$0xf]  ;;  %v4328_v51 = vld [vmem:[%s7436_s1 + $0x2f4] sm:$0xf0]  ;;  %v5944_v30 = vor.u32 %v4378_v5, %v3913_v11 }
  0xa5   : > { %7684 = vst [vmem:[#allocation94_spill] sm:$0xff] %v5905_v17  ;;  %v4087_v4 = vld [vmem:[%s7436_s1 + $0x5e0] sm:$0xf]  ;;  %v4424_v3 = vld [vmem:[%s7436_s1 + $0x5f4] sm:$0xf0]  ;;  %1738 = vmatpush.bf16.msrb.mxu1 %v5890_v1  ;;  %v5948_v12 = vor.u32 %v4328_v51, %v3703_v20 }
  0xa6   : > { %1757 = vmatpush.bf16.msrb.mxu2 %v5853_v47  ;;  %7685 = vst [vmem:[#allocation95_spill] sm:$0xff] %v5907_v59  ;;  %v5920_v47 = vor.u32 %v4280_v53, %v3511_v56  ;;  %v3871_v58 = vld [vmem:[%s7436_s1 + $0x430] sm:$0xf]  ;;  %v4370_v0 = vld [vmem:[%s7436_s1 + $0x444] sm:$0xf0]  ;;  %v5950_v39 = vor.u32 %v4424_v3, %v4087_v4 }
  0xa7   : > { %7686 = vst [vmem:[#allocation96_spill] sm:$0xff] %v5918_v16  ;;  %v3487_v53 = vld [vmem:[%s7436_s1 + $0x130] sm:$0xf]  ;;  %v4274_v56 = vld [vmem:[%s7436_s1 + $0x144] sm:$0xf0]  ;;  %1776 = vmatpush.bf16.msrb.mxu3 %v5892_v25  ;;  %v5957_v48 = vor.u32 %v4370_v0, %v3871_v58 }
  0xa8   : > { %7687 = vst [vmem:[#allocation97_spill] sm:$0xff] %v5920_v47  ;;  %1720 = vmatpush.bf16.msrb.mxu0 %v5907_v59  ;;  %v3679_v43 = vld [vmem:[%s7436_s1 + $0x2b0] sm:$0xf]  ;;  %v5959_v31 = vor.u32 %v4274_v56, %v3487_v53  ;;  %v4322_v5 = vld [vmem:[%s7436_s1 + $0x2c4] sm:$0xf0] }
  0xa9   : > { %7688 = vst [vmem:[#allocation98_spill] sm:$0xff] %v5942_v13  ;;  %v4063_v51 = vld [vmem:[%s7436_s1 + $0x5b0] sm:$0xf]  ;;  %v4418_v11 = vld [vmem:[%s7436_s1 + $0x5c4] sm:$0xf0]  ;;  %1739 = vmatpush.bf16.msrb.mxu1 %v5942_v13  ;;  %v5980_v3 = vor.u32 %v4322_v5, %v3679_v43 }
  0xaa   : > { %7689 = vst [vmem:[#allocation99_spill] sm:$0xff] %v5944_v30  ;;  %1758 = vmatpush.bf16.msrb.mxu2 %v5905_v17  ;;  %v3847_v20 = vld [vmem:[%s7436_s1 + $0x400] sm:$0xf]  ;;  %v4364_v4 = vld [vmem:[%s7436_s1 + $0x414] sm:$0xf0]  ;;  %v5982_v58 = vor.u32 %v4418_v11, %v4063_v51 }
  0xab   : > { %7690 = vst [vmem:[#allocation100_spill] sm:$0xff] %v5948_v12  ;;  %1777 = vmatpush.bf16.msrb.mxu3 %v5944_v30  ;;  %v3463_v0 = vld [vmem:[%s7436_s1 + $0x100] sm:$0xf]  ;;  %v4268_v53 = vld [vmem:[%s7436_s1 + $0x114] sm:$0xf0]  ;;  %v6004_v11 = vor.u32 %v4364_v4, %v3847_v20  ;;  %1721 = vmatmul.bf16.vlgmr.msrb.gmra.mxu0 %v5017_v22 }
  0xac   : > { %7691 = vst [vmem:[#allocation101_spill] sm:$0xff] %v5950_v39  ;;  %1789 = vmatpush.bf16.msra.mxu0 %v5920_v47  ;;  %v3655_v56 = vld [vmem:[%s7436_s1 + $0x280] sm:$0xf]  ;;  %v4316_v43 = vld [vmem:[%s7436_s1 + $0x294] sm:$0xf0]  ;;  %1740 = vmatmul.bf16.vlgmr.msrb.gmra.mxu1 %v5031_v35 }
  0xad   : > { %7692 = vst [vmem:[#allocation102_spill] sm:$0xff] %v5957_v48  ;;  %1808 = vmatpush.bf16.msra.mxu1 %v5948_v12  ;;  %v4039_v5 = vld [vmem:[%s7436_s1 + $0x580] sm:$0xf]  ;;  %v4412_v51 = vld [vmem:[%s7436_s1 + $0x594] sm:$0xf0]  ;;  %v6016_v12 = vor.u32 %v4316_v43, %v3655_v56  ;;  %1759 = vmatmul.bf16.vlgmr.msrb.gmra.mxu2 %v5033_v36 }
  0xae   : > { %1827 = vmatpush.bf16.msra.mxu2 %v5918_v16  ;;  %7693 = vst [vmem:[#allocation103_spill] sm:$0xff] %v5959_v31  ;;  %v6018_v47 = vor.u32 %v4412_v51, %v4039_v5  ;;  %v3439_v20 = vld [vmem:[%s7436_s1 + $0xd0] sm:$0xf]  ;;  %v4262_v4 = vld [vmem:[%s7436_s1 + $0xe4] sm:$0xf0]  ;;  %1778 = vmatmul.bf16.vlgmr.msrb.gmra.mxu3 %v5043_v42 }
  0xaf   : > { %1846 = vmatpush.bf16.msra.mxu3 %v5950_v39  ;;  %7694 = vst [vmem:[#allocation104_spill] sm:$0xff] %v5980_v3  ;;  %v6006_v39 = vor.u32 %v4268_v53, %v3463_v0  ;;  %v3631_v0 = vld [vmem:[%s7436_s1 + $0x250] sm:$0xf]  ;;  %v4310_v53 = vld [vmem:[%s7436_s1 + $0x264] sm:$0xf0]  ;;  %v6046_v51 = vor.u32 %v4262_v4, %v3439_v20 }
  0xb0   : > { %7695 = vst [vmem:[#allocation105_spill] sm:$0xff] %v5982_v58  ;;  %1790 = vmatpush.bf16.msra.mxu0 %v5959_v31  ;;  %v3823_v31 = vld [vmem:[%s7436_s1 + $0x3d0] sm:$0xf]  ;;  %v4406_v43 = vld [vmem:[%s7436_s1 + $0x564] sm:$0xf0]  ;;  %v6056_v16 = vor.u32 %v4310_v53, %v3631_v0 }
  0xb1   : > { %7696 = vst [vmem:[#allocation106_spill] sm:$0xff] %v6004_v11  ;;  %1809 = vmatpush.bf16.msra.mxu1 %v5980_v3  ;;  %v4015_v56 = vld [vmem:[%s7436_s1 + $0x550] sm:$0xf]  ;;  %v4352_v3 = vld [vmem:[%s7436_s1 + $0x3b4] sm:$0xf0] }
  0xb2   : > { %1828 = vmatpush.bf16.msra.mxu2 %v5957_v48  ;;  %7697 = vst [vmem:[#allocation107_spill] sm:$0xff] %v6006_v39  ;;  %v4358_v48 = vld [vmem:[%s7436_s1 + $0x3e4] sm:$0xf0]  ;;  %v3607_v20 = vld [vmem:[%s7436_s1 + $0x220] sm:$0xf] }
  0xb3   : > { %1847 = vmatpush.bf16.msra.mxu3 %v5982_v58  ;;  %7698 = vst [vmem:[#allocation108_spill] sm:$0xff] %v6016_v12  ;;  %v6044_v5 = vor.u32 %v4358_v48, %v3823_v31  ;;  %v3799_v58 = vld [vmem:[%s7436_s1 + $0x3a0] sm:$0xf]  ;;  %v4256_v31 = vld [vmem:[%s7436_s1 + $0xb4] sm:$0xf0] }
  0xb4   : > { %7699 = vst [vmem:[#allocation109_spill] sm:$0xff] %v6018_v47  ;;  %1791 = vmatpush.bf16.msra.mxu0 %v6006_v39  ;;  %v3415_v48 = vld [vmem:[%s7436_s1 + $0xa0] sm:$0xf]  ;;  %v4304_v4 = vld [vmem:[%s7436_s1 + $0x234] sm:$0xf0] }
  0xb5   : > { %7700 = vst [vmem:[#allocation110_spill] sm:$0xff] %v6044_v5  ;;  %1810 = vmatpush.bf16.msra.mxu1 %v6016_v12  ;;  %v3991_v0 = vld [vmem:[%s7436_s1 + $0x520] sm:$0xf]  ;;  %v4400_v53 = vld [vmem:[%s7436_s1 + $0x534] sm:$0xf0]  ;;  %v6092_v39 = vor.u32 %v4304_v4, %v3607_v20 }
  0xb6   : > { %1829 = vmatpush.bf16.msra.mxu2 %v6004_v11  ;;  %7701 = vst [vmem:[#allocation111_spill] sm:$0xff] %v6046_v51  ;;  %v6058_v11 = vor.u32 %v4406_v43, %v4015_v56  ;;  %v6080_v56 = vor.u32 %v4352_v3, %v3799_v58  ;;  %v6082_v43 = vor.u32 %v4256_v31, %v3415_v48  ;;  %v4346_v12 = vld [vmem:[%s7436_s1 + $0x384] sm:$0xf0]  ;;  %v3391_v3 = vld [vmem:[%s7436_s1 + $0x70] sm:$0xf] }
  0xb7   : > { %1848 = vmatpush.bf16.msra.mxu3 %v6018_v47  ;;  %7702 = vst [vmem:[#allocation112_spill] sm:$0xff] %v6056_v16  ;;  %v3775_v47 = vld [vmem:[%s7436_s1 + $0x370] sm:$0xf]  ;;  %v4250_v58 = vld [vmem:[%s7436_s1 + $0x84] sm:$0xf0] }
  0xb8   : > { %7703 = vst [vmem:[#allocation113_spill] sm:$0xff] %v6058_v11  ;;  %1792 = vmatpush.bf16.msra.mxu0 %v6046_v51  ;;  %v3583_v48 = vld [vmem:[%s7436_s1 + $0x1f0] sm:$0xf]  ;;  %v4298_v31 = vld [vmem:[%s7436_s1 + $0x204] sm:$0xf0] }
  0xb9   : > { %7704 = vst [vmem:[#allocation114_spill] sm:$0xff] %v6080_v56  ;;  %1811 = vmatpush.bf16.msra.mxu1 %v6056_v16  ;;  %v3967_v20 = vld [vmem:[%s7436_s1 + $0x4f0] sm:$0xf]  ;;  %v4394_v4 = vld [vmem:[%s7436_s1 + $0x504] sm:$0xf0]  ;;  %v6128_v51 = vor.u32 %v4298_v31, %v3583_v48 }
  0xba   : > { %1830 = vmatpush.bf16.msra.mxu2 %v6044_v5  ;;  %7705 = vst [vmem:[#allocation115_spill] sm:$0xff] %v6082_v43  ;;  %v6094_v5 = vor.u32 %v4400_v53, %v3991_v0  ;;  %v6116_v0 = vor.u32 %v4346_v12, %v3775_v47  ;;  %v6118_v53 = vor.u32 %v4250_v58, %v3391_v3  ;;  %v4340_v16 = vld [vmem:[%s7436_s1 + $0x354] sm:$0xf0]  ;;  %v3367_v47 = vld [vmem:[%s7436_s1 + $0x40] sm:$0xf] }
  0xbb   : > { %1849 = vmatpush.bf16.msra.mxu3 %v6058_v11  ;;  %7706 = vst [vmem:[#allocation116_spill] sm:$0xff] %v6092_v39  ;;  %v3751_v11 = vld [vmem:[%s7436_s1 + $0x340] sm:$0xf]  ;;  %v4244_v12 = vld [vmem:[%s7436_s1 + $0x54] sm:$0xf0]  ;;  %1726 = vmatmul.bf16.gmra.mxu0 %v5183_v55 }
  0xbc   : > { %7707 = vst [vmem:[#allocation117_spill] sm:$0xff] %v6094_v5  ;;  %1793 = vmatpush.bf16.msra.mxu0 %v6082_v43  ;;  %v3559_v3 = vld [vmem:[%s7436_s1 + $0x1c0] sm:$0xf]  ;;  %v4292_v58 = vld [vmem:[%s7436_s1 + $0x1d4] sm:$0xf0]  ;;  %1745 = vmatmul.bf16.gmra.mxu1 %v5196_v57 }
  0xbd   : > { %7708 = vst [vmem:[#allocation118_spill] sm:$0xff] %v6116_v0  ;;  %1812 = vmatpush.bf16.msra.mxu1 %v6092_v39  ;;  %v3943_v48 = vld [vmem:[%s7436_s1 + $0x4c0] sm:$0xf]  ;;  %v4388_v31 = vld [vmem:[%s7436_s1 + $0x4d4] sm:$0xf0]  ;;  %1764 = vmatmul.bf16.gmra.mxu2 %v5198_v38 }
  0xbe   : > { %1831 = vmatpush.bf16.msra.mxu2 %v6080_v56  ;;  %7709 = vst [vmem:[#allocation119_spill] sm:$0xff] %v6118_v53  ;;  %v6130_v56 = vor.u32 %v4394_v4, %v3967_v20  ;;  %v3727_v20 = vld [vmem:[%s7436_s1 + $0x310] sm:$0xf]  ;;  %v6155_v4 = vor.u32 %v4340_v16, %v3751_v11  ;;  %v4334_v39 = vld [vmem:[%s7436_s1 + $0x324] sm:$0xf0]  ;;  %v6170_v16 = vor.u32 %v4292_v58, %v3559_v3 }
  0xbf   : > { %1850 = vmatpush.bf16.msra.mxu3 %v6094_v5  ;;  %7710 = vst [vmem:[#allocation120_spill] sm:$0xff] %v6128_v51  ;;  %v6157_v5 = vor.u32 %v4244_v12, %v3367_v47  ;;  %v3343_v43 = vld [vmem:[%s7436_s1 + $0x10] sm:$0xf]  ;;  %v4238_v30 = vld [vmem:[%s7436_s1 + $0x24] sm:$0xf0]  ;;  %v6172_v11 = vor.u32 %v4388_v31, %v3943_v48 }
  0xc0   : > { %7711 = vst [vmem:[#allocation121_spill] sm:$0xff] %v6130_v56  ;;  %1794 = vmatpush.bf16.msra.mxu0 %v6118_v53  ;;  %v3535_v47 = vld [vmem:[%s7436_s1 + $0x190] sm:$0xf]  ;;  %v4286_v12 = vld [vmem:[%s7436_s1 + $0x1a4] sm:$0xf0]  ;;  %1783 = vmatmul.bf16.gmra.mxu3 %v5207_v29  ;;  %v6209_v13 = vor.u32 %v4238_v30, %v3343_v43 }
  0xc1   : > { %7712 = vst [vmem:[#allocation122_spill] sm:$0xff] %v6155_v4  ;;  %1813 = vmatpush.bf16.msra.mxu1 %v6128_v51  ;;  %v3919_v53 = vld [vmem:[%s7436_s1 + $0x490] sm:$0xf]  ;;  %v4382_v3 = vld [vmem:[%s7436_s1 + $0x4a4] sm:$0xf0] }
  0xc2   : > { %1832 = vmatpush.bf16.msra.mxu2 %v6116_v0  ;;  %7713 = vst [vmem:[#allocation123_spill] sm:$0xff] %v6157_v5  ;;  %v4373_v58 = vld [vmem:[%s7436_s1 + $0x464] sm:$0xf]  ;;  %v3897_v48 = vld [vmem:[%s7436_s1 + $0x478] sm:$0xf0]  ;;  %v6207_v0 = vor.u32 %v4334_v39, %v3727_v20  ;;  %v6222_v39 = vor.u32 %v4286_v12, %v3535_v47  ;;  %v6224_v30 = vor.u32 %v4382_v3, %v3919_v53 }
  0xc3   : > { %1851 = vmatpush.bf16.msra.mxu3 %v6130_v56  ;;  %7714 = vst [vmem:[#allocation124_spill] sm:$0xff] %v6170_v16  ;;  %v4277_v31 = vld [vmem:[%s7436_s1 + $0x164] sm:$0xf]  ;;  %v3513_v56 = vld [vmem:[%s7436_s1 + $0x178] sm:$0xf0]  ;;  %v6226_v43 = vor.u32 %v4373_v58, %v3897_v48 }
  0xc4   : > { %7715 = vst [vmem:[#allocation125_spill] sm:$0xff] %v6172_v11  ;;  %v4325_v51 = vld [vmem:[%s7436_s1 + $0x2e4] sm:$0xf]  ;;  %1795 = vmatpush.bf16.msra.mxu0 %v6157_v5  ;;  %v3705_v59 = vld [vmem:[%s7436_s1 + $0x2f8] sm:$0xf0]  ;;  %v6228_v20 = vor.u32 %v4277_v31, %v3513_v56 }
  0xc5   : > { %7716 = vst [vmem:[#allocation126_spill] sm:$0xff] %v6207_v0  ;;  %v4421_v17 = vld [vmem:[%s7436_s1 + $0x5e4] sm:$0xf]  ;;  %v4089_v25 = vld [vmem:[%s7436_s1 + $0x5f8] sm:$0xf0]  ;;  %1814 = vmatpush.bf16.msra.mxu1 %v6170_v16  ;;  %v6236_v1 = vor.u32 %v4325_v51, %v3705_v59 }
  0xc6   : > { %1833 = vmatpush.bf16.msra.mxu2 %v6155_v4  ;;  %7717 = vst [vmem:[#allocation127_spill] sm:$0xff] %v6209_v13  ;;  %v4367_v5 = vld [vmem:[%s7436_s1 + $0x434] sm:$0xf]  ;;  %v3873_v4 = vld [vmem:[%s7436_s1 + $0x448] sm:$0xf0]  ;;  %v6238_v16 = vor.u32 %v4421_v17, %v4089_v25 }
  0xc7   : > { %1852 = vmatpush.bf16.msra.mxu3 %v6172_v11  ;;  %7718 = vst [vmem:[#allocation128_spill] sm:$0xff] %v6222_v39  ;;  %v4271_v53 = vld [vmem:[%s7436_s1 + $0x134] sm:$0xf]  ;;  %v3489_v56 = vld [vmem:[%s7436_s1 + $0x148] sm:$0xf0]  ;;  %v6264_v51 = vor.u32 %v4367_v5, %v3873_v4 }
  0xc8   : > { %7719 = vst [vmem:[#allocation129_spill] sm:$0xff] %v6224_v30  ;;  %v4319_v47 = vld [vmem:[%s7436_s1 + $0x2b4] sm:$0xf]  ;;  %1796 = vmatpush.bf16.msra.mxu0 %v6209_v13  ;;  %v3681_v25 = vld [vmem:[%s7436_s1 + $0x2c8] sm:$0xf0]  ;;  %v6266_v12 = vor.u32 %v4271_v53, %v3489_v56  ;;  %v1494_v56 = vpop.f32.mrf.mxu0 }
  0xc9   : > { %7720 = vst [vmem:[#allocation130_spill] sm:$0xff] %v6226_v43  ;;  %v4415_v17 = vld [vmem:[%s7436_s1 + $0x5b4] sm:$0xf]  ;;  %v4065_v59 = vld [vmem:[%s7436_s1 + $0x5c8] sm:$0xf0]  ;;  %1815 = vmatpush.bf16.msra.mxu1 %v6222_v39  ;;  %v6270_v3 = vor.u32 %v4319_v47, %v3681_v25 }
  0xca   : > { %7721 = vst [vmem:[#allocation131_spill] sm:$0xff] %v6228_v20  ;;  %1834 = vmatpush.bf16.msra.mxu2 %v6207_v0  ;;  %v6272_v58 = vor.u32 %v4415_v17, %v4065_v59  ;;  %v4361_v48 = vld [vmem:[%s7436_s1 + $0x404] sm:$0xf]  ;;  %v3849_v31 = vld [vmem:[%s7436_s1 + $0x418] sm:$0xf0]  ;;  %v1513_v59 = vpop.f32.mrf.mxu1 }
  0xcb   : > { %7722 = vst [vmem:[#allocation132_spill] sm:$0xff] %v6236_v1  ;;  %1853 = vmatpush.bf16.msra.mxu3 %v6224_v30  ;;  %v4265_v5 = vld [vmem:[%s7436_s1 + $0x104] sm:$0xf]  ;;  %v3465_v4 = vld [vmem:[%s7436_s1 + $0x118] sm:$0xf0]  ;;  %1797 = vmatmul.bf16.vlgmr.msra.gmra.mxu0 %v5017_v22 }
  0xcc   : > { %7723 = vst [vmem:[#allocation133_spill] sm:$0xff] %v6238_v16  ;;  %1865 = vmatpush.bf16.msrb.mxu0 %v6228_v20  ;;  %v4313_v53 = vld [vmem:[%s7436_s1 + $0x284] sm:$0xf]  ;;  %v3657_v47 = vld [vmem:[%s7436_s1 + $0x298] sm:$0xf0]  ;;  %1816 = vmatmul.bf16.vlgmr.msra.gmra.mxu1 %v5031_v35 }
  0xcd   : > { %7724 = vst [vmem:[#allocation134_spill] sm:$0xff] %v6264_v51  ;;  %1884 = vmatpush.bf16.msrb.mxu1 %v6236_v1  ;;  %v4409_v25 = vld [vmem:[%s7436_s1 + $0x584] sm:$0xf]  ;;  %v4041_v17 = vld [vmem:[%s7436_s1 + $0x598] sm:$0xf0]  ;;  %1835 = vmatmul.bf16.vlgmr.msra.gmra.mxu2 %v5033_v36 }
  0xce   : > { %1903 = vmatpush.bf16.msrb.mxu2 %v6226_v43  ;;  %7725 = vst [vmem:[#allocation135_spill] sm:$0xff] %v6266_v12  ;;  %v4355_v1 = vld [vmem:[%s7436_s1 + $0x3d4] sm:$0xf]  ;;  %v3825_v20 = vld [vmem:[%s7436_s1 + $0x3e8] sm:$0xf0]  ;;  %v6312_v43 = vor.u32 %v4313_v53, %v3657_v47  ;;  %v6314_v30 = vor.u32 %v4409_v25, %v4041_v17 }
  0xcf   : > { %1922 = vmatpush.bf16.msrb.mxu3 %v6238_v16  ;;  %7726 = vst [vmem:[#allocation136_spill] sm:$0xff] %v6270_v3  ;;  %v6302_v16 = vor.u32 %v4361_v48, %v3849_v31  ;;  %v3441_v48 = vld [vmem:[%s7436_s1 + $0xe8] sm:$0xf0]  ;;  %v4307_v31 = vld [vmem:[%s7436_s1 + $0x254] sm:$0xf]  ;;  %v6340_v47 = vor.u32 %v4355_v1, %v3825_v20 }
  0xd0   : > { %7727 = vst [vmem:[#allocation137_spill] sm:$0xff] %v6272_v58  ;;  %1866 = vmatpush.bf16.msrb.mxu0 %v6266_v12  ;;  %v6304_v12 = vor.u32 %v4265_v5, %v3465_v4  ;;  %v3633_v5 = vld [vmem:[%s7436_s1 + $0x268] sm:$0xf0]  ;;  %v4403_v4 = vld [vmem:[%s7436_s1 + $0x554] sm:$0xf]  ;;  %1854 = vmatmul.bf16.vlgmr.msra.gmra.mxu3 %v5043_v42 }
  0xd1   : > { %1885 = vmatpush.bf16.msrb.mxu1 %v6270_v3  ;;  %7728 = vst [vmem:[#allocation138_spill] sm:$0xff] %v6302_v16  ;;  %v4017_v53 = vld [vmem:[%s7436_s1 + $0x568] sm:$0xf0]  ;;  %v4349_v17 = vld [vmem:[%s7436_s1 + $0x3a4] sm:$0xf]  ;;  %v1496_v3 = vpop.f32.mrf.mxu0 }
  0xd2   : > { %1904 = vmatpush.bf16.msrb.mxu2 %v6264_v51  ;;  %v1514_v51 = vadd.f32 %v1513_v59, %v1494_v56  ;;  %7729 = vst [vmem:[#allocation139_spill] sm:$0xff] %v6304_v12  ;;  %v4259_v56 = vld [vmem:[%s7436_s1 + $0xd4] sm:$0xf]  ;;  %v3801_v59 = vld [vmem:[%s7436_s1 + $0x3b8] sm:$0xf0] }
  0xd3   : > { %1923 = vmatpush.bf16.msrb.mxu3 %v6272_v58  ;;  %7730 = vst [vmem:[#allocation140_spill] sm:$0xff] %v6312_v43  ;;  %v6342_v25 = vor.u32 %v4259_v56, %v3441_v48  ;;  %v1532_v58 = vpop.f32.mrf.mxu2  ;;  %v4253_v1 = vld [vmem:[%s7436_s1 + $0xa4] sm:$0xf]  ;;  %v3417_v20 = vld [vmem:[%s7436_s1 + $0xb8] sm:$0xf0] }
  0xd4   : > { %7731 = vst [vmem:[#allocation141_spill] sm:$0xff] %v6314_v30  ;;  %1867 = vmatpush.bf16.msrb.mxu0 %v6304_v12  ;;  %v6354_v12 = vor.u32 %v4403_v4, %v4017_v53  ;;  %v4301_v56 = vld [vmem:[%s7436_s1 + $0x224] sm:$0xf]  ;;  %v1533_v48 = vadd.f32 %v1532_v58, %v1514_v51  ;;  %v3993_v4 = vld [vmem:[%s7436_s1 + $0x538] sm:$0xf0]  ;;  %v1515_v53 = vpop.f32.mrf.mxu1  ;;  %v6380_v58 = vor.u32 %v4253_v1, %v3417_v20 }
  0xd5   : > { %7732 = vst [vmem:[#allocation142_spill] sm:$0xff] %v6340_v47  ;;  %1886 = vmatpush.bf16.msrb.mxu1 %v6312_v43  ;;  %v1551_v43 = vpop.f32.mrf.mxu3  ;;  %v1516_v51 = vadd.f32 %v1515_v53, %v1496_v3  ;;  %v4343_v13 = vld [vmem:[%s7436_s1 + $0x374] sm:$0xf]  ;;  %v3777_v0 = vld [vmem:[%s7436_s1 + $0x388] sm:$0xf0] }
  0xd6   : > { %1905 = vmatpush.bf16.msrb.mxu2 %v6302_v16  ;;  %7733 = vst [vmem:[#allocation143_spill] sm:$0xff] %v6342_v25  ;;  %v6352_v16 = vor.u32 %v4307_v31, %v3633_v5  ;;  %v3609_v31 = vld [vmem:[%s7436_s1 + $0x238] sm:$0xf0]  ;;  %v4397_v5 = vld [vmem:[%s7436_s1 + $0x524] sm:$0xf]  ;;  %v6376_v39 = vadd.f32 %v1551_v43, %v1533_v48 }
  0xd7   : > { %1924 = vmatpush.bf16.msrb.mxu3 %v6314_v30  ;;  %7735 = vst [vmem:[#allocation145_spill] sm:$0xff] %v6354_v12  ;;  %v6374_v30 = vor.u32 %v4349_v17, %v3801_v59  ;;  %v6390_v43 = vor.u32 %v4301_v56, %v3609_v31  ;;  %v6392_v3 = vor.u32 %v4397_v5, %v3993_v4  ;;  %v4247_v17 = vld [vmem:[%s7436_s1 + $0x74] sm:$0xf]  ;;  %v3393_v59 = vld [vmem:[%s7436_s1 + $0x88] sm:$0xf0] }
  0xd8   : > { %7734 = vst [vmem:[#allocation144_spill] sm:$0xff] %v6352_v16  ;;  %1868 = vmatpush.bf16.msrb.mxu0 %v6342_v25  ;;  %v4295_v1 = vld [vmem:[%s7436_s1 + $0x1f4] sm:$0xf]  ;;  %v3585_v20 = vld [vmem:[%s7436_s1 + $0x208] sm:$0xf0]  ;;  %v6414_v31 = vor.u32 %v4343_v13, %v3777_v0  ;;  %v6416_v5 = vor.u32 %v4247_v17, %v3393_v59 }
  0xd9   : > { %7736 = vst [vmem:[#allocation146_spill] sm:$0xff] %v6374_v30  ;;  %1887 = vmatpush.bf16.msrb.mxu1 %v6352_v16  ;;  %v4391_v56 = vld [vmem:[%s7436_s1 + $0x4f4] sm:$0xf]  ;;  %v3969_v48 = vld [vmem:[%s7436_s1 + $0x508] sm:$0xf0]  ;;  %v1499_v16 = vpop.f32.mrf.mxu0 }
  0xda   : > { %1906 = vmatpush.bf16.msrb.mxu2 %v6340_v47  ;;  %7737 = vst [vmem:[#allocation147_spill] sm:$0xff] %v6380_v58  ;;  %v4337_v4 = vld [vmem:[%s7436_s1 + $0x344] sm:$0xf]  ;;  %v3753_v53 = vld [vmem:[%s7436_s1 + $0x358] sm:$0xf0] }
  0xdb   : > { %1925 = vmatpush.bf16.msrb.mxu3 %v6354_v12  ;;  %7738 = vst [vmem:[#allocation148_spill] sm:$0xff] %v6390_v43  ;;  %v1534_v12 = vpop.f32.mrf.mxu2  ;;  %v4241_v13 = vld [vmem:[%s7436_s1 + $0x44] sm:$0xf]  ;;  %v3369_v0 = vld [vmem:[%s7436_s1 + $0x58] sm:$0xf0]  ;;  %1802 = vmatmul.bf16.gmra.mxu0 %v5183_v55 }
  0xdc   : > { %7739 = vst [vmem:[#allocation149_spill] sm:$0xff] %v6392_v3  ;;  %1869 = vmatpush.bf16.msrb.mxu0 %v6380_v58  ;;  %v6428_v58 = vor.u32 %v4391_v56, %v3969_v48  ;;  %v4289_v17 = vld [vmem:[%s7436_s1 + $0x1c4] sm:$0xf]  ;;  %v1535_v59 = vadd.f32 %v1534_v12, %v1516_v51  ;;  %v3945_v56 = vld [vmem:[%s7436_s1 + $0x4d8] sm:$0xf0]  ;;  %v1518_v48 = vpop.f32.mrf.mxu1  ;;  %v6454_v51 = vor.u32 %v4241_v13, %v3369_v0 }
  0xdd   : > { %7740 = vst [vmem:[#allocation150_spill] sm:$0xff] %v6414_v31  ;;  %1888 = vmatpush.bf16.msrb.mxu1 %v6390_v43  ;;  %v1553_v43 = vpop.f32.mrf.mxu3  ;;  %v1519_v12 = vadd.f32 %v1518_v48, %v1499_v16  ;;  %v4331_v47 = vld [vmem:[%s7436_s1 + $0x314] sm:$0xf]  ;;  %v3729_v11 = vld [vmem:[%s7436_s1 + $0x328] sm:$0xf0]  ;;  %1840 = vmatmul.bf16.gmra.mxu2 %v5198_v38 }
  0xde   : > { %1907 = vmatpush.bf16.msrb.mxu2 %v6374_v30  ;;  %7741 = vst [vmem:[#allocation151_spill] sm:$0xff] %v6416_v5  ;;  %v6426_v30 = vor.u32 %v4295_v1, %v3585_v20  ;;  %v3561_v1 = vld [vmem:[%s7436_s1 + $0x1d8] sm:$0xf0]  ;;  %v4385_v20 = vld [vmem:[%s7436_s1 + $0x4c4] sm:$0xf]  ;;  %v6450_v25 = vadd.f32 %v1553_v43, %v1535_v59  ;;  %1821 = vmatmul.bf16.gmra.mxu1 %v5196_v57 }
  0xdf   : > { %1926 = vmatpush.bf16.msrb.mxu3 %v6392_v3  ;;  %7743 = vst [vmem:[#allocation153_spill] sm:$0xff] %v6428_v58  ;;  %v6448_v3 = vor.u32 %v4337_v4, %v3753_v53  ;;  %v6464_v43 = vor.u32 %v4289_v17, %v3561_v1  ;;  %v6466_v16 = vor.u32 %v4385_v20, %v3945_v56  ;;  %v4235_v4 = vld [vmem:[%s7436_s1 + $0x14] sm:$0xf]  ;;  %v3345_v53 = vld [vmem:[%s7436_s1 + $0x28] sm:$0xf0] }
  0xe0   : > { %7742 = vst [vmem:[#allocation152_spill] sm:$0xff] %v6426_v30  ;;  %1870 = vmatpush.bf16.msrb.mxu0 %v6416_v5  ;;  %v4283_v13 = vld [vmem:[%s7436_s1 + $0x194] sm:$0xf]  ;;  %v3537_v0 = vld [vmem:[%s7436_s1 + $0x1a8] sm:$0xf0]  ;;  %1859 = vmatmul.bf16.gmra.mxu3 %v5207_v29  ;;  %v6492_v1 = vor.u32 %v4331_v47, %v3729_v11  ;;  %v6494_v20 = vor.u32 %v4235_v4, %v3345_v53  ;;  %v7752_v53 = vld [vmem:[#allocation7_spill] sm:$0xff] }
  0xe1   : > { %7744 = vst [vmem:[#allocation154_spill] sm:$0xff] %v6448_v3  ;;  %1889 = vmatpush.bf16.msrb.mxu1 %v6426_v30  ;;  %v4379_v17 = vld [vmem:[%s7436_s1 + $0x494] sm:$0xf]  ;;  %v3921_v59 = vld [vmem:[%s7436_s1 + $0x4a8] sm:$0xf0]  ;;  %v6498_v48 = vor.u32 %v4283_v13, %v3537_v0 }
  0xe2   : > { %7745 = vst [vmem:[#allocation155_spill] sm:$0xff] %v6450_v25  ;;  %1908 = vmatpush.bf16.msrb.mxu2 %v6414_v31  ;;  %v1501_v31 = vpop.f32.mrf.mxu0  ;;  %v7753_v13 = vld [vmem:[#allocation9_spill] sm:$0xff] }
  0xe3   : > { %7746 = vst [vmem:[#allocation156_spill] sm:$0xff] %v6454_v51  ;;  %1927 = vmatpush.bf16.msrb.mxu3 %v6428_v58  ;;  %v1537_v56 = vpop.f32.mrf.mxu2  ;;  %v6500_v58 = vor.u32 %v4379_v17, %v3921_v59  ;;  %v7754_v59 = vld [vmem:[#allocation10_spill] sm:$0xff] }
  0xe4   : > { %1871 = vmatpush.bf16.msrb.mxu0 %v6454_v51  ;;  %v1538_v30 = vadd.f32 %v1537_v56, %v1519_v12  ;;  %v1520_v25 = vpop.f32.mrf.mxu1  ;;  %v7755_v56 = vld [vmem:[#allocation12_spill] sm:$0xff] }
  0xe5   : > { %1890 = vmatpush.bf16.msrb.mxu1 %v6464_v43  ;;  %v1556_v5 = vpop.f32.mrf.mxu3  ;;  %v1521_v51 = vadd.f32 %v1520_v25, %v1501_v31 }
  0xe6   : > { %1909 = vmatpush.bf16.msrb.mxu2 %v6448_v3  ;;  %v6502_v3 = vadd.f32 %v1556_v5, %v1538_v30 }
  0xe7   : > { %1928 = vmatpush.bf16.msrb.mxu3 %v6466_v16 }
  0xe8   : > { %1872 = vmatpush.bf16.msrb.mxu0 %v6494_v20 }
  0xe9   : > { %1891 = vmatpush.bf16.msrb.mxu1 %v6498_v48 }
  0xea   : > { %1910 = vmatpush.bf16.msrb.mxu2 %v6492_v1  ;;  %v1570_v25 = vpop.f32.mrf.mxu0 }
  0xeb   : > { %1929 = vmatpush.bf16.msrb.mxu3 %v6500_v58  ;;  %v1539_v11 = vpop.f32.mrf.mxu2  ;;  %1873 = vmatmul.bf16.vlgmr.msrb.gmra.mxu0 %v5017_v22 }
  0xec   : > { %1990 = vmatpush.bf16.msra.mxu0 %v4708_v19  ;;  %v1540_v30 = vadd.f32 %v1539_v11, %v1521_v51  ;;  %v1589_v31 = vpop.f32.mrf.mxu1  ;;  %v7756_v11 = vld [vmem:[#allocation11_spill] sm:$0xff] }
  0xed   : > { %2009 = vmatpush.bf16.msra.mxu1 %v4719_v23  ;;  %v1558_v47 = vpop.f32.mrf.mxu3  ;;  %v1590_v19 = vadd.f32 %v1589_v31, %v1570_v25  ;;  %1911 = vmatmul.bf16.vlgmr.msrb.gmra.mxu2 %v5033_v36  ;;  %v4434_v36 = vld [vmem:[%s4975_s29 + $0x4c] sm:$0xf] }
  0xee   : > { %2028 = vmatpush.bf16.msra.mxu2 %v4721_v24  ;;  %v6516_v24 = vadd.f32 %v1558_v47, %v1540_v30  ;;  %1892 = vmatmul.bf16.vlgmr.msrb.gmra.mxu1 %v5031_v35  ;;  %v7748_v35 = vld [vmem:[#allocation3_spill] sm:$0xff]  ;;  %v7757_v30 = vld [vmem:[#allocation13_spill] sm:$0xff] }
  0xef   : > { %2047 = vmatpush.bf16.msra.mxu3 %v4733_v28 }
  0xf0   : > { %1991 = vmatpush.bf16.msra.mxu0 %v4746_v32  ;;  %1930 = vmatmul.bf16.vlgmr.msrb.gmra.mxu3 %v5043_v42  ;;  %v4113_v42 = vld [vmem:[%s4975_s29 + $0x58] sm:$0xf0] }
  0xf1   : > { %2010 = vmatpush.bf16.msra.mxu1 %v4748_v33  ;;  %v6576_v4 = vor.u32 %v4434_v36, %v4113_v42 }
  0xf2   : > { %2029 = vmatpush.bf16.msra.mxu2 %v4760_v37  ;;  %v1572_v33 = vpop.f32.mrf.mxu0 }
  0xf3   : > { %2048 = vmatpush.bf16.msra.mxu3 %v4771_v41  ;;  %v1608_v23 = vpop.f32.mrf.mxu2 }
  0xf4   : > { %1992 = vmatpush.bf16.msra.mxu0 %v4783_v45  ;;  %v1609_v32 = vadd.f32 %v1608_v23, %v1590_v19  ;;  %v1591_v37 = vpop.f32.mrf.mxu1 }
  0xf5   : > { %2011 = vmatpush.bf16.msra.mxu1 %v4796_v49  ;;  %v1627_v28 = vpop.f32.mrf.mxu3  ;;  %v1592_v41 = vadd.f32 %v1591_v37, %v1572_v33  ;;  %v7759_v33 = vld [vmem:[#allocation16_spill] sm:$0xff] }
  0xf6   : > { %2030 = vmatpush.bf16.msra.mxu2 %v4798_v50  ;;  %v6528_v22 = vadd.f32 %v1627_v28, %v1609_v32  ;;  %v7758_v32 = vld [vmem:[#allocation14_spill] sm:$0xff] }
  0xf7   : > { %2049 = vmatpush.bf16.msra.mxu3 %v4810_v54 }
  0xf8   : > { %1993 = vmatpush.bf16.msra.mxu0 %v4828_v60 }
  0xf9   : > { %2012 = vmatpush.bf16.msra.mxu1 %v4832_v61 }
  0xfa   : > { %2031 = vmatpush.bf16.msra.mxu2 %v4834_v62  ;;  %v1575_v54 = vpop.f32.mrf.mxu0 }
  0xfb   : > { %2050 = vmatpush.bf16.msra.mxu3 %v4846_v2  ;;  %v1610_v45 = vpop.f32.mrf.mxu2  ;;  %1878 = vmatmul.bf16.gmra.mxu0 %v5183_v55 }
  0xfc   : > { %1994 = vmatpush.bf16.msra.mxu0 %v4864_v8  ;;  %v1611_v50 = vadd.f32 %v1610_v45, %v1592_v41  ;;  %v1594_v62 = vpop.f32.mrf.mxu1  ;;  %v7760_v41 = vld [vmem:[#allocation15_spill] sm:$0xff]  ;;  %v7761_v45 = vld [vmem:[#allocation17_spill] sm:$0xff] }
  0xfd   : > { %2013 = vmatpush.bf16.msra.mxu1 %v4868_v9  ;;  %v1629_v49 = vpop.f32.mrf.mxu3  ;;  %v1595_v60 = vadd.f32 %v1594_v62, %v1575_v54  ;;  %1916 = vmatmul.bf16.gmra.mxu2 %v5198_v38  ;;  %v4437_v54 = vld [vmem:[%s4975_s29 + $0x64] sm:$0xf]  ;;  %v4121_v62 = vld [vmem:[%s4975_s29 + $0x70] sm:$0xf0] }
  0xfe   : > { %2032 = vmatpush.bf16.msra.mxu2 %v4870_v10  ;;  %v6538_v61 = vadd.f32 %v1629_v49, %v1611_v50  ;;  %1897 = vmatmul.bf16.gmra.mxu1 %v5196_v57  ;;  %v7750_v57 = vld [vmem:[#allocation6_spill] sm:$0xff]  ;;  %v4119_v49 = vld [vmem:[%s4975_s29 + $0x60] sm:$0xf]  ;;  %v4439_v50 = vld [vmem:[%s4975_s29 + $0x6c] sm:$0xf0] }
  0xff   : > { %2051 = vmatpush.bf16.msra.mxu3 %v4882_v14 }
 0x100   : > { %1995 = vmatpush.bf16.msra.mxu0 %v4900_v21  ;;  %1935 = vmatmul.bf16.gmra.mxu3 %v5207_v29 }
 0x101   : > { %2014 = vmatpush.bf16.msra.mxu1 %v4910_v26 }
 0x102   : > { %2033 = vmatpush.bf16.msra.mxu2 %v4912_v27  ;;  %v1577_v10 = vpop.f32.mrf.mxu0  ;;  %v4103_v27 = vld [vmem:[%s4975_s29 + $0x40] sm:$0xf] }
 0x103   : > { %2052 = vmatpush.bf16.msra.mxu3 %v4924_v34  ;;  %v1613_v2 = vpop.f32.mrf.mxu2  ;;  %v4435_v34 = vld [vmem:[%s4975_s29 + $0x4c] sm:$0xf0] }
 0x104   : > { %1996 = vmatpush.bf16.msra.mxu0 %v4940_v40  ;;  %v1614_v9 = vadd.f32 %v1613_v2, %v1595_v60  ;;  %v1596_v14 = vpop.f32.mrf.mxu1  ;;  %v7747_v40 = vld [vmem:[#allocation4_spill] sm:$0xff]  ;;  %v6568_v55 = vor.u32 %v4435_v34, %v4103_v27  ;;  %v4440_v2 = vld [vmem:[%s4975_s29 + $0x74] sm:$0xf0]  ;;  %v7765_v27 = vld [vmem:[#allocation21_spill] sm:$0xff] }
 0x105   : > { %2015 = vmatpush.bf16.msra.mxu1 %v4950_v44  ;;  %v1632_v8 = vpop.f32.mrf.mxu3  ;;  %v1597_v21 = vadd.f32 %v1596_v14, %v1577_v10  ;;  %v4433_v44 = vld [vmem:[%s4975_s29 + $0x44] sm:$0xf]  ;;  %v4127_v60 = vld [vmem:[%s4975_s29 + $0x68] sm:$0xf]  ;;  %v7762_v10 = vld [vmem:[#allocation18_spill] sm:$0xff] }
 0x106   : > { %2034 = vmatpush.bf16.msra.mxu2 %v4952_v46  ;;  %v6552_v26 = vadd.f32 %v1632_v8, %v1614_v9  ;;  %v4105_v46 = vld [vmem:[%s4975_s29 + $0x50] sm:$0xf0]  ;;  %v4438_v8 = vld [vmem:[%s4975_s29 + $0x6c] sm:$0xf]  ;;  %v4129_v9 = vld [vmem:[%s4975_s29 + $0x78] sm:$0xf0] }
 0x107   : > { %2053 = vmatpush.bf16.msra.mxu3 %v4964_v52  ;;  %v4111_v52 = vld [vmem:[%s4975_s29 + $0x48] sm:$0xf]  ;;  %v6614_v36 = vor.u32 %v4438_v8, %v4129_v9 }
 0x108   : > { %1997 = vmatpush.bf16.msra.mxu0 %v4985_v63  ;;  %v4436_v63 = vld [vmem:[%s4975_s29 + $0x54] sm:$0xf0]  ;;  %v7763_v14 = vld [vmem:[#allocation20_spill] sm:$0xff] }
 0x109   : > { %2016 = vmatpush.bf16.msra.mxu1 %v5000_v6  ;;  %v6574_v51 = vor.u32 %v4436_v63, %v4111_v52  ;;  %v6612_v63 = vor.u32 %v4440_v2, %v4127_v60  ;;  %v7784_v9 = vld [vmem:[#allocation40_spill] sm:$0xff] }
 0x10a   : > { %2035 = vmatpush.bf16.msra.mxu2 %v5002_v7  ;;  %v7749_v7 = vld [vmem:[#allocation5_spill] sm:$0xff]  ;;  %v1646_v5 = vpop.f32.mrf.mxu0 }
 0x10b   : > { %2054 = vmatpush.bf16.msra.mxu3 %v5008_v15  ;;  %v1615_v38 = vpop.f32.mrf.mxu2  ;;  %v6570_v15 = vor.u32 %v4433_v44, %v4105_v46  ;;  %1998 = vmatmul.bf16.vlgmr.msra.gmra.mxu0 %v6568_v55  ;;  %v6608_v44 = vor.u32 %v4439_v50, %v4119_v49  ;;  %v6610_v46 = vor.u32 %v4437_v54, %v4121_v62  ;;  %v7782_v54 = vld [vmem:[#allocation38_spill] sm:$0xff]  ;;  %v7783_v62 = vld [vmem:[#allocation39_spill] sm:$0xff] }
 0x10c   : > { %2066 = vmatpush.bf16.msrb.mxu0 %v7747_v40  ;;  %v1616_v29 = vadd.f32 %v1615_v38, %v1597_v21  ;;  %v1665_v12 = vpop.f32.mrf.mxu1  ;;  %v7764_v21 = vld [vmem:[#allocation19_spill] sm:$0xff]  ;;  %v7766_v38 = vld [vmem:[#allocation22_spill] sm:$0xff] }
 0x10d   : > { %2085 = vmatpush.bf16.msrb.mxu1 %v7748_v35  ;;  %v1634_v6 = vpop.f32.mrf.mxu3  ;;  %v1666_v0 = vadd.f32 %v1665_v12, %v1646_v5  ;;  %2036 = vmatmul.bf16.vlgmr.msra.gmra.mxu2 %v6574_v51  ;;  %v7770_v5 = vld [vmem:[#allocation26_spill] sm:$0xff]  ;;  %v7771_v12 = vld [vmem:[#allocation28_spill] sm:$0xff] }
 0x10e   : > { %2104 = vmatpush.bf16.msrb.mxu2 %v5012_v18  ;;  %v7751_v18 = vld [vmem:[#allocation8_spill] sm:$0xff]  ;;  %v6580_v17 = vadd.f32 %v1634_v6, %v1616_v29  ;;  %2017 = vmatmul.bf16.vlgmr.msra.gmra.mxu1 %v6570_v15  ;;  %v7769_v29 = vld [vmem:[#allocation25_spill] sm:$0xff] }
 0x10f   : > { %2123 = vmatpush.bf16.msrb.mxu3 %v7749_v7  ;;  %v7767_v6 = vld [vmem:[#allocation24_spill] sm:$0xff] }
 0x110   : > { %2067 = vmatpush.bf16.msrb.mxu0 %v7751_v18  ;;  %2055 = vmatmul.bf16.vlgmr.msra.gmra.mxu3 %v6576_v4  ;;  %v7768_v18 = vld [vmem:[#allocation23_spill] sm:$0xff] }
 0x111   : > { %2086 = vmatpush.bf16.msrb.mxu1 %v7752_v53  ;;  %v7772_v53 = vld [vmem:[#allocation27_spill] sm:$0xff] }
 0x112   : > { %2105 = vmatpush.bf16.msrb.mxu2 %v7750_v57  ;;  %v1648_v19 = vpop.f32.mrf.mxu0 }
 0x113   : > { %2124 = vmatpush.bf16.msrb.mxu3 %v7753_v13  ;;  %v1684_v47 = vpop.f32.mrf.mxu2  ;;  %v7773_v13 = vld [vmem:[#allocation29_spill] sm:$0xff] }
 0x114   : > { %2068 = vmatpush.bf16.msrb.mxu0 %v7755_v56  ;;  %v1685_v31 = vadd.f32 %v1684_v47, %v1666_v0  ;;  %v1667_v23 = vpop.f32.mrf.mxu1 }
 0x115   : > { %2087 = vmatpush.bf16.msrb.mxu1 %v7756_v11  ;;  %v1703_v25 = vpop.f32.mrf.mxu3  ;;  %v1668_v28 = vadd.f32 %v1667_v23, %v1648_v19  ;;  %v7776_v23 = vld [vmem:[#allocation31_spill] sm:$0xff] }
 0x116   : > { %2106 = vmatpush.bf16.msrb.mxu2 %v7754_v59  ;;  %v6592_v37 = vadd.f32 %v1703_v25, %v1685_v31  ;;  %v7774_v25 = vld [vmem:[#allocation30_spill] sm:$0xff] }
 0x117   : > { %2125 = vmatpush.bf16.msrb.mxu3 %v7757_v30  ;;  %v7775_v31 = vld [vmem:[#allocation34_spill] sm:$0xff] }
 0x118   : > { %2069 = vmatpush.bf16.msrb.mxu0 %v7759_v33  ;;  %v7779_v33 = vld [vmem:[#allocation36_spill] sm:$0xff] }
 0x119   : > { %2088 = vmatpush.bf16.msrb.mxu1 %v7760_v41  ;;  %v7780_v41 = vld [vmem:[#allocation33_spill] sm:$0xff] }
 0x11a   : > { %2107 = vmatpush.bf16.msrb.mxu2 %v7758_v32  ;;  %v1651_v35 = vpop.f32.mrf.mxu0  ;;  %v7778_v32 = vld [vmem:[#allocation32_spill] sm:$0xff] }
 0x11b   : > { %2126 = vmatpush.bf16.msrb.mxu3 %v7761_v45  ;;  %v1686_v34 = vpop.f32.mrf.mxu2  ;;  %2003 = vmatmul.bf16.gmra.mxu0 %v6608_v44  ;;  %v7781_v45 = vld [vmem:[#allocation37_spill] sm:$0xff] }
 0x11c   : > { %2070 = vmatpush.bf16.msrb.mxu0 %v7763_v14  ;;  %v1687_v52 = vadd.f32 %v1686_v34, %v1668_v28  ;;  %v1670_v7 = vpop.f32.mrf.mxu1  ;;  %v7777_v28 = vld [vmem:[#allocation35_spill] sm:$0xff] }
 0x11d   : > { %2089 = vmatpush.bf16.msrb.mxu1 %v7764_v21  ;;  %v1705_v40 = vpop.f32.mrf.mxu3  ;;  %v1671_v42 = vadd.f32 %v1670_v7, %v1651_v35  ;;  %2041 = vmatmul.bf16.gmra.mxu2 %v6612_v63  ;;  %v7787_v34 = vld [vmem:[#allocation43_spill] sm:$0xff] }
 0x11e   : > { %2108 = vmatpush.bf16.msrb.mxu2 %v7762_v10  ;;  %v6618_v57 = vadd.f32 %v1705_v40, %v1687_v52  ;;  %2022 = vmatmul.bf16.gmra.mxu1 %v6610_v46  ;;  %v7785_v10 = vld [vmem:[#allocation41_spill] sm:$0xff]  ;;  %v7788_v40 = vld [vmem:[#allocation44_spill] sm:$0xff] }
 0x11f   : > { %2127 = vmatpush.bf16.msrb.mxu3 %v7765_v27  ;;  %v7786_v27 = vld [vmem:[#allocation42_spill] sm:$0xff]  ;;  %v7789_v52 = vld [vmem:[#allocation45_spill] sm:$0xff] }
 0x120   : > { %2071 = vmatpush.bf16.msrb.mxu0 %v7767_v6  ;;  %2060 = vmatmul.bf16.gmra.mxu3 %v6614_v36 }
 0x121   : > { %2090 = vmatpush.bf16.msrb.mxu1 %v7768_v18 }
 0x122   : > { %2109 = vmatpush.bf16.msrb.mxu2 %v7766_v38  ;;  %v1653_v11 = vpop.f32.mrf.mxu0 }
 0x123   : > { %2128 = vmatpush.bf16.msrb.mxu3 %v7769_v29  ;;  %v1689_v0 = vpop.f32.mrf.mxu2  ;;  %v7790_v29 = vld [vmem:[#allocation46_spill] sm:$0xff] }
 0x124   : > { %2072 = vmatpush.bf16.msrb.mxu0 %v7771_v12  ;;  %v1690_v56 = vadd.f32 %v1689_v0, %v1671_v42  ;;  %v1672_v30 = vpop.f32.mrf.mxu1  ;;  %v2446_v0 = vmul.f32 %v6376_v39, %v6376_v39  ;;  %v7799_v39 = vld [vmem:[#allocation55_spill] sm:$0xff] }
 0x125   : > { %2091 = vmatpush.bf16.msrb.mxu1 %v7772_v53  ;;  %v1708_v59 = vpop.f32.mrf.mxu3  ;;  %v1673_v47 = vadd.f32 %v1672_v30, %v1653_v11  ;;  %v7792_v53 = vld [vmem:[#allocation48_spill] sm:$0xff]  ;;  %v7795_v11 = vld [vmem:[#allocation51_spill] sm:$0xff] }
 0x126   : > { %2110 = vmatpush.bf16.msrb.mxu2 %v7770_v5  ;;  %v6632_v19 = vadd.f32 %v1708_v59, %v1690_v56  ;;  %v7791_v5 = vld [vmem:[#allocation47_spill] sm:$0xff]  ;;  %v7794_v56 = vld [vmem:[#allocation50_spill] sm:$0xff] }
 0x127   : > { %2129 = vmatpush.bf16.msrb.mxu3 %v7773_v13  ;;  %v7793_v13 = vld [vmem:[#allocation49_spill] sm:$0xff] }
 0x128   : > { %2073 = vmatpush.bf16.msrb.mxu0 %v7775_v31 }
 0x129   : > { %2092 = vmatpush.bf16.msrb.mxu1 %v7776_v23 }
 0x12a   : > { %2111 = vmatpush.bf16.msrb.mxu2 %v7774_v25  ;;  %v1722_v2 = vpop.f32.mrf.mxu0  ;;  %v7797_v25 = vld [vmem:[#allocation53_spill] sm:$0xff] }
 0x12b   : > { %2130 = vmatpush.bf16.msrb.mxu3 %v7777_v28  ;;  %v1691_v49 = vpop.f32.mrf.mxu2  ;;  %2074 = vmatmul.bf16.vlgmr.msrb.gmra.mxu0 %v6568_v55 }
 0x12c   : > { %2142 = vmatpush.bf16.msra.mxu0 %v7779_v33  ;;  %v1692_v60 = vadd.f32 %v1691_v49, %v1673_v47  ;;  %v1741_v8 = vpop.f32.mrf.mxu1  ;;  %v7796_v47 = vld [vmem:[#allocation52_spill] sm:$0xff] }
 0x12d   : > { %2161 = vmatpush.bf16.msra.mxu1 %v7780_v41  ;;  %v1710_v50 = vpop.f32.mrf.mxu3  ;;  %v1742_v14 = vadd.f32 %v1741_v8, %v1722_v2  ;;  %2112 = vmatmul.bf16.vlgmr.msrb.gmra.mxu2 %v6574_v51  ;;  %v7803_v8 = vld [vmem:[#allocation58_spill] sm:$0xff] }
 0x12e   : > { %2180 = vmatpush.bf16.msra.mxu2 %v7778_v32  ;;  %v6644_v21 = vadd.f32 %v1710_v50, %v1692_v60  ;;  %2093 = vmatmul.bf16.vlgmr.msrb.gmra.mxu1 %v6570_v15  ;;  %v7800_v50 = vld [vmem:[#allocation56_spill] sm:$0xff] }
 0x12f   : > { %2199 = vmatpush.bf16.msra.mxu3 %v7781_v45  ;;  %v7798_v45 = vld [vmem:[#allocation54_spill] sm:$0xff] }
 0x130   : > { %2143 = vmatpush.bf16.msra.mxu0 %v7783_v62  ;;  %2131 = vmatmul.bf16.vlgmr.msrb.gmra.mxu3 %v6576_v4  ;;  %v7802_v62 = vld [vmem:[#allocation155_spill] sm:$0xff] }
 0x131   : > { %2162 = vmatpush.bf16.msra.mxu1 %v7784_v9  ;;  %v2449_v60 = vmul.f32 %v7802_v62, %v7802_v62  ;;  %v7804_v9 = vld [vmem:[#allocation59_spill] sm:$0xff] }
 0x132   : > { %2181 = vmatpush.bf16.msra.mxu2 %v7782_v54  ;;  %v1724_v38 = vpop.f32.mrf.mxu0  ;;  %v7801_v54 = vld [vmem:[#allocation57_spill] sm:$0xff]  ;;  %v7820_v62 = vld [vmem:[#allocation75_spill] sm:$0xff] }
 0x133   : > { %2200 = vmatpush.bf16.msra.mxu3 %v7785_v10  ;;  %v1760_v35 = vpop.f32.mrf.mxu2 }
 0x134   : > { %2144 = vmatpush.bf16.msra.mxu0 %v7787_v34  ;;  %v1761_v42 = vadd.f32 %v1760_v35, %v1742_v14  ;;  %v1743_v6 = vpop.f32.mrf.mxu1  ;;  %v7805_v14 = vld [vmem:[#allocation60_spill] sm:$0xff] }
 0x135   : > { %2163 = vmatpush.bf16.msra.mxu1 %v7788_v40  ;;  %v1779_v7 = vpop.f32.mrf.mxu3  ;;  %v1744_v18 = vadd.f32 %v1743_v6, %v1724_v38  ;;  %v7807_v38 = vld [vmem:[#allocation62_spill] sm:$0xff]  ;;  %v7808_v6 = vld [vmem:[#allocation64_spill] sm:$0xff] }
 0x136   : > { %2182 = vmatpush.bf16.msra.mxu2 %v7786_v27  ;;  %v1780_v12 = vadd.f32 %v1779_v7, %v1761_v42  ;;  %v7806_v27 = vld [vmem:[#allocation61_spill] sm:$0xff] }
 0x137   : > { %2201 = vmatpush.bf16.msra.mxu3 %v7789_v52 }
 0x138   : > { %2145 = vmatpush.bf16.msra.mxu0 %v7791_v5  ;;  %v2458_v59 = vmul.f32 %v1780_v12, %v1780_v12  ;;  %v7810_v5 = vld [vmem:[#allocation66_spill] sm:$0xff]  ;;  %v7811_v12 = vld [vmem:[#allocation63_spill] sm:$0xff] }
 0x139   : > { %2164 = vmatpush.bf16.msra.mxu1 %v7792_v53  ;;  %v7812_v53 = vld [vmem:[#allocation67_spill] sm:$0xff] }
 0x13a   : > { %2183 = vmatpush.bf16.msra.mxu2 %v7790_v29  ;;  %v6662_v30 = vadd.f32 %v2458_v59, %v2446_v0  ;;  %v1727_v32 = vpop.f32.mrf.mxu0  ;;  %v7809_v29 = vld [vmem:[#allocation65_spill] sm:$0xff]  ;;  %v7813_v59 = vld [vmem:[#allocation68_spill] sm:$0xff] }
 0x13b   : > { %2202 = vmatpush.bf16.msra.mxu3 %v7793_v13  ;;  %v1762_v31 = vpop.f32.mrf.mxu2  ;;  %2079 = vmatmul.bf16.gmra.mxu0 %v6608_v44  ;;  %v2452_v13 = vmul.f32 %v6502_v3, %v6502_v3 }
 0x13c   : > { %2146 = vmatpush.bf16.msra.mxu0 %v7795_v11  ;;  %v1763_v28 = vadd.f32 %v1762_v31, %v1744_v18  ;;  %v1746_v33 = vpop.f32.mrf.mxu1  ;;  %v7815_v31 = vld [vmem:[#allocation70_spill] sm:$0xff]  ;;  %vm2489_vm1 = vcmp.eq.f32.partialorder %v6662_v30, inf  ;;  %vm2491_vm3 = vcmp.eq.f32.partialorder %v6662_v30, 0.0 }
 0x13d   : > { %2165 = vmatpush.bf16.msra.mxu1 %v7796_v47  ;;  %v1781_v23 = vpop.f32.mrf.mxu3  ;;  %v1747_v41 = vadd.f32 %v1746_v33, %v1727_v32  ;;  %2117 = vmatmul.bf16.gmra.mxu2 %v6612_v63 }
 0x13e   : > { %2184 = vmatpush.bf16.msra.mxu2 %v7794_v56  ;;  %v1782_v49 = vadd.f32 %v1781_v23, %v1763_v28  ;;  %2098 = vmatmul.bf16.gmra.mxu1 %v6610_v46  ;;  %v7814_v56 = vld [vmem:[#allocation69_spill] sm:$0xff]  ;;  %v7816_v23 = vld [vmem:[#allocation71_spill] sm:$0xff] }
 0x13f   : > { %2203 = vmatpush.bf16.msra.mxu3 %v7797_v25 }
 0x140   : > { %2147 = vmatpush.bf16.msra.mxu0 %v7799_v39  ;;  %v2461_v2 = vmul.f32 %v1782_v49, %v1782_v49  ;;  %2136 = vmatmul.bf16.gmra.mxu3 %v6614_v36  ;;  %v2455_v49 = vmul.f32 %v6516_v24, %v6516_v24 }
 0x141   : > { %2166 = vmatpush.bf16.msra.mxu1 %v7800_v50 }
 0x142   : > { %2185 = vmatpush.bf16.msra.mxu2 %v7798_v45  ;;  %v6678_v10 = vadd.f32 %v2461_v2, %v2449_v60  ;;  %v1729_v35 = vpop.f32.mrf.mxu0  ;;  %v7818_v45 = vld [vmem:[#allocation73_spill] sm:$0xff]  ;;  %v7821_v2 = vld [vmem:[#allocation76_spill] sm:$0xff] }
 0x143   : > { %2204 = vmatpush.bf16.msra.mxu3 %v7801_v54  ;;  %v1765_v34 = vpop.f32.mrf.mxu2  ;;  %v7819_v54 = vld [vmem:[#allocation74_spill] sm:$0xff] }
 0x144   : > { %2148 = vmatpush.bf16.msra.mxu0 %v7804_v9  ;;  %v1766_v52 = vadd.f32 %v1765_v34, %v1747_v41  ;;  %v1748_v7 = vpop.f32.mrf.mxu1  ;;  %v7817_v41 = vld [vmem:[#allocation72_spill] sm:$0xff]  ;;  %4523 = vrsqrt.f32 %v6678_v10  ;;  %vm2525_vm0 = vcmp.eq.f32.partialorder %v6678_v10, inf  ;;  %vm2527_vm2 = vcmp.eq.f32.partialorder %v6678_v10, 0.0 }
 0x145   : > { %2167 = vmatpush.bf16.msra.mxu1 %v7805_v14  ;;  %v1784_v40 = vpop.f32.mrf.mxu3  ;;  %v1749_v42 = vadd.f32 %v1748_v7, %v1729_v35  ;;  %v7824_v35 = vld [vmem:[#allocation79_spill] sm:$0xff]  ;;  %4525 = vrsqrt.f32 %v6662_v30 }
 0x146   : > { %2186 = vmatpush.bf16.msra.mxu2 %v7803_v8  ;;  %v1785_v18 = vadd.f32 %v1784_v40, %v1766_v52  ;;  %v7822_v8 = vld [vmem:[#allocation77_spill] sm:$0xff]  ;;  %v7823_v52 = vld [vmem:[#allocation78_spill] sm:$0xff] }
 0x147   : > { %2205 = vmatpush.bf16.msra.mxu3 %v7806_v27 }
 0x148   : > { %2149 = vmatpush.bf16.msra.mxu0 %v7808_v6  ;;  %v2464_v0 = vmul.f32 %v1785_v18, %v1785_v18  ;;  %v2447_v6 = vmul.f32 %v6528_v22, %v6528_v22  ;;  %v7832_v22 = vld [vmem:[#allocation87_spill] sm:$0xff] }
 0x149   : > { %2168 = vmatpush.bf16.msra.mxu1 %v7809_v29  ;;  %v7827_v29 = vld [vmem:[#allocation82_spill] sm:$0xff] }
 0x14a   : > { %2187 = vmatpush.bf16.msra.mxu2 %v7807_v38  ;;  %v6692_v11 = vadd.f32 %v2464_v0, %v2452_v13  ;;  %v1798_v32 = vpop.f32.mrf.mxu0  ;;  %v7826_v38 = vld [vmem:[#allocation81_spill] sm:$0xff] }
 0x14b   : > { %2206 = vmatpush.bf16.msra.mxu3 %v7810_v5  ;;  %v1767_v47 = vpop.f32.mrf.mxu2  ;;  %2150 = vmatmul.bf16.vlgmr.msra.gmra.mxu0 %v6568_v55  ;;  %v7828_v5 = vld [vmem:[#allocation83_spill] sm:$0xff]  ;;  %v7830_v13 = vld [vmem:[#allocation85_spill] sm:$0xff] }
 0x14c   : > { %2218 = vmatpush.bf16.msrb.mxu0 %v7812_v53  ;;  %v1768_v28 = vadd.f32 %v1767_v47, %v1749_v42  ;;  %v1817_v33 = vpop.f32.mrf.mxu1  ;;  %v7825_v42 = vld [vmem:[#allocation80_spill] sm:$0xff]  ;;  %vm2561_vm12 = vcmp.eq.f32.partialorder %v6692_v11, inf  ;;  %vm2563_vm13 = vcmp.eq.f32.partialorder %v6692_v11, 0.0 }
 0x14d   : > { %2237 = vmatpush.bf16.msrb.mxu1 %v7813_v59  ;;  %v1786_v25 = vpop.f32.mrf.mxu3  ;;  %v1818_v3 = vadd.f32 %v1817_v33, %v1798_v32  ;;  %2188 = vmatmul.bf16.vlgmr.msra.gmra.mxu2 %v6574_v51  ;;  %v7829_v53 = vld [vmem:[#allocation84_spill] sm:$0xff]  ;;  %v7834_v33 = vld [vmem:[#allocation89_spill] sm:$0xff] }
 0x14e   : > { %2256 = vmatpush.bf16.msrb.mxu2 %v7811_v12  ;;  %v1787_v39 = vadd.f32 %v1786_v25, %v1768_v28  ;;  %2169 = vmatmul.bf16.vlgmr.msra.gmra.mxu1 %v6570_v15  ;;  %v7833_v32 = vld [vmem:[#allocation88_spill] sm:$0xff] }
 0x14f   : > { %2275 = vmatpush.bf16.msrb.mxu3 %v7814_v56 }
 0x150   : > { %2219 = vmatpush.bf16.msrb.mxu0 %v7816_v23  ;;  %v2467_v50 = vmul.f32 %v1787_v39, %v1787_v39  ;;  %2207 = vmatmul.bf16.vlgmr.msra.gmra.mxu3 %v6576_v4  ;;  %v7831_v23 = vld [vmem:[#allocation86_spill] sm:$0xff]  ;;  %v7836_v39 = vld [vmem:[#allocation91_spill] sm:$0xff] }
 0x151   : > { %2238 = vmatpush.bf16.msrb.mxu1 %v7817_v41  ;;  %v2450_v41 = vmul.f32 %v6538_v61, %v6538_v61 }
 0x152   : > { %2257 = vmatpush.bf16.msrb.mxu2 %v7815_v31  ;;  %v6706_v60 = vadd.f32 %v2467_v50, %v2455_v49  ;;  %v1800_v34 = vpop.f32.mrf.mxu0  ;;  %v7837_v50 = vld [vmem:[#allocation92_spill] sm:$0xff] }
 0x153   : > { %2276 = vmatpush.bf16.msrb.mxu3 %v7818_v45  ;;  %v1836_v9 = vpop.f32.mrf.mxu2 }
 0x154   : > { %2220 = vmatpush.bf16.msrb.mxu0 %v7820_v62  ;;  %v1837_v27 = vadd.f32 %v1836_v9, %v1818_v3  ;;  %v1819_v24 = vpop.f32.mrf.mxu1  ;;  %v7835_v3 = vld [vmem:[#allocation90_spill] sm:$0xff]  ;;  %vm2597_vm14 = vcmp.eq.f32.partialorder %v6706_v60, inf }
 0x155   : > { %2239 = vmatpush.bf16.msrb.mxu1 %v7821_v2  ;;  %v1855_v14 = vpop.f32.mrf.mxu3  ;;  %v1820_v40 = vadd.f32 %v1819_v24, %v1800_v34  ;;  %v7840_v34 = vld [vmem:[#allocation95_spill] sm:$0xff] }
 0x156   : > { %2258 = vmatpush.bf16.msrb.mxu2 %v7819_v54  ;;  %v1856_v7 = vadd.f32 %v1855_v14, %v1837_v27  ;;  %v7838_v54 = vld [vmem:[#allocation93_spill] sm:$0xff]  ;;  %v7839_v27 = vld [vmem:[#allocation94_spill] sm:$0xff] }
 0x157   : > { %2277 = vmatpush.bf16.msrb.mxu3 %v7822_v8 }
 0x158   : > { %2221 = vmatpush.bf16.msrb.mxu0 %v7824_v35  ;;  %v2459_v18 = vmul.f32 %v1856_v7, %v1856_v7  ;;  %v7843_v35 = vld [vmem:[#allocation96_spill] sm:$0xff]  ;;  %v7844_v7 = vld [vmem:[#allocation97_spill] sm:$0xff] }
 0x159   : > { %2240 = vmatpush.bf16.msrb.mxu1 %v7825_v42  ;;  %v2453_v42 = vmul.f32 %v6552_v26, %v6552_v26  ;;  %v7850_v26 = vld [vmem:[#allocation105_spill] sm:$0xff] }
 0x15a   : > { %2259 = vmatpush.bf16.msrb.mxu2 %v7823_v52  ;;  %v6718_v12 = vadd.f32 %v2459_v18, %v2447_v6  ;;  %v1803_v47 = vpop.f32.mrf.mxu0  ;;  %v7842_v52 = vld [vmem:[#allocation99_spill] sm:$0xff]  ;;  %v7845_v6 = vld [vmem:[#allocation100_spill] sm:$0xff]  ;;  %v7846_v18 = vld [vmem:[#allocation101_spill] sm:$0xff] }
 0x15b   : > { %2278 = vmatpush.bf16.msrb.mxu3 %v7826_v38  ;;  %v1838_v0 = vpop.f32.mrf.mxu2  ;;  %2155 = vmatmul.bf16.gmra.mxu0 %v6608_v44 }
 0x15c   : > { %2222 = vmatpush.bf16.msrb.mxu0 %v7828_v5  ;;  %v1839_v56 = vadd.f32 %v1838_v0, %v1820_v40  ;;  %v1822_v25 = vpop.f32.mrf.mxu1  ;;  %v7841_v40 = vld [vmem:[#allocation98_spill] sm:$0xff]  ;;  %v7848_v0 = vld [vmem:[#allocation103_spill] sm:$0xff]  ;;  %vm2501_vm4 = vcmp.eq.f32.partialorder %v6718_v12, inf  ;;  %vm2503_vm5 = vcmp.eq.f32.partialorder %v6718_v12, 0.0 }
 0x15d   : > { %2241 = vmatpush.bf16.msrb.mxu1 %v7829_v53  ;;  %v1857_v59 = vpop.f32.mrf.mxu3  ;;  %v1823_v31 = vadd.f32 %v1822_v25, %v1803_v47  ;;  %2193 = vmatmul.bf16.gmra.mxu2 %v6612_v63  ;;  %v7849_v25 = vld [vmem:[#allocation104_spill] sm:$0xff] }
 0x15e   : > { %2260 = vmatpush.bf16.msrb.mxu2 %v7827_v29  ;;  %v1858_v28 = vadd.f32 %v1857_v59, %v1839_v56  ;;  %2174 = vmatmul.bf16.gmra.mxu1 %v6610_v46 }
 0x15f   : > { %2279 = vmatpush.bf16.msrb.mxu3 %v7830_v13  ;;  %v7847_v13 = vld [vmem:[#allocation102_spill] sm:$0xff] }
 0x160   : > { %2223 = vmatpush.bf16.msrb.mxu0 %v7832_v22  ;;  %v2462_v45 = vmul.f32 %v1858_v28, %v1858_v28  ;;  %2212 = vmatmul.bf16.gmra.mxu3 %v6614_v36  ;;  %v7851_v28 = vld [vmem:[#allocation106_spill] sm:$0xff] }
 0x161   : > { %2242 = vmatpush.bf16.msrb.mxu1 %v7833_v32  ;;  %v7852_v32 = vld [vmem:[#allocation107_spill] sm:$0xff] }
 0x162   : > { %2261 = vmatpush.bf16.msrb.mxu2 %v7831_v23  ;;  %v6734_v49 = vadd.f32 %v2462_v45, %v2450_v41  ;;  %v1805_v9 = vpop.f32.mrf.mxu0  ;;  %v2456_v23 = vmul.f32 %v6580_v17, %v6580_v17  ;;  %v7853_v41 = vld [vmem:[#allocation108_spill] sm:$0xff]  ;;  %v7854_v45 = vld [vmem:[#allocation109_spill] sm:$0xff] }
 0x163   : > { %2280 = vmatpush.bf16.msrb.mxu3 %v7834_v33  ;;  %v1841_v62 = vpop.f32.mrf.mxu2 }
 0x164   : > { %2224 = vmatpush.bf16.msrb.mxu0 %v7836_v39  ;;  %v1842_v8 = vadd.f32 %v1841_v62, %v1823_v31  ;;  %v1824_v61 = vpop.f32.mrf.mxu1  ;;  %v7856_v62 = vld [vmem:[#allocation111_spill] sm:$0xff]  ;;  %4527 = vrsqrt.f32 %v6734_v49  ;;  %vm2537_vm6 = vcmp.eq.f32.partialorder %v6734_v49, inf  ;;  %vm2539_vm8 = vcmp.eq.f32.partialorder %v6734_v49, 0.0 }
 0x165   : > { %2243 = vmatpush.bf16.msrb.mxu1 %v7837_v50  ;;  %v1860_v2 = vpop.f32.mrf.mxu3  ;;  %v1825_v14 = vadd.f32 %v1824_v61, %v1805_v9  ;;  %v7859_v9 = vld [vmem:[#allocation114_spill] sm:$0xff]  ;;  %v7860_v61 = vld [vmem:[#allocation115_spill] sm:$0xff] }
 0x166   : > { %2262 = vmatpush.bf16.msrb.mxu2 %v7835_v3  ;;  %v1861_v24 = vadd.f32 %v1860_v2, %v1842_v8  ;;  %v7857_v2 = vld [vmem:[#allocation112_spill] sm:$0xff]  ;;  %v7858_v8 = vld [vmem:[#allocation113_spill] sm:$0xff] }
 0x167   : > { %2281 = vmatpush.bf16.msrb.mxu3 %v7838_v54  ;;  %v7855_v54 = vld [vmem:[#allocation110_spill] sm:$0xff] }
 0x168   : > { %2225 = vmatpush.bf16.msrb.mxu0 %v7840_v34  ;;  %v2465_v38 = vmul.f32 %v1861_v24, %v1861_v24 }
 0x169   : > { %2244 = vmatpush.bf16.msrb.mxu1 %v7841_v40 }
 0x16a   : > { %2263 = vmatpush.bf16.msrb.mxu2 %v7839_v27  ;;  %v6748_v29 = vadd.f32 %v2465_v38, %v2453_v42  ;;  %v6752_v56 = vpop.f32.mrf.mxu0  ;;  %v7862_v27 = vld [vmem:[#allocation117_spill] sm:$0xff]  ;;  %v7865_v42 = vld [vmem:[#allocation120_spill] sm:$0xff] }
 0x16b   : > { %2282 = vmatpush.bf16.msrb.mxu3 %v7842_v52  ;;  %v1843_v5 = vpop.f32.mrf.mxu2  ;;  %2226 = vmatmul.bf16.vlgmr.msrb.gmra.mxu0 %v6568_v55  ;;  %v7866_v38 = vld [vmem:[#allocation121_spill] sm:$0xff] }
 0x16c   : > { %2294 = vmatpush.bf16.msra.mxu0 %v7844_v7  ;;  %v1844_v59 = vadd.f32 %v1843_v5, %v1825_v14  ;;  %v6754_v47 = vpop.f32.mrf.mxu1  ;;  %v7861_v14 = vld [vmem:[#allocation116_spill] sm:$0xff]  ;;  %v7864_v7 = vld [vmem:[#allocation119_spill] sm:$0xff] }
 0x16d   : > { %2313 = vmatpush.bf16.msra.mxu1 %v7845_v6  ;;  %v1862_v53 = vpop.f32.mrf.mxu3  ;;  %2264 = vmatmul.bf16.vlgmr.msrb.gmra.mxu2 %v6574_v51  ;;  %v7867_v6 = vld [vmem:[#allocation122_spill] sm:$0xff]  ;;  %v7869_v5 = vld [vmem:[#allocation124_spill] sm:$0xff] }
 0x16e   : > { %2332 = vmatpush.bf16.msra.mxu2 %v7843_v35  ;;  %v1863_v31 = vadd.f32 %v1862_v53, %v1844_v59  ;;  %2245 = vmatmul.bf16.vlgmr.msrb.gmra.mxu1 %v6570_v15  ;;  %v7863_v35 = vld [vmem:[#allocation118_spill] sm:$0xff]  ;;  %v7870_v53 = vld [vmem:[#allocation125_spill] sm:$0xff] }
 0x16f   : > { %2351 = vmatpush.bf16.msra.mxu3 %v7846_v18  ;;  %v7868_v18 = vld [vmem:[#allocation123_spill] sm:$0xff] }
 0x170   : > { %2295 = vmatpush.bf16.msra.mxu0 %v7848_v0  ;;  %v2468_v22 = vmul.f32 %v1863_v31, %v1863_v31  ;;  %2283 = vmatmul.bf16.vlgmr.msrb.gmra.mxu3 %v6576_v4  ;;  %v7872_v31 = vld [vmem:[#allocation127_spill] sm:$0xff] }
 0x171   : > { %2314 = vmatpush.bf16.msra.mxu1 %v7849_v25 }
 0x172   : > { %2333 = vmatpush.bf16.msra.mxu2 %v7847_v13  ;;  %v6766_v33 = vadd.f32 %v2468_v22, %v2456_v23  ;;  %v1876_v17 = vpop.f32.mrf.mxu0  ;;  %v7873_v23 = vld [vmem:[#allocation128_spill] sm:$0xff]  ;;  %v7874_v22 = vld [vmem:[#allocation129_spill] sm:$0xff] }
 0x173   : > { %2352 = vmatpush.bf16.msra.mxu3 %v7850_v26  ;;  %v6770_v3 = vpop.f32.mrf.mxu2  ;;  %v7871_v26 = vld [vmem:[#allocation126_spill] sm:$0xff] }
 0x174   : > { %2296 = vmatpush.bf16.msra.mxu0 %v7852_v32  ;;  %v1895_v50 = vpop.f32.mrf.mxu1  ;;  %v7876_v32 = vld [vmem:[#allocation131_spill] sm:$0xff]  ;;  %vm2609_vm15 = vcmp.eq.f32.partialorder %v6766_v33, inf }
 0x175   : > { %2315 = vmatpush.bf16.msra.mxu1 %v7853_v41  ;;  %v6772_v39 = vpop.f32.mrf.mxu3  ;;  %v7877_v41 = vld [vmem:[#allocation132_spill] sm:$0xff] }
 0x176   : > { %2334 = vmatpush.bf16.msra.mxu2 %v7851_v28  ;;  %v7875_v28 = vld [vmem:[#allocation130_spill] sm:$0xff] }
 0x177   : > { %2353 = vmatpush.bf16.msra.mxu3 %v7854_v45  ;;  %v7878_v45 = vld [vmem:[#allocation133_spill] sm:$0xff] }
 0x178   : > { %2297 = vmatpush.bf16.msra.mxu0 %v7856_v62 }
 0x179   : > { %2316 = vmatpush.bf16.msra.mxu1 %v7857_v2  ;;  %v7879_v2 = vld [vmem:[#allocation134_spill] sm:$0xff] }
 0x17a   : > { %2335 = vmatpush.bf16.msra.mxu2 %v7855_v54  ;;  %v6784_v40 = vpop.f32.mrf.mxu0 }
 0x17b   : > { %2354 = vmatpush.bf16.msra.mxu3 %v7858_v8  ;;  %v1914_v34 = vpop.f32.mrf.mxu2  ;;  %2231 = vmatmul.bf16.gmra.mxu0 %v6608_v44  ;;  %v7880_v8 = vld [vmem:[#allocation135_spill] sm:$0xff] }
 0x17c   : > { %2298 = vmatpush.bf16.msra.mxu0 %v7860_v61  ;;  %v6786_v52 = vpop.f32.mrf.mxu1 }
 0x17d   : > { %2317 = vmatpush.bf16.msra.mxu1 %v7861_v14  ;;  %v6782_v24 = vpop.f32.mrf.mxu3  ;;  %2269 = vmatmul.bf16.gmra.mxu2 %v6612_v63  ;;  %v7881_v14 = vld [vmem:[#allocation136_spill] sm:$0xff] }
 0x17e   : > { %2336 = vmatpush.bf16.msra.mxu2 %v7859_v9  ;;  %2250 = vmatmul.bf16.gmra.mxu1 %v6610_v46 }
 0x17f   : > { %2355 = vmatpush.bf16.msra.mxu3 %v7862_v27  ;;  %v7882_v27 = vld [vmem:[#allocation137_spill] sm:$0xff] }
 0x180   : > { %2299 = vmatpush.bf16.msra.mxu0 %v7864_v7  ;;  %2288 = vmatmul.bf16.gmra.mxu3 %v6614_v36  ;;  %v7883_v7 = vld [vmem:[#allocation138_spill] sm:$0xff] }
 0x181   : > { %2318 = vmatpush.bf16.msra.mxu1 %v7865_v42  ;;  %v7884_v42 = vld [vmem:[#allocation139_spill] sm:$0xff] }
 0x182   : > { %2337 = vmatpush.bf16.msra.mxu2 %v7863_v35  ;;  %v6804_v59 = vpop.f32.mrf.mxu0 }
 0x183   : > { %2356 = vmatpush.bf16.msra.mxu3 %v7866_v38  ;;  %v6800_v13 = vpop.f32.mrf.mxu2  ;;  %v7885_v38 = vld [vmem:[#allocation140_spill] sm:$0xff] }
 0x184   : > { %2300 = vmatpush.bf16.msra.mxu0 %v7868_v18  ;;  %v6806_v25 = vpop.f32.mrf.mxu1 }
 0x185   : > { %2319 = vmatpush.bf16.msra.mxu1 %v7869_v5  ;;  %v6802_v0 = vpop.f32.mrf.mxu3 }
 0x186   : > { %2338 = vmatpush.bf16.msra.mxu2 %v7867_v6  ;;  %v7886_v6 = vld [vmem:[#allocation141_spill] sm:$0xff] }
 0x187   : > { %2357 = vmatpush.bf16.msra.mxu3 %v7870_v53  ;;  %v1894_v53 = vadd.f32 %v6754_v47, %v6752_v56  ;;  %v7892_v56 = vld [vmem:[#allocation147_spill] sm:$0xff]  ;;  %v7893_v47 = vld [vmem:[#allocation148_spill] sm:$0xff] }
 0x188   : > { %2301 = vmatpush.bf16.msra.mxu0 %v7872_v31 }
 0x189   : > { %2320 = vmatpush.bf16.msra.mxu1 %v7873_v23 }
 0x18a   : > { %2339 = vmatpush.bf16.msra.mxu2 %v7871_v26  ;;  %v1999_v9 = vpop.f32.mrf.mxu0 }
 0x18b   : > { %2358 = vmatpush.bf16.msra.mxu3 %v7874_v22  ;;  %v6816_v54 = vpop.f32.mrf.mxu2  ;;  %2302 = vmatmul.bf16.vlgmr.msra.gmra.mxu0 %v6568_v55  ;;  %v1896_v22 = vadd.f32 %v1895_v50, %v1876_v17  ;;  %v7894_v17 = vld [vmem:[#allocation149_spill] sm:$0xff] }
 0x18c   : > { %2370 = vmatpush.bf16.msrb.mxu0 %v7876_v32  ;;  %v2018_v61 = vpop.f32.mrf.mxu1  ;;  %v7887_v32 = vld [vmem:[#allocation142_spill] sm:$0xff] }
 0x18d   : > { %2389 = vmatpush.bf16.msrb.mxu1 %v7877_v41  ;;  %v6818_v62 = vpop.f32.mrf.mxu3  ;;  %v2019_v35 = vadd.f32 %v2018_v61, %v1999_v9  ;;  %2340 = vmatmul.bf16.vlgmr.msra.gmra.mxu2 %v6574_v51  ;;  %v7888_v41 = vld [vmem:[#allocation143_spill] sm:$0xff]  ;;  %v1915_v9 = vadd.f32 %v1914_v34, %v1896_v22  ;;  %v1913_v61 = vadd.f32 %v6770_v3, %v1894_v53  ;;  %v7898_v53 = vld [vmem:[#allocation153_spill] sm:$0xff]  ;;  %v7899_v22 = vld [vmem:[#allocation154_spill] sm:$0xff] }
 0x18e   : > { %2408 = vmatpush.bf16.msrb.mxu2 %v7875_v28  ;;  %2321 = vmatmul.bf16.vlgmr.msra.gmra.mxu1 %v6570_v15 }
 0x18f   : > { %2427 = vmatpush.bf16.msrb.mxu3 %v7878_v45  ;;  %v1934_v50 = vadd.f32 %v6782_v24, %v1915_v9  ;;  %v1932_v34 = vadd.f32 %v6772_v39, %v1913_v61  ;;  %v6859_v24 = vpop.eup %4523  ;;  %v4448_v9 = vld [vmem:[%s7437_s2 + $0x38] sm:$0xff] }
 0x190   : > { %2371 = vmatpush.bf16.msrb.mxu0 %v7880_v8  ;;  %2359 = vmatmul.bf16.vlgmr.msra.gmra.mxu3 %v6576_v4  ;;  %v7890_v8 = vld [vmem:[#allocation145_spill] sm:$0xff] }
 0x191   : > { %2390 = vmatpush.bf16.msrb.mxu1 %v7881_v14  ;;  %v7891_v14 = vld [vmem:[#allocation146_spill] sm:$0xff]  ;;  %v2460_v39 = vmul.f32 %v1932_v34, %v1932_v34 }
 0x192   : > { %2409 = vmatpush.bf16.msrb.mxu2 %v7879_v2  ;;  %v2001_v31 = vpop.f32.mrf.mxu0  ;;  %v7889_v2 = vld [vmem:[#allocation144_spill] sm:$0xff] }
 0x193   : > { %2428 = vmatpush.bf16.msrb.mxu3 %v7882_v27  ;;  %v2037_v18 = vpop.f32.mrf.mxu2 }
 0x194   : > { %2372 = vmatpush.bf16.msrb.mxu0 %v7884_v42  ;;  %v2038_v26 = vadd.f32 %v2037_v18, %v2019_v35  ;;  %v2020_v23 = vpop.f32.mrf.mxu1  ;;  %v7896_v18 = vld [vmem:[#allocation151_spill] sm:$0xff] }
 0x195   : > { %2391 = vmatpush.bf16.msrb.mxu1 %v7885_v38  ;;  %v2056_v5 = vpop.f32.mrf.mxu3  ;;  %v2021_v28 = vadd.f32 %v2020_v23, %v2001_v31  ;;  %v6863_v31 = vpop.eup %4525  ;;  %v2451_v23 = vmul.f32 %v6618_v57, %v6618_v57  ;;  %v6881_v57 = vld [vmem:[%s7437_s2 + $0x78] sm:$0xff] }
 0x196   : > { %2410 = vmatpush.bf16.msrb.mxu2 %v7883_v7  ;;  %v6836_v45 = vadd.f32 %v2056_v5, %v2038_v26  ;;  %v7897_v5 = vld [vmem:[#allocation152_spill] sm:$0xff]  ;;  %v2463_v26 = vmul.f32 %v1934_v50, %v1934_v50  ;;  %v1901_v50 = vadd.f32 %v6806_v25, %v6804_v59 }
 0x197   : > { %2429 = vmatpush.bf16.msrb.mxu3 %v7886_v6  ;;  %v7895_v6 = vld [vmem:[#allocation150_spill] sm:$0xff] }
 0x198   : > { %2373 = vmatpush.bf16.msrb.mxu0 %v7888_v41  ;;  %v6873_v41 = vadd.f32 %v2463_v26, %v2451_v23  ;;  %v4446_v26 = vld [vmem:[%s7437_s2 + $0x28] sm:$0xff] }
 0x199   : > { %2392 = vmatpush.bf16.msrb.mxu1 %v7889_v2 }
 0x19a   : > { %2411 = vmatpush.bf16.msrb.mxu2 %v7887_v32  ;;  %v2004_v7 = vpop.f32.mrf.mxu0  ;;  %v2448_v32 = vmul.f32 %v6592_v37, %v6592_v37  ;;  %v2519_v37 = vmul.f32 %v6859_v24, %v6678_v10  ;;  %4529 = vrsqrt.f32 %v6873_v41  ;;  %vm2549_vm7 = vcmp.eq.f32.partialorder %v6873_v41, inf }
 0x19b   : > { %2430 = vmatpush.bf16.msrb.mxu3 %v7890_v8  ;;  %v2039_v27 = vpop.f32.mrf.mxu2  ;;  %2307 = vmatmul.bf16.gmra.mxu0 %v6608_v44  ;;  %4531 = vrsqrt.f32 %v6718_v12  ;;  %vm2551_vm10 = vcmp.eq.f32.partialorder %v6873_v41, 0.0 }
 0x19c   : > { %2374 = vmatpush.bf16.msrb.mxu0 %v7892_v56  ;;  %v6851_v3 = vadd.f32 %v2039_v27, %v2021_v28  ;;  %v2023_v42 = vpop.f32.mrf.mxu1  ;;  %v7900_v28 = vld [vmem:[#allocation156_spill] sm:$0xff]  ;;  %v6885_v61 = vadd.f32 %v2460_v39, %v2448_v32  ;;  %v6890_v56 = vld [vmem:[%s7437_s2 + $0xb8] sm:$0xff] }
 0x19d   : > { %2393 = vmatpush.bf16.msrb.mxu1 %v7893_v47  ;;  %v6848_v35 = vpop.f32.mrf.mxu3  ;;  %v2024_v38 = vadd.f32 %v2023_v42, %v2004_v7  ;;  %2345 = vmatmul.bf16.gmra.mxu2 %v6612_v63  ;;  %v2483_v47 = vmul.f32 %v6863_v31, %v6662_v30  ;;  %v6946_v39 = vld [vmem:[%s7437_s2 + $0x68] sm:$0xff] }
 0x19e   : > { %2412 = vmatpush.bf16.msrb.mxu2 %v7891_v14  ;;  %2326 = vmatmul.bf16.gmra.mxu1 %v6610_v46  ;;  %4533 = vrsqrt.f32 %v6885_v61  ;;  %vm2513_vm9 = vcmp.eq.f32.partialorder %v6885_v61, inf  ;;  %vm2515_vm11 = vcmp.eq.f32.partialorder %v6885_v61, 0.0 }
 0x19f   : > { %2431 = vmatpush.bf16.msrb.mxu3 %v7894_v17  ;;  %v1899_v17 = vadd.f32 %v6786_v52, %v6784_v40  ;;  %v1920_v40 = vadd.f32 %v6816_v54, %v1901_v50  ;;  %v2484_v59 = vmul.f32 %v6863_v31, %v2483_v47  ;;  %4535 = vrsqrt.f32 %v6692_v11 }
 0x1a0   : > { %2375 = vmatpush.bf16.msrb.mxu0 %v7896_v18  ;;  %2364 = vmatmul.bf16.gmra.mxu3 %v6614_v36  ;;  %4537 = vrsqrt.f32 %v6706_v60  ;;  %v2454_v47 = vmul.f32 %v6632_v19, %v6632_v19  ;;  %v4444_v19 = vld [vmem:[%s7437_s2 + $0x18] sm:$0xff] }
 0x1a1   : > { %2394 = vmatpush.bf16.msrb.mxu1 %v7897_v5  ;;  %v1918_v52 = vadd.f32 %v6800_v13, %v1899_v17  ;;  %v1939_v25 = vadd.f32 %v6818_v62, %v1920_v40  ;;  %v2485_v23 = vmul.f32 0.5, %v2484_v59  ;;  %4539 = vrsqrt.f32 %v6766_v33 }
 0x1a2   : > { %2413 = vmatpush.bf16.msrb.mxu2 %v7895_v6 }
 0x1a3   : > { %2432 = vmatpush.bf16.msrb.mxu3 %v7898_v53  ;;  %v2042_v2 = vpop.f32.mrf.mxu2  ;;  %v1937_v62 = vadd.f32 %v6802_v0, %v1918_v52  ;;  %v2469_v0 = vmul.f32 %v1939_v25, %v1939_v25 }
 0x1a4   : > { %2376 = vmatpush.bf16.msrb.mxu0 %v7900_v28  ;;  %v2025_v14 = vpop.f32.mrf.mxu1  ;;  %v6953_v28 = vld [vmem:[%s7437_s2 + $0xa8] sm:$0xff] }
 0x1a5   : > { %2395 = vmatpush.bf16.msrb.mxu1 %v6464_v43  ;;  %v2061_v8 = vpop.f32.mrf.mxu3  ;;  %v2043_v43 = vadd.f32 %v2042_v2, %v2024_v38  ;;  %v6931_v38 = vpop.eup %4527 }
 0x1a6   : > { %2414 = vmatpush.bf16.msrb.mxu2 %v7899_v22  ;;  %v6936_v13 = vpop.eup %4529 }
 0x1a7   : > { %2433 = vmatpush.bf16.msrb.mxu3 %v6466_v16  ;;  %v2006_v16 = vpop.f32.mrf.mxu0  ;;  %v6901_v34 = vadd.f32 %v2061_v8, %v2043_v43  ;;  %v6948_v22 = vpop.eup %4531  ;;  %v2531_v8 = vmul.f32 %v6931_v38, %v6734_v49  ;;  %v2466_v43 = vmul.f32 %v1937_v62, %v1937_v62  ;;  %v7020_v62 = vld [vmem:[%s7437_s2 + $0x98] sm:$0xff] }
 0x1a8   : > { %v2026_v27 = vadd.f32 %v2025_v14, %v2006_v16  ;;  %2377 = vmatpush.bf16.msrb.mxu0 %v6494_v20  ;;  %v6914_v20 = vld [vmem:[%s7437_s2 + $0x70] sm:$0xff]  ;;  %v6955_v32 = vpop.eup %4533 }
 0x1a9   : > { %2396 = vmatpush.bf16.msrb.mxu1 %v6498_v48  ;;  %v2520_v48 = vmul.f32 %v6859_v24, %v2519_v37  ;;  %v2457_v37 = vmul.f32 %v6644_v21, %v6644_v21  ;;  %v6983_v21 = vld [vmem:[%s7437_s2 + $0xa0] sm:$0xff]  ;;  %v2507_v16 = vmul.f32 %v6955_v32, %v6885_v61  ;;  %v6987_v14 = vpop.eup %4535 }
 0x1aa   : > { %2415 = vmatpush.bf16.msrb.mxu2 %v6492_v1  ;;  %v4447_v1 = vld [vmem:[%s7437_s2 + $0x30] sm:$0xff] }
 0x1ab   : > { %2434 = vmatpush.bf16.msrb.mxu3 %v6500_v58  ;;  %v6922_v58 = vld [vmem:[%s7437_s2 + $0xb0] sm:$0xff]  ;;  %v2044_v54 = vpop.f32.mrf.mxu2  ;;  %v2521_v42 = vmul.f32 0.5, %v2520_v48  ;;  %2378 = vmatmul.bf16.vlgmr.msrb.gmra.mxu0 %v6568_v55  ;;  %v4445_v55 = vld [vmem:[%s7437_s2 + $0x20] sm:$0xff]  ;;  %v6991_v17 = vadd.f32 %v2469_v0, %v2457_v37  ;;  %v7027_v0 = vpop.eup %4537 }
 0x1ac   : > { %3046 = vmatpush.bf16.msra.mxu0 %v4448_v9  ;;  %v6933_v6 = vadd.f32 %v2044_v54, %v2026_v27  ;;  %v2094_v5 = vpop.f32.mrf.mxu1  ;;  %v7000_v54 = vadd.f32 %v2466_v43, %v2454_v47  ;;  %v7044_v43 = vld [vmem:[%s7437_s2 + $0x90] sm:$0xff] }
 0x1ad   : > { %3065 = vmatpush.bf16.msra.mxu1 %v6881_v57  ;;  %v6928_v7 = vpop.f32.mrf.mxu3  ;;  %v2522_v2 = vsub.f32 1.5, %v2521_v42  ;;  %2416 = vmatmul.bf16.vlgmr.msrb.gmra.mxu2 %v6574_v51  ;;  %v2486_v51 = vsub.f32 1.5, %v2485_v23  ;;  %4541 = vrsqrt.f32 %v6991_v17 }
 0x1ae   : > { %3084 = vmatpush.bf16.msra.mxu2 %v6890_v56  ;;  %2397 = vmatmul.bf16.vlgmr.msrb.gmra.mxu1 %v6570_v15  ;;  %v6974_v15 = vld [vmem:[%s7437_s2 + $0x60] sm:$0xff]  ;;  %4543 = vrsqrt.f32 %v6748_v29 }
 0x1af   : > { %3109 = vmatpush.bf16.msra.mxu3 %v4448_v9  ;;  %v2075_v18 = vpop.f32.mrf.mxu0  ;;  %v2543_v9 = vmul.f32 %v6936_v13, %v6873_v41  ;;  %v2523_v40 = vmul.f32 %v6859_v24, %v2522_v2  ;;  %v7009_v24 = vld [vmem:[%s7437_s2 + $0x58] sm:$0xff]  ;;  %v2487_v42 = vmul.f32 %v6863_v31, %v2486_v51  ;;  %4545 = vrsqrt.f32 %v7000_v54 }
 0x1b0   : > { %3047 = vmatpush.bf16.msra.mxu0 %v4447_v1  ;;  %v2095_v53 = vadd.f32 %v2094_v5, %v2075_v18  ;;  %2435 = vmatmul.bf16.vlgmr.msrb.gmra.mxu3 %v6576_v4  ;;  %v2495_v4 = vmul.f32 %v6948_v22, %v6718_v12 }
 0x1b1   : > { %3066 = vmatpush.bf16.msra.mxu1 %v6914_v20  ;;  %v2544_v25 = vmul.f32 %v6936_v13, %v2543_v9  ;;  %v2524_v31 = vmul.f32 %v2523_v40, %v6678_v10  ;;  %v7038_v9 = vld [vmem:[%s7437_s2 + $0x50] sm:$0xff]  ;;  %v2591_v40 = vmul.f32 %v7027_v0, %v6706_v60 }
 0x1b2   : > { %3085 = vmatpush.bf16.msra.mxu2 %v6922_v58  ;;  %v2496_v18 = vmul.f32 %v6948_v22, %v2495_v4 }
 0x1b3   : > { %3110 = vmatpush.bf16.msra.mxu3 %v4447_v1  ;;  %v2113_v50 = vpop.f32.mrf.mxu2  ;;  %v2532_v1 = vmul.f32 %v6931_v38, %v2531_v8  ;;  %v2545_v2 = vmul.f32 0.5, %v2544_v25  ;;  %v4443_v8 = vld [vmem:[%s7437_s2 + $0x10] sm:$0xff] }
 0x1b4   : > { %3048 = vmatpush.bf16.msra.mxu0 %v4446_v26  ;;  %v2114_v48 = vadd.f32 %v2113_v50, %v2095_v53  ;;  %v6997_v59 = vpop.f32.mrf.mxu1  ;;  %v2508_v53 = vmul.f32 %v6955_v32, %v2507_v16  ;;  %v2497_v37 = vmul.f32 0.5, %v2496_v18  ;;  %v2526_v50 = vsel %vm2525_vm0, %v6678_v10, %v2524_v31  ;;  %v7068_v31 = vld [vmem:[%s7437_s2 + $0x48] sm:$0xff] }
 0x1b5   : > { %3067 = vmatpush.bf16.msra.mxu1 %v6946_v39  ;;  %v2132_v27 = vpop.f32.mrf.mxu3  ;;  %7902 = vst [vmem:[#allocation3_spill] sm:$0xff] %v6997_v59  ;;  %v2533_v23 = vmul.f32 0.5, %v2532_v1  ;;  %v7056_v1 = vpop.eup %4539  ;;  %v2546_v18 = vsub.f32 1.5, %v2545_v2  ;;  %vm2599_vm0 = vcmp.eq.f32.partialorder %v6706_v60, 0.0 }
 0x1b6   : > { %3086 = vmatpush.bf16.msra.mxu2 %v6953_v28  ;;  %v7014_v5 = vadd.f32 %v2132_v27, %v2114_v48  ;;  %v2509_v51 = vmul.f32 0.5, %v2508_v53  ;;  %v7059_v53 = vpop.eup %4541 }
 0x1b7   : > { %3111 = vmatpush.bf16.msra.mxu3 %v4446_v26  ;;  %v6995_v52 = vpop.f32.mrf.mxu0  ;;  %v2555_v26 = vmul.f32 %v6987_v14, %v6692_v11  ;;  %v2534_v27 = vsub.f32 1.5, %v2533_v23  ;;  %v2498_v23 = vsub.f32 1.5, %v2497_v37  ;;  %v7072_v2 = vpop.eup %4543 }
 0x1b8   : > { %7901 = vst [vmem:[#allocation4_spill] sm:$0xff] %v6995_v52  ;;  %3049 = vmatpush.bf16.msra.mxu0 %v4445_v55  ;;  %v7085_v59 = vpop.eup %4545  ;;  %v2592_v52 = vmul.f32 %v7027_v0, %v2591_v40 }
 0x1b9   : > { %3068 = vmatpush.bf16.msra.mxu1 %v6974_v15  ;;  %7903 = vst [vmem:[#allocation5_spill] sm:$0xff] %v7014_v5  ;;  %v2556_v4 = vmul.f32 %v6987_v14, %v2555_v26  ;;  %v4442_v26 = vld [vmem:[%s7437_s2 + $0x8] sm:$0xff]  ;;  %v2535_v37 = vmul.f32 %v6931_v38, %v2534_v27  ;;  %v2567_v38 = vmul.f32 %v7072_v2, %v6748_v29 }
 0x1ba   : > { %3087 = vmatpush.bf16.msra.mxu2 %v6983_v21 }
 0x1bb   : > { %3112 = vmatpush.bf16.msra.mxu3 %v4445_v55  ;;  %v2488_v55 = vmul.f32 %v2487_v42, %v6662_v30  ;;  %v7049_v16 = vpop.f32.mrf.mxu2  ;;  %v2528_v42 = vand.u32 2147483648, %v6678_v10  ;;  %v7083_v5 = vmul.f32 0.5, %v2556_v4  ;;  %2383 = vmatmul.bf16.gmra.mxu0 %v6608_v44  ;;  %v2492_v10 = vand.u32 2147483648, %v6662_v30 }
 0x1bc   : > { %3050 = vmatpush.bf16.msra.mxu0 %v4444_v19  ;;  %7904 = vst [vmem:[#allocation6_spill] sm:$0xff] %v7049_v16  ;;  %v2099_v25 = vpop.f32.mrf.mxu1  ;;  %v2510_v16 = vsub.f32 1.5, %v2509_v51  ;;  %v2615_v44 = vmul.f32 %v7059_v53, %v6991_v17 }
 0x1bd   : > { %3069 = vmatpush.bf16.msra.mxu1 %v7009_v24  ;;  %v7051_v47 = vpop.f32.mrf.mxu3  ;;  %2421 = vmatmul.bf16.gmra.mxu2 %v6612_v63  ;;  %v7107_v63 = vld [vmem:[%s7437_s2 + $0x40] sm:$0xff] }
 0x1be   : > { %3088 = vmatpush.bf16.msra.mxu2 %v7020_v62  ;;  %7905 = vst [vmem:[#allocation8_spill] sm:$0xff] %v7051_v47  ;;  %v7081_v47 = vsel %vm2527_vm2, %v2528_v42, %v2526_v50  ;;  %2402 = vmatmul.bf16.gmra.mxu1 %v6610_v46  ;;  %v4441_v46 = vld [vmem:[%s7437_s2] sm:$0xff]  ;;  %v2511_v4 = vmul.f32 %v6955_v32, %v2510_v16  ;;  %vm2573_vm2 = vcmp.eq.f32.partialorder %v6748_v29, inf }
 0x1bf   : > { %3113 = vmatpush.bf16.msra.mxu3 %v4444_v19  ;;  %v2080_v48 = vpop.f32.mrf.mxu0  ;;  %v2536_v42 = vmul.f32 %v2535_v37, %v6734_v49  ;;  %v2616_v16 = vmul.f32 %v7059_v53, %v2615_v44  ;;  %v2504_v37 = vand.u32 2147483648, %v6718_v12 }
 0x1c0   : > { %v2100_v19 = vadd.f32 %v2099_v25, %v2080_v48  ;;  %3051 = vmatpush.bf16.msra.mxu0 %v4443_v8  ;;  %v7078_v48 = vld [vmem:[%s7437_s2 + $0x88] sm:$0xff]  ;;  %v2490_v25 = vsel %vm2489_vm1, %v6662_v30, %v2488_v55  ;;  %v2603_v55 = vmul.f32 %v7056_v1, %v6766_v33  ;;  %2440 = vmatmul.bf16.gmra.mxu3 %v6614_v36  ;;  %vm2621_vm1 = vcmp.eq.f32.partialorder %v6991_v17, inf }
 0x1c1   : > { %3070 = vmatpush.bf16.msra.mxu1 %v7038_v9  ;;  %v7109_v36 = vsel %vm2491_vm3, %v2492_v10, %v2490_v25  ;;  %v2499_v30 = vmul.f32 %v6948_v22, %v2498_v23  ;;  %v2579_v22 = vmul.f32 %v7085_v59, %v7000_v54  ;;  %v2538_v44 = vsel %vm2537_vm6, %v6734_v49, %v2536_v42 }
 0x1c2   : > { %3089 = vmatpush.bf16.msra.mxu2 %v7044_v43  ;;  %v2604_v23 = vmul.f32 %v7056_v1, %v2603_v55  ;;  %vm2611_vm3 = vcmp.eq.f32.partialorder %v6766_v33, 0.0  ;;  %vm2575_vm6 = vcmp.eq.f32.partialorder %v6748_v29, 0.0 }
 0x1c3   : > { %3114 = vmatpush.bf16.msra.mxu3 %v4443_v8  ;;  %v2547_v8 = vmul.f32 %v6936_v13, %v2546_v18  ;;  %v7118_v13 = vld [vmem:[%s7437_s2 + $0x80] sm:$0xff]  ;;  %v2118_v27 = vpop.f32.mrf.mxu2  ;;  %v2593_v18 = vmul.f32 0.5, %v2592_v52  ;;  %v2568_v52 = vmul.f32 %v7072_v2, %v2567_v38  ;;  %v2540_v38 = vand.u32 2147483648, %v6734_v49 }
 0x1c4   : > { %3052 = vmatpush.bf16.msra.mxu0 %v4442_v26  ;;  %v2119_v25 = vadd.f32 %v2118_v27, %v2100_v19  ;;  %v2101_v51 = vpop.f32.mrf.mxu1  ;;  %v2512_v19 = vmul.f32 %v2511_v4, %v6885_v61  ;;  %v2617_v4 = vmul.f32 0.5, %v2616_v16 }
 0x1c5   : > { %3071 = vmatpush.bf16.msra.mxu1 %v7068_v31  ;;  %v2137_v40 = vpop.f32.mrf.mxu3  ;;  %v2548_v32 = vmul.f32 %v2547_v8, %v6873_v41  ;;  %v2580_v8 = vmul.f32 %v7085_v59, %v2579_v22  ;;  %v2552_v22 = vand.u32 2147483648, %v6873_v41 }
 0x1c6   : > { %3090 = vmatpush.bf16.msra.mxu2 %v7078_v48  ;;  %v7136_v55 = vadd.f32 %v2137_v40, %v2119_v25  ;;  %v7156_v40 = vsel %vm2539_vm8, %v2540_v38, %v2538_v44  ;;  %v2514_v49 = vsel %vm2513_vm9, %v6885_v61, %v2512_v19  ;;  %v2618_v19 = vsub.f32 1.5, %v2617_v4 }
 0x1c7   : > { %3115 = vmatpush.bf16.msra.mxu3 %v4442_v26  ;;  %v2082_v10 = vpop.f32.mrf.mxu0  ;;  %v2500_v26 = vmul.f32 %v2499_v30, %v6718_v12  ;;  %v2594_v30 = vsub.f32 1.5, %v2593_v18  ;;  %v2550_v27 = vsel %vm2549_vm7, %v6873_v41, %v2548_v32  ;;  %v2581_v42 = vmul.f32 0.5, %v2580_v8 }
 0x1c8   : > { %v2102_v50 = vadd.f32 %v2101_v51, %v2082_v10  ;;  %3053 = vmatpush.bf16.msra.mxu0 %v4441_v46  ;;  %v2605_v51 = vmul.f32 0.5, %v2604_v23  ;;  %v7161_v25 = vsel %vm2551_vm10, %v2552_v22, %v2550_v27  ;;  %v2619_v38 = vmul.f32 %v7059_v53, %v2618_v19 }
 0x1c9   : > { %3072 = vmatpush.bf16.msra.mxu1 %v7107_v63  ;;  %v2595_v10 = vmul.f32 %v7027_v0, %v2594_v30  ;;  %vm2587_vm7 = vcmp.eq.f32.partialorder %v7000_v54, 0.0 }
 0x1ca   : > { %3091 = vmatpush.bf16.msra.mxu2 %v7118_v13  ;;  %v2606_v32 = vsub.f32 1.5, %v2605_v51 }
 0x1cb   : > { %3116 = vmatpush.bf16.msra.mxu3 %v4441_v46  ;;  %v2502_v46 = vsel %vm2501_vm4, %v6718_v12, %v2500_v26  ;;  %v2120_v18 = vpop.f32.mrf.mxu2  ;;  %v2596_v27 = vmul.f32 %v2595_v10, %v6706_v60  ;;  %vm2585_vm4 = vcmp.eq.f32.partialorder %v7000_v54, inf }
 0x1cc   : > { %3128 = vmatpush.bf16.msrb.mxu0 %v6881_v57  ;;  %v2121_v16 = vadd.f32 %v2120_v18, %v2102_v50  ;;  %v7168_v41 = vsel %vm2503_vm5, %v2504_v37, %v2502_v46  ;;  %v2582_v37 = vsub.f32 1.5, %v2581_v42  ;;  %v2607_v51 = vmul.f32 %v7056_v1, %v2606_v32 }
 0x1cd   : > { %3147 = vmatpush.bf16.msrb.mxu1 %v6890_v56  ;;  %v2139_v23 = vpop.f32.mrf.mxu3  ;;  %v2897_v8 = vpack.c.bf16 %v7156_v40, %v7168_v41  ;;  %vm2623_vm5 = vcmp.eq.f32.partialorder %v6991_v17, 0.0 }
 0x1ce   : > { %4465 = vmatpush.bf16.msrb.mxu2 %v6881_v57  ;;  %v2569_v57 = vmul.f32 0.5, %v2568_v52  ;;  %v2170_v52 = vpop.f32.mrf.mxu1  ;;  %v7177_v50 = vadd.f32 %v2139_v23, %v2121_v16  ;;  %v2583_v46 = vmul.f32 %v7085_v59, %v2582_v37  ;;  %v2608_v53 = vmul.f32 %v2607_v51, %v6766_v33 }
 0x1cf   : > { %4473 = vmatpush.bf16.msrb.mxu3 %v6890_v56  ;;  %v2516_v56 = vand.u32 2147483648, %v6885_v61  ;;  %v2151_v26 = vpop.f32.mrf.mxu0  ;;  %v7906_v61 = vpack.c.bf16 %v7081_v47, %v7109_v36  ;;  %3073 = vmatmul.bf16.vlgmr.msra.gmra.mxu1 %v2897_v8  ;;  %v2564_v59 = vand.u32 2147483648, %v6692_v11  ;;  %v2600_v23 = vand.u32 2147483648, %v6706_v60 }
 0x1d0   : > { %3129 = vmatpush.bf16.msrb.mxu0 %v6914_v20  ;;  %v2171_v0 = vadd.f32 %v2170_v52, %v2151_v26  ;;  %v2612_v16 = vand.u32 2147483648, %v6766_v33  ;;  %v2576_v52 = vand.u32 2147483648, %v6748_v29 }
 0x1d1   : > { %3148 = vmatpush.bf16.msrb.mxu1 %v6922_v58  ;;  %v7175_v44 = vsel %vm2515_vm11, %v2516_v56, %v2514_v49  ;;  %3054 = vmatmul.bf16.vlgmr.msra.gmra.mxu0 %v7906_v61  ;;  %v2584_v56 = vmul.f32 %v2583_v46, %v7000_v54 }
 0x1d2   : > { %4466 = vmatpush.bf16.msrb.mxu2 %v6914_v20  ;;  %v2570_v20 = vsub.f32 1.5, %v2569_v57  ;;  %v2898_v12 = vpack.c.bf16 %v7161_v25, %v7175_v44 }
 0x1d3   : > { %4474 = vmatpush.bf16.msrb.mxu3 %v6922_v58  ;;  %v7907_v58 = vsub.f32 1.5, %v7083_v5 }
 0x1d4   : > { %3092 = vmatmul.bf16.vlgmr.msra.gmra.mxu2 %v2898_v12  ;;  %3130 = vmatpush.bf16.msrb.mxu0 %v6946_v39  ;;  %v2571_v4 = vmul.f32 %v7072_v2, %v2570_v20  ;;  %v2598_v2 = vsel %vm2597_vm14, %v6706_v60, %v2596_v27  ;;  %v2624_v60 = vand.u32 2147483648, %v6991_v17 }
 0x1d5   : > { %v2559_v30 = vmul.f32 %v6987_v14, %v7907_v58  ;;  %3149 = vmatpush.bf16.msrb.mxu1 %v6953_v28  ;;  %v2189_v14 = vpop.f32.mrf.mxu2  ;;  %v2208_v5 = vpop.f32.mrf.mxu3  ;;  %v7220_v32 = vsel %vm2599_vm0, %v2600_v23, %v2598_v2 }
 0x1d6   : > { %4467 = vmatpush.bf16.msrb.mxu2 %v6946_v39  ;;  %v2190_v22 = vadd.f32 %v2189_v14, %v2171_v0  ;;  %v2172_v49 = vpop.f32.mrf.mxu1  ;;  %v2620_v39 = vmul.f32 %v2619_v38, %v6991_v17  ;;  %v2572_v42 = vmul.f32 %v2571_v4, %v6748_v29  ;;  %v2586_v0 = vsel %vm2585_vm4, %v7000_v54, %v2584_v56 }
 0x1d7   : > { %4475 = vmatpush.bf16.msrb.mxu3 %v6953_v28  ;;  %v2560_v1 = vmul.f32 %v2559_v30, %v6692_v11  ;;  %v2153_v57 = vpop.f32.mrf.mxu0 }
 0x1d8   : > { %3131 = vmatpush.bf16.msrb.mxu0 %v6974_v15  ;;  %v2173_v28 = vadd.f32 %v2172_v49, %v2153_v57  ;;  %v7208_v18 = vadd.f32 %v2208_v5, %v2190_v22  ;;  %v2622_v26 = vsel %vm2621_vm1, %v6991_v17, %v2620_v39 }
 0x1d9   : > { %3150 = vmatpush.bf16.msrb.mxu1 %v6983_v21  ;;  %v2562_v10 = vsel %vm2561_vm12, %v6692_v11, %v2560_v1  ;;  %v7244_v12 = vsel %vm2623_vm5, %v2624_v60, %v2622_v26 }
 0x1da   : > { %4468 = vmatpush.bf16.msrb.mxu2 %v6974_v15  ;;  %v2610_v15 = vsel %vm2609_vm15, %v6766_v33, %v2608_v53  ;;  %v7240_v20 = vsel %vm2563_vm13, %v2564_v59, %v2562_v10 }
 0x1db   : > { %4476 = vmatpush.bf16.msrb.mxu3 %v6983_v21  ;;  %v2574_v21 = vsel %vm2573_vm2, %v6748_v29, %v2572_v42  ;;  %v7233_v19 = vsel %vm2611_vm3, %v2612_v16, %v2610_v15  ;;  %v2899_v17 = vpack.c.bf16 %v7220_v32, %v7240_v20  ;;  %v2626_v42 = vmul.f32 %v6836_v45, %v6836_v45 }
 0x1dc   : > { %3132 = vmatpush.bf16.msrb.mxu0 %v7009_v24  ;;  %v7248_v30 = vsel %vm2575_vm6, %v2576_v52, %v2574_v21  ;;  %v2059_v16 = vadd.f32 %v6848_v35, %v6851_v3 }
 0x1dd   : > { %3151 = vmatpush.bf16.msrb.mxu1 %v7020_v62  ;;  %v2191_v8 = vpop.f32.mrf.mxu2  ;;  %v2210_v33 = vpop.f32.mrf.mxu3  ;;  %v2900_v29 = vpack.c.bf16 %v7233_v19, %v7248_v30 }
 0x1de   : > { %4469 = vmatpush.bf16.msrb.mxu2 %v7009_v24  ;;  %v2588_v24 = vand.u32 2147483648, %v7000_v54  ;;  %v2192_v37 = vadd.f32 %v2191_v8, %v2173_v28  ;;  %v2175_v58 = vpop.f32.mrf.mxu1 }
 0x1df   : > { %4477 = vmatpush.bf16.msrb.mxu3 %v7020_v62  ;;  %v2156_v61 = vpop.f32.mrf.mxu0  ;;  %3078 = vmatmul.bf16.gmra.mxu1 %v2900_v29 }
 0x1e0   : > { %3133 = vmatpush.bf16.msrb.mxu0 %v7038_v9  ;;  %v2176_v11 = vadd.f32 %v2175_v58, %v2156_v61  ;;  %v7254_v62 = vsel %vm2587_vm7, %v2588_v24, %v2586_v0  ;;  %v7258_v51 = vadd.f32 %v2210_v33, %v2192_v37  ;;  %v2629_v0 = vmul.f32 %v2059_v16, %v2059_v16 }
 0x1e1   : > { %3152 = vmatpush.bf16.msrb.mxu1 %v7044_v43  ;;  %v2901_v38 = vpack.c.bf16 %v7244_v12, %v7254_v62  ;;  %3059 = vmatmul.bf16.gmra.mxu0 %v2899_v17 }
 0x1e2   : > { %4470 = vmatpush.bf16.msrb.mxu2 %v7038_v9 }
 0x1e3   : > { %4478 = vmatpush.bf16.msrb.mxu3 %v7044_v43 }
 0x1e4   : > { %3097 = vmatmul.bf16.gmra.mxu2 %v2901_v38  ;;  %3134 = vmatpush.bf16.msrb.mxu0 %v7068_v31 }
 0x1e5   : > { %3153 = vmatpush.bf16.msrb.mxu1 %v7078_v48  ;;  %v2194_v54 = vpop.f32.mrf.mxu2  ;;  %v2213_v9 = vpop.f32.mrf.mxu3 }
 0x1e6   : > { %4471 = vmatpush.bf16.msrb.mxu2 %v7068_v31  ;;  %v2195_v27 = vadd.f32 %v2194_v54, %v2176_v11  ;;  %v2177_v46 = vpop.f32.mrf.mxu1  ;;  %v2632_v54 = vmul.f32 %v6901_v34, %v6901_v34 }
 0x1e7   : > { %4479 = vmatpush.bf16.msrb.mxu3 %v7078_v48  ;;  %v2158_v4 = vpop.f32.mrf.mxu0 }
 0x1e8   : > { %3135 = vmatpush.bf16.msrb.mxu0 %v7107_v63  ;;  %v2178_v14 = vadd.f32 %v2177_v46, %v2158_v4  ;;  %v7270_v43 = vadd.f32 %v2213_v9, %v2195_v27 }
 0x1e9   : > { %3154 = vmatpush.bf16.msrb.mxu1 %v7118_v13 }
 0x1ea   : > { %4472 = vmatpush.bf16.msrb.mxu2 %v7107_v63 }
 0x1eb   : > { %4480 = vmatpush.bf16.msrb.mxu3 %v7118_v13 }
 0x1ed   : > { %v2196_v31 = vpop.f32.mrf.mxu2  ;;  %v2215_v5 = vpop.f32.mrf.mxu3 }
 0x1ee   : > { %v2197_v1 = vadd.f32 %v2196_v31, %v2178_v14  ;;  %v2246_v53 = vpop.f32.mrf.mxu1 }
 0x1ef   : > { %v2227_v48 = vpop.f32.mrf.mxu0 }
 0x1f0   : > { %v7273_v22 = vadd.f32 %v2215_v5, %v2197_v1  ;;  %v2247_v57 = vadd.f32 %v2246_v53, %v2227_v48  ;;  %v2064_v53 = vadd.f32 %v6928_v7, %v6933_v6 }
 0x1f5   : > { %v2265_v49 = vpop.f32.mrf.mxu2  ;;  %v2284_v39 = vpop.f32.mrf.mxu3 }
 0x1f6   : > { %v2266_v28 = vadd.f32 %v2265_v49, %v2247_v57  ;;  %v2248_v2 = vpop.f32.mrf.mxu1 }
 0x1f7   : > { %v2229_v59 = vpop.f32.mrf.mxu0 }
 0x1f8   : > { %v2285_v63 = vadd.f32 %v2284_v39, %v2266_v28  ;;  %v2249_v13 = vadd.f32 %v2248_v2, %v2229_v59 }
 0x1fa   : > { %v2638_v23 = vmul.f32 %v2285_v63, %v2285_v63  ;;  %v2635_v63 = vmul.f32 %v2064_v53, %v2064_v53 }
 0x1fc   : > { %v7277_v56 = vadd.f32 %v2638_v23, %v2626_v42 }
 0x1fd   : > { %v2267_v10 = vpop.f32.mrf.mxu2  ;;  %v2286_v15 = vpop.f32.mrf.mxu3 }
 0x1fe   : > { %4547 = vrsqrt.f32 %v7277_v56  ;;  %v2268_v26 = vadd.f32 %v2267_v10, %v2249_v13  ;;  %v2251_v60 = vpop.f32.mrf.mxu1  ;;  %vm2669_vm8 = vcmp.eq.f32.partialorder %v7277_v56, inf  ;;  %v2672_v6 = vand.u32 2147483648, %v7277_v56 }
 0x1ff   : > { %v2232_v21 = vpop.f32.mrf.mxu0  ;;  %vm2671_vm9 = vcmp.eq.f32.partialorder %v7277_v56, 0.0 }
 0x200   : > { %v2287_v52 = vadd.f32 %v2286_v15, %v2268_v26  ;;  %v2252_v33 = vadd.f32 %v2251_v60, %v2232_v21 }
 0x202   : > { %v2641_v8 = vmul.f32 %v2287_v52, %v2287_v52 }
 0x204   : > { %v4548_v24 = vpop.eup %4547  ;;  %v7282_v45 = vadd.f32 %v2641_v8, %v2629_v0 }
 0x205   : > { %v2270_v37 = vpop.f32.mrf.mxu2  ;;  %v2289_v61 = vpop.f32.mrf.mxu3  ;;  %v2663_v58 = vmul.f32 %v4548_v24, %v7277_v56 }
 0x206   : > { %4549 = vrsqrt.f32 %v7282_v45  ;;  %v2271_v17 = vadd.f32 %v2270_v37, %v2252_v33  ;;  %v2253_v3 = vpop.f32.mrf.mxu1  ;;  %vm2705_vm10 = vcmp.eq.f32.partialorder %v7282_v45, inf  ;;  %vm2707_vm11 = vcmp.eq.f32.partialorder %v7282_v45, 0.0 }
 0x207   : > { %v2234_v35 = vpop.f32.mrf.mxu0  ;;  %v2664_v11 = vmul.f32 %v4548_v24, %v2663_v58  ;;  %v7909_v58 = vld [vmem:[#allocation3_spill] sm:$0xff] }
 0x208   : > { %v2290_v29 = vadd.f32 %v2289_v61, %v2271_v17  ;;  %v2254_v14 = vadd.f32 %v2253_v3, %v2234_v35  ;;  %v7908_v61 = vld [vmem:[#allocation4_spill] sm:$0xff] }
 0x209   : > { %v2665_v38 = vmul.f32 0.5, %v2664_v11  ;;  %v2097_v17 = vadd.f32 %v7909_v58, %v7908_v61 }
 0x20a   : > { %v2644_v9 = vmul.f32 %v2290_v29, %v2290_v29 }
 0x20b   : > { %v2666_v27 = vsub.f32 1.5, %v2665_v38  ;;  %v7910_v38 = vld [vmem:[#allocation5_spill] sm:$0xff] }
 0x20c   : > { %v4550_v4 = vpop.eup %4549  ;;  %v7288_v46 = vadd.f32 %v2644_v9, %v2632_v54  ;;  %v2627_v54 = vmul.f32 %v7910_v38, %v7910_v38  ;;  %v7911_v9 = vld [vmem:[#allocation6_spill] sm:$0xff] }
 0x20d   : > { %v2272_v31 = vpop.f32.mrf.mxu2  ;;  %v2291_v5 = vpop.f32.mrf.mxu3  ;;  %v2667_v1 = vmul.f32 %v4548_v24, %v2666_v27  ;;  %v2699_v48 = vmul.f32 %v4550_v4, %v7282_v45  ;;  %v2116_v27 = vadd.f32 %v7911_v9, %v2097_v17 }
 0x20e   : > { %4551 = vrsqrt.f32 %v7288_v46  ;;  %v2273_v57 = vadd.f32 %v2272_v31, %v2254_v14  ;;  %v2322_v39 = vpop.f32.mrf.mxu1  ;;  %vm2741_vm12 = vcmp.eq.f32.partialorder %v7288_v46, inf  ;;  %vm2743_vm13 = vcmp.eq.f32.partialorder %v7288_v46, 0.0 }
 0x20f   : > { %v2303_v49 = vpop.f32.mrf.mxu0  ;;  %v2668_v34 = vmul.f32 %v2667_v1, %v7277_v56  ;;  %v2700_v28 = vmul.f32 %v4550_v4, %v2699_v48 }
 0x210   : > { %v2292_v59 = vadd.f32 %v2291_v5, %v2273_v57  ;;  %v2323_v23 = vadd.f32 %v2322_v39, %v2303_v49 }
 0x211   : > { %v2701_v2 = vmul.f32 0.5, %v2700_v28  ;;  %v2670_v13 = vsel %vm2669_vm8, %v7277_v56, %v2668_v34  ;;  %v2708_v56 = vand.u32 2147483648, %v7282_v45 }
 0x212   : > { %v2647_v42 = vmul.f32 %v2292_v59, %v2292_v59  ;;  %v2673_v33 = vsel %vm2671_vm9, %v2672_v6, %v2670_v13  ;;  %v7912_v59 = vld [vmem:[#allocation8_spill] sm:$0xff] }
 0x213   : > { %v2702_v10 = vsub.f32 1.5, %v2701_v2  ;;  %v2809_v11 = vsub.f32 %v7109_v36, %v2673_v33  ;;  %v2135_v2 = vadd.f32 %v7912_v59, %v2116_v27 }
 0x214   : > { %v4552_v15 = vpop.eup %4551  ;;  %v7297_v7 = vadd.f32 %v2647_v42, %v2635_v63 }
 0x215   : > { %v2341_v16 = vpop.f32.mrf.mxu2  ;;  %v2360_v26 = vpop.f32.mrf.mxu3  ;;  %v2703_v21 = vmul.f32 %v4550_v4, %v2702_v10  ;;  %v2735_v60 = vmul.f32 %v4552_v15, %v7288_v46  ;;  %v2821_v34 = vand.u32 2147483647, %v2809_v11 }
 0x216   : > { %4553 = vrsqrt.f32 %v7297_v7  ;;  %v2342_v52 = vadd.f32 %v2341_v16, %v2323_v23  ;;  %v2324_v8 = vpop.f32.mrf.mxu1  ;;  %vm2777_vm14 = vcmp.eq.f32.partialorder %v7297_v7, inf  ;;  %vm2779_vm15 = vcmp.eq.f32.partialorder %v7297_v7, 0.0 }
 0x217   : > { %v2305_v0 = vpop.f32.mrf.mxu0  ;;  %v2704_v24 = vmul.f32 %v2703_v21, %v7282_v45  ;;  %v2736_v37 = vmul.f32 %v4552_v15, %v2735_v60 }
 0x218   : > { %v2361_v35 = vadd.f32 %v2360_v26, %v2342_v52  ;;  %v2325_v57 = vadd.f32 %v2324_v8, %v2305_v0  ;;  %v2630_v26 = vmul.f32 %v2135_v2, %v2135_v2 }
 0x219   : > { %v2706_v3 = vsel %vm2705_vm10, %v7282_v45, %v2704_v24  ;;  %v2737_v29 = vmul.f32 0.5, %v2736_v37 }
 0x21a   : > { %v2639_v4 = vmul.f32 %v2361_v35, %v2361_v35  ;;  %v2709_v14 = vsel %vm2707_vm11, %v2708_v56, %v2706_v3 }
 0x21b   : > { %v2812_v31 = vsub.f32 %v7081_v47, %v2709_v14  ;;  %v3103_v5 = vpack.c.bf16 %v2709_v14, %v2673_v33  ;;  %v2738_v1 = vsub.f32 1.5, %v2737_v29  ;;  %v2744_v33 = vand.u32 2147483648, %v7288_v46 }
 0x21c   : > { %v4554_v48 = vpop.eup %4553  ;;  %v7315_v53 = vadd.f32 %v2639_v4, %v2627_v54  ;;  %v2780_v54 = vand.u32 2147483648, %v7297_v7  ;;  %v2633_v4 = vmul.f32 %v7136_v55, %v7136_v55 }
 0x21d   : > { %v2343_v49 = vpop.f32.mrf.mxu2  ;;  %v2362_v45 = vpop.f32.mrf.mxu3  ;;  %3117 = vmatmul.bf16.vlgmr.msra.gmra.mxu3 %v3103_v5  ;;  %v2739_v36 = vmul.f32 %v4552_v15, %v2738_v1  ;;  %v2771_v39 = vmul.f32 %v4554_v48, %v7297_v7  ;;  %v2824_v28 = vand.u32 2147483647, %v2812_v31 }
 0x21e   : > { %4555 = vrsqrt.f32 %v7315_v53  ;;  %v2344_v63 = vadd.f32 %v2343_v49, %v2325_v57  ;;  %v2327_v42 = vpop.f32.mrf.mxu1  ;;  %vm2681_vm0 = vcmp.eq.f32.partialorder %v7315_v53, inf  ;;  %vm2683_vm2 = vcmp.eq.f32.partialorder %v7315_v53, 0.0 }
 0x21f   : > { %v2308_v47 = vpop.f32.mrf.mxu0  ;;  %v2740_v23 = vmul.f32 %v2739_v36, %v7288_v46  ;;  %v2772_v13 = vmul.f32 %v4554_v48, %v2771_v39  ;;  %v2833_v10 = vadd.f32 %v2824_v28, %v2821_v34 }
 0x220   : > { %v2363_v6 = vadd.f32 %v2362_v45, %v2344_v63  ;;  %v2328_v15 = vadd.f32 %v2327_v42, %v2308_v47 }
 0x221   : > { %v2773_v16 = vmul.f32 0.5, %v2772_v13  ;;  %v2742_v60 = vsel %vm2741_vm12, %v7288_v46, %v2740_v23  ;;  %v2636_v13 = vmul.f32 %v7177_v50, %v7177_v50 }
 0x222   : > { %v2642_v21 = vmul.f32 %v2363_v6, %v2363_v6  ;;  %v2745_v3 = vsel %vm2743_vm13, %v2744_v33, %v2742_v60 }
 0x223   : > { %v2774_v52 = vsub.f32 1.5, %v2773_v16  ;;  %v2815_v9 = vsub.f32 %v7240_v20, %v2745_v3 }
 0x224   : > { %v4556_v0 = vpop.eup %4555  ;;  %v7323_v8 = vadd.f32 %v2642_v21, %v2630_v26 }
 0x225   : > { %v2346_v24 = vpop.f32.mrf.mxu2  ;;  %v2365_v37 = vpop.f32.mrf.mxu3  ;;  %v2775_v61 = vmul.f32 %v4554_v48, %v2774_v52  ;;  %v2675_v58 = vmul.f32 %v4556_v0, %v7315_v53  ;;  %v2827_v20 = vand.u32 2147483647, %v2815_v9 }
 0x226   : > { %4557 = vrsqrt.f32 %v7323_v8  ;;  %v2347_v17 = vadd.f32 %v2346_v24, %v2328_v15  ;;  %v2329_v56 = vpop.f32.mrf.mxu1  ;;  %vm2717_vm1 = vcmp.eq.f32.partialorder %v7323_v8, inf  ;;  %vm2719_vm3 = vcmp.eq.f32.partialorder %v7323_v8, 0.0 }
 0x227   : > { %v2310_v35 = vpop.f32.mrf.mxu0  ;;  %v2776_v11 = vmul.f32 %v2775_v61, %v7297_v7  ;;  %v2676_v29 = vmul.f32 %v4556_v0, %v2675_v58 }
 0x228   : > { %v2366_v38 = vadd.f32 %v2365_v37, %v2347_v17  ;;  %v2330_v45 = vadd.f32 %v2329_v56, %v2310_v35  ;;  %v2684_v56 = vand.u32 2147483648, %v7315_v53 }
 0x229   : > { %v2778_v46 = vsel %vm2777_vm14, %v7297_v7, %v2776_v11  ;;  %v2677_v27 = vmul.f32 0.5, %v2676_v29 }
 0x22a   : > { %v2645_v14 = vmul.f32 %v2366_v38, %v2366_v38  ;;  %v2781_v31 = vsel %vm2779_vm15, %v2780_v54, %v2778_v46  ;;  %v2628_v38 = vmul.f32 %v7208_v18, %v7208_v18 }
 0x22b   : > { %v2818_v5 = vsub.f32 %v7220_v32, %v2781_v31  ;;  %v3106_v1 = vpack.c.bf16 %v2781_v31, %v2745_v3  ;;  %v2678_v48 = vsub.f32 1.5, %v2677_v27  ;;  %v2720_v3 = vand.u32 2147483648, %v7323_v8 }
 0x22c   : > { %v4558_v57 = vpop.eup %4557  ;;  %v7342_v49 = vadd.f32 %v2645_v14, %v2633_v4 }
 0x22d   : > { %v2348_v7 = vpop.f32.mrf.mxu2  ;;  %v2367_v36 = vpop.f32.mrf.mxu3  ;;  %v2830_v39 = vand.u32 2147483647, %v2818_v5  ;;  %3122 = vmatmul.bf16.gmra.mxu3 %v3106_v1  ;;  %v2711_v55 = vmul.f32 %v4558_v57, %v7323_v8  ;;  %v2679_v2 = vmul.f32 %v4556_v0, %v2678_v48 }
 0x22e   : > { %4559 = vrsqrt.f32 %v7342_v49  ;;  %v2349_v34 = vadd.f32 %v2348_v7, %v2330_v45  ;;  %v2398_v59 = vpop.f32.mrf.mxu1  ;;  %vm2753_vm4 = vcmp.eq.f32.partialorder %v7342_v49, inf  ;;  %vm2755_vm5 = vcmp.eq.f32.partialorder %v7342_v49, 0.0 }
 0x22f   : > { %v2379_v28 = vpop.f32.mrf.mxu0  ;;  %v2836_v32 = vadd.f32 %v2830_v39, %v2827_v20  ;;  %v2712_v63 = vmul.f32 %v4558_v57, %v2711_v55  ;;  %v2680_v26 = vmul.f32 %v2679_v2, %v7315_v53  ;;  %v2631_v55 = vmul.f32 %v7258_v51, %v7258_v51 }
 0x230   : > { %v2368_v47 = vadd.f32 %v2367_v36, %v2349_v34  ;;  %v2399_v16 = vadd.f32 %v2398_v59, %v2379_v28 }
 0x231   : > { %v2839_v42 = vadd.f32 %v2836_v32, %v2833_v10  ;;  %v2713_v23 = vmul.f32 0.5, %v2712_v63  ;;  %v2682_v61 = vsel %vm2681_vm0, %v7315_v53, %v2680_v26 }
 0x232   : > { %v2648_v6 = vmul.f32 %v2368_v47, %v2368_v47  ;;  %v2685_v46 = vsel %vm2683_vm2, %v2684_v56, %v2682_v61  ;;  %v2756_v47 = vand.u32 2147483648, %v7342_v49 }
 0x233   : > { %v2714_v21 = vsub.f32 1.5, %v2713_v23  ;;  %2845 = vst [vmem:[%s7352_s7] sm:$0xff] %v2839_v42 }
 0x234   : > { %v4560_v15 = vpop.eup %4559  ;;  %v7355_v60 = vadd.f32 %v2648_v6, %v2636_v13 }
 0x235   : > { %v2417_v10 = vpop.f32.mrf.mxu2  ;;  %v2436_v52 = vpop.f32.mrf.mxu3  ;;  %v2715_v0 = vmul.f32 %v4558_v57, %v2714_v21  ;;  %v2747_v50 = vmul.f32 %v4560_v15, %v7342_v49 }
 0x236   : > { %4561 = vrsqrt.f32 %v7355_v60  ;;  %v2418_v33 = vadd.f32 %v2417_v10, %v2399_v16  ;;  %v2400_v37 = vpop.f32.mrf.mxu1  ;;  %v2810_v10 = vsub.f32 %v7168_v41, %v2685_v46  ;;  %vm2789_vm6 = vcmp.eq.f32.partialorder %v7355_v60, inf }
 0x237   : > { %v2381_v24 = vpop.f32.mrf.mxu0  ;;  %v2716_v58 = vmul.f32 %v2715_v0, %v7323_v8  ;;  %v2748_v17 = vmul.f32 %v4560_v15, %v2747_v50  ;;  %v2792_v0 = vand.u32 2147483648, %v7355_v60  ;;  %vm2791_vm7 = vcmp.eq.f32.partialorder %v7355_v60, 0.0 }
 0x238   : > { %v2437_v35 = vadd.f32 %v2436_v52, %v2418_v33  ;;  %v2401_v5 = vadd.f32 %v2400_v37, %v2381_v24 }
 0x239   : > { %v2718_v11 = vsel %vm2717_vm1, %v7323_v8, %v2716_v58  ;;  %v2749_v29 = vmul.f32 0.5, %v2748_v17 }
 0x23a   : > { %v2640_v54 = vmul.f32 %v2437_v35, %v2437_v35  ;;  %v2721_v9 = vsel %vm2719_vm3, %v2720_v3, %v2718_v11  ;;  %v2822_v11 = vand.u32 2147483647, %v2810_v10 }
 0x23b   : > { %v3104_v27 = vpack.c.bf16 %v2721_v9, %v2685_v46  ;;  %v2750_v4 = vsub.f32 1.5, %v2749_v29  ;;  %v2813_v26 = vsub.f32 %v7156_v40, %v2721_v9  ;;  %v2634_v40 = vmul.f32 %v7270_v43, %v7270_v43 }
 0x23c   : > { %v4562_v14 = vpop.eup %4561  ;;  %v7371_v31 = vadd.f32 %v2640_v54, %v2628_v38 }
 0x23d   : > { %v2419_v1 = vpop.f32.mrf.mxu2  ;;  %v2438_v48 = vpop.f32.mrf.mxu3  ;;  %3136 = vmatmul.bf16.vlgmr.msrb.gmra.mxu0 %v3104_v27  ;;  %v2751_v53 = vmul.f32 %v4560_v15, %v2750_v4  ;;  %v2783_v57 = vmul.f32 %v4562_v14, %v7355_v60  ;;  %v2825_v41 = vand.u32 2147483647, %v2813_v26 }
 0x23e   : > { %4563 = vrsqrt.f32 %v7371_v31  ;;  %v2420_v8 = vadd.f32 %v2419_v1, %v2401_v5  ;;  %v2403_v18 = vpop.f32.mrf.mxu1  ;;  %vm2693_vm8 = vcmp.eq.f32.partialorder %v7371_v31, inf  ;;  %vm2695_vm9 = vcmp.eq.f32.partialorder %v7371_v31, 0.0 }
 0x23f   : > { %v2384_v45 = vpop.f32.mrf.mxu0  ;;  %v2752_v7 = vmul.f32 %v2751_v53, %v7342_v49  ;;  %v2784_v36 = vmul.f32 %v4562_v14, %v2783_v57  ;;  %v2834_v27 = vadd.f32 %v2825_v41, %v2822_v11  ;;  %v2637_v57 = vmul.f32 %v7273_v22, %v7273_v22 }
 0x240   : > { %v2439_v20 = vadd.f32 %v2438_v48, %v2420_v8  ;;  %v2404_v28 = vadd.f32 %v2403_v18, %v2384_v45 }
 0x241   : > { %v2785_v39 = vmul.f32 0.5, %v2784_v36  ;;  %v2754_v59 = vsel %vm2753_vm4, %v7342_v49, %v2752_v7 }
 0x242   : > { %v2643_v34 = vmul.f32 %v2439_v20, %v2439_v20  ;;  %v2757_v16 = vsel %vm2755_vm5, %v2756_v47, %v2754_v59  ;;  %v2696_v20 = vand.u32 2147483648, %v7371_v31 }
 0x243   : > { %v2786_v32 = vsub.f32 1.5, %v2785_v39  ;;  %v2816_v24 = vsub.f32 %v7248_v30, %v2757_v16 }
 0x244   : > { %v4564_v2 = vpop.eup %4563  ;;  %v7380_v63 = vadd.f32 %v2643_v34, %v2631_v55 }
 0x245   : > { %v2422_v42 = vpop.f32.mrf.mxu2  ;;  %v2441_v23 = vpop.f32.mrf.mxu3  ;;  %v2787_v13 = vmul.f32 %v4562_v14, %v2786_v32  ;;  %v2687_v6 = vmul.f32 %v4564_v2, %v7371_v31  ;;  %v2828_v46 = vand.u32 2147483647, %v2816_v24 }
 0x246   : > { %4565 = vrsqrt.f32 %v7380_v63  ;;  %v2423_v51 = vadd.f32 %v2422_v42, %v2404_v28  ;;  %v2405_v50 = vpop.f32.mrf.mxu1  ;;  %vm2729_vm10 = vcmp.eq.f32.partialorder %v7380_v63, inf  ;;  %v2732_v59 = vand.u32 2147483648, %v7380_v63 }
 0x247   : > { %v2788_v21 = vmul.f32 %v2787_v13, %v7355_v60  ;;  %v2688_v15 = vmul.f32 %v4564_v2, %v2687_v6  ;;  %v2386_v49 = vpop.f32.mrf.mxu0  ;;  %vm2731_vm11 = vcmp.eq.f32.partialorder %v7380_v63, 0.0 }
 0x248   : > { %v2442_v52 = vadd.f32 %v2441_v23, %v2423_v51  ;;  %v2406_v38 = vadd.f32 %v2405_v50, %v2386_v49 }
 0x249   : > { %v2790_v33 = vsel %vm2789_vm6, %v7355_v60, %v2788_v21  ;;  %v2689_v37 = vmul.f32 0.5, %v2688_v15 }
 0x24a   : > { %v2646_v61 = vmul.f32 %v2442_v52, %v2442_v52  ;;  %v2793_v58 = vsel %vm2791_vm7, %v2792_v0, %v2790_v33 }
 0x24b   : > { %v2819_v17 = vsub.f32 %v7233_v19, %v2793_v58  ;;  %v3107_v35 = vpack.c.bf16 %v2793_v58, %v2757_v16  ;;  %v2690_v56 = vsub.f32 1.5, %v2689_v37 }
 0x24c   : > { %v4566_v3 = vpop.eup %4565  ;;  %v2658_v29 = vadd.f32 %v2646_v61, %v2634_v40 }
 0x24d   : > { %v2424_v54 = vpop.f32.mrf.mxu2  ;;  %v2831_v60 = vand.u32 2147483647, %v2819_v17  ;;  %3141 = vmatmul.bf16.vlgmr.msrb.gmra.mxu2 %v3107_v35  ;;  %v2691_v30 = vmul.f32 %v4564_v2, %v2690_v56  ;;  %v2723_v9 = vmul.f32 %v4566_v3, %v7380_v63  ;;  %v2443_v4 = vpop.f32.mrf.mxu3 }
 0x24e   : > { %4567 = vrsqrt.f32 %v2658_v29  ;;  %v2425_v43 = vadd.f32 %v2424_v54, %v2406_v38  ;;  %vm2765_vm12 = vcmp.eq.f32.partialorder %v2658_v29, inf  ;;  %vm2767_vm13 = vcmp.eq.f32.partialorder %v2658_v29, 0.0 }
 0x24f   : > { %v2837_v14 = vadd.f32 %v2831_v60, %v2828_v46  ;;  %v2692_v19 = vmul.f32 %v2691_v30, %v7371_v31  ;;  %v2724_v5 = vmul.f32 %v4566_v3, %v2723_v9  ;;  %v3055_v11 = vpop.f32.mrf.mxu0 }
 0x250   : > { %v2444_v1 = vadd.f32 %v2443_v4, %v2425_v43 }
 0x251   : > { %v2840_v48 = vadd.f32 %v2837_v14, %v2834_v27  ;;  %v2725_v53 = vmul.f32 0.5, %v2724_v5  ;;  %v2694_v45 = vsel %vm2693_vm8, %v7371_v31, %v2692_v19 }
 0x252   : > { %v2649_v8 = vmul.f32 %v2444_v1, %v2444_v1  ;;  %v2697_v34 = vsel %vm2695_vm9, %v2696_v20, %v2694_v45 }
 0x253   : > { %v2726_v18 = vsub.f32 1.5, %v2725_v53  ;;  %2846 = vst [vmem:[%s7352_s7 + $0x8] sm:$0xff] %v2840_v48  ;;  %v2811_v2 = vsub.f32 %v7175_v44, %v2697_v34  ;;  %v2768_v44 = vand.u32 2147483648, %v2658_v29 }
 0x254   : > { %v4568_v7 = vpop.eup %4567  ;;  %v2661_v36 = vadd.f32 %v2649_v8, %v2637_v57 }
 0x255   : > { %v2727_v39 = vmul.f32 %v4566_v3, %v2726_v18  ;;  %v2759_v55 = vmul.f32 %v4568_v7, %v2658_v29  ;;  %v2823_v51 = vand.u32 2147483647, %v2811_v2 }
 0x256   : > { %4569 = vrsqrt.f32 %v2661_v36  ;;  %vm2801_vm14 = vcmp.eq.f32.partialorder %v2661_v36, inf  ;;  %v2804_v24 = vand.u32 2147483648, %v2661_v36  ;;  %vm2803_vm15 = vcmp.eq.f32.partialorder %v2661_v36, 0.0 }
 0x257   : > { %v2728_v28 = vmul.f32 %v2727_v39, %v7380_v63  ;;  %v2760_v22 = vmul.f32 %v4568_v7, %v2759_v55  ;;  %v3093_v38 = vpop.f32.mrf.mxu2  ;;  %v3057_v54 = vpop.f32.mrf.mxu0 }
 0x259   : > { %v2730_v32 = vsel %vm2729_vm10, %v7380_v63, %v2728_v28  ;;  %v2761_v47 = vmul.f32 0.5, %v2760_v22 }
 0x25a   : > { %v2733_v42 = vsel %vm2731_vm11, %v2732_v59, %v2730_v32 }
 0x25b   : > { %v2814_v31 = vsub.f32 %v7161_v25, %v2733_v42  ;;  %v3105_v23 = vpack.c.bf16 %v2733_v42, %v2697_v34  ;;  %v2762_v13 = vsub.f32 1.5, %v2761_v47 }
 0x25c   : > { %v4570_v6 = vpop.eup %4569 }
 0x25d   : > { %v2826_v16 = vand.u32 2147483647, %v2814_v31  ;;  %3155 = vmatmul.bf16.vlgmr.msrb.gmra.mxu1 %v3105_v23  ;;  %v2763_v26 = vmul.f32 %v4568_v7, %v2762_v13  ;;  %v2795_v21 = vmul.f32 %v4570_v6, %v2661_v36 }
 0x25f   : > { %v2835_v15 = vadd.f32 %v2826_v16, %v2823_v51  ;;  %v2764_v10 = vmul.f32 %v2763_v26, %v2658_v29  ;;  %v2796_v52 = vmul.f32 %v4570_v6, %v2795_v21  ;;  %v3095_v30 = vpop.f32.mrf.mxu2  ;;  %v3060_v9 = vpop.f32.mrf.mxu0 }
 0x261   : > { %v2797_v0 = vmul.f32 0.5, %v2796_v52  ;;  %v2766_v63 = vsel %vm2765_vm12, %v2658_v29, %v2764_v10  ;;  %v3074_v29 = vpop.f32.mrf.mxu1 }
 0x262   : > { %v2769_v25 = vsel %vm2767_vm13, %v2768_v44, %v2766_v63  ;;  %v3075_v55 = vadd.f32 %v3074_v29, %v3055_v11 }
 0x263   : > { %v2798_v49 = vsub.f32 1.5, %v2797_v0  ;;  %v2817_v40 = vsub.f32 %v7254_v62, %v2769_v25 }
 0x264   : > { %v3094_v2 = vadd.f32 %v3093_v38, %v3075_v55 }
 0x265   : > { %v2799_v50 = vmul.f32 %v4570_v6, %v2798_v49  ;;  %v2829_v17 = vand.u32 2147483647, %v2817_v40 }
 0x267   : > { %v2800_v33 = vmul.f32 %v2799_v50, %v2661_v36  ;;  %v3098_v27 = vpop.f32.mrf.mxu2  ;;  %v3062_v4 = vpop.f32.mrf.mxu0 }
 0x269   : > { %v2802_v37 = vsel %vm2801_vm14, %v2661_v36, %v2800_v33  ;;  %v3076_v46 = vpop.f32.mrf.mxu1 }
 0x26a   : > { %v2805_v61 = vsel %vm2803_vm15, %v2804_v24, %v2802_v37  ;;  %v3077_v7 = vadd.f32 %v3076_v46, %v3057_v54 }
 0x26b   : > { %v2820_v58 = vsub.f32 %v7244_v12, %v2805_v61  ;;  %v3108_v41 = vpack.c.bf16 %v2805_v61, %v2769_v25 }
 0x26c   : > { %v3096_v28 = vadd.f32 %v3095_v30, %v3077_v7 }
 0x26d   : > { %v2832_v35 = vand.u32 2147483647, %v2820_v58  ;;  %3160 = vmatmul.bf16.vlgmr.msrb.gmra.mxu3 %v3108_v41 }
 0x26f   : > { %v2838_v56 = vadd.f32 %v2832_v35, %v2829_v17  ;;  %v3100_v19 = vpop.f32.mrf.mxu2 }
 0x271   : > { %v2841_v3 = vadd.f32 %v2838_v56, %v2835_v15  ;;  %v3079_v43 = vpop.f32.mrf.mxu1 }
 0x272   : > { %v3080_v22 = vadd.f32 %v3079_v43, %v3060_v9 }
 0x273   : > { %2847 = vst [vmem:[%s7352_s7 + $0x10] sm:$0xff] %v2841_v3 }
 0x274   : > { %v3099_v47 = vadd.f32 %v3098_v27, %v3080_v22 }
 0x279   : > { %v3081_v12 = vpop.f32.mrf.mxu1 }
 0x27a   : > { %v3082_v42 = vadd.f32 %v3081_v12, %v3062_v4 }
 0x27c   : > { %v3101_v6 = vadd.f32 %v3100_v19, %v3082_v42 }
 0x2a0   : > { %v3118_v60 = vpop.f32.mrf.mxu3 }
 0x2a8   : > { %v3120_v62 = vpop.f32.mrf.mxu3 }
 0x2b0   : > { %v3123_v14 = vpop.f32.mrf.mxu3 }
 0x2b8   : > { %v3125_v48 = vpop.f32.mrf.mxu3 }
 0x2ba   : > { %v3137_v5 = vpop.f32.mrf.mxu0 }
 0x2bb   : > { %v3138_v36 = vadd.f32 %v3137_v5, %v3118_v60 }
 0x2c2   : > { %v3139_v57 = vpop.f32.mrf.mxu0 }
 0x2c3   : > { %v3140_v18 = vadd.f32 %v3139_v57, %v3120_v62 }
 0x2d0   : > { %v3142_v53 = vpop.f32.mrf.mxu2 }
 0x2d1   : > { %v3143_v20 = vadd.f32 %v3142_v53, %v3123_v14 }
 0x2d8   : > { %v3144_v34 = vpop.f32.mrf.mxu2 }
 0x2d9   : > { %v3145_v31 = vadd.f32 %v3144_v34, %v3125_v48 }
 0x2da   : > { %v3156_v1 = vpop.f32.mrf.mxu1 }
 0x2db   : > { %v3157_v59 = vadd.f32 %v3156_v1, %v3138_v36 }
 0x2dd   : > { %v3167_v51 = vsub.f32 %v3094_v2, %v3157_v59 }
 0x2df   : > { %v3171_v10 = vand.u32 2147483647, %v3167_v51 }
 0x2e2   : > { %v3158_v8 = vpop.f32.mrf.mxu1 }
 0x2e3   : > { %v3159_v39 = vadd.f32 %v3158_v8, %v3140_v18 }
 0x2e5   : > { %v3168_v23 = vsub.f32 %v3096_v28, %v3159_v39 }
 0x2e7   : > { %v3172_v21 = vand.u32 2147483647, %v3168_v23 }
 0x2e9   : > { %v3175_v63 = vadd.f32 %v3172_v21, %v3171_v10 }
 0x2f0   : > { %v3161_v45 = vpop.f32.mrf.mxu3 }
 0x2f1   : > { %v3162_v32 = vadd.f32 %v3161_v45, %v3143_v20 }
 0x2f3   : > { %v3169_v16 = vsub.f32 %v3099_v47, %v3162_v32 }
 0x2f5   : > { %v3173_v52 = vand.u32 2147483647, %v3169_v16 }
 0x2f8   : > { %v3163_v13 = vpop.f32.mrf.mxu3 }
 0x2f9   : > { %v3164_v26 = vadd.f32 %v3163_v13, %v3145_v31 }
 0x2fb   : > { %v3170_v15 = vsub.f32 %v3101_v6, %v3164_v26 }
 0x2fd   : > { %v3174_v0 = vand.u32 2147483647, %v3170_v15 }
 0x2ff   : > { %v3176_v49 = vadd.f32 %v3174_v0, %v3173_v52 }
 0x301   : > { %v3177_v44 = vadd.f32 %v3176_v49, %v3175_v63 }
 0x303   : > { %3179 = vst [vmem:[%s276_s10] sm:$0xff] %v3177_v44 }
 0x304 PF: > { %s15_s19 = sadd.s32 1, %s4609_s19   ;;  %s7913_s15 = smov %s4597_s16 }
 0x305   : > { %p12_p10 = scmp.ge.s32.totalorder %s15_s19, 4   ;;  %s7914_s16 = smov %s4671_s23 }
 0x306   : > { %s7915_s17 = smov %s4605_s18  ;;  %s7916_s18 = smov %s7918_s20 }
 0x307   :  { %14 = sbr.rel (!%p12_p10) target bundleno = 3 (0x3), region = 107 }

// kernel: spectral_distances_forward.4
= control target key start
LH: loop header
LB: loop body
LE: loop exit
PB: predicated region body
PF: predicated region fallthrough
CT: control target
= control target key end

     0   :  { %s2550_s15 = smov 0   ;;  %s2552_s16 = smov 0   ;;  %s3837_s0 = inlined_call_operand.vmem [shape: bf16[2,96,256], index: 0, kind: input, shape index: {}]   ;;  %s3838_s1 = inlined_call_operand.vmem [shape: bf16[256,512], index: 1, kind: input, shape index: {}]   ;;  %s3839_s2 = inlined_call_operand.vmem [shape: bf16[256,128], index: 2, kind: input, shape index: {}]   ;;  %s3840_s3 = inlined_call_operand.vmem [shape: f32[2,8,256], index: 3, kind: output, shape index: {0}]   ;;  %s3841_s4 = inlined_call_operand.vmem [shape: f32[2,8,128], index: 4, kind: output, shape index: {1}]  }
   0x1   :  { %s2554_s17 = smov 0   ;;  %s2556_s18 = smov 0  }
   0x2   :  { %s2558_s19 = smov 0  }
   0x3 LB: > { %s27_s20 = sadd.s32 1, %s2519_s18  ;;  %p43_p1 = scmp.ne.s32.totalorder %s2511_s16, %s2507_s15  ;;  %s2523_s19 = sphi %s2558_s19, %s15_s19   ;;  %s2519_s18 = sphi %s2556_s18, %s3887_s18   ;;  %s2515_s17 = sphi %s2554_s17, %s3886_s17   ;;  %s2511_s16 = sphi %s2552_s16, %s3885_s16   ;;  %s2507_s15 = sphi %s2550_s15, %s3884_s15  }
   0x4   : > { %p29_p0 = scmp.ge.s32.totalorder %s27_s20, 2  ;;  %p44_p2 = scmp.eq.s32.totalorder %s2523_s19, 0 }
   0x5   : > { %s36_s22 = sadd.s32 1, %s2511_s16  ;;  %p1915_p5 = scmp.ge.s32.totalorder %s2523_s19, 2 }
   0x6   : > { %s3889_s20 = smov (%p29_p0, %s27_s20), 0  ;;  %p45_p3 = por %p44_p2, %p43_p1 }
   0x7   : > { %s33_s21 = ssub.s32 %s2519_s18, %s3889_s20  ;;  %169 = sbr.rel (%p1915_p5) target bundleno = 29 (0x1d), region = 24 }
   0x8   : > { %p34_p4 = scmp.eq.s32.totalorder %s33_s21, 0 }
   0xa   : > { %s2585_s23 = scalar_select %p34_p4, %s2511_s16, %s36_s22  }
   0xc   : > { %172 = sbr.rel (!%p45_p3) target bundleno = 29 (0x1d), region = 28  ;;  %s174_s24 = sand.u32 (%p45_p3), 1, %s2511_s16  }
   0xd   : > { %s2393_s25 = smul.u32 (%p45_p3), 48, %s2519_s18 }
   0xe   : > { %s2394_s26 = smul.u32 (%p45_p3), 96, %s174_s24 }
   0xf   : > { %s181_s29 = scalar_lea.vmem (%p45_p3), %s3837_s0, %s2393_s25 }
  0x10   : > { %v232_v0 = vld [vmem:[%s181_s29] sm:$0xff] (%p45_p3)  ;;  %v234_v1 = vld [vmem:[%s181_s29 + $0x8] sm:$0xff] (%p45_p3)  ;;  %v236_v2 = vld [vmem:[%s181_s29 + $0x10] sm:$0xff] (%p45_p3)  ;;  %s176_s30 = scalar_lea.vmem (%p45_p3), [#allocation2], %s2394_s26 }
  0x11   : > { %233 = vst [vmem:[%s176_s30] sm:$0xff] %v232_v0  ;;  %v238_v3 = vld [vmem:[%s181_s29 + $0x18] sm:$0xff]  ;;  %v240_v4 = vld [vmem:[%s181_s29 + $0x20] sm:$0xff]  ;;  %v242_v5 = vld [vmem:[%s181_s29 + $0x28] sm:$0xff] }
  0x12   : > { %235 = vst [vmem:[%s176_s30 + $0x8] sm:$0xff] %v234_v1  ;;  %v244_v6 = vld [vmem:[%s181_s29 + $0x60] sm:$0xff]  ;;  %v246_v7 = vld [vmem:[%s181_s29 + $0x68] sm:$0xff]  ;;  %v248_v8 = vld [vmem:[%s181_s29 + $0x70] sm:$0xff] }
  0x13   : > { %237 = vst [vmem:[%s176_s30 + $0x10] sm:$0xff] %v236_v2  ;;  %v250_v9 = vld [vmem:[%s181_s29 + $0x78] sm:$0xff]  ;;  %v252_v10 = vld [vmem:[%s181_s29 + $0x80] sm:$0xff]  ;;  %v254_v11 = vld [vmem:[%s181_s29 + $0x88] sm:$0xff] }
  0x14   : > { %239 = vst [vmem:[%s176_s30 + $0x18] sm:$0xff] %v238_v3 }
  0x15   : > { %241 = vst [vmem:[%s176_s30 + $0x20] sm:$0xff] %v240_v4 }
  0x16   : > { %243 = vst [vmem:[%s176_s30 + $0x28] sm:$0xff] %v242_v5 }
  0x17   : > { %245 = vst [vmem:[%s176_s30 + $0x30] sm:$0xff] %v244_v6 }
  0x18   : > { %247 = vst [vmem:[%s176_s30 + $0x38] sm:$0xff] %v246_v7 }
  0x19   : > { %249 = vst [vmem:[%s176_s30 + $0x40] sm:$0xff] %v248_v8 }
  0x1a   : > { %251 = vst [vmem:[%s176_s30 + $0x48] sm:$0xff] %v250_v9 }
  0x1b   : > { %253 = vst [vmem:[%s176_s30 + $0x50] sm:$0xff] %v252_v10 }
  0x1c   : > { %255 = vst [vmem:[%s176_s30 + $0x58] sm:$0xff] %v254_v11 }
  0x1d PF: > { %p1918_p6 = scmp.ge.s32.totalorder %s2523_s19, 1  ;;  %p260_p7 = scmp.lt.s32.totalorder %s2523_s19, 3 }
  0x1f   : > { %p261_p8 = pnand %p1918_p6, %p260_p7 }
  0x21   : > { %264 = sbr.rel (%p261_p8) target bundleno = 570 (0x23a), region = 66 }
  0x26   : > { %v2060_v12 = vld [vmem:[%s3838_s1 + $0xe0] sm:$0xf]  ;;  %v2331_v13 = vld [vmem:[%s3838_s1 + $0xec] sm:$0xf0]  ;;  %v2329_v17 = vld [vmem:[%s3838_s1 + $0xe4] sm:$0xf] }
  0x27   : > { %v2188_v14 = vld [vmem:[%s3838_s1 + $0x1e0] sm:$0xf]  ;;  %v2604_v15 = vor.u32 %v2331_v13, %v2060_v12  ;;  %v2363_v16 = vld [vmem:[%s3838_s1 + $0x1ec] sm:$0xf0]  ;;  %v2062_v18 = vld [vmem:[%s3838_s1 + $0xf0] sm:$0xf0] }
  0x28   : > { %v2615_v19 = vor.u32 %v2363_v16, %v2188_v14  ;;  %v2617_v20 = vor.u32 %v2329_v17, %v2062_v18  ;;  %v2361_v21 = vld [vmem:[%s3838_s1 + $0x1e4] sm:$0xf]  ;;  %v2190_v22 = vld [vmem:[%s3838_s1 + $0x1f0] sm:$0xf0]  ;;  %v2044_v23 = vld [vmem:[%s3838_s1 + $0xc0] sm:$0xf] }
  0x29   : > { %734 = vmatpush.bf16.msra.mxu0 %v2604_v15  ;;  %v2629_v24 = vor.u32 %v2361_v21, %v2190_v22  ;;  %v2327_v25 = vld [vmem:[%s3838_s1 + $0xcc] sm:$0xf0]  ;;  %v2172_v26 = vld [vmem:[%s3838_s1 + $0x1c0] sm:$0xf]  ;;  %v2325_v30 = vld [vmem:[%s3838_s1 + $0xc4] sm:$0xf] }
  0x2a   : > { %v2359_v27 = vld [vmem:[%s3838_s1 + $0x1cc] sm:$0xf0]  ;;  %758 = vmatpush.bf16.msra.mxu1 %v2615_v19  ;;  %782 = vmatpush.bf16.msra.mxu2 %v2617_v20  ;;  %v2642_v28 = vor.u32 %v2327_v25, %v2044_v23  ;;  %v2046_v31 = vld [vmem:[%s3838_s1 + $0xd0] sm:$0xf0]  ;;  %v2357_v32 = vld [vmem:[%s3838_s1 + $0x1c4] sm:$0xf] }
  0x2b   : > { %v2644_v29 = vor.u32 %v2359_v27, %v2172_v26  ;;  %806 = vmatpush.bf16.msra.mxu3 %v2629_v24  ;;  %v2656_v33 = vor.u32 %v2325_v30, %v2046_v31  ;;  %v2174_v34 = vld [vmem:[%s3838_s1 + $0x1d0] sm:$0xf0]  ;;  %v2028_v35 = vld [vmem:[%s3838_s1 + $0xa0] sm:$0xf]  ;;  %v2323_v36 = vld [vmem:[%s3838_s1 + $0xac] sm:$0xf0] }
  0x2c   : > { %v2667_v37 = vor.u32 %v2357_v32, %v2174_v34  ;;  %v2156_v38 = vld [vmem:[%s3838_s1 + $0x1a0] sm:$0xf]  ;;  %v2355_v39 = vld [vmem:[%s3838_s1 + $0x1ac] sm:$0xf0]  ;;  %v2321_v40 = vld [vmem:[%s3838_s1 + $0xa4] sm:$0xf]  ;;  %v2679_v41 = vor.u32 %v2323_v36, %v2028_v35 }
  0x2d   : > { %735 = vmatpush.bf16.msra.mxu0 %v2642_v28  ;;  %v2030_v42 = vld [vmem:[%s3838_s1 + $0xb0] sm:$0xf0]  ;;  %v2353_v43 = vld [vmem:[%s3838_s1 + $0x1a4] sm:$0xf]  ;;  %v2692_v45 = vor.u32 %v2355_v39, %v2156_v38  ;;  %v2012_v47 = vld [vmem:[%s3838_s1 + $0x80] sm:$0xf] }
  0x2e   : > { %v2158_v44 = vld [vmem:[%s3838_s1 + $0x1b0] sm:$0xf0]  ;;  %759 = vmatpush.bf16.msra.mxu1 %v2644_v29  ;;  %783 = vmatpush.bf16.msra.mxu2 %v2656_v33  ;;  %v2694_v46 = vor.u32 %v2321_v40, %v2030_v42  ;;  %v2319_v48 = vld [vmem:[%s3838_s1 + $0x8c] sm:$0xf0]  ;;  %v2140_v49 = vld [vmem:[%s3838_s1 + $0x180] sm:$0xf] }
  0x2f   : > { %807 = vmatpush.bf16.msra.mxu3 %v2667_v37  ;;  %v2706_v50 = vor.u32 %v2353_v43, %v2158_v44  ;;  %v2351_v51 = vld [vmem:[%s3838_s1 + $0x18c] sm:$0xf0]  ;;  %v2317_v52 = vld [vmem:[%s3838_s1 + $0x84] sm:$0xf]  ;;  %v2014_v53 = vld [vmem:[%s3838_s1 + $0x90] sm:$0xf0]  ;;  %v2724_v56 = vor.u32 %v2319_v48, %v2012_v47 }
  0x30   : > { %v2349_v54 = vld [vmem:[%s3838_s1 + $0x184] sm:$0xf]  ;;  %v2142_v55 = vld [vmem:[%s3838_s1 + $0x190] sm:$0xf0]  ;;  %v2728_v57 = vor.u32 %v2351_v51, %v2140_v49  ;;  %v2730_v58 = vor.u32 %v2317_v52, %v2014_v53  ;;  %v1996_v59 = vld [vmem:[%s3838_s1 + $0x60] sm:$0xf] }
  0x31   : > { %736 = vmatpush.bf16.msra.mxu0 %v2679_v41  ;;  %v2315_v60 = vld [vmem:[%s3838_s1 + $0x6c] sm:$0xf0]  ;;  %v2124_v61 = vld [vmem:[%s3838_s1 + $0x160] sm:$0xf]  ;;  %v2742_v62 = vor.u32 %v2349_v54, %v2142_v55  ;;  %v2313_v0 = vld [vmem:[%s3838_s1 + $0x64] sm:$0xf] }
  0x32   : > { %760 = vmatpush.bf16.msra.mxu1 %v2692_v45  ;;  %784 = vmatpush.bf16.msra.mxu2 %v2694_v46  ;;  %v2347_v63 = vld [vmem:[%s3838_s1 + $0x16c] sm:$0xf0]  ;;  %v1998_v1 = vld [vmem:[%s3838_s1 + $0x70] sm:$0xf0]  ;;  %v2345_v2 = vld [vmem:[%s3838_s1 + $0x164] sm:$0xf]  ;;  %v2760_v4 = vor.u32 %v2315_v60, %v1996_v59 }
  0x33   : > { %808 = vmatpush.bf16.msra.mxu3 %v2706_v50  ;;  %v2126_v3 = vld [vmem:[%s3838_s1 + $0x170] sm:$0xf0]  ;;  %v2764_v5 = vor.u32 %v2347_v63, %v2124_v61  ;;  %v2766_v6 = vor.u32 %v2313_v0, %v1998_v1  ;;  %v1980_v7 = vld [vmem:[%s3838_s1 + $0x40] sm:$0xf]  ;;  %v2311_v8 = vld [vmem:[%s3838_s1 + $0x4c] sm:$0xf0] }
  0x34   : > { %v2108_v9 = vld [vmem:[%s3838_s1 + $0x140] sm:$0xf]  ;;  %v2778_v10 = vor.u32 %v2345_v2, %v2126_v3  ;;  %v2343_v11 = vld [vmem:[%s3838_s1 + $0x14c] sm:$0xf0]  ;;  %v2309_v12 = vld [vmem:[%s3838_s1 + $0x44] sm:$0xf]  ;;  %v2796_v17 = vor.u32 %v2311_v8, %v1980_v7 }
  0x35   : > { %737 = vmatpush.bf16.msra.mxu0 %v2724_v56  ;;  %v1982_v13 = vld [vmem:[%s3838_s1 + $0x50] sm:$0xf0]  ;;  %v2341_v14 = vld [vmem:[%s3838_s1 + $0x144] sm:$0xf]  ;;  %v1964_v18 = vld [vmem:[%s3838_s1 + $0x20] sm:$0xf]  ;;  %v2803_v21 = vor.u32 %v2343_v11, %v2108_v9 }
  0x36   : > { %761 = vmatpush.bf16.msra.mxu1 %v2728_v57  ;;  %785 = vmatpush.bf16.msra.mxu2 %v2730_v58  ;;  %v2110_v16 = vld [vmem:[%s3838_s1 + $0x150] sm:$0xf0]  ;;  %v2805_v22 = vor.u32 %v2309_v12, %v1982_v13  ;;  %v2307_v23 = vld [vmem:[%s3838_s1 + $0x2c] sm:$0xf0]  ;;  %v2092_v25 = vld [vmem:[%s3838_s1 + $0x120] sm:$0xf] }
  0x37   : > { %809 = vmatpush.bf16.msra.mxu3 %v2742_v62  ;;  %v2339_v26 = vld [vmem:[%s3838_s1 + $0x12c] sm:$0xf0]  ;;  %v2817_v27 = vor.u32 %v2341_v14, %v2110_v16  ;;  %v2305_v30 = vld [vmem:[%s3838_s1 + $0x24] sm:$0xf]  ;;  %v1966_v31 = vld [vmem:[%s3838_s1 + $0x30] sm:$0xf0]  ;;  %v2833_v35 = vor.u32 %v2307_v23, %v1964_v18 }
  0x38   : > { %s267_s25 = sand.u32 1, %s2507_s15   ;;  %v2337_v32 = vld [vmem:[%s3838_s1 + $0x124] sm:$0xf]  ;;  %v2094_v34 = vld [vmem:[%s3838_s1 + $0x130] sm:$0xf0]  ;;  %v2846_v40 = vor.u32 %v2339_v26, %v2092_v25  ;;  %v2848_v42 = vor.u32 %v2305_v30, %v1966_v31  ;;  %p298_p9 = scmp.lt.s32.totalorder %s2515_s17, 1 }
  0x39   : > { %738 = vmatpush.bf16.msra.mxu0 %v2760_v4  ;;  %s2395_s30 = smul.u32 96, %s267_s25  ;;  %v1948_v36 = vld [vmem:[%s3838_s1] sm:$0xf]  ;;  %v2303_v38 = vld [vmem:[%s3838_s1 + $0xc] sm:$0xf0]  ;;  %v2857_v47 = vor.u32 %v2337_v32, %v2094_v34 }
  0x3a   : > { %762 = vmatpush.bf16.msra.mxu1 %v2764_v5  ;;  %786 = vmatpush.bf16.msra.mxu2 %v2766_v6  ;;  %v2076_v39 = vld [vmem:[%s3838_s1 + $0x100] sm:$0xf]  ;;  %v2335_v43 = vld [vmem:[%s3838_s1 + $0x10c] sm:$0xf0]  ;;  %v2301_v44 = vld [vmem:[%s3838_s1 + $0x4] sm:$0xf]  ;;  %v2878_v55 = vor.u32 %v2303_v38, %v1948_v36 }
  0x3b   : > { %810 = vmatpush.bf16.msra.mxu3 %v2778_v10  ;;  %v1950_v48 = vld [vmem:[%s3838_s1 + $0x10] sm:$0xf0]  ;;  %v2333_v49 = vld [vmem:[%s3838_s1 + $0x104] sm:$0xf]  ;;  %v2330_v52 = vld [vmem:[%s3838_s1 + $0xec] sm:$0xf]  ;;  %v2889_v63 = vor.u32 %v2335_v43, %v2076_v39 }
  0x3c   : > { %v2078_v51 = vld [vmem:[%s3838_s1 + $0x110] sm:$0xf0]  ;;  %v2070_v53 = vld [vmem:[%s3838_s1 + $0xf8] sm:$0xf0]  ;;  %v2362_v54 = vld [vmem:[%s3838_s1 + $0x1ec] sm:$0xf]  ;;  %v2891_v0 = vor.u32 %v2301_v44, %v1950_v48 }
  0x3d   : > { %739 = vmatpush.bf16.msra.mxu0 %v2796_v17  ;;  %s2880_s8 = scalar_lea.vmem [#allocation2], %s2395_s30  ;;  %v2198_v61 = vld [vmem:[%s3838_s1 + $0x1f8] sm:$0xf0]  ;;  %v2896_v3 = vor.u32 %v2333_v49, %v2078_v51  ;;  %v2898_v7 = vor.u32 %v2330_v52, %v2070_v53  ;;  %v2068_v8 = vld [vmem:[%s3838_s1 + $0xe8] sm:$0xf]  ;;  %s3891_s17 = smov (!%p298_p9, %s2515_s17), 1 }
  0x3e   : > { %763 = vmatpush.bf16.msra.mxu1 %v2803_v21  ;;  %787 = vmatpush.bf16.msra.mxu2 %v2805_v22  ;;  %v1924_v59 = vld [vmem:[%s2880_s8] sm:$0xf]  ;;  %v2366_v60 = vld [vmem:[%s2880_s8 + $0x4] sm:$0xf0]  ;;  %v2365_v1 = vld [vmem:[%s2880_s8 + $0x4] sm:$0xf]  ;;  %v2911_v13 = vor.u32 %v2362_v54, %v2198_v61 }
  0x3f   : > { %811 = vmatpush.bf16.msra.mxu3 %v2817_v27  ;;  %v1926_v2 = vld [vmem:[%s2880_s8 + $0x8] sm:$0xf0]  ;;  %v2332_v9 = vld [vmem:[%s3838_s1 + $0xf4] sm:$0xf0]  ;;  %v2196_v11 = vld [vmem:[%s3838_s1 + $0x1e8] sm:$0xf]  ;;  %v2909_v12 = vor.u32 %v2366_v60, %v1924_v59 }
  0x40   : > { %v2364_v14 = vld [vmem:[%s3838_s1 + $0x1f4] sm:$0xf0]  ;;  %v2326_v16 = vld [vmem:[%s3838_s1 + $0xcc] sm:$0xf]  ;;  %v2054_v18 = vld [vmem:[%s3838_s1 + $0xd8] sm:$0xf0]  ;;  %v2923_v23 = vor.u32 %v2365_v1, %v1926_v2  ;;  %v2933_v30 = vor.u32 %v2332_v9, %v2068_v8 }
  0x41   : > { %740 = vmatpush.bf16.msra.mxu0 %v2833_v35  ;;  %v2358_v25 = vld [vmem:[%s3838_s1 + $0x1cc] sm:$0xf]  ;;  %v2182_v26 = vld [vmem:[%s3838_s1 + $0x1d8] sm:$0xf0]  ;;  %v2937_v31 = vor.u32 %v2364_v14, %v2196_v11  ;;  %v2939_v32 = vor.u32 %v2326_v16, %v2054_v18  ;;  %v2052_v34 = vld [vmem:[%s3838_s1 + $0xc8] sm:$0xf] }
  0x42   : > { %764 = vmatpush.bf16.msra.mxu1 %v2846_v40  ;;  %788 = vmatpush.bf16.msra.mxu2 %v2848_v42  ;;  %v2328_v36 = vld [vmem:[%s3838_s1 + $0xd4] sm:$0xf0]  ;;  %v2180_v38 = vld [vmem:[%s3838_s1 + $0x1c8] sm:$0xf]  ;;  %v2952_v39 = vor.u32 %v2358_v25, %v2182_v26  ;;  %v2322_v44 = vld [vmem:[%s3838_s1 + $0xac] sm:$0xf] }
  0x43   : > { %812 = vmatpush.bf16.msra.mxu3 %v2857_v47  ;;  %v2360_v43 = vld [vmem:[%s3838_s1 + $0x1d4] sm:$0xf0]  ;;  %v2038_v48 = vld [vmem:[%s3838_s1 + $0xb8] sm:$0xf0]  ;;  %v2354_v49 = vld [vmem:[%s3838_s1 + $0x1ac] sm:$0xf]  ;;  %v2973_v52 = vor.u32 %v2328_v36, %v2052_v34 }
  0x44   : > { %v2166_v51 = vld [vmem:[%s3838_s1 + $0x1b8] sm:$0xf0]  ;;  %v2977_v53 = vor.u32 %v2360_v43, %v2180_v38  ;;  %v2979_v54 = vor.u32 %v2322_v44, %v2038_v48  ;;  %v2036_v59 = vld [vmem:[%s3838_s1 + $0xa8] sm:$0xf]  ;;  %v2324_v60 = vld [vmem:[%s3838_s1 + $0xb4] sm:$0xf0] }
  0x45   : > { %741 = vmatpush.bf16.msra.mxu0 %v2878_v55  ;;  %v2164_v61 = vld [vmem:[%s3838_s1 + $0x1a8] sm:$0xf]  ;;  %v2991_v1 = vor.u32 %v2354_v49, %v2166_v51  ;;  %v2356_v2 = vld [vmem:[%s3838_s1 + $0x1b4] sm:$0xf0]  ;;  %v2318_v8 = vld [vmem:[%s3838_s1 + $0x8c] sm:$0xf]  ;;  %v3009_v16 = vor.u32 %v2324_v60, %v2036_v59 }
  0x46   : > { %765 = vmatpush.bf16.msra.mxu1 %v2889_v63  ;;  %789 = vmatpush.bf16.msra.mxu2 %v2891_v0  ;;  %v2022_v9 = vld [vmem:[%s3838_s1 + $0x98] sm:$0xf0]  ;;  %v2350_v11 = vld [vmem:[%s3838_s1 + $0x18c] sm:$0xf]  ;;  %v1932_v18 = vld [vmem:[%s2880_s8 + $0x10] sm:$0xf]  ;;  %v3014_v25 = vor.u32 %v2356_v2, %v2164_v61 }
  0x47   : > { %813 = vmatpush.bf16.msra.mxu3 %v2896_v3  ;;  %3856 = vst [vmem:[#allocation3_spill] sm:$0xff] %v2991_v1  ;;  %v2150_v14 = vld [vmem:[%s3838_s1 + $0x198] sm:$0xf0]  ;;  %v3016_v26 = vor.u32 %v2318_v8, %v2022_v9  ;;  %v2020_v34 = vld [vmem:[%s3838_s1 + $0x88] sm:$0xf]  ;;  %s2300_s15 = sshll.u32 %s3891_s17, 4 }
  0x48   : > { %742 = vmatmul.bf16.vlgmr.msra.gmra.mxu0 %v2909_v12  ;;  %v2320_v36 = vld [vmem:[%s3838_s1 + $0x94] sm:$0xf0]  ;;  %v2148_v38 = vld [vmem:[%s3838_s1 + $0x188] sm:$0xf]  ;;  %v3028_v43 = vor.u32 %v2350_v11, %v2150_v14  ;;  %v2314_v48 = vld [vmem:[%s3838_s1 + $0x6c] sm:$0xf]  ;;  %s302_s10 = scalar_lea.vmem %s3840_s3, %s2300_s15 }
  0x49   : > { %766 = vmatmul.bf16.vlgmr.msra.gmra.mxu1 %v2923_v23  ;;  %790 = vmatmul.bf16.vlgmr.msra.gmra.mxu2 %v2909_v12  ;;  %3857 = vst [vmem:[#allocation4_spill] sm:$0xff] %v3016_v26  ;;  %v2352_v44 = vld [vmem:[%s3838_s1 + $0x194] sm:$0xf0]  ;;  %v2006_v49 = vld [vmem:[%s3838_s1 + $0x78] sm:$0xf0]  ;;  %v3049_v8 = vor.u32 %v2320_v36, %v2020_v34  ;;  %s1921_s11 = sshll.u32 %s3891_s17, 3 }
  0x4a   : > { %878 = vmatpush.bf16.msrb.mxu2 %v2898_v7  ;;  %814 = vmatmul.bf16.vlgmr.msra.gmra.mxu3 %v2923_v23  ;;  %3858 = vst [vmem:[#allocation5_spill] sm:$0xff] %v3028_v43  ;;  %v2368_v51 = vld [vmem:[%s2880_s8 + $0x14] sm:$0xf0]  ;;  %v2346_v59 = vld [vmem:[%s3838_s1 + $0x16c] sm:$0xf]  ;;  %v3053_v9 = vor.u32 %v2352_v44, %v2148_v38  ;;  %v3055_v11 = vor.u32 %v2314_v48, %v2006_v49  ;;  %s306_s14 = scalar_lea.vmem %s3841_s4, %s1921_s11 }
  0x4b   : > { %902 = vmatpush.bf16.msrb.mxu3 %v2911_v13  ;;  %830 = vmatpush.bf16.msrb.mxu0 %v2933_v30  ;;  %v2134_v60 = vld [vmem:[%s3838_s1 + $0x178] sm:$0xf0]  ;;  %v2367_v61 = vld [vmem:[%s2880_s8 + $0x14] sm:$0xf]  ;;  %3859 = vst [vmem:[#allocation6_spill] sm:$0xff] %v3049_v8  ;;  %v3066_v36 = vor.u32 %v2368_v51, %v1932_v18 }
  0x4c   : > { %854 = vmatpush.bf16.msrb.mxu1 %v2937_v31  ;;  %v1934_v2 = vld [vmem:[%s2880_s8 + $0x18] sm:$0xf0]  ;;  %3860 = vst [vmem:[#allocation7_spill] sm:$0xff] %v3053_v9  ;;  %v2004_v14 = vld [vmem:[%s3838_s1 + $0x68] sm:$0xf]  ;;  %v3069_v38 = vor.u32 %v2346_v59, %v2134_v60 }
  0x4d   : > { %3861 = vst [vmem:[#allocation8_spill] sm:$0xff] %v3055_v11  ;;  %v2132_v34 = vld [vmem:[%s3838_s1 + $0x168] sm:$0xf]  ;;  %v2348_v44 = vld [vmem:[%s3838_s1 + $0x174] sm:$0xf0] }
  0x4e   : > { %879 = vmatpush.bf16.msrb.mxu2 %v2939_v32  ;;  %3862 = vst [vmem:[#allocation9_spill] sm:$0xff] %v3069_v38  ;;  %v2310_v48 = vld [vmem:[%s3838_s1 + $0x4c] sm:$0xf]  ;;  %v1990_v49 = vld [vmem:[%s3838_s1 + $0x58] sm:$0xf0]  ;;  %v3093_v60 = vor.u32 %v2348_v44, %v2132_v34 }
  0x4f   : > { %903 = vmatpush.bf16.msrb.mxu3 %v2952_v39  ;;  %831 = vmatpush.bf16.msrb.mxu0 %v2973_v52  ;;  %v2342_v18 = vld [vmem:[%s3838_s1 + $0x14c] sm:$0xf]  ;;  %v2118_v51 = vld [vmem:[%s3838_s1 + $0x158] sm:$0xf0]  ;;  %v2344_v34 = vld [vmem:[%s3838_s1 + $0x154] sm:$0xf0] }
  0x50   : > { %855 = vmatpush.bf16.msrb.mxu1 %v2977_v53  ;;  %3864 = vst [vmem:[#allocation11_spill] sm:$0xff] %v3093_v60  ;;  %v2306_v44 = vld [vmem:[%s3838_s1 + $0x2c] sm:$0xf] }
  0x52   : > { %880 = vmatpush.bf16.msrb.mxu2 %v2979_v54 }
  0x53   : > { %904 = vmatpush.bf16.msrb.mxu3 %v2991_v1  ;;  %832 = vmatpush.bf16.msrb.mxu0 %v3009_v16  ;;  %v2316_v1 = vld [vmem:[%s3838_s1 + $0x74] sm:$0xf0] }
  0x54   : > { %856 = vmatpush.bf16.msrb.mxu1 %v3014_v25  ;;  %v3089_v59 = vor.u32 %v2316_v1, %v2004_v14  ;;  %v2116_v1 = vld [vmem:[%s3838_s1 + $0x148] sm:$0xf]  ;;  %v3108_v14 = vor.u32 %v2342_v18, %v2118_v51  ;;  %v2102_v18 = vld [vmem:[%s3838_s1 + $0x138] sm:$0xf0] }
  0x56   : > { %881 = vmatpush.bf16.msrb.mxu2 %v3016_v26  ;;  %v3080_v26 = vor.u32 %v2367_v61, %v1934_v2  ;;  %3863 = vst [vmem:[#allocation10_spill] sm:$0xff] %v3089_v59  ;;  %v3095_v61 = vor.u32 %v2310_v48, %v1990_v49  ;;  %v1988_v2 = vld [vmem:[%s3838_s1 + $0x48] sm:$0xf]  ;;  %v1974_v48 = vld [vmem:[%s3838_s1 + $0x38] sm:$0xf0] }
  0x57   : > { %905 = vmatpush.bf16.msrb.mxu3 %v3028_v43  ;;  %833 = vmatpush.bf16.msrb.mxu0 %v3049_v8  ;;  %v2312_v43 = vld [vmem:[%s3838_s1 + $0x54] sm:$0xf0]  ;;  %3866 = vst [vmem:[#allocation13_spill] sm:$0xff] %v3108_v14  ;;  %v2338_v49 = vld [vmem:[%s3838_s1 + $0x12c] sm:$0xf] }
  0x58   : > { %857 = vmatpush.bf16.msrb.mxu1 %v3053_v9  ;;  %3865 = vst [vmem:[#allocation12_spill] sm:$0xff] %v3095_v61  ;;  %747 = vmatmul.bf16.gmra.mxu0 %v3066_v36  ;;  %v3129_v51 = vor.u32 %v2312_v43, %v1988_v2  ;;  %v1972_v9 = vld [vmem:[%s3838_s1 + $0x28] sm:$0xf]  ;;  %v2308_v8 = vld [vmem:[%s3838_s1 + $0x34] sm:$0xf0]  ;;  %v3147_v2 = vor.u32 %v2338_v49, %v2102_v18 }
  0x59   : > { %771 = vmatmul.bf16.gmra.mxu1 %v3080_v26  ;;  %795 = vmatmul.bf16.gmra.mxu2 %v3066_v36  ;;  %v2100_v43 = vld [vmem:[%s3838_s1 + $0x128] sm:$0xf]  ;;  %v2086_v49 = vld [vmem:[%s3838_s1 + $0x118] sm:$0xf0]  ;;  %v3165_v18 = vor.u32 %v2308_v8, %v1972_v9 }
  0x5a   : > { %882 = vmatpush.bf16.msrb.mxu2 %v3055_v11  ;;  %819 = vmatmul.bf16.gmra.mxu3 %v3080_v26  ;;  %v3135_v11 = vor.u32 %v2306_v44, %v1974_v48  ;;  %3869 = vst [vmem:[#allocation16_spill] sm:$0xff] %v3147_v2  ;;  %v1958_v44 = vld [vmem:[%s3838_s1 + $0x18] sm:$0xf0]  ;;  %v2334_v48 = vld [vmem:[%s3838_s1 + $0x10c] sm:$0xf] }
  0x5b   : > { %906 = vmatpush.bf16.msrb.mxu3 %v3069_v38  ;;  %834 = vmatpush.bf16.msrb.mxu0 %v3089_v59  ;;  %v3133_v38 = vor.u32 %v2344_v34, %v2116_v1  ;;  %v2340_v1 = vld [vmem:[%s3838_s1 + $0x134] sm:$0xf0]  ;;  %v2302_v34 = vld [vmem:[%s3838_s1 + $0xc] sm:$0xf]  ;;  %v3180_v8 = vor.u32 %v2334_v48, %v2086_v49  ;;  %v2084_v9 = vld [vmem:[%s3838_s1 + $0x108] sm:$0xf] }
  0x5c   : > { %858 = vmatpush.bf16.msrb.mxu1 %v3093_v60  ;;  %3868 = vst [vmem:[#allocation15_spill] sm:$0xff] %v3135_v11  ;;  %v1956_v60 = vld [vmem:[%s3838_s1 + $0x8] sm:$0xf]  ;;  %v2304_v59 = vld [vmem:[%s3838_s1 + $0x14] sm:$0xf0] }
  0x5d   : > { %3867 = vst [vmem:[#allocation14_spill] sm:$0xff] %v3133_v38 }
  0x5e   : > { %883 = vmatpush.bf16.msrb.mxu2 %v3095_v61  ;;  %v3171_v61 = vor.u32 %v2302_v34, %v1958_v44  ;;  %v2370_v34 = vld [vmem:[%s2880_s8 + $0x24] sm:$0xf0]  ;;  %v2369_v44 = vld [vmem:[%s2880_s8 + $0x24] sm:$0xf] }
  0x5f   : > { %907 = vmatpush.bf16.msrb.mxu3 %v3108_v14  ;;  %835 = vmatpush.bf16.msrb.mxu0 %v3129_v51  ;;  %v3169_v14 = vor.u32 %v2340_v1, %v2100_v43  ;;  %v2336_v43 = vld [vmem:[%s3838_s1 + $0x114] sm:$0xf0]  ;;  %v1940_v1 = vld [vmem:[%s2880_s8 + $0x20] sm:$0xf] }
  0x60   : > { %859 = vmatpush.bf16.msrb.mxu1 %v3133_v38  ;;  %v3193_v38 = vor.u32 %v2304_v59, %v1956_v60  ;;  %v3197_v48 = vor.u32 %v2336_v43, %v2084_v9  ;;  %v3199_v49 = vor.u32 %v2370_v34, %v1940_v1  ;;  %v2382_v60 = vld [vmem:[%s3839_s2 + $0x28] sm:$0xff]  ;;  %v2380_v43 = vld [vmem:[%s3839_s2 + $0x18] sm:$0xff] }
  0x62   : > { %884 = vmatpush.bf16.msrb.mxu2 %v3135_v11  ;;  %v1942_v11 = vld [vmem:[%s2880_s8 + $0x28] sm:$0xf0] }
  0x63   : > { %908 = vmatpush.bf16.msrb.mxu3 %v3147_v2  ;;  %836 = vmatpush.bf16.msrb.mxu0 %v3165_v18  ;;  %v3203_v2 = vor.u32 %v2369_v44, %v1942_v11 }
  0x64   : > { %860 = vmatpush.bf16.msrb.mxu1 %v3169_v14 }
  0x66   : > { %885 = vmatpush.bf16.msrb.mxu2 %v3171_v61 }
  0x67   : > { %909 = vmatpush.bf16.msrb.mxu3 %v3180_v8  ;;  %837 = vmatpush.bf16.msrb.mxu0 %v3193_v38 }
  0x68   : > { %861 = vmatpush.bf16.msrb.mxu1 %v3197_v48  ;;  %752 = vmatmul.bf16.gmra.mxu0 %v3199_v49 }
  0x69   : > { %776 = vmatmul.bf16.gmra.mxu1 %v3203_v2  ;;  %800 = vmatmul.bf16.gmra.mxu2 %v3199_v49 }
  0x6a   : > { %1011 = vmatpush.bf16.msra.mxu2 %v2617_v20  ;;  %824 = vmatmul.bf16.gmra.mxu3 %v3203_v2  ;;  %v3872_v20 = vld [vmem:[#allocation6_spill] sm:$0xff] }
  0x6b   : > { %1035 = vmatpush.bf16.msra.mxu3 %v2629_v24  ;;  %963 = vmatpush.bf16.msra.mxu0 %v2604_v15  ;;  %v3870_v15 = vld [vmem:[#allocation3_spill] sm:$0xff]  ;;  %v3873_v24 = vld [vmem:[#allocation5_spill] sm:$0xff] }
  0x6c   : > { %987 = vmatpush.bf16.msra.mxu1 %v2615_v19  ;;  %v3871_v19 = vld [vmem:[#allocation4_spill] sm:$0xff] }
  0x6e   : > { %1012 = vmatpush.bf16.msra.mxu2 %v2656_v33  ;;  %v3876_v33 = vld [vmem:[#allocation10_spill] sm:$0xff] }
  0x6f   : > { %1036 = vmatpush.bf16.msra.mxu3 %v2667_v37  ;;  %964 = vmatpush.bf16.msra.mxu0 %v2642_v28  ;;  %v3874_v28 = vld [vmem:[#allocation7_spill] sm:$0xff]  ;;  %v3877_v37 = vld [vmem:[#allocation9_spill] sm:$0xff] }
  0x70   : > { %988 = vmatpush.bf16.msra.mxu1 %v2644_v29  ;;  %v3875_v29 = vld [vmem:[#allocation8_spill] sm:$0xff] }
  0x72   : > { %1013 = vmatpush.bf16.msra.mxu2 %v2694_v46  ;;  %v3880_v46 = vld [vmem:[#allocation13_spill] sm:$0xff] }
  0x73   : > { %1037 = vmatpush.bf16.msra.mxu3 %v2706_v50  ;;  %965 = vmatpush.bf16.msra.mxu0 %v2679_v41  ;;  %v3878_v41 = vld [vmem:[#allocation11_spill] sm:$0xff]  ;;  %v3881_v50 = vld [vmem:[#allocation14_spill] sm:$0xff] }
  0x74   : > { %989 = vmatpush.bf16.msra.mxu1 %v2692_v45  ;;  %v3879_v45 = vld [vmem:[#allocation12_spill] sm:$0xff] }
  0x76   : > { %1014 = vmatpush.bf16.msra.mxu2 %v2730_v58  ;;  %v2210_v58 = vld [vmem:[%s2880_s8 + $0x30] sm:$0xf] }
  0x77   : > { %1038 = vmatpush.bf16.msra.mxu3 %v2742_v62  ;;  %966 = vmatpush.bf16.msra.mxu0 %v2724_v56  ;;  %v3882_v56 = vld [vmem:[#allocation15_spill] sm:$0xff]  ;;  %v2372_v62 = vld [vmem:[%s2880_s8 + $0x34] sm:$0xf0] }
  0x78   : > { %990 = vmatpush.bf16.msra.mxu1 %v2728_v57  ;;  %838 = vmatmul.bf16.vlgmr.msrb.gmra.mxu0 %v2909_v12  ;;  %v3883_v57 = vld [vmem:[#allocation16_spill] sm:$0xff] }
  0x79   : > { %862 = vmatmul.bf16.vlgmr.msrb.gmra.mxu1 %v2923_v23  ;;  %886 = vmatmul.bf16.vlgmr.msrb.gmra.mxu2 %v2909_v12 }
  0x7a   : > { %1015 = vmatpush.bf16.msra.mxu2 %v2766_v6  ;;  %910 = vmatmul.bf16.vlgmr.msrb.gmra.mxu3 %v2923_v23  ;;  %v2211_v6 = vor.u32 %v2372_v62, %v2210_v58 }
  0x7b   : > { %1039 = vmatpush.bf16.msra.mxu3 %v2778_v10  ;;  %967 = vmatpush.bf16.msra.mxu0 %v2760_v4  ;;  %v2371_v4 = vld [vmem:[%s2880_s8 + $0x34] sm:$0xf] }
  0x7c   : > { %991 = vmatpush.bf16.msra.mxu1 %v2764_v5  ;;  %v2212_v5 = vld [vmem:[%s2880_s8 + $0x38] sm:$0xf0] }
  0x7d   : > { %v2215_v10 = vor.u32 %v2371_v4, %v2212_v5 }
  0x7e   : > { %1016 = vmatpush.bf16.msra.mxu2 %v2805_v22  ;;  %v2373_v22 = vld [vmem:[%s2880_s8 + $0x44] sm:$0xf] }
  0x7f   : > { %1040 = vmatpush.bf16.msra.mxu3 %v2817_v27  ;;  %968 = vmatpush.bf16.msra.mxu0 %v2796_v17  ;;  %v2218_v17 = vld [vmem:[%s2880_s8 + $0x40] sm:$0xf]  ;;  %v2220_v27 = vld [vmem:[%s2880_s8 + $0x48] sm:$0xf0] }
  0x80   : > { %992 = vmatpush.bf16.msra.mxu1 %v2803_v21  ;;  %v2374_v21 = vld [vmem:[%s2880_s8 + $0x44] sm:$0xf0] }
  0x82   : > { %1017 = vmatpush.bf16.msra.mxu2 %v2848_v42  ;;  %v2226_v42 = vld [vmem:[%s2880_s8 + $0x50] sm:$0xf] }
  0x83   : > { %1041 = vmatpush.bf16.msra.mxu3 %v2857_v47  ;;  %969 = vmatpush.bf16.msra.mxu0 %v2833_v35  ;;  %v2219_v35 = vor.u32 %v2374_v21, %v2218_v17  ;;  %v2376_v47 = vld [vmem:[%s2880_s8 + $0x54] sm:$0xf0]  ;;  %v2385_v21 = vld [vmem:[%s3839_s2 + $0x40] sm:$0xff] }
  0x84   : > { %993 = vmatpush.bf16.msra.mxu1 %v2846_v40  ;;  %v2223_v40 = vor.u32 %v2373_v22, %v2220_v27 }
  0x86   : > { %1018 = vmatpush.bf16.msra.mxu2 %v2891_v0  ;;  %v3298_v0 = vor.u32 %v2376_v47, %v2226_v42 }
  0x87   : > { %1042 = vmatpush.bf16.msra.mxu3 %v2896_v3  ;;  %970 = vmatpush.bf16.msra.mxu0 %v2878_v55  ;;  %v2375_v55 = vld [vmem:[%s2880_s8 + $0x54] sm:$0xf] }
  0x88   : > { %994 = vmatpush.bf16.msra.mxu1 %v2889_v63  ;;  %843 = vmatmul.bf16.gmra.mxu0 %v3066_v36  ;;  %v2228_v63 = vld [vmem:[%s2880_s8 + $0x58] sm:$0xf0] }
  0x89   : > { %867 = vmatmul.bf16.gmra.mxu1 %v3080_v26  ;;  %891 = vmatmul.bf16.gmra.mxu2 %v3066_v36  ;;  %v2383_v36 = vld [vmem:[%s3839_s2 + $0x30] sm:$0xff] }
  0x8a   : > { %1107 = vmatpush.bf16.msrb.mxu2 %v2898_v7  ;;  %915 = vmatmul.bf16.gmra.mxu3 %v3080_v26  ;;  %v3302_v7 = vor.u32 %v2375_v55, %v2228_v63 }
  0x8b   : > { %1131 = vmatpush.bf16.msrb.mxu3 %v2911_v13  ;;  %1059 = vmatpush.bf16.msrb.mxu0 %v2933_v30 }
  0x8c   : > { %1083 = vmatpush.bf16.msrb.mxu1 %v2937_v31 }
  0x8e   : > { %1108 = vmatpush.bf16.msrb.mxu2 %v2939_v32 }
  0x8f   : > { %1060 = vmatpush.bf16.msrb.mxu0 %v2973_v52  ;;  %1132 = vmatpush.bf16.msrb.mxu3 %v2952_v39 }
  0x90   : > { %1084 = vmatpush.bf16.msrb.mxu1 %v2977_v53 }
  0x92   : > { %1109 = vmatpush.bf16.msrb.mxu2 %v2979_v54 }
  0x93   : > { %1061 = vmatpush.bf16.msrb.mxu0 %v3009_v16  ;;  %1133 = vmatpush.bf16.msrb.mxu3 %v3870_v15  ;;  %v2384_v16 = vld [vmem:[%s3839_s2 + $0x38] sm:$0xff] }
  0x94   : > { %1085 = vmatpush.bf16.msrb.mxu1 %v3014_v25  ;;  %v2388_v15 = vld [vmem:[%s3839_s2 + $0x58] sm:$0xff] }
  0x96   : > { %1110 = vmatpush.bf16.msrb.mxu2 %v3871_v19 }
  0x97   : > { %1062 = vmatpush.bf16.msrb.mxu0 %v3872_v20  ;;  %1134 = vmatpush.bf16.msrb.mxu3 %v3873_v24  ;;  %v2378_v20 = vld [vmem:[%s3839_s2 + $0x8] sm:$0xff] }
  0x98   : > { %1086 = vmatpush.bf16.msrb.mxu1 %v3874_v28  ;;  %848 = vmatmul.bf16.gmra.mxu0 %v3199_v49 }
  0x99   : > { %872 = vmatmul.bf16.gmra.mxu1 %v3203_v2  ;;  %896 = vmatmul.bf16.gmra.mxu2 %v3199_v49  ;;  %v2379_v49 = vld [vmem:[%s3839_s2 + $0x10] sm:$0xff] }
  0x9a   : > { %1111 = vmatpush.bf16.msrb.mxu2 %v3875_v29  ;;  %920 = vmatmul.bf16.gmra.mxu3 %v3203_v2  ;;  %v2391_v2 = vld [vmem:[%s3839_s2 + $0x70] sm:$0xff] }
  0x9b   : > { %1063 = vmatpush.bf16.msrb.mxu0 %v3876_v33  ;;  %1135 = vmatpush.bf16.msrb.mxu3 %v3877_v37  ;;  %v2387_v37 = vld [vmem:[%s3839_s2 + $0x50] sm:$0xff] }
  0x9c   : > { %1087 = vmatpush.bf16.msrb.mxu1 %v3878_v41 }
  0x9e   : > { %1112 = vmatpush.bf16.msrb.mxu2 %v3879_v45  ;;  %v2377_v45 = vld [vmem:[%s3839_s2] sm:$0xff] }
  0x9f   : > { %1064 = vmatpush.bf16.msrb.mxu0 %v3129_v51  ;;  %1136 = vmatpush.bf16.msrb.mxu3 %v3880_v46 }
  0xa0   : > { %1088 = vmatpush.bf16.msrb.mxu1 %v3881_v50 }
  0xa2   : > { %1113 = vmatpush.bf16.msrb.mxu2 %v3882_v56  ;;  %v2386_v56 = vld [vmem:[%s3839_s2 + $0x48] sm:$0xff] }
  0xa3   : > { %1065 = vmatpush.bf16.msrb.mxu0 %v3165_v18  ;;  %1137 = vmatpush.bf16.msrb.mxu3 %v3883_v57  ;;  %v2381_v18 = vld [vmem:[%s3839_s2 + $0x20] sm:$0xff] }
  0xa4   : > { %1089 = vmatpush.bf16.msrb.mxu1 %v3169_v14 }
  0xa6   : > { %1114 = vmatpush.bf16.msrb.mxu2 %v3171_v61 }
  0xa7   : > { %1066 = vmatpush.bf16.msrb.mxu0 %v3193_v38  ;;  %1138 = vmatpush.bf16.msrb.mxu3 %v3180_v8  ;;  %v2392_v38 = vld [vmem:[%s3839_s2 + $0x78] sm:$0xff]  ;;  %v2390_v8 = vld [vmem:[%s3839_s2 + $0x68] sm:$0xff] }
  0xa8   : > { %1090 = vmatpush.bf16.msrb.mxu1 %v3197_v48  ;;  %971 = vmatmul.bf16.vlgmr.msra.gmra.mxu0 %v2211_v6  ;;  %v2389_v48 = vld [vmem:[%s3839_s2 + $0x60] sm:$0xff] }
  0xa9   : > { %995 = vmatmul.bf16.vlgmr.msra.gmra.mxu1 %v2215_v10  ;;  %1019 = vmatmul.bf16.vlgmr.msra.gmra.mxu2 %v2211_v6 }
  0xaa   : > { %1043 = vmatmul.bf16.vlgmr.msra.gmra.mxu3 %v2215_v10  ;;  %1743 = vmatpush.bf16.msra.mxu2 %v2384_v16 }
  0xab   : > { %1689 = vmatpush.bf16.msra.mxu0 %v2384_v16  ;;  %1767 = vmatpush.bf16.msra.mxu3 %v2392_v38 }
  0xac   : > { %1713 = vmatpush.bf16.msra.mxu1 %v2392_v38 }
  0xae   : > { %1744 = vmatpush.bf16.msra.mxu2 %v2383_v36 }
  0xaf   : > { %1690 = vmatpush.bf16.msra.mxu0 %v2383_v36  ;;  %1768 = vmatpush.bf16.msra.mxu3 %v2391_v2 }
  0xb0   : > { %1714 = vmatpush.bf16.msra.mxu1 %v2391_v2 }
  0xb2   : > { %1745 = vmatpush.bf16.msra.mxu2 %v2382_v60 }
  0xb3   : > { %1691 = vmatpush.bf16.msra.mxu0 %v2382_v60  ;;  %1769 = vmatpush.bf16.msra.mxu3 %v2390_v8 }
  0xb4   : > { %1715 = vmatpush.bf16.msra.mxu1 %v2390_v8 }
  0xb6   : > { %1746 = vmatpush.bf16.msra.mxu2 %v2381_v18 }
  0xb7   : > { %1692 = vmatpush.bf16.msra.mxu0 %v2381_v18  ;;  %1770 = vmatpush.bf16.msra.mxu3 %v2389_v48 }
  0xb8   : > { %976 = vmatmul.bf16.gmra.mxu0 %v2219_v35  ;;  %1716 = vmatpush.bf16.msra.mxu1 %v2389_v48 }
  0xb9   : > { %1000 = vmatmul.bf16.gmra.mxu1 %v2223_v40  ;;  %1024 = vmatmul.bf16.gmra.mxu2 %v2219_v35 }
  0xba   : > { %1048 = vmatmul.bf16.gmra.mxu3 %v2223_v40  ;;  %1747 = vmatpush.bf16.msra.mxu2 %v2380_v43 }
  0xbb   : > { %1693 = vmatpush.bf16.msra.mxu0 %v2380_v43  ;;  %1771 = vmatpush.bf16.msra.mxu3 %v2388_v15 }
  0xbc   : > { %1717 = vmatpush.bf16.msra.mxu1 %v2388_v15 }
  0xbe   : > { %1748 = vmatpush.bf16.msra.mxu2 %v2379_v49 }
  0xbf   : > { %1694 = vmatpush.bf16.msra.mxu0 %v2379_v49  ;;  %1772 = vmatpush.bf16.msra.mxu3 %v2387_v37 }
  0xc0   : > { %1718 = vmatpush.bf16.msra.mxu1 %v2387_v37 }
  0xc2   : > { %1749 = vmatpush.bf16.msra.mxu2 %v2378_v20 }
  0xc3   : > { %1695 = vmatpush.bf16.msra.mxu0 %v2378_v20  ;;  %1773 = vmatpush.bf16.msra.mxu3 %v2386_v56 }
  0xc4   : > { %1719 = vmatpush.bf16.msra.mxu1 %v2386_v56 }
  0xc5   : > { %v3300_v3 = vpop.f32.mrf.mxu0 }
  0xc6   : > { %v3304_v12 = vpop.f32.mrf.mxu1  ;;  %1750 = vmatpush.bf16.msra.mxu2 %v2377_v45 }
  0xc7   : > { %v768_v24 = vadd.f32 %v3304_v12, %v3300_v3  ;;  %1696 = vmatpush.bf16.msra.mxu0 %v2377_v45  ;;  %1774 = vmatpush.bf16.msra.mxu3 %v2385_v21 }
  0xc8   : > { %981 = vmatmul.bf16.gmra.mxu0 %v3298_v0  ;;  %1720 = vmatpush.bf16.msra.mxu1 %v2385_v21 }
  0xc9   : > { %1005 = vmatmul.bf16.gmra.mxu1 %v3302_v7  ;;  %1029 = vmatmul.bf16.gmra.mxu2 %v3298_v0  ;;  %v1155_v46 = vmul.f32 %v768_v24, %v768_v24 }
  0xca   : > { %1053 = vmatmul.bf16.gmra.mxu3 %v3302_v7 }
  0xcc   : > { %v3310_v13 = vpop.f32.mrf.mxu2 }
  0xcd   : > { %v3312_v23 = vpop.f32.mrf.mxu3  ;;  %v3314_v30 = vpop.f32.mrf.mxu0 }
  0xce   : > { %v3316_v31 = vpop.f32.mrf.mxu1  ;;  %v816_v58 = vadd.f32 %v3312_v23, %v3310_v13 }
  0xcf   : > { %v770_v4 = vadd.f32 %v3316_v31, %v3314_v30 }
  0xd0   : > { %v1156_v27 = vmul.f32 %v816_v58, %v816_v58 }
  0xd4   : > { %v3318_v32 = vpop.f32.mrf.mxu2 }
  0xd5   : > { %v3320_v39 = vpop.f32.mrf.mxu3  ;;  %v3322_v52 = vpop.f32.mrf.mxu0 }
  0xd6   : > { %v3324_v53 = vpop.f32.mrf.mxu1 }
  0xd7   : > { %v773_v12 = vadd.f32 %v3324_v53, %v3322_v52 }
  0xd8   : > { %1067 = vmatmul.bf16.vlgmr.msrb.gmra.mxu0 %v2211_v6 }
  0xd9   : > { %1091 = vmatmul.bf16.vlgmr.msrb.gmra.mxu1 %v2215_v10  ;;  %1115 = vmatmul.bf16.vlgmr.msrb.gmra.mxu2 %v2211_v6 }
  0xda   : > { %1139 = vmatmul.bf16.vlgmr.msrb.gmra.mxu3 %v2215_v10 }
  0xdc   : > { %v3326_v54 = vpop.f32.mrf.mxu2 }
  0xdd   : > { %v3331_v25 = vpop.f32.mrf.mxu3  ;;  %v3333_v26 = vpop.f32.mrf.mxu0 }
  0xde   : > { %v3335_v11 = vpop.f32.mrf.mxu1  ;;  %v821_v52 = vadd.f32 %v3331_v25, %v3326_v54 }
  0xdf   : > { %v775_v53 = vadd.f32 %v3335_v11, %v3333_v26 }
  0xe4   : > { %v3343_v59 = vpop.f32.mrf.mxu2 }
  0xe5   : > { %v3348_v61 = vpop.f32.mrf.mxu3  ;;  %v3350_v14 = vpop.f32.mrf.mxu0 }
  0xe6   : > { %v3352_v51 = vpop.f32.mrf.mxu1  ;;  %v823_v20 = vadd.f32 %v3348_v61, %v3343_v59  ;;  %v1160_v61 = vmul.f32 %v821_v52, %v821_v52 }
  0xe7   : > { %v778_v24 = vadd.f32 %v3352_v51, %v3350_v14 }
  0xe8   : > { %1072 = vmatmul.bf16.gmra.mxu0 %v2219_v35 }
  0xe9   : > { %1096 = vmatmul.bf16.gmra.mxu1 %v2223_v40  ;;  %1120 = vmatmul.bf16.gmra.mxu2 %v2219_v35  ;;  %v1163_v56 = vmul.f32 %v778_v24, %v778_v24 }
  0xea   : > { %1144 = vmatmul.bf16.gmra.mxu3 %v2223_v40  ;;  %v1157_v40 = vmul.f32 %v770_v4, %v770_v4 }
  0xec   : > { %v3363_v9 = vpop.f32.mrf.mxu2 }
  0xed   : > { %v3368_v1 = vpop.f32.mrf.mxu3  ;;  %v3370_v34 = vpop.f32.mrf.mxu0 }
  0xee   : > { %v3372_v44 = vpop.f32.mrf.mxu1  ;;  %v826_v37 = vadd.f32 %v3368_v1, %v3363_v9 }
  0xef   : > { %v3446_v4 = vadd.f32 %v3372_v44, %v3370_v34 }
  0xf0   : > { %v3449_v1 = vmul.f32 %v826_v37, %v826_v37 }
  0xf4   : > { %v3383_v19 = vpop.f32.mrf.mxu2 }
  0xf5   : > { %v3390_v28 = vpop.f32.mrf.mxu3  ;;  %v839_v29 = vpop.f32.mrf.mxu0 }
  0xf6   : > { %v863_v33 = vpop.f32.mrf.mxu1 }
  0xf7   : > { %v864_v41 = vadd.f32 %v863_v33, %v839_v29 }
  0xf8   : > { %1077 = vmatmul.bf16.gmra.mxu0 %v3298_v0 }
  0xf9   : > { %v1167_v50 = vmul.f32 %v864_v41, %v864_v41  ;;  %1101 = vmatmul.bf16.gmra.mxu1 %v3302_v7  ;;  %1125 = vmatmul.bf16.gmra.mxu2 %v3298_v0  ;;  %v818_v0 = vadd.f32 %v3320_v39, %v3318_v32  ;;  %v1159_v32 = vmul.f32 %v773_v12, %v773_v12 }
  0xfa   : > { %1149 = vmatmul.bf16.gmra.mxu3 %v3302_v7 }
  0xfb   : > { %v3405_v57 = vadd.f32 %v1167_v50, %v1155_v46  ;;  %v1158_v38 = vmul.f32 %v818_v0, %v818_v0  ;;  %v1161_v46 = vmul.f32 %v775_v53, %v775_v53  ;;  %v1162_v50 = vmul.f32 %v823_v20, %v823_v20 }
  0xfc   : > { %v887_v62 = vpop.f32.mrf.mxu2 }
  0xfd   : > { %2437 = vrsqrt.f32 %v3405_v57  ;;  %v911_v5 = vpop.f32.mrf.mxu3  ;;  %v841_v6 = vpop.f32.mrf.mxu0  ;;  %vm1198_vm0 = vcmp.eq.f32.partialorder %v3405_v57, inf  ;;  %vm1200_vm1 = vcmp.eq.f32.partialorder %v3405_v57, 0.0 }
  0xfe   : > { %v912_v10 = vadd.f32 %v911_v5, %v887_v62  ;;  %v865_v17 = vpop.f32.mrf.mxu1 }
  0xff   : > { %v866_v22 = vadd.f32 %v865_v17, %v841_v6  ;;  %v3453_v17 = vadd.f32 %v3390_v28, %v3383_v19 }
 0x100   : > { %v1168_v35 = vmul.f32 %v912_v10, %v912_v10 }
 0x101   : > { %v1169_v42 = vmul.f32 %v866_v22, %v866_v22 }
 0x102   : > { %v3415_v47 = vadd.f32 %v1168_v35, %v1156_v27 }
 0x103   : > { %v2438_v55 = vpop.eup %2437  ;;  %v3417_v63 = vadd.f32 %v1169_v42, %v1157_v40  ;;  %v1201_v40 = vand.u32 2147483648, %v3405_v57 }
 0x104   : > { %2439 = vrsqrt.f32 %v3415_v47  ;;  %v889_v3 = vpop.f32.mrf.mxu2  ;;  %v1192_v7 = vmul.f32 %v2438_v55, %v3405_v57  ;;  %vm1210_vm4 = vcmp.eq.f32.partialorder %v3415_v47, inf  ;;  %vm1212_vm5 = vcmp.eq.f32.partialorder %v3415_v47, 0.0 }
 0x105   : > { %2441 = vrsqrt.f32 %v3417_v63  ;;  %v913_v13 = vpop.f32.mrf.mxu3  ;;  %v844_v23 = vpop.f32.mrf.mxu0  ;;  %vm1222_vm2 = vcmp.eq.f32.partialorder %v3417_v63, inf  ;;  %vm1224_vm3 = vcmp.eq.f32.partialorder %v3417_v63, 0.0 }
 0x106   : > { %v914_v30 = vadd.f32 %v913_v13, %v889_v3  ;;  %v868_v31 = vpop.f32.mrf.mxu1  ;;  %v1193_v16 = vmul.f32 %v2438_v55, %v1192_v7 }
 0x107   : > { %v869_v36 = vadd.f32 %v868_v31, %v844_v23 }
 0x108   : > { %v1170_v60 = vmul.f32 %v914_v30, %v914_v30  ;;  %v1194_v2 = vmul.f32 0.5, %v1193_v16  ;;  %v1225_v16 = vand.u32 2147483648, %v3417_v63 }
 0x109   : > { %v1171_v39 = vmul.f32 %v869_v36, %v869_v36 }
 0x10a   : > { %v2440_v18 = vpop.eup %2439  ;;  %v3426_v8 = vadd.f32 %v1170_v60, %v1158_v38  ;;  %v1195_v43 = vsub.f32 1.5, %v1194_v2 }
 0x10b   : > { %v2442_v48 = vpop.eup %2441  ;;  %v3432_v49 = vadd.f32 %v1171_v39, %v1159_v32  ;;  %v1204_v15 = vmul.f32 %v2440_v18, %v3415_v47 }
 0x10c   : > { %2443 = vrsqrt.f32 %v3426_v8  ;;  %v892_v29 = vpop.f32.mrf.mxu2  ;;  %v1216_v33 = vmul.f32 %v2442_v48, %v3417_v63  ;;  %v1196_v26 = vmul.f32 %v2438_v55, %v1195_v43  ;;  %vm1234_vm6 = vcmp.eq.f32.partialorder %v3426_v8, inf }
 0x10d   : > { %2445 = vrsqrt.f32 %v3432_v49  ;;  %v916_v54 = vpop.f32.mrf.mxu3  ;;  %v846_v25 = vpop.f32.mrf.mxu0  ;;  %v1205_v11 = vmul.f32 %v2440_v18, %v1204_v15  ;;  %vm1236_vm7 = vcmp.eq.f32.partialorder %v3426_v8, 0.0  ;;  %vm1246_vm8 = vcmp.eq.f32.partialorder %v3432_v49, inf }
 0x10e   : > { %v917_v41 = vadd.f32 %v916_v54, %v892_v29  ;;  %v870_v45 = vpop.f32.mrf.mxu1  ;;  %v1217_v59 = vmul.f32 %v2442_v48, %v1216_v33  ;;  %v1197_v6 = vmul.f32 %v1196_v26, %v3405_v57  ;;  %v1213_v54 = vand.u32 2147483648, %v3415_v47 }
 0x10f   : > { %v871_v14 = vadd.f32 %v870_v45, %v846_v25  ;;  %v1206_v51 = vmul.f32 0.5, %v1205_v11  ;;  %vm1248_vm9 = vcmp.eq.f32.partialorder %v3432_v49, 0.0 }
 0x110   : > { %v1172_v58 = vmul.f32 %v917_v41, %v917_v41  ;;  %v1218_v62 = vmul.f32 0.5, %v1217_v59  ;;  %v1199_v0 = vsel %vm1198_vm0, %v3405_v57, %v1197_v6 }
 0x111   : > { %v1173_v5 = vmul.f32 %v871_v14, %v871_v14  ;;  %v1207_v10 = vsub.f32 1.5, %v1206_v51  ;;  %v3473_v60 = vsel %vm1200_vm1, %v1201_v40, %v1199_v0 }
 0x112   : > { %v2444_v9 = vpop.eup %2443  ;;  %v3455_v21 = vadd.f32 %v1172_v58, %v1160_v61  ;;  %v1219_v22 = vsub.f32 1.5, %v1218_v62 }
 0x113   : > { %v2446_v27 = vpop.eup %2445  ;;  %v3457_v35 = vadd.f32 %v1173_v5, %v1161_v46  ;;  %v1228_v34 = vmul.f32 %v2444_v9, %v3426_v8  ;;  %v1208_v3 = vmul.f32 %v2440_v18, %v1207_v10  ;;  %v1237_v46 = vand.u32 2147483648, %v3426_v8 }
 0x114   : > { %2447 = vrsqrt.f32 %v3455_v21  ;;  %v894_v44 = vpop.f32.mrf.mxu2  ;;  %v1220_v42 = vmul.f32 %v2442_v48, %v1219_v22  ;;  %v1240_v19 = vmul.f32 %v2446_v27, %v3432_v49  ;;  %vm1258_vm12 = vcmp.eq.f32.partialorder %v3455_v21, inf }
 0x115   : > { %2449 = vrsqrt.f32 %v3457_v35  ;;  %v918_v28 = vpop.f32.mrf.mxu3  ;;  %v849_v55 = vpop.f32.mrf.mxu0  ;;  %v1229_v7 = vmul.f32 %v2444_v9, %v1228_v34  ;;  %v1209_v43 = vmul.f32 %v1208_v3, %v3415_v47  ;;  %vm1270_vm10 = vcmp.eq.f32.partialorder %v3457_v35, inf }
 0x116   : > { %v919_v12 = vadd.f32 %v918_v28, %v894_v44  ;;  %v873_v13 = vpop.f32.mrf.mxu1  ;;  %v1221_v23 = vmul.f32 %v1220_v42, %v3417_v63  ;;  %v1241_v30 = vmul.f32 %v2446_v27, %v1240_v19  ;;  %v1166_v19 = vmul.f32 %v3453_v17, %v3453_v17 }
 0x117   : > { %v874_v31 = vadd.f32 %v873_v13, %v849_v55  ;;  %v1230_v36 = vmul.f32 0.5, %v1229_v7  ;;  %v1211_v37 = vsel %vm1210_vm4, %v3415_v47, %v1209_v43  ;;  %vm1272_vm11 = vcmp.eq.f32.partialorder %v3457_v35, 0.0 }
 0x118   : > { %v1174_v38 = vmul.f32 %v919_v12, %v919_v12  ;;  %v1223_v2 = vsel %vm1222_vm2, %v3417_v63, %v1221_v23  ;;  %v1242_v32 = vmul.f32 0.5, %v1241_v30  ;;  %v3502_v5 = vsel %vm1212_vm5, %v1213_v54, %v1211_v37 }
 0x119   : > { %v1175_v39 = vmul.f32 %v874_v31, %v874_v31  ;;  %v3476_v18 = vsel %vm1224_vm3, %v1225_v16, %v1223_v2  ;;  %v1231_v48 = vsub.f32 1.5, %v1230_v36  ;;  %v1249_v36 = vand.u32 2147483648, %v3432_v49 }
 0x11a   : > { %v2448_v52 = vpop.eup %2447  ;;  %v3479_v53 = vadd.f32 %v1174_v38, %v1162_v50  ;;  %v1587_v15 = vpack.c.bf16 %v3476_v18, %v3473_v60  ;;  %v1243_v57 = vsub.f32 1.5, %v1242_v32  ;;  %v1273_v38 = vand.u32 2147483648, %v3457_v35 }
 0x11b   : > { %v2450_v20 = vpop.eup %2449  ;;  %v3484_v24 = vadd.f32 %v1175_v39, %v1163_v56  ;;  %v1232_v63 = vmul.f32 %v2444_v9, %v1231_v48  ;;  %v1252_v29 = vmul.f32 %v2448_v52, %v3455_v21  ;;  %v1165_v9 = vmul.f32 %v3446_v4, %v3446_v4 }
 0x11c   : > { %2451 = vrsqrt.f32 %v3479_v53  ;;  %v897_v33 = vpop.f32.mrf.mxu2  ;;  %1697 = vmatmul.bf16.vlgmr.msra.gmra.mxu0 %v1587_v15  ;;  %v1264_v25 = vmul.f32 %v2450_v20, %v3457_v35  ;;  %v1244_v14 = vmul.f32 %v2446_v27, %v1243_v57  ;;  %vm1282_vm13 = vcmp.eq.f32.partialorder %v3479_v53, inf }
 0x11d   : > { %2453 = vrsqrt.f32 %v3484_v24  ;;  %v921_v26 = vpop.f32.mrf.mxu3  ;;  %v851_v11 = vpop.f32.mrf.mxu0  ;;  %v1233_v41 = vmul.f32 %v1232_v63, %v3426_v8  ;;  %v1253_v45 = vmul.f32 %v2448_v52, %v1252_v29  ;;  %vm1260_vm14 = vcmp.eq.f32.partialorder %v3455_v21, 0.0 }
 0x11e   : > { %v922_v59 = vadd.f32 %v921_v26, %v897_v33  ;;  %v875_v61 = vpop.f32.mrf.mxu1  ;;  %v1265_v51 = vmul.f32 %v2450_v20, %v1264_v25  ;;  %v1245_v40 = vmul.f32 %v1244_v14, %v3432_v49  ;;  %v1285_v14 = vand.u32 2147483648, %v3479_v53 }
 0x11f   : > { %v876_v50 = vadd.f32 %v875_v61, %v851_v11  ;;  %v1235_v56 = vsel %vm1234_vm6, %v3426_v8, %v1233_v41  ;;  %v1254_v58 = vmul.f32 0.5, %v1253_v45  ;;  %v1261_v45 = vand.u32 2147483648, %v3455_v21 }
 0x120   : > { %v1176_v62 = vmul.f32 %v922_v59, %v922_v59  ;;  %v3504_v6 = vsel %vm1236_vm7, %v1237_v46, %v1235_v56  ;;  %v1266_v10 = vmul.f32 0.5, %v1265_v51  ;;  %v1247_v30 = vsel %vm1246_vm8, %v3432_v49, %v1245_v40 }
 0x121   : > { %v1177_v22 = vmul.f32 %v876_v50, %v876_v50  ;;  %v1588_v27 = vpack.c.bf16 %v3504_v6, %v3502_v5  ;;  %v1255_v34 = vsub.f32 1.5, %v1254_v58  ;;  %v3537_v48 = vsel %vm1248_vm9, %v1249_v36, %v1247_v30 }
 0x122   : > { %v2452_v44 = vpop.eup %2451  ;;  %v3511_v8 = vadd.f32 %v1176_v62, %v3449_v1  ;;  %v1267_v47 = vsub.f32 1.5, %v1266_v10  ;;  %vm1284_vm15 = vcmp.eq.f32.partialorder %v3479_v53, 0.0  ;;  %vm1294_vm0 = vcmp.eq.f32.partialorder %v3484_v24, inf }
 0x123   : > { %v2454_v42 = vpop.eup %2453  ;;  %v3516_v28 = vadd.f32 %v1177_v22, %v1165_v9  ;;  %1721 = vmatmul.bf16.vlgmr.msra.gmra.mxu1 %v1588_v27  ;;  %v1276_v4 = vmul.f32 %v2452_v44, %v3479_v53  ;;  %v1256_v17 = vmul.f32 %v2448_v52, %v1255_v34  ;;  %vm1296_vm2 = vcmp.eq.f32.partialorder %v3484_v24, 0.0 }
 0x124   : > { %2455 = vrsqrt.f32 %v3511_v8  ;;  %v899_v55 = vpop.f32.mrf.mxu2  ;;  %v1268_v0 = vmul.f32 %v2450_v20, %v1267_v47  ;;  %v1288_v1 = vmul.f32 %v2454_v42, %v3484_v24  ;;  %vm1306_vm4 = vcmp.eq.f32.partialorder %v3511_v8, inf }
 0x125   : > { %2457 = vrsqrt.f32 %v3516_v28  ;;  %v923_v3 = vpop.f32.mrf.mxu3  ;;  %v3523_v7 = vpop.f32.mrf.mxu0  ;;  %v1277_v12 = vmul.f32 %v2452_v44, %v1276_v4  ;;  %v1257_v15 = vmul.f32 %v1256_v17, %v3455_v21  ;;  %v1297_v17 = vand.u32 2147483648, %v3484_v24 }
 0x126   : > { %v924_v13 = vadd.f32 %v923_v3, %v899_v55  ;;  %v3526_v23 = vpop.f32.mrf.mxu1  ;;  %v1269_v31 = vmul.f32 %v1268_v0, %v3457_v35  ;;  %v1289_v16 = vmul.f32 %v2454_v42, %v1288_v1  ;;  %vm1318_vm1 = vcmp.eq.f32.partialorder %v3516_v28, inf }
 0x127   : > { %v1278_v2 = vmul.f32 0.5, %v1277_v12  ;;  %v1259_v41 = vsel %vm1258_vm12, %v3455_v21, %v1257_v15  ;;  %v1321_v12 = vand.u32 2147483648, %v3516_v28  ;;  %vm1320_vm3 = vcmp.eq.f32.partialorder %v3516_v28, 0.0 }
 0x128   : > { %v1178_v32 = vmul.f32 %v924_v13, %v924_v13  ;;  %v1271_v39 = vsel %vm1270_vm10, %v3457_v35, %v1269_v31  ;;  %v1290_v43 = vmul.f32 0.5, %v1289_v16  ;;  %v3566_v62 = vsel %vm1260_vm14, %v1261_v45, %v1259_v41 }
 0x129   : > { %v3539_v52 = vsel %vm1272_vm11, %v1273_v38, %v1271_v39  ;;  %v1279_v57 = vsub.f32 1.5, %v1278_v2  ;;  %vm1308_vm6 = vcmp.eq.f32.partialorder %v3511_v8, 0.0 }
 0x12a   : > { %v2456_v20 = vpop.eup %2455  ;;  %v3542_v63 = vadd.f32 %v1178_v32, %v1166_v19  ;;  %v1589_v29 = vpack.c.bf16 %v3539_v52, %v3537_v48  ;;  %v1291_v33 = vsub.f32 1.5, %v1290_v43 }
 0x12b   : > { %v2458_v54 = vpop.eup %2457  ;;  %v1280_v25 = vmul.f32 %v2452_v44, %v1279_v57  ;;  %v1300_v35 = vmul.f32 %v2456_v20, %v3511_v8 }
 0x12c   : > { %2459 = vrsqrt.f32 %v3542_v63  ;;  %v3548_v49 = vpop.f32.mrf.mxu2  ;;  %1702 = vmatmul.bf16.gmra.mxu0 %v1589_v29  ;;  %v1312_v26 = vmul.f32 %v2458_v54, %v3516_v28  ;;  %v1292_v51 = vmul.f32 %v2454_v42, %v1291_v33  ;;  %vm1330_vm5 = vcmp.eq.f32.partialorder %v3542_v63, inf }
 0x12d   : > { %v3552_v11 = vpop.f32.mrf.mxu3  ;;  %v3554_v37 = vpop.f32.mrf.mxu0  ;;  %v1281_v59 = vmul.f32 %v1280_v25, %v3479_v53  ;;  %v1301_v61 = vmul.f32 %v2456_v20, %v1300_v35  ;;  %v1333_v29 = vand.u32 2147483648, %v3542_v63  ;;  %vm1332_vm7 = vcmp.eq.f32.partialorder %v3542_v63, 0.0 }
 0x12e   : > { %v3559_v46 = vpop.f32.mrf.mxu1  ;;  %v1313_v50 = vmul.f32 %v2458_v54, %v1312_v26  ;;  %v1293_v44 = vmul.f32 %v1292_v51, %v3484_v24 }
 0x12f   : > { %v1283_v56 = vsel %vm1282_vm13, %v3479_v53, %v1281_v59  ;;  %v1302_v58 = vmul.f32 0.5, %v1301_v61 }
 0x130   : > { %v3568_v10 = vsel %vm1284_vm15, %v1285_v14, %v1283_v56  ;;  %v1314_v9 = vmul.f32 0.5, %v1313_v50  ;;  %v1295_v1 = vsel %vm1294_vm0, %v3484_v24, %v1293_v44  ;;  %v997_v50 = vadd.f32 %v3526_v23, %v3523_v7 }
 0x131   : > { %v1590_v22 = vpack.c.bf16 %v3568_v10, %v3566_v62  ;;  %v1303_v27 = vsub.f32 1.5, %v1302_v58  ;;  %v3591_v31 = vsel %vm1296_vm2, %v1297_v17, %v1295_v1 }
 0x132   : > { %v2460_v34 = vpop.eup %2459  ;;  %v1315_v40 = vsub.f32 1.5, %v1314_v9 }
 0x133   : > { %1726 = vmatmul.bf16.gmra.mxu1 %v1590_v22  ;;  %v1324_v21 = vmul.f32 %v2460_v34, %v3542_v63  ;;  %v1304_v4 = vmul.f32 %v2456_v20, %v1303_v27  ;;  %v1309_v20 = vand.u32 2147483648, %v3511_v8  ;;  %v1335_v27 = vmul.f32 %v997_v50, %v997_v50 }
 0x134   : > { %v3574_v47 = vpop.f32.mrf.mxu2  ;;  %v1316_v53 = vmul.f32 %v2458_v54, %v1315_v40  ;;  %v1045_v40 = vadd.f32 %v3552_v11, %v3548_v49 }
 0x135   : > { %v3576_v42 = vpop.f32.mrf.mxu3  ;;  %v3578_v19 = vpop.f32.mrf.mxu0  ;;  %v1325_v55 = vmul.f32 %v2460_v34, %v1324_v21  ;;  %v1305_v36 = vmul.f32 %v1304_v4, %v3511_v8 }
 0x136   : > { %v3581_v0 = vpop.f32.mrf.mxu1  ;;  %v1317_v3 = vmul.f32 %v1316_v53, %v3516_v28  ;;  %v999_v53 = vadd.f32 %v3559_v46, %v3554_v37  ;;  %v1047_v49 = vadd.f32 %v3576_v42, %v3574_v47 }
 0x137   : > { %v1326_v13 = vmul.f32 0.5, %v1325_v55  ;;  %v1002_v46 = vadd.f32 %v3581_v0, %v3578_v19 }
 0x138   : > { %v1319_v30 = vsel %vm1318_vm1, %v3516_v28, %v1317_v3  ;;  %v1307_v28 = vsel %vm1306_vm4, %v3511_v8, %v1305_v36  ;;  %v1336_v3 = vmul.f32 %v1045_v40, %v1045_v40 }
 0x139   : > { %v3593_v16 = vsel %vm1320_vm3, %v1321_v12, %v1319_v30  ;;  %v1327_v38 = vsub.f32 1.5, %v1326_v13  ;;  %v3615_v54 = vsel %vm1308_vm6, %v1309_v20, %v1307_v28  ;;  %v1337_v12 = vmul.f32 %v999_v53, %v999_v53 }
 0x13a   : > { %v1591_v2 = vpack.c.bf16 %v3593_v16, %v3591_v31  ;;  %v1339_v47 = vmul.f32 %v1002_v46, %v1002_v46 }
 0x13b   : > { %v1328_v32 = vmul.f32 %v2460_v34, %v1327_v38 }
 0x13c   : > { %v3598_v39 = vpop.f32.mrf.mxu2  ;;  %1707 = vmatmul.bf16.gmra.mxu0 %v1591_v2 }
 0x13d   : > { %v3601_v24 = vpop.f32.mrf.mxu3  ;;  %v3603_v43 = vpop.f32.mrf.mxu0  ;;  %v1329_v15 = vmul.f32 %v1328_v32, %v3542_v63 }
 0x13e   : > { %v3607_v57 = vpop.f32.mrf.mxu1  ;;  %v1050_v19 = vadd.f32 %v3601_v24, %v3598_v39 }
 0x13f   : > { %v1331_v33 = vsel %vm1330_vm5, %v3542_v63, %v1329_v15  ;;  %v1004_v0 = vadd.f32 %v3607_v57, %v3603_v43 }
 0x140   : > { %v3617_v25 = vsel %vm1332_vm7, %v1333_v29, %v1331_v33  ;;  %v1338_v33 = vmul.f32 %v1047_v49, %v1047_v49 }
 0x141   : > { %v1592_v35 = vpack.c.bf16 %v3617_v25, %v3615_v54 }
 0x143   : > { %1731 = vmatmul.bf16.gmra.mxu1 %v1592_v35 }
 0x144   : > { %v1027_v26 = vpop.f32.mrf.mxu2 }
 0x145   : > { %v1051_v41 = vpop.f32.mrf.mxu3  ;;  %v982_v45 = vpop.f32.mrf.mxu0 }
 0x146   : > { %v1006_v59 = vpop.f32.mrf.mxu1 }
 0x147   : > { %v1007_v53 = vadd.f32 %v1006_v59, %v982_v45 }
 0x14c   : > { %v3621_v61 = vpop.f32.mrf.mxu2 }
 0x14d   : > { %v3623_v14 = vpop.f32.mrf.mxu3  ;;  %v3625_v8 = vpop.f32.mrf.mxu0 }
 0x14e   : > { %v3627_v51 = vpop.f32.mrf.mxu1  ;;  %v1055_v24 = vadd.f32 %v3623_v14, %v3621_v61 }
 0x150   : > { %v3672_v14 = vmul.f32 %v1055_v24, %v1055_v24 }
 0x154   : > { %v3629_v63 = vpop.f32.mrf.mxu2 }
 0x155   : > { %v3633_v56 = vpop.f32.mrf.mxu3  ;;  %v1068_v58 = vpop.f32.mrf.mxu0 }
 0x156   : > { %v1092_v9 = vpop.f32.mrf.mxu1 }
 0x157   : > { %v1093_v22 = vadd.f32 %v1092_v9, %v1068_v58 }
 0x159   : > { %v1347_v34 = vmul.f32 %v1093_v22, %v1093_v22 }
 0x15b   : > { %v3635_v44 = vadd.f32 %v1347_v34, %v1335_v27 }
 0x15c   : > { %v1116_v21 = vpop.f32.mrf.mxu2 }
 0x15d   : > { %2461 = vrsqrt.f32 %v3635_v44  ;;  %v1140_v4 = vpop.f32.mrf.mxu3  ;;  %v1070_v7 = vpop.f32.mrf.mxu0  ;;  %vm1378_vm8 = vcmp.eq.f32.partialorder %v3635_v44, inf  ;;  %vm1380_vm9 = vcmp.eq.f32.partialorder %v3635_v44, 0.0 }
 0x15e   : > { %v1141_v23 = vadd.f32 %v1140_v4, %v1116_v21  ;;  %v1094_v55 = vpop.f32.mrf.mxu1  ;;  %v1052_v21 = vadd.f32 %v1051_v41, %v1027_v26  ;;  %v1341_v26 = vmul.f32 %v1004_v0, %v1004_v0 }
 0x15f   : > { %v1095_v1 = vadd.f32 %v1094_v55, %v1070_v7 }
 0x160   : > { %v1348_v17 = vmul.f32 %v1141_v23, %v1141_v23  ;;  %v1342_v59 = vmul.f32 %v1052_v21, %v1052_v21 }
 0x161   : > { %v1349_v13 = vmul.f32 %v1095_v1, %v1095_v1 }
 0x162   : > { %v3642_v30 = vadd.f32 %v1348_v17, %v1336_v3  ;;  %v1340_v17 = vmul.f32 %v1050_v19, %v1050_v19 }
 0x163   : > { %v2462_v36 = vpop.eup %2461  ;;  %v3644_v38 = vadd.f32 %v1349_v13, %v1337_v12  ;;  %v1343_v12 = vmul.f32 %v1007_v53, %v1007_v53 }
 0x164   : > { %2463 = vrsqrt.f32 %v3642_v30  ;;  %v1118_v11 = vpop.f32.mrf.mxu2  ;;  %v1372_v37 = vmul.f32 %v2462_v36, %v3635_v44  ;;  %vm1390_vm12 = vcmp.eq.f32.partialorder %v3642_v30, inf  ;;  %vm1392_vm13 = vcmp.eq.f32.partialorder %v3642_v30, 0.0 }
 0x165   : > { %2465 = vrsqrt.f32 %v3644_v38  ;;  %v1142_v2 = vpop.f32.mrf.mxu3  ;;  %v1073_v32 = vpop.f32.mrf.mxu0  ;;  %vm1402_vm10 = vcmp.eq.f32.partialorder %v3644_v38, inf  ;;  %vm1404_vm11 = vcmp.eq.f32.partialorder %v3644_v38, 0.0 }
 0x166   : > { %v1143_v28 = vadd.f32 %v1142_v2, %v1118_v11  ;;  %v1097_v15 = vpop.f32.mrf.mxu1  ;;  %v1373_v20 = vmul.f32 %v2462_v36, %v1372_v37  ;;  %v3669_v11 = vadd.f32 %v3627_v51, %v3625_v8  ;;  %v3676_v2 = vadd.f32 %v3633_v56, %v3629_v63 }
 0x167   : > { %v1098_v29 = vadd.f32 %v1097_v15, %v1073_v32 }
 0x168   : > { %v1350_v35 = vmul.f32 %v1143_v28, %v1143_v28  ;;  %v1374_v50 = vmul.f32 0.5, %v1373_v20 }
 0x169   : > { %v1351_v42 = vmul.f32 %v1098_v29, %v1098_v29  ;;  %v1381_v29 = vand.u32 2147483648, %v3635_v44 }
 0x16a   : > { %v2464_v58 = vpop.eup %2463  ;;  %v3653_v9 = vadd.f32 %v1350_v35, %v1338_v33  ;;  %v1375_v22 = vsub.f32 1.5, %v1374_v50 }
 0x16b   : > { %v2466_v27 = vpop.eup %2465  ;;  %v3659_v34 = vadd.f32 %v1351_v42, %v1339_v47  ;;  %v1384_v40 = vmul.f32 %v2464_v58, %v3642_v30 }
 0x16c   : > { %2467 = vrsqrt.f32 %v3653_v9  ;;  %v1121_v4 = vpop.f32.mrf.mxu2  ;;  %v1396_v7 = vmul.f32 %v2466_v27, %v3644_v38  ;;  %v1376_v1 = vmul.f32 %v2462_v36, %v1375_v22  ;;  %vm1414_vm14 = vcmp.eq.f32.partialorder %v3653_v9, inf }
 0x16d   : > { %2469 = vrsqrt.f32 %v3659_v34  ;;  %v1145_v23 = vpop.f32.mrf.mxu3  ;;  %v1075_v55 = vpop.f32.mrf.mxu0  ;;  %v1385_v39 = vmul.f32 %v2464_v58, %v1384_v40  ;;  %vm1416_vm15 = vcmp.eq.f32.partialorder %v3653_v9, 0.0  ;;  %vm1426_vm0 = vcmp.eq.f32.partialorder %v3659_v34, inf }
 0x16e   : > { %v1146_v43 = vadd.f32 %v1145_v23, %v1121_v4  ;;  %v1099_v57 = vpop.f32.mrf.mxu1  ;;  %v1397_v3 = vmul.f32 %v2466_v27, %v1396_v7  ;;  %v1377_v37 = vmul.f32 %v1376_v1, %v3635_v44  ;;  %vm1428_vm1 = vcmp.eq.f32.partialorder %v3659_v34, 0.0 }
 0x16f   : > { %v1100_v41 = vadd.f32 %v1099_v57, %v1075_v55  ;;  %v1386_v45 = vmul.f32 0.5, %v1385_v39 }
 0x170   : > { %v1352_v13 = vmul.f32 %v1146_v43, %v1146_v43  ;;  %v1398_v49 = vmul.f32 0.5, %v1397_v3  ;;  %v1379_v50 = vsel %vm1378_vm8, %v3635_v44, %v1377_v37 }
 0x171   : > { %v1353_v36 = vmul.f32 %v1100_v41, %v1100_v41  ;;  %v1387_v46 = vsub.f32 1.5, %v1386_v45  ;;  %v3696_v7 = vsel %vm1380_vm9, %v1381_v29, %v1379_v50 }
 0x172   : > { %v2468_v61 = vpop.eup %2467  ;;  %v3678_v32 = vadd.f32 %v1352_v13, %v1340_v17  ;;  %v1399_v28 = vsub.f32 1.5, %v1398_v49 }
 0x173   : > { %v2470_v15 = vpop.eup %2469  ;;  %v3680_v20 = vadd.f32 %v1353_v36, %v1341_v26  ;;  %v1408_v8 = vmul.f32 %v2468_v61, %v3653_v9  ;;  %v1388_v47 = vmul.f32 %v2464_v58, %v1387_v46  ;;  %v1417_v46 = vand.u32 2147483648, %v3653_v9 }
 0x174   : > { %2471 = vrsqrt.f32 %v3678_v32  ;;  %v1123_v51 = vpop.f32.mrf.mxu2  ;;  %v1400_v33 = vmul.f32 %v2466_v27, %v1399_v28  ;;  %v1420_v63 = vmul.f32 %v2470_v15, %v3659_v34  ;;  %v1405_v27 = vand.u32 2147483648, %v3644_v38 }
 0x175   : > { %2473 = vrsqrt.f32 %v3680_v20  ;;  %v1147_v56 = vpop.f32.mrf.mxu3  ;;  %v1078_v35 = vpop.f32.mrf.mxu0  ;;  %v1409_v42 = vmul.f32 %v2468_v61, %v1408_v8  ;;  %v1389_v39 = vmul.f32 %v1388_v47, %v3642_v30  ;;  %vm1450_vm2 = vcmp.eq.f32.partialorder %v3680_v20, inf }
 0x176   : > { %v1148_v22 = vadd.f32 %v1147_v56, %v1123_v51  ;;  %v1102_v19 = vpop.f32.mrf.mxu1  ;;  %v1401_v0 = vmul.f32 %v1400_v33, %v3644_v38  ;;  %v1421_v40 = vmul.f32 %v2470_v15, %v1420_v63  ;;  %vm1452_vm3 = vcmp.eq.f32.partialorder %v3680_v20, 0.0 }
 0x177   : > { %v1103_v21 = vadd.f32 %v1102_v19, %v1078_v35  ;;  %v1410_v53 = vmul.f32 0.5, %v1409_v42  ;;  %vm1438_vm4 = vcmp.eq.f32.partialorder %v3678_v32, inf  ;;  %vm1440_vm5 = vcmp.eq.f32.partialorder %v3678_v32, 0.0 }
 0x178   : > { %v1354_v4 = vmul.f32 %v1148_v22, %v1148_v22  ;;  %v1403_v58 = vsel %vm1402_vm10, %v3644_v38, %v1401_v0  ;;  %v1422_v23 = vmul.f32 0.5, %v1421_v40  ;;  %v1345_v22 = vmul.f32 %v3669_v11, %v3669_v11 }
 0x179   : > { %v1355_v55 = vmul.f32 %v1103_v21, %v1103_v21  ;;  %v3699_v1 = vsel %vm1404_vm11, %v1405_v27, %v1403_v58  ;;  %v1411_v24 = vsub.f32 1.5, %v1410_v53  ;;  %v1346_v11 = vmul.f32 %v3676_v2, %v3676_v2 }
 0x17a   : > { %v2472_v43 = vpop.eup %2471  ;;  %v3702_v57 = vadd.f32 %v1354_v4, %v1342_v59  ;;  %v1737_v3 = vpack.c.bf16 %v3699_v1, %v3696_v7  ;;  %v1423_v44 = vsub.f32 1.5, %v1422_v23  ;;  %v1393_v59 = vand.u32 2147483648, %v3642_v30 }
 0x17b   : > { %v2474_v17 = vpop.eup %2473  ;;  %v3707_v26 = vadd.f32 %v1355_v55, %v1343_v12  ;;  %v1412_v38 = vmul.f32 %v2468_v61, %v1411_v24  ;;  %v1432_v41 = vmul.f32 %v2472_v43, %v3678_v32  ;;  %v1391_v12 = vsel %vm1390_vm12, %v3642_v30, %v1389_v39 }
 0x17c   : > { %2475 = vrsqrt.f32 %v3702_v57  ;;  %v1126_v45 = vpop.f32.mrf.mxu2  ;;  %1751 = vmatmul.bf16.vlgmr.msra.gmra.mxu2 %v1737_v3  ;;  %v1444_v13 = vmul.f32 %v2474_v17, %v3680_v20  ;;  %v1424_v51 = vmul.f32 %v2470_v15, %v1423_v44  ;;  %v3723_v50 = vsel %vm1392_vm13, %v1393_v59, %v1391_v12 }
 0x17d   : > { %v1150_v49 = vpop.f32.mrf.mxu3  ;;  %v1080_v36 = vpop.f32.mrf.mxu0  ;;  %v1413_v37 = vmul.f32 %v1412_v38, %v3653_v9  ;;  %v1433_v61 = vmul.f32 %v2472_v43, %v1432_v41  ;;  %2477 = vrsqrt.f32 %v3707_v26  ;;  %v1429_v44 = vand.u32 2147483648, %v3659_v34 }
 0x17e   : > { %v1151_v28 = vadd.f32 %v1150_v49, %v1126_v45  ;;  %v1104_v8 = vpop.f32.mrf.mxu1  ;;  %v1445_v29 = vmul.f32 %v2474_v17, %v1444_v13  ;;  %vm1462_vm6 = vcmp.eq.f32.partialorder %v3702_v57, inf  ;;  %vm1464_vm7 = vcmp.eq.f32.partialorder %v3702_v57, 0.0 }
 0x17f   : > { %v1105_v33 = vadd.f32 %v1104_v8, %v1080_v36  ;;  %v1415_v63 = vsel %vm1414_vm14, %v3653_v9, %v1413_v37  ;;  %v1434_v56 = vmul.f32 0.5, %v1433_v61  ;;  %v1425_v9 = vmul.f32 %v1424_v51, %v3659_v34 }
 0x180   : > { %v1356_v35 = vmul.f32 %v1151_v28, %v1151_v28  ;;  %v3725_v47 = vsel %vm1416_vm15, %v1417_v46, %v1415_v63  ;;  %v1446_v42 = vmul.f32 0.5, %v1445_v29  ;;  %v1441_v29 = vand.u32 2147483648, %v3678_v32 }
 0x181   : > { %v1357_v19 = vmul.f32 %v1105_v33, %v1105_v33  ;;  %v1738_v15 = vpack.c.bf16 %v3725_v47, %v3723_v50  ;;  %v1435_v30 = vsub.f32 1.5, %v1434_v56  ;;  %v1427_v3 = vsel %vm1426_vm0, %v3659_v34, %v1425_v9 }
 0x182   : > { %v2476_v0 = vpop.eup %2475  ;;  %v3732_v40 = vadd.f32 %v1356_v35, %v3672_v14  ;;  %v1447_v21 = vsub.f32 1.5, %v1446_v42  ;;  %v1430_v13 = vsel %vm1428_vm1, %v1429_v44, %v1427_v3  ;;  %v1465_v56 = vand.u32 2147483648, %v3702_v57 }
 0x183   : > { %v3735_v27 = vadd.f32 %v1357_v19, %v1345_v22  ;;  %1775 = vmatmul.bf16.vlgmr.msra.gmra.mxu3 %v1738_v15  ;;  %v1456_v53 = vmul.f32 %v2476_v0, %v3702_v57  ;;  %v2478_v4 = vpop.eup %2477  ;;  %v1436_v55 = vmul.f32 %v2472_v43, %v1435_v30  ;;  %v1517_v30 = vsub.f32 %v3473_v60, %v3696_v7 }
 0x184   : > { %2479 = vrsqrt.f32 %v3732_v40  ;;  %v1128_v58 = vpop.f32.mrf.mxu2  ;;  %v1448_v23 = vmul.f32 %v2474_v17, %v1447_v21  ;;  %v1453_v17 = vand.u32 2147483648, %v3680_v20  ;;  %v1468_v38 = vmul.f32 %v2478_v4, %v3707_v26 }
 0x185   : > { %2481 = vrsqrt.f32 %v3735_v27  ;;  %v1152_v14 = vpop.f32.mrf.mxu3  ;;  %v1457_v39 = vmul.f32 %v2476_v0, %v1456_v53  ;;  %v1437_v59 = vmul.f32 %v1436_v55, %v3678_v32  ;;  %v1519_v53 = vsub.f32 %v3476_v18, %v3699_v1 }
 0x186   : > { %v1153_v24 = vadd.f32 %v1152_v14, %v1128_v58  ;;  %v1449_v2 = vmul.f32 %v1448_v23, %v3680_v20  ;;  %v1469_v34 = vmul.f32 %v2478_v4, %v1468_v38  ;;  %v1521_v55 = vsub.f32 %v3537_v48, %v1430_v13 }
 0x187   : > { %v1458_v43 = vmul.f32 0.5, %v1457_v39  ;;  %vm1474_vm8 = vcmp.eq.f32.partialorder %v3707_v26, inf  ;;  %v1477_v60 = vand.u32 2147483648, %v3707_v26  ;;  %vm1476_vm9 = vcmp.eq.f32.partialorder %v3707_v26, 0.0 }
 0x188   : > { %v1358_v41 = vmul.f32 %v1153_v24, %v1153_v24  ;;  %v1451_v45 = vsel %vm1450_vm2, %v3680_v20, %v1449_v2  ;;  %v1470_v8 = vmul.f32 0.5, %v1469_v34  ;;  %v1439_v20 = vsel %vm1438_vm4, %v3678_v32, %v1437_v59 }
 0x189   : > { %v1454_v49 = vsel %vm1452_vm3, %v1453_v17, %v1451_v45  ;;  %v1459_v36 = vsub.f32 1.5, %v1458_v43  ;;  %v3765_v22 = vsel %vm1440_vm5, %v1441_v29, %v1439_v20  ;;  %v1529_v39 = vand.u32 2147483647, %v1517_v30 }
 0x18a   : > { %v2480_v12 = vpop.eup %2479  ;;  %v3753_v37 = vadd.f32 %v1358_v41, %v1346_v11  ;;  %v1739_v46 = vpack.c.bf16 %v1454_v49, %v1430_v13  ;;  %v1471_v63 = vsub.f32 1.5, %v1470_v8  ;;  %v1531_v24 = vand.u32 2147483647, %v1519_v53 }
 0x18b   : > { %v2482_v61 = vpop.eup %2481  ;;  %v1460_v28 = vmul.f32 %v2476_v0, %v1459_v36  ;;  %v1480_v42 = vmul.f32 %v2480_v12, %v3732_v40  ;;  %v1523_v0 = vsub.f32 %v3539_v52, %v1454_v49  ;;  %v1520_v44 = vsub.f32 %v3504_v6, %v3725_v47 }
 0x18c   : > { %2483 = vrsqrt.f32 %v3753_v37  ;;  %1756 = vmatmul.bf16.gmra.mxu2 %v1739_v46  ;;  %v1492_v51 = vmul.f32 %v2482_v61, %v3735_v27  ;;  %v1472_v15 = vmul.f32 %v2478_v4, %v1471_v63  ;;  %v1533_v2 = vand.u32 2147483647, %v1521_v55 }
 0x18d   : > { %v1461_v33 = vmul.f32 %v1460_v28, %v3702_v57  ;;  %v1481_v21 = vmul.f32 %v2480_v12, %v1480_v42  ;;  %v1535_v18 = vand.u32 2147483647, %v1523_v0  ;;  %vm1498_vm10 = vcmp.eq.f32.partialorder %v3735_v27, inf }
 0x18e   : > { %v1493_v35 = vmul.f32 %v2482_v61, %v1492_v51  ;;  %v1473_v58 = vmul.f32 %v1472_v15, %v3707_v26  ;;  %vm1500_vm11 = vcmp.eq.f32.partialorder %v3735_v27, 0.0  ;;  %vm1486_vm12 = vcmp.eq.f32.partialorder %v3732_v40, inf }
 0x18f   : > { %v1463_v19 = vsel %vm1462_vm6, %v3702_v57, %v1461_v33  ;;  %v1482_v52 = vmul.f32 0.5, %v1481_v21  ;;  %v1543_v41 = vadd.f32 %v1535_v18, %v1533_v2  ;;  %vm1488_vm13 = vcmp.eq.f32.partialorder %v3732_v40, 0.0 }
 0x190   : > { %v1466_v32 = vsel %vm1464_vm7, %v1465_v56, %v1463_v19  ;;  %v1494_v9 = vmul.f32 0.5, %v1493_v35  ;;  %v1475_v4 = vsel %vm1474_vm8, %v3707_v26, %v1473_v58  ;;  %v1501_v26 = vand.u32 2147483648, %v3735_v27 }
 0x191   : > { %v1740_v11 = vpack.c.bf16 %v1466_v32, %v3765_v22  ;;  %v1483_v14 = vsub.f32 1.5, %v1482_v52  ;;  %v1478_v48 = vsel %vm1476_vm9, %v1477_v60, %v1475_v4  ;;  %v1524_v47 = vsub.f32 %v3568_v10, %v1466_v32 }
 0x192   : > { %v2484_v23 = vpop.eup %2483  ;;  %v1495_v57 = vsub.f32 1.5, %v1494_v9  ;;  %v1525_v59 = vsub.f32 %v3591_v31, %v1478_v48  ;;  %v1518_v31 = vsub.f32 %v3502_v5, %v3723_v50  ;;  %v1522_v10 = vsub.f32 %v3566_v62, %v3765_v22 }
 0x193   : > { %1780 = vmatmul.bf16.gmra.mxu3 %v1740_v11  ;;  %v1504_v7 = vmul.f32 %v2484_v23, %v3753_v37  ;;  %v1484_v43 = vmul.f32 %v2480_v12, %v1483_v14  ;;  %v1532_v20 = vand.u32 2147483647, %v1520_v44  ;;  %v1536_v51 = vand.u32 2147483647, %v1524_v47 }
 0x194   : > { %v1496_v1 = vmul.f32 %v2482_v61, %v1495_v57  ;;  %v1541_v61 = vadd.f32 %v1531_v24, %v1529_v39  ;;  %v1537_v28 = vand.u32 2147483647, %v1525_v59  ;;  %vm1510_vm14 = vcmp.eq.f32.partialorder %v3753_v37, inf }
 0x195   : > { %v1505_v3 = vmul.f32 %v2484_v23, %v1504_v7  ;;  %v1485_v6 = vmul.f32 %v1484_v43, %v3732_v40  ;;  %v1513_v5 = vand.u32 2147483648, %v3753_v37  ;;  %v1534_v62 = vand.u32 2147483647, %v1522_v10 }
 0x196   : > { %v1497_v17 = vmul.f32 %v1496_v1, %v3735_v27  ;;  %v1547_v33 = vadd.f32 %v1543_v41, %v1541_v61  ;;  %vm1512_vm15 = vcmp.eq.f32.partialorder %v3753_v37, 0.0  ;;  %v1530_v42 = vand.u32 2147483647, %v1518_v31 }
 0x197   : > { %v1506_v38 = vmul.f32 0.5, %v1505_v3  ;;  %v1487_v12 = vsel %vm1486_vm12, %v3732_v40, %v1485_v6  ;;  %v1544_v22 = vadd.f32 %v1536_v51, %v1534_v62 }
 0x198   : > { %v1499_v45 = vsel %vm1498_vm10, %v3735_v27, %v1497_v17  ;;  %v1489_v27 = vand.u32 2147483648, %v3732_v40  ;;  %v1542_v0 = vadd.f32 %v1532_v20, %v1530_v42 }
 0x199   : > { %v1502_v13 = vsel %vm1500_vm11, %v1501_v26, %v1499_v45  ;;  %v1507_v49 = vsub.f32 1.5, %v1506_v38  ;;  %v1698_v53 = vpop.f32.mrf.mxu0 }
 0x19a   : > { %v1527_v36 = vsub.f32 %v3593_v16, %v1502_v13  ;;  %v1741_v34 = vpack.c.bf16 %v1502_v13, %v1478_v48  ;;  %v1490_v16 = vsel %vm1488_vm13, %v1489_v27, %v1487_v12  ;;  %v1548_v21 = vadd.f32 %v1544_v22, %v1542_v0 }
 0x19b   : > { %v1508_v46 = vmul.f32 %v2484_v23, %v1507_v49  ;;  %v1526_v40 = vsub.f32 %v3615_v54, %v1490_v16 }
 0x19c   : > { %v1539_v8 = vand.u32 2147483647, %v1527_v36  ;;  %1761 = vmatmul.bf16.gmra.mxu2 %v1741_v34 }
 0x19d   : > { %v1509_v29 = vmul.f32 %v1508_v46, %v3753_v37  ;;  %v1538_v32 = vand.u32 2147483647, %v1526_v40 }
 0x19e   : > { %v1545_v63 = vadd.f32 %v1539_v8, %v1537_v28 }
 0x19f   : > { %v1511_v50 = vsel %vm1510_vm14, %v3753_v37, %v1509_v29 }
 0x1a0   : > { %v1549_v56 = vadd.f32 %v1547_v33, %v1545_v63  ;;  %v1514_v35 = vsel %vm1512_vm15, %v1513_v5, %v1511_v50  ;;  %v1722_v54 = vpop.f32.mrf.mxu1 }
 0x1a1   : > { %v1528_v19 = vsub.f32 %v3617_v25, %v1514_v35  ;;  %v1742_v15 = vpack.c.bf16 %v1514_v35, %v1490_v16  ;;  %v1700_v23 = vpop.f32.mrf.mxu0  ;;  %v1723_v6 = vadd.f32 %v1722_v54, %v1698_v53 }
 0x1a2   : > { %1553 = vst [vmem:[%s302_s10] sm:$0xff] %v1549_v56 }
 0x1a3   : > { %v1540_v9 = vand.u32 2147483647, %v1528_v19  ;;  %1785 = vmatmul.bf16.gmra.mxu3 %v1742_v15 }
 0x1a5   : > { %v1546_v37 = vadd.f32 %v1540_v9, %v1538_v32 }
 0x1a7   : > { %v1550_v30 = vadd.f32 %v1548_v21, %v1546_v37 }
 0x1a8   : > { %v1724_v58 = vpop.f32.mrf.mxu1 }
 0x1a9   : > { %1554 = vst [vmem:[%s302_s10 + $0x8] sm:$0xff] %v1550_v30  ;;  %v1703_v25 = vpop.f32.mrf.mxu0  ;;  %v1725_v38 = vadd.f32 %v1724_v58, %v1700_v23 }
 0x1b0   : > { %v1727_v52 = vpop.f32.mrf.mxu1 }
 0x1b1   : > { %v1705_v1 = vpop.f32.mrf.mxu0  ;;  %v1728_v41 = vadd.f32 %v1727_v52, %v1703_v25 }
 0x1b8   : > { %v1729_v18 = vpop.f32.mrf.mxu1 }
 0x1b9   : > { %v1708_v48 = vpop.f32.mrf.mxu0  ;;  %v1730_v17 = vadd.f32 %v1729_v18, %v1705_v1 }
 0x1c0   : > { %v1732_v24 = vpop.f32.mrf.mxu1 }
 0x1c1   : > { %v1733_v34 = vadd.f32 %v1732_v24, %v1708_v48  ;;  %v1710_v12 = vpop.f32.mrf.mxu0 }
 0x1c8   : > { %v1734_v47 = vpop.f32.mrf.mxu1 }
 0x1c9   : > { %v1735_v10 = vadd.f32 %v1734_v47, %v1710_v12 }
 0x1ff   : > { %v1752_v11 = vpop.f32.mrf.mxu2 }
 0x206   : > { %v1776_v55 = vpop.f32.mrf.mxu3 }
 0x207   : > { %v1754_v57 = vpop.f32.mrf.mxu2  ;;  %v1777_v45 = vadd.f32 %v1776_v55, %v1752_v11 }
 0x209   : > { %v1792_v27 = vsub.f32 %v1723_v6, %v1777_v45 }
 0x20b   : > { %v1798_v51 = vand.u32 2147483647, %v1792_v27 }
 0x20e   : > { %v1778_v4 = vpop.f32.mrf.mxu3 }
 0x20f   : > { %v1757_v60 = vpop.f32.mrf.mxu2  ;;  %v1779_v43 = vadd.f32 %v1778_v4, %v1754_v57 }
 0x211   : > { %v1793_v13 = vsub.f32 %v1725_v38, %v1779_v43 }
 0x213   : > { %v1799_v28 = vand.u32 2147483647, %v1793_v13 }
 0x215   : > { %v1804_v63 = vadd.f32 %v1799_v28, %v1798_v51 }
 0x216   : > { %v1781_v7 = vpop.f32.mrf.mxu3 }
 0x217   : > { %v1759_v14 = vpop.f32.mrf.mxu2  ;;  %v1782_v26 = vadd.f32 %v1781_v7, %v1757_v60 }
 0x219   : > { %v1794_v49 = vsub.f32 %v1728_v41, %v1782_v26 }
 0x21b   : > { %v1800_v8 = vand.u32 2147483647, %v1794_v49 }
 0x21e   : > { %v1783_v39 = vpop.f32.mrf.mxu3 }
 0x21f   : > { %v1762_v3 = vpop.f32.mrf.mxu2  ;;  %v1784_v44 = vadd.f32 %v1783_v39, %v1759_v14 }
 0x221   : > { %v1795_v59 = vsub.f32 %v1730_v17, %v1784_v44 }
 0x223   : > { %v1801_v31 = vand.u32 2147483647, %v1795_v59 }
 0x225   : > { %v1805_v29 = vadd.f32 %v1801_v31, %v1800_v8 }
 0x226   : > { %v1786_v2 = vpop.f32.mrf.mxu3 }
 0x227   : > { %v1787_v36 = vadd.f32 %v1786_v2, %v1762_v3  ;;  %v1764_v46 = vpop.f32.mrf.mxu2  ;;  %v1807_v50 = vadd.f32 %v1805_v29, %v1804_v63 }
 0x229   : > { %v1796_v16 = vsub.f32 %v1733_v34, %v1787_v36 }
 0x22b   : > { %v1802_v5 = vand.u32 2147483647, %v1796_v16 }
 0x22e   : > { %v1788_v61 = vpop.f32.mrf.mxu3 }
 0x22f   : > { %v1789_v20 = vadd.f32 %v1788_v61, %v1764_v46 }
 0x231   : > { %v1797_v33 = vsub.f32 %v1735_v10, %v1789_v20 }
 0x233   : > { %v1803_v62 = vand.u32 2147483647, %v1797_v33 }
 0x235   : > { %v1806_v40 = vadd.f32 %v1803_v62, %v1802_v5 }
 0x237   : > { %v1808_v56 = vadd.f32 %v1807_v50, %v1806_v40 }
 0x239   : > { %1810 = vst [vmem:[%s306_s14] sm:$0xff] %v1808_v56 }
 0x23a PF: > { %s15_s19 = sadd.s32 1, %s2523_s19   ;;  %s3884_s15 = smov %s2511_s16 }
 0x23b   : > { %p12_p10 = scmp.ge.s32.totalorder %s15_s19, 4   ;;  %s3885_s16 = smov %s2585_s23 }
 0x23c   : > { %s3886_s17 = smov %s2519_s18  ;;  %s3887_s18 = smov %s3889_s20 }
 0x23d   :  { %14 = sbr.rel (!%p12_p10) target bundleno = 3 (0x3), region = 122 }

// kernel: spectral_distances_forward.5
= control target key start
LH: loop header
LB: loop body
LE: loop exit
PB: predicated region body
PF: predicated region fallthrough
CT: control target
= control target key end

     0   :  { %s1285_s9 = smov 0   ;;  %s1287_s10 = smov 0   ;;  %s1765_s0 = inlined_call_operand.vmem [shape: bf16[2,160,128], index: 0, kind: input, shape index: {}]   ;;  %s1766_s1 = inlined_call_operand.vmem [shape: bf16[128,256], index: 1, kind: input, shape index: {}]   ;;  %s1767_s2 = inlined_call_operand.vmem [shape: f32[2,8,128], index: 2, kind: output, shape index: {}]  }
   0x1   :  { %s1289_s11 = smov 0   ;;  %s1291_s12 = smov 0  }
   0x2   :  { %s1293_s13 = smov 0  }
   0x3 LB: > { %s24_s14 = sadd.s32 1, %s1264_s12  ;;  %p40_p1 = scmp.ne.s32.totalorder %s1256_s10, %s1252_s9  ;;  %s1268_s13 = sphi %s1293_s13, %s12_s13   ;;  %s1264_s12 = sphi %s1291_s12, %s1771_s12   ;;  %s1260_s11 = sphi %s1289_s11, %s1770_s11   ;;  %s1256_s10 = sphi %s1287_s10, %s1769_s10   ;;  %s1252_s9 = sphi %s1285_s9, %s1768_s9  }
   0x4   : > { %p26_p0 = scmp.ge.s32.totalorder %s24_s14, 2  ;;  %p41_p2 = scmp.eq.s32.totalorder %s1268_s13, 0 }
   0x5   : > { %s33_s16 = sadd.s32 1, %s1256_s10  ;;  %p1000_p5 = scmp.ge.s32.totalorder %s1268_s13, 2 }
   0x6   : > { %s1773_s14 = smov (%p26_p0, %s24_s14), 0  ;;  %p42_p3 = por %p41_p2, %p40_p1 }
   0x7   : > { %s30_s15 = ssub.s32 %s1264_s12, %s1773_s14  ;;  %116 = sbr.rel (%p1000_p5) target bundleno = 27 (0x1b), region = 20 }
   0x8   : > { %p31_p4 = scmp.eq.s32.totalorder %s30_s15, 0 }
   0xa   : > { %s1320_s17 = scalar_select %p31_p4, %s1256_s10, %s33_s16  }
   0xc   : > { %119 = sbr.rel (!%p42_p3) target bundleno = 27 (0x1b), region = 24  ;;  %s121_s18 = sand.u32 (%p42_p3), 1, %s1256_s10  }
   0xd   : > { %s1120_s19 = smul.u32 (%p42_p3), 40, %s1264_s12 }
   0xe   : > { %s1147_s20 = smul.u32 (%p42_p3), 80, %s121_s18 }
   0xf   : > { %s127_s23 = scalar_lea.vmem (%p42_p3), %s1765_s0, %s1120_s19 }
  0x10   : > { %v144_v0 = vld [vmem:[%s127_s23] sm:$0xff] (%p42_p3)   ;;  %v148_v1 = vld [vmem:[%s127_s23 + $0x8] sm:$0xff] (%p42_p3)   ;;  %v152_v2 = vld [vmem:[%s127_s23 + $0x10] sm:$0xff] (%p42_p3)   ;;  %s123_s24 = scalar_lea.vmem (%p42_p3), [#allocation2], %s1147_s20 }
  0x11   : > { %145 = vst [vmem:[%s123_s24] sm:$0xff] %v144_v0   ;;  %v156_v3 = vld [vmem:[%s127_s23 + $0x18] sm:$0xff]   ;;  %v160_v4 = vld [vmem:[%s127_s23 + $0x20] sm:$0xff]   ;;  %v164_v5 = vld [vmem:[%s127_s23 + $0x50] sm:$0xff]  }
  0x12   : > { %149 = vst [vmem:[%s123_s24 + $0x8] sm:$0xff] %v148_v1   ;;  %v168_v6 = vld [vmem:[%s127_s23 + $0x58] sm:$0xff]   ;;  %v172_v7 = vld [vmem:[%s127_s23 + $0x60] sm:$0xff]   ;;  %v176_v8 = vld [vmem:[%s127_s23 + $0x68] sm:$0xff]  }
  0x13   : > { %153 = vst [vmem:[%s123_s24 + $0x10] sm:$0xff] %v152_v2   ;;  %v180_v9 = vld [vmem:[%s127_s23 + $0x70] sm:$0xff]  }
  0x14   : > { %157 = vst [vmem:[%s123_s24 + $0x18] sm:$0xff] %v156_v3  }
  0x15   : > { %161 = vst [vmem:[%s123_s24 + $0x20] sm:$0xff] %v160_v4  }
  0x16   : > { %165 = vst [vmem:[%s123_s24 + $0x28] sm:$0xff] %v164_v5  }
  0x17   : > { %169 = vst [vmem:[%s123_s24 + $0x30] sm:$0xff] %v168_v6  }
  0x18   : > { %173 = vst [vmem:[%s123_s24 + $0x38] sm:$0xff] %v172_v7  }
  0x19   : > { %177 = vst [vmem:[%s123_s24 + $0x40] sm:$0xff] %v176_v8  }
  0x1a   : > { %181 = vst [vmem:[%s123_s24 + $0x48] sm:$0xff] %v180_v9  }
  0x1b PF: > { %p1002_p6 = scmp.ge.s32.totalorder %s1268_s13, 1  ;;  %p246_p7 = scmp.lt.s32.totalorder %s1268_s13, 3 }
  0x1d   : > { %p247_p8 = pnand %p1002_p6, %p246_p7 }
  0x1e   : > { %s253_s7 = sand.u32 (!%p247_p8), 1, %s1252_s9   ;;  %p275_p9 = scmp.lt.s32.totalorder (!%p247_p8), %s1260_s11, 1 }
  0x1f   : > { %250 = sbr.rel (%p247_p8) target bundleno = 309 (0x135), region = 65 }
  0x20   : > { %s1148_s19 = smul.u32 (!%p247_p8), 80, %s253_s7 }
  0x22   : > { %s255_s27 = scalar_lea.vmem (!%p247_p8), [#allocation2], %s1148_s19 }
  0x24   : > { %v1082_v10 = vld [vmem:[%s1766_s1 + $0x70] sm:$0xf]  ;;  %v1136_v11 = vld [vmem:[%s1766_s1 + $0x74] sm:$0xf0]  ;;  %v1135_v12 = vld [vmem:[%s1766_s1 + $0x74] sm:$0xf] }
  0x25   : > { %v1083_v13 = vor.u32 %v1136_v11, %v1082_v10  ;;  %v1084_v14 = vld [vmem:[%s1766_s1 + $0x78] sm:$0xf0]  ;;  %v1074_v15 = vld [vmem:[%s1766_s1 + $0x60] sm:$0xf]  ;;  %v1134_v16 = vld [vmem:[%s1766_s1 + $0x64] sm:$0xf0] }
  0x26   : > { %v1087_v17 = vor.u32 %v1135_v12, %v1084_v14  ;;  %v1133_v18 = vld [vmem:[%s1766_s1 + $0x64] sm:$0xf]  ;;  %v1076_v19 = vld [vmem:[%s1766_s1 + $0x68] sm:$0xf0]  ;;  %v1075_v20 = vor.u32 %v1134_v16, %v1074_v15  ;;  %v1066_v22 = vld [vmem:[%s1766_s1 + $0x50] sm:$0xf] }
  0x27   : > { %420 = vmatpush.bf16.msra.mxu0 %v1083_v13  ;;  %529 = vmatpush.bf16.msra.mxu2 %v1083_v13  ;;  %v1079_v21 = vor.u32 %v1133_v18, %v1076_v19  ;;  %v1132_v23 = vld [vmem:[%s1766_s1 + $0x54] sm:$0xf0]  ;;  %v1131_v24 = vld [vmem:[%s1766_s1 + $0x54] sm:$0xf]  ;;  %v1068_v25 = vld [vmem:[%s1766_s1 + $0x58] sm:$0xf0] }
  0x28   : > { %454 = vmatpush.bf16.msra.mxu1 %v1087_v17  ;;  %563 = vmatpush.bf16.msra.mxu3 %v1087_v17  ;;  %v1067_v26 = vor.u32 %v1132_v23, %v1066_v22  ;;  %v1071_v27 = vor.u32 %v1131_v24, %v1068_v25  ;;  %v1058_v28 = vld [vmem:[%s1766_s1 + $0x40] sm:$0xf]  ;;  %v1130_v29 = vld [vmem:[%s1766_s1 + $0x44] sm:$0xf0]  ;;  %v1129_v30 = vld [vmem:[%s1766_s1 + $0x44] sm:$0xf] }
  0x29   : > { %v1060_v31 = vld [vmem:[%s1766_s1 + $0x48] sm:$0xf0]  ;;  %v1059_v32 = vor.u32 %v1130_v29, %v1058_v28  ;;  %v1050_v34 = vld [vmem:[%s1766_s1 + $0x30] sm:$0xf]  ;;  %v1128_v35 = vld [vmem:[%s1766_s1 + $0x34] sm:$0xf0] }
  0x2a   : > { %v1063_v33 = vor.u32 %v1129_v30, %v1060_v31  ;;  %v1127_v36 = vld [vmem:[%s1766_s1 + $0x34] sm:$0xf]  ;;  %v1052_v37 = vld [vmem:[%s1766_s1 + $0x38] sm:$0xf0]  ;;  %v1051_v38 = vor.u32 %v1128_v35, %v1050_v34  ;;  %v1042_v40 = vld [vmem:[%s1766_s1 + $0x20] sm:$0xf] }
  0x2b   : > { %421 = vmatpush.bf16.msra.mxu0 %v1075_v20  ;;  %530 = vmatpush.bf16.msra.mxu2 %v1075_v20  ;;  %v1055_v39 = vor.u32 %v1127_v36, %v1052_v37  ;;  %v1126_v41 = vld [vmem:[%s1766_s1 + $0x24] sm:$0xf0]  ;;  %v1125_v42 = vld [vmem:[%s1766_s1 + $0x24] sm:$0xf]  ;;  %v1044_v43 = vld [vmem:[%s1766_s1 + $0x28] sm:$0xf0] }
  0x2c   : > { %455 = vmatpush.bf16.msra.mxu1 %v1079_v21  ;;  %564 = vmatpush.bf16.msra.mxu3 %v1079_v21  ;;  %v1043_v44 = vor.u32 %v1126_v41, %v1042_v40  ;;  %v1047_v45 = vor.u32 %v1125_v42, %v1044_v43  ;;  %v1034_v46 = vld [vmem:[%s1766_s1 + $0x10] sm:$0xf]  ;;  %v1124_v47 = vld [vmem:[%s1766_s1 + $0x14] sm:$0xf0]  ;;  %v1123_v48 = vld [vmem:[%s1766_s1 + $0x14] sm:$0xf] }
  0x2d   : > { %v1036_v49 = vld [vmem:[%s1766_s1 + $0x18] sm:$0xf0]  ;;  %v1035_v50 = vor.u32 %v1124_v47, %v1034_v46  ;;  %v1026_v52 = vld [vmem:[%s1766_s1] sm:$0xf]  ;;  %v1122_v53 = vld [vmem:[%s1766_s1 + $0x4] sm:$0xf0] }
  0x2e   : > { %v1039_v51 = vor.u32 %v1123_v48, %v1036_v49  ;;  %v1121_v54 = vld [vmem:[%s1766_s1 + $0x4] sm:$0xf]  ;;  %v1028_v55 = vld [vmem:[%s1766_s1 + $0x8] sm:$0xf0]  ;;  %v1027_v56 = vor.u32 %v1122_v53, %v1026_v52  ;;  %s1775_s11 = smov (!%p275_p9, %s1260_s11), 1 }
  0x2f   : > { %422 = vmatpush.bf16.msra.mxu0 %v1067_v26  ;;  %531 = vmatpush.bf16.msra.mxu2 %v1067_v26  ;;  %v1031_v57 = vor.u32 %v1121_v54, %v1028_v55  ;;  %v1137_v58 = vld [vmem:[%s255_s27] sm:$0xff]  ;;  %v1142_v59 = vld [vmem:[%s255_s27 + $0x28] sm:$0xff]  ;;  %v1143_v61 = vld [vmem:[%s255_s27 + $0x30] sm:$0xff]  ;;  %s1003_s28 = sshll.u32 %s1775_s11, 3 }
  0x30   : > { %456 = vmatpush.bf16.msra.mxu1 %v1071_v27  ;;  %565 = vmatpush.bf16.msra.mxu3 %v1071_v27  ;;  %v1138_v60 = vld [vmem:[%s255_s27 + $0x8] sm:$0xff]  ;;  %v1139_v62 = vld [vmem:[%s255_s27 + $0x10] sm:$0xff]  ;;  %v1144_v63 = vld [vmem:[%s255_s27 + $0x38] sm:$0xff]  ;;  %s278_s3 = scalar_lea.vmem %s1767_s2, %s1003_s28 }
  0x31   : > { %v1140_v0 = vld [vmem:[%s255_s27 + $0x18] sm:$0xff]  ;;  %v1145_v1 = vld [vmem:[%s255_s27 + $0x40] sm:$0xff]  ;;  %v1146_v3 = vld [vmem:[%s255_s27 + $0x48] sm:$0xff] }
  0x32   : > { %v1141_v2 = vld [vmem:[%s255_s27 + $0x20] sm:$0xff] }
  0x33   : > { %423 = vmatpush.bf16.msra.mxu0 %v1059_v32  ;;  %532 = vmatpush.bf16.msra.mxu2 %v1059_v32 }
  0x34   : > { %457 = vmatpush.bf16.msra.mxu1 %v1063_v33  ;;  %566 = vmatpush.bf16.msra.mxu3 %v1063_v33 }
  0x37   : > { %424 = vmatpush.bf16.msra.mxu0 %v1051_v38  ;;  %533 = vmatpush.bf16.msra.mxu2 %v1051_v38 }
  0x38   : > { %458 = vmatpush.bf16.msra.mxu1 %v1055_v39  ;;  %567 = vmatpush.bf16.msra.mxu3 %v1055_v39 }
  0x3b   : > { %425 = vmatpush.bf16.msra.mxu0 %v1043_v44  ;;  %534 = vmatpush.bf16.msra.mxu2 %v1043_v44 }
  0x3c   : > { %459 = vmatpush.bf16.msra.mxu1 %v1047_v45  ;;  %568 = vmatpush.bf16.msra.mxu3 %v1047_v45 }
  0x3f   : > { %426 = vmatpush.bf16.msra.mxu0 %v1035_v50  ;;  %535 = vmatpush.bf16.msra.mxu2 %v1035_v50 }
  0x40   : > { %460 = vmatpush.bf16.msra.mxu1 %v1039_v51  ;;  %569 = vmatpush.bf16.msra.mxu3 %v1039_v51 }
  0x43   : > { %427 = vmatpush.bf16.msra.mxu0 %v1027_v56  ;;  %536 = vmatpush.bf16.msra.mxu2 %v1027_v56 }
  0x44   : > { %461 = vmatpush.bf16.msra.mxu1 %v1031_v57  ;;  %570 = vmatpush.bf16.msra.mxu3 %v1031_v57 }
  0x46   : > { %428 = vmatmul.bf16.vlgmr.msra.gmra.mxu0 %v1137_v58  ;;  %537 = vmatmul.bf16.vlgmr.msra.gmra.mxu2 %v1142_v59 }
  0x47   : > { %462 = vmatmul.bf16.vlgmr.msra.gmra.mxu1 %v1137_v58  ;;  %571 = vmatmul.bf16.vlgmr.msra.gmra.mxu3 %v1142_v59 }
  0x56   : > { %433 = vmatmul.bf16.gmra.mxu0 %v1138_v60  ;;  %542 = vmatmul.bf16.gmra.mxu2 %v1143_v61 }
  0x57   : > { %467 = vmatmul.bf16.gmra.mxu1 %v1138_v60  ;;  %576 = vmatmul.bf16.gmra.mxu3 %v1143_v61 }
  0x66   : > { %438 = vmatmul.bf16.gmra.mxu0 %v1139_v62  ;;  %547 = vmatmul.bf16.gmra.mxu2 %v1144_v63 }
  0x67   : > { %472 = vmatmul.bf16.gmra.mxu1 %v1139_v62  ;;  %581 = vmatmul.bf16.gmra.mxu3 %v1144_v63 }
  0x76   : > { %443 = vmatmul.bf16.gmra.mxu0 %v1140_v0  ;;  %552 = vmatmul.bf16.gmra.mxu2 %v1145_v1 }
  0x77   : > { %477 = vmatmul.bf16.gmra.mxu1 %v1140_v0  ;;  %586 = vmatmul.bf16.gmra.mxu3 %v1145_v1 }
  0x86   : > { %448 = vmatmul.bf16.gmra.mxu0 %v1141_v2  ;;  %557 = vmatmul.bf16.gmra.mxu2 %v1146_v3 }
  0x87   : > { %482 = vmatmul.bf16.gmra.mxu1 %v1141_v2  ;;  %591 = vmatmul.bf16.gmra.mxu3 %v1146_v3 }
  0xc3   : > { %v429_v4 = vpop.f32.mrf.mxu0 }
  0xc4   : > { %v597_v5 = vmul.f32 %v429_v4, %v429_v4  ;;  %v463_v6 = vpop.f32.mrf.mxu1 }
  0xc5   : > { %v607_v7 = vmul.f32 %v463_v6, %v463_v6 }
  0xc7   : > { %v617_v8 = vadd.f32 %v607_v7, %v597_v5 }
  0xc9   : > { %1190 = vrsqrt.f32 %v617_v8  ;;  %v538_v9 = vpop.f32.mrf.mxu2  ;;  %vm634_vm0 = vcmp.eq.f32.partialorder %v617_v8, inf  ;;  %v637_v49 = vand.u32 2147483648, %v617_v8  ;;  %vm636_vm2 = vcmp.eq.f32.partialorder %v617_v8, 0.0 }
  0xca   : > { %v747_v10 = vmul.f32 %v538_v9, %v538_v9  ;;  %v572_v11 = vpop.f32.mrf.mxu3 }
  0xcb   : > { %v757_v12 = vmul.f32 %v572_v11, %v572_v11  ;;  %v431_v13 = vpop.f32.mrf.mxu0 }
  0xcc   : > { %v465_v14 = vpop.f32.mrf.mxu1  ;;  %v598_v27 = vmul.f32 %v431_v13, %v431_v13 }
  0xcd   : > { %v767_v15 = vadd.f32 %v757_v12, %v747_v10  ;;  %v608_v28 = vmul.f32 %v465_v14, %v465_v14 }
  0xcf   : > { %v1191_v16 = vpop.eup %1190  ;;  %1192 = vrsqrt.f32 %v767_v15  ;;  %v1427_v36 = vadd.f32 %v608_v28, %v598_v27  ;;  %vm784_vm1 = vcmp.eq.f32.partialorder %v767_v15, inf  ;;  %v787_v50 = vand.u32 2147483648, %v767_v15 }
  0xd0   : > { %v628_v17 = vmul.f32 %v1191_v16, %v617_v8  ;;  %vm786_vm3 = vcmp.eq.f32.partialorder %v767_v15, 0.0 }
  0xd1   : > { %v540_v18 = vpop.f32.mrf.mxu2  ;;  %1194 = vrsqrt.f32 %v1427_v36  ;;  %vm646_vm4 = vcmp.eq.f32.partialorder %v1427_v36, inf  ;;  %vm648_vm5 = vcmp.eq.f32.partialorder %v1427_v36, 0.0 }
  0xd2   : > { %v629_v19 = vmul.f32 %v1191_v16, %v628_v17  ;;  %v574_v20 = vpop.f32.mrf.mxu3  ;;  %v748_v31 = vmul.f32 %v540_v18, %v540_v18 }
  0xd3   : > { %v434_v21 = vpop.f32.mrf.mxu0  ;;  %v758_v32 = vmul.f32 %v574_v20, %v574_v20 }
  0xd4   : > { %v630_v22 = vmul.f32 0.5, %v629_v19  ;;  %v468_v23 = vpop.f32.mrf.mxu1  ;;  %v599_v42 = vmul.f32 %v434_v21, %v434_v21 }
  0xd5   : > { %v1193_v24 = vpop.eup %1192  ;;  %v1429_v40 = vadd.f32 %v758_v32, %v748_v31  ;;  %v609_v43 = vmul.f32 %v468_v23, %v468_v23 }
  0xd6   : > { %v631_v25 = vsub.f32 1.5, %v630_v22  ;;  %v778_v26 = vmul.f32 %v1193_v24, %v767_v15 }
  0xd7   : > { %1196 = vrsqrt.f32 %v1429_v40  ;;  %v1433_v51 = vadd.f32 %v609_v43, %v599_v42  ;;  %v1195_v61 = vpop.eup %1194  ;;  %vm796_vm6 = vcmp.eq.f32.partialorder %v1429_v40, inf  ;;  %vm798_vm7 = vcmp.eq.f32.partialorder %v1429_v40, 0.0 }
  0xd8   : > { %v632_v29 = vmul.f32 %v1191_v16, %v631_v25  ;;  %v779_v30 = vmul.f32 %v1193_v24, %v778_v26  ;;  %v640_v3 = vmul.f32 %v1195_v61, %v1427_v36 }
  0xd9   : > { %v543_v33 = vpop.f32.mrf.mxu2  ;;  %1198 = vrsqrt.f32 %v1433_v51  ;;  %vm658_vm8 = vcmp.eq.f32.partialorder %v1433_v51, inf  ;;  %vm660_vm10 = vcmp.eq.f32.partialorder %v1433_v51, 0.0 }
  0xda   : > { %v780_v34 = vmul.f32 0.5, %v779_v30  ;;  %v577_v35 = vpop.f32.mrf.mxu3  ;;  %v633_v38 = vmul.f32 %v632_v29, %v617_v8  ;;  %v749_v45 = vmul.f32 %v543_v33, %v543_v33  ;;  %v641_v13 = vmul.f32 %v1195_v61, %v640_v3 }
  0xdb   : > { %v436_v37 = vpop.f32.mrf.mxu0  ;;  %v759_v46 = vmul.f32 %v577_v35, %v577_v35 }
  0xdc   : > { %v781_v39 = vsub.f32 1.5, %v780_v34  ;;  %v470_v41 = vpop.f32.mrf.mxu1  ;;  %v635_v47 = vsel %vm634_vm0, %v617_v8, %v633_v38  ;;  %v600_v62 = vmul.f32 %v436_v37, %v436_v37  ;;  %v642_v21 = vmul.f32 0.5, %v641_v13 }
  0xdd   : > { %v1435_v54 = vadd.f32 %v759_v46, %v749_v45  ;;  %v1437_v56 = vsel %vm636_vm2, %v637_v49, %v635_v47  ;;  %v610_v63 = vmul.f32 %v470_v41, %v470_v41  ;;  %v1197_v0 = vpop.eup %1196 }
  0xde   : > { %v782_v44 = vmul.f32 %v1193_v24, %v781_v39  ;;  %v790_v4 = vmul.f32 %v1197_v0, %v1429_v40  ;;  %v643_v35 = vsub.f32 1.5, %v642_v21 }
  0xdf   : > { %1200 = vrsqrt.f32 %v1435_v54  ;;  %v1447_v5 = vadd.f32 %v610_v63, %v600_v62  ;;  %v1451_v9 = vpop.eup %1198  ;;  %vm808_vm9 = vcmp.eq.f32.partialorder %v1435_v54, inf  ;;  %vm810_vm11 = vcmp.eq.f32.partialorder %v1435_v54, 0.0 }
  0xe0   : > { %v783_v48 = vmul.f32 %v782_v44, %v767_v15  ;;  %v791_v14 = vmul.f32 %v1197_v0, %v790_v4  ;;  %v644_v46 = vmul.f32 %v1195_v61, %v643_v35 }
  0xe1   : > { %v545_v52 = vpop.f32.mrf.mxu2  ;;  %1202 = vrsqrt.f32 %v1447_v5  ;;  %vm670_vm12 = vcmp.eq.f32.partialorder %v1447_v5, inf  ;;  %vm672_vm14 = vcmp.eq.f32.partialorder %v1447_v5, 0.0 }
  0xe2   : > { %v785_v53 = vsel %vm784_vm1, %v767_v15, %v783_v48  ;;  %v579_v55 = vpop.f32.mrf.mxu3  ;;  %v750_v1 = vmul.f32 %v545_v52, %v545_v52  ;;  %v652_v15 = vmul.f32 %v1451_v9, %v1433_v51  ;;  %v792_v22 = vmul.f32 0.5, %v791_v14 }
  0xe3   : > { %v1439_v57 = vsel %vm786_vm3, %v787_v50, %v785_v53  ;;  %v439_v58 = vpop.f32.mrf.mxu0  ;;  %v760_v2 = vmul.f32 %v579_v55, %v579_v55  ;;  %v645_v4 = vmul.f32 %v644_v46, %v1427_v36 }
  0xe4   : > { %v898_v59 = vsub.f32 %v1437_v56, %v1439_v57  ;;  %v473_v60 = vpop.f32.mrf.mxu1  ;;  %v601_v16 = vmul.f32 %v439_v58, %v439_v58  ;;  %v653_v24 = vmul.f32 %v1451_v9, %v652_v15  ;;  %v793_v37 = vsub.f32 1.5, %v792_v22 }
  0xe5   : > { %v1449_v7 = vadd.f32 %v760_v2, %v750_v1  ;;  %v1453_v11 = vpop.eup %1200  ;;  %v611_v17 = vmul.f32 %v473_v60, %v473_v60  ;;  %v649_v60 = vand.u32 2147483648, %v1427_v36  ;;  %v673_v22 = vand.u32 2147483648, %v1447_v5 }
  0xe6   : > { %v802_v18 = vmul.f32 %v1453_v11, %v1435_v54  ;;  %v654_v38 = vmul.f32 0.5, %v653_v24  ;;  %v794_v52 = vmul.f32 %v1197_v0, %v793_v37  ;;  %v799_v0 = vand.u32 2147483648, %v1429_v40 }
  0xe7   : > { %1204 = vrsqrt.f32 %v1449_v7  ;;  %v1462_v25 = vadd.f32 %v611_v17, %v601_v16  ;;  %v1464_v27 = vpop.eup %1202  ;;  %vm820_vm13 = vcmp.eq.f32.partialorder %v1449_v7, inf  ;;  %vm822_vm15 = vcmp.eq.f32.partialorder %v1449_v7, 0.0 }
  0xe8   : > { %v803_v28 = vmul.f32 %v1453_v11, %v802_v18  ;;  %v664_v39 = vmul.f32 %v1464_v27, %v1447_v5  ;;  %v655_v53 = vsub.f32 1.5, %v654_v38  ;;  %v811_v18 = vand.u32 2147483648, %v1435_v54 }
  0xe9   : > { %v548_v6 = vpop.f32.mrf.mxu2  ;;  %1206 = vrsqrt.f32 %v1462_v25  ;;  %vm682_vm0 = vcmp.eq.f32.partialorder %v1462_v25, inf }
  0xea   : > { %v582_v8 = vpop.f32.mrf.mxu3  ;;  %v751_v19 = vmul.f32 %v548_v6, %v548_v6  ;;  %v804_v42 = vmul.f32 0.5, %v803_v28  ;;  %v665_v55 = vmul.f32 %v1464_v27, %v664_v39  ;;  %v661_v6 = vand.u32 2147483648, %v1433_v51 }
  0xeb   : > { %v441_v10 = vpop.f32.mrf.mxu0  ;;  %v761_v20 = vmul.f32 %v582_v8, %v582_v8 }
  0xec   : > { %v475_v12 = vpop.f32.mrf.mxu1  ;;  %v602_v32 = vmul.f32 %v441_v10, %v441_v10  ;;  %v805_v62 = vsub.f32 1.5, %v804_v42  ;;  %v795_v10 = vmul.f32 %v794_v52, %v1429_v40  ;;  %v666_v13 = vmul.f32 0.5, %v665_v55 }
  0xed   : > { %v1467_v29 = vadd.f32 %v761_v20, %v751_v19  ;;  %v1469_v31 = vpop.eup %1204  ;;  %v612_v33 = vmul.f32 %v475_v12, %v475_v12  ;;  %v656_v12 = vmul.f32 %v1451_v9, %v655_v53 }
  0xee   : > { %v814_v43 = vmul.f32 %v1469_v31, %v1449_v7  ;;  %v806_v15 = vmul.f32 %v1453_v11, %v805_v62  ;;  %v647_v11 = vsel %vm646_vm4, %v1427_v36, %v645_v4  ;;  %v797_v28 = vsel %vm796_vm6, %v1429_v40, %v795_v10 }
  0xef   : > { %1208 = vrsqrt.f32 %v1467_v29  ;;  %v1477_v45 = vadd.f32 %v612_v33, %v602_v32  ;;  %v1487_v1 = vpop.eup %1206  ;;  %v667_v32 = vsub.f32 1.5, %v666_v13  ;;  %v1532_v42 = vsel %vm648_vm5, %v649_v60, %v647_v11 }
  0xf0   : > { %v815_v63 = vmul.f32 %v1469_v31, %v814_v43  ;;  %v676_v17 = vmul.f32 %v1487_v1, %v1462_v25  ;;  %v807_v35 = vmul.f32 %v806_v15, %v1435_v54  ;;  %v823_v60 = vand.u32 2147483648, %v1449_v7 }
  0xf1   : > { %v550_v23 = vpop.f32.mrf.mxu2  ;;  %v668_v53 = vmul.f32 %v1464_v27, %v667_v32  ;;  %vm832_vm1 = vcmp.eq.f32.partialorder %v1467_v29, inf  ;;  %vm834_vm2 = vcmp.eq.f32.partialorder %v1467_v29, 0.0  ;;  %vm694_vm4 = vcmp.eq.f32.partialorder %v1477_v45, inf }
  0xf2   : > { %v584_v26 = vpop.f32.mrf.mxu3  ;;  %v752_v41 = vmul.f32 %v550_v23, %v550_v23  ;;  %v816_v16 = vmul.f32 0.5, %v815_v63  ;;  %v677_v38 = vmul.f32 %v1487_v1, %v676_v17  ;;  %v809_v55 = vsel %vm808_vm9, %v1435_v54, %v807_v35 }
  0xf3   : > { %v444_v30 = vpop.f32.mrf.mxu0  ;;  %v762_v44 = vmul.f32 %v584_v26, %v584_v26  ;;  %v685_v63 = vand.u32 2147483648, %v1462_v25  ;;  %v669_v15 = vmul.f32 %v668_v53, %v1447_v5  ;;  %vm696_vm6 = vcmp.eq.f32.partialorder %v1477_v45, 0.0 }
  0xf4   : > { %v478_v34 = vpop.f32.mrf.mxu1  ;;  %v603_v48 = vmul.f32 %v444_v30, %v444_v30  ;;  %v657_v30 = vmul.f32 %v656_v12, %v1433_v51  ;;  %v817_v37 = vsub.f32 1.5, %v816_v16  ;;  %v678_v62 = vmul.f32 0.5, %v677_v38 }
  0xf5   : > { %v1479_v47 = vadd.f32 %v762_v44, %v752_v41  ;;  %v613_v49 = vmul.f32 %v478_v34, %v478_v34  ;;  %v1493_v3 = vpop.eup %1208 }
  0xf6   : > { %v826_v19 = vmul.f32 %v1493_v3, %v1467_v29  ;;  %v659_v36 = vsel %vm658_vm8, %v1433_v51, %v657_v30  ;;  %vm684_vm8 = vcmp.eq.f32.partialorder %v1462_v25, 0.0 }
  0xf7   : > { %1210 = vrsqrt.f32 %v1479_v47  ;;  %v1498_v8 = vadd.f32 %v613_v49, %v603_v48  ;;  %v1540_v48 = vsel %vm798_vm7, %v799_v0, %v797_v28  ;;  %vm844_vm3 = vcmp.eq.f32.partialorder %v1479_v47, inf }
  0xf8   : > { %1212 = vrsqrt.f32 %v1477_v45  ;;  %v827_v43 = vmul.f32 %v1493_v3, %v826_v19  ;;  %v899_v27 = vsub.f32 %v1532_v42, %v1540_v48  ;;  %v679_v19 = vsub.f32 1.5, %v678_v62 }
  0xf9   : > { %v553_v50 = vpop.f32.mrf.mxu2  ;;  %1214 = vrsqrt.f32 %v1498_v8  ;;  %vm846_vm5 = vcmp.eq.f32.partialorder %v1479_v47, 0.0  ;;  %vm706_vm7 = vcmp.eq.f32.partialorder %v1498_v8, inf }
  0xfa   : > { %v587_v58 = vpop.f32.mrf.mxu3  ;;  %v753_v14 = vmul.f32 %v553_v50, %v553_v50 }
  0xfb   : > { %v446_v61 = vpop.f32.mrf.mxu0  ;;  %v763_v20 = vmul.f32 %v587_v58, %v587_v58  ;;  %v818_v58 = vmul.f32 %v1469_v31, %v817_v37  ;;  %v835_v37 = vand.u32 2147483648, %v1467_v29 }
  0xfc   : > { %v480_v2 = vpop.f32.mrf.mxu1  ;;  %v604_v21 = vmul.f32 %v446_v61, %v446_v61  ;;  %v828_v61 = vmul.f32 0.5, %v827_v43  ;;  %v671_v43 = vsel %vm670_vm12, %v1447_v5, %v669_v15  ;;  %v697_v15 = vand.u32 2147483648, %v1477_v45 }
  0xfd   : > { %v1510_v9 = vpop.eup %1210  ;;  %v614_v23 = vmul.f32 %v480_v2, %v480_v2  ;;  %v1524_v33 = vadd.f32 %v763_v20, %v753_v14  ;;  %v1564_v2 = vsel %vm660_vm10, %v661_v6, %v659_v36  ;;  %v1574_v14 = vsel %vm810_vm11, %v811_v18, %v809_v55 }
  0xfe   : > { %v1518_v26 = vpop.eup %1212  ;;  %v838_v44 = vmul.f32 %v1510_v9, %v1479_v47  ;;  %v819_v17 = vmul.f32 %v818_v58, %v1449_v7  ;;  %v829_v18 = vsub.f32 1.5, %v828_v61  ;;  %v900_v35 = vsub.f32 %v1564_v2, %v1574_v14 }
  0xff   : > { %v1528_v39 = vadd.f32 %v614_v23, %v604_v21  ;;  %1216 = vrsqrt.f32 %v1524_v33  ;;  %v688_v49 = vmul.f32 %v1518_v26, %v1477_v45  ;;  %v1551_v40 = vpop.eup %1214  ;;  %vm856_vm9 = vcmp.eq.f32.partialorder %v1524_v33, inf }
 0x100   : > { %v839_v0 = vmul.f32 %v1510_v9, %v838_v44  ;;  %v700_v51 = vmul.f32 %v1551_v40, %v1498_v8  ;;  %v821_v44 = vsel %vm820_vm13, %v1449_v7, %v819_v17  ;;  %vm858_vm10 = vcmp.eq.f32.partialorder %v1524_v33, 0.0 }
 0x101   : > { %v555_v24 = vpop.f32.mrf.mxu2  ;;  %1218 = vrsqrt.f32 %v1528_v39  ;;  %v689_v4 = vmul.f32 %v1518_v26, %v688_v49  ;;  %vm708_vm11 = vcmp.eq.f32.partialorder %v1498_v8, 0.0  ;;  %vm718_vm13 = vcmp.eq.f32.partialorder %v1528_v39, inf }
 0x102   : > { %v589_v34 = vpop.f32.mrf.mxu3  ;;  %v754_v50 = vmul.f32 %v555_v24, %v555_v24  ;;  %v840_v21 = vmul.f32 0.5, %v839_v0  ;;  %v701_v38 = vmul.f32 %v1551_v40, %v700_v51  ;;  %v910_v56 = vand.u32 2147483647, %v900_v35 }
 0x103   : > { %v449_v41 = vpop.f32.mrf.mxu0  ;;  %v764_v52 = vmul.f32 %v589_v34, %v589_v34  ;;  %v690_v24 = vmul.f32 0.5, %v689_v4 }
 0x104   : > { %v483_v46 = vpop.f32.mrf.mxu1  ;;  %v605_v10 = vmul.f32 %v449_v41, %v449_v41  ;;  %v702_v4 = vmul.f32 0.5, %v701_v38  ;;  %v709_v38 = vand.u32 2147483648, %v1498_v8 }
 0x105   : > { %v1568_v31 = vadd.f32 %v764_v52, %v754_v50  ;;  %v1570_v13 = vpop.eup %1216  ;;  %v615_v6 = vmul.f32 %v483_v46, %v483_v46  ;;  %v680_v46 = vmul.f32 %v1487_v1, %v679_v19  ;;  %v830_v50 = vmul.f32 %v1493_v3, %v829_v18 }
 0x106   : > { %v850_v20 = vmul.f32 %v1570_v13, %v1524_v33  ;;  %v841_v52 = vsub.f32 1.5, %v840_v21  ;;  %v691_v58 = vsub.f32 1.5, %v690_v24  ;;  %v1613_v1 = vsel %vm672_vm14, %v673_v22, %v671_v43 }
 0x107   : > { %1220 = vrsqrt.f32 %v1568_v31  ;;  %v1584_v54 = vpop.eup %1218  ;;  %v1586_v11 = vadd.f32 %v615_v6, %v605_v10  ;;  %v1619_v10 = vsel %vm822_vm15, %v823_v60, %v821_v44  ;;  %v831_v51 = vmul.f32 %v830_v50, %v1467_v29 }
 0x108   : > { %v851_v28 = vmul.f32 %v1570_v13, %v850_v20  ;;  %v712_v30 = vmul.f32 %v1584_v54, %v1528_v39  ;;  %v842_v6 = vmul.f32 %v1510_v9, %v841_v52  ;;  %v692_v7 = vmul.f32 %v1518_v26, %v691_v58 }
 0x109   : > { %v558_v12 = vpop.f32.mrf.mxu2  ;;  %1222 = vrsqrt.f32 %v1586_v11  ;;  %v703_v21 = vsub.f32 1.5, %v702_v4  ;;  %v901_v9 = vsub.f32 %v1613_v1, %v1619_v10  ;;  %v833_v44 = vsel %vm832_vm1, %v1467_v29, %v831_v51 }
 0x10a   : > { %v592_v16 = vpop.f32.mrf.mxu3  ;;  %v755_v23 = vmul.f32 %v558_v12, %v558_v12  ;;  %v713_v49 = vmul.f32 %v1584_v54, %v712_v30  ;;  %v852_v62 = vmul.f32 0.5, %v851_v28  ;;  %v681_v12 = vmul.f32 %v680_v46, %v1462_v25 }
 0x10b   : > { %v765_v32 = vmul.f32 %v592_v16, %v592_v16  ;;  %v451_v34 = vpop.f32.mrf.mxu0  ;;  %v847_v28 = vand.u32 2147483648, %v1479_v47  ;;  %v693_v52 = vmul.f32 %v692_v7, %v1477_v45  ;;  %v859_v51 = vand.u32 2147483648, %v1524_v33 }
 0x10c   : > { %v485_v41 = vpop.f32.mrf.mxu1  ;;  %v606_v53 = vmul.f32 %v451_v34, %v451_v34  ;;  %v714_v61 = vmul.f32 0.5, %v713_v49  ;;  %v853_v60 = vsub.f32 1.5, %v852_v62  ;;  %v683_v26 = vsel %vm682_vm0, %v1462_v25, %v681_v12 }
 0x10d   : > { %v1607_v36 = vadd.f32 %v765_v32, %v755_v23  ;;  %v1221_v55 = vpop.eup %1220  ;;  %v616_v0 = vmul.f32 %v485_v41, %v485_v41  ;;  %v843_v34 = vmul.f32 %v842_v6, %v1479_v47  ;;  %v695_v29 = vsel %vm694_vm4, %v1477_v45, %v693_v52 }
 0x10e   : > { %v862_v3 = vmul.f32 %v1221_v55, %v1568_v31  ;;  %v715_v19 = vsub.f32 1.5, %v714_v61  ;;  %v854_v46 = vmul.f32 %v1570_v13, %v853_v60  ;;  %vm868_vm12 = vcmp.eq.f32.partialorder %v1568_v31, inf }
 0x10f   : > { %1224 = vrsqrt.f32 %v1607_v36  ;;  %v1625_v22 = vpop.eup %1222  ;;  %v1629_v17 = vadd.f32 %v616_v0, %v606_v53  ;;  %v704_v53 = vmul.f32 %v1551_v40, %v703_v21  ;;  %v836_v0 = vsel %vm834_vm2, %v835_v37, %v833_v44 }
 0x110   : > { %v863_v16 = vmul.f32 %v1221_v55, %v862_v3  ;;  %v724_v20 = vmul.f32 %v1625_v22, %v1586_v11  ;;  %v716_v49 = vmul.f32 %v1584_v54, %v715_v19  ;;  %v845_v40 = vsel %vm844_vm3, %v1479_v47, %v843_v34 }
 0x111   : > { %v560_v5 = vpop.f32.mrf.mxu2  ;;  %1226 = vrsqrt.f32 %v1629_v17  ;;  %v855_v4 = vmul.f32 %v854_v46, %v1524_v33  ;;  %v705_v37 = vmul.f32 %v704_v53, %v1498_v8  ;;  %v848_v19 = vsel %vm846_vm5, %v847_v28, %v845_v40 }
 0x112   : > { %v594_v18 = vpop.f32.mrf.mxu3  ;;  %v864_v23 = vmul.f32 0.5, %v863_v16  ;;  %v756_v24 = vmul.f32 %v560_v5, %v560_v5  ;;  %v725_v30 = vmul.f32 %v1625_v22, %v724_v20  ;;  %v717_v3 = vmul.f32 %v716_v49, %v1528_v39 }
 0x113   : > { %v766_v43 = vmul.f32 %v594_v18, %v594_v18  ;;  %vm870_vm14 = vcmp.eq.f32.partialorder %v1568_v31, 0.0  ;;  %v871_v20 = vand.u32 2147483648, %v1568_v31  ;;  %v857_v18 = vsel %vm856_vm9, %v1524_v33, %v855_v4 }
 0x114   : > { %v865_v41 = vsub.f32 1.5, %v864_v23  ;;  %v726_v13 = vmul.f32 0.5, %v725_v30  ;;  %v719_v21 = vsel %vm718_vm13, %v1528_v39, %v717_v3  ;;  %v698_v47 = vsel %vm696_vm6, %v697_v15, %v695_v29 }
 0x115   : > { %v1225_v32 = vpop.eup %1224  ;;  %v1656_v62 = vadd.f32 %v766_v43, %v756_v24  ;;  %vm720_vm15 = vcmp.eq.f32.partialorder %v1528_v39, 0.0  ;;  %v721_v28 = vand.u32 2147483648, %v1528_v39  ;;  %v686_v45 = vsel %vm684_vm8, %v685_v63, %v683_v26 }
 0x116   : > { %v874_v50 = vmul.f32 %v1225_v32, %v1607_v36  ;;  %v866_v58 = vmul.f32 %v1221_v55, %v865_v41  ;;  %v727_v16 = vsub.f32 1.5, %v726_v13  ;;  %v903_v15 = vsub.f32 %v698_v47, %v848_v19 }
 0x117   : > { %v1227_v54 = vpop.eup %1226  ;;  %1228 = vrsqrt.f32 %v1656_v62  ;;  %v860_v44 = vsel %vm858_vm10, %v859_v51, %v857_v18  ;;  %v722_v39 = vsel %vm720_vm15, %v721_v28, %v719_v21  ;;  %v911_v53 = vand.u32 2147483647, %v901_v9 }
 0x118   : > { %v875_v61 = vmul.f32 %v1225_v32, %v874_v50  ;;  %v867_v55 = vmul.f32 %v866_v58, %v1568_v31  ;;  %v736_v5 = vmul.f32 %v1227_v54, %v1629_v17  ;;  %v728_v41 = vmul.f32 %v1625_v22, %v727_v16 }
 0x119   : > { %v908_v22 = vand.u32 2147483647, %v898_v59  ;;  %v902_v25 = vsub.f32 %v686_v45, %v836_v0  ;;  %v909_v63 = vand.u32 2147483647, %v899_v27  ;;  %v913_v57 = vand.u32 2147483647, %v903_v15 }
 0x11a   : > { %v876_v12 = vmul.f32 0.5, %v875_v61  ;;  %v869_v6 = vsel %vm868_vm12, %v1568_v31, %v867_v55  ;;  %v737_v60 = vmul.f32 %v1227_v54, %v736_v5  ;;  %v707_v31 = vsel %vm706_vm7, %v1498_v8, %v705_v37 }
 0x11b   : > { %v872_v34 = vsel %vm870_vm14, %v871_v20, %v869_v6  ;;  %v710_v33 = vsel %vm708_vm11, %v709_v38, %v707_v31  ;;  %v729_v58 = vmul.f32 %v728_v41, %v1586_v11  ;;  %vm880_vm0 = vcmp.eq.f32.partialorder %v1607_v36, inf }
 0x11c   : > { %v877_v7 = vsub.f32 1.5, %v876_v12  ;;  %v738_v24 = vmul.f32 0.5, %v737_v60  ;;  %v905_v46 = vsub.f32 %v722_v39, %v872_v34  ;;  %v904_v26 = vsub.f32 %v710_v33, %v860_v44 }
 0x11d   : > { %v1229_v30 = vpop.eup %1228  ;;  %v919_v42 = vadd.f32 %v911_v53, %v910_v56  ;;  %v912_v48 = vand.u32 2147483647, %v902_v25  ;;  %vm730_vm1 = vcmp.eq.f32.partialorder %v1586_v11, inf  ;;  %v883_v27 = vand.u32 2147483648, %v1607_v36 }
 0x11e   : > { %v878_v23 = vmul.f32 %v1225_v32, %v877_v7  ;;  %v739_v43 = vsub.f32 1.5, %v738_v24  ;;  %v886_v32 = vmul.f32 %v1229_v30, %v1656_v62  ;;  %v915_v59 = vand.u32 2147483647, %v905_v46 }
 0x11f   : > { %v914_v9 = vand.u32 2147483647, %v904_v26  ;;  %v731_v2 = vsel %vm730_vm1, %v1586_v11, %v729_v58  ;;  %vm882_vm2 = vcmp.eq.f32.partialorder %v1607_v36, 0.0  ;;  %vm732_vm3 = vcmp.eq.f32.partialorder %v1586_v11, 0.0 }
 0x120   : > { %v879_v49 = vmul.f32 %v878_v23, %v1607_v36  ;;  %v740_v50 = vmul.f32 %v1227_v54, %v739_v43  ;;  %v887_v52 = vmul.f32 %v1229_v30, %v886_v32  ;;  %v733_v35 = vand.u32 2147483648, %v1586_v11 }
 0x121   : > { %vm742_vm4 = vcmp.eq.f32.partialorder %v1629_v17, inf  ;;  %v920_v61 = vadd.f32 %v913_v57, %v912_v48  ;;  %v921_v54 = vadd.f32 %v915_v59, %v914_v9  ;;  %vm892_vm5 = vcmp.eq.f32.partialorder %v1656_v62, inf }
 0x122   : > { %v888_v13 = vmul.f32 0.5, %v887_v52  ;;  %v881_v1 = vsel %vm880_vm0, %v1607_v36, %v879_v49  ;;  %v741_v8 = vmul.f32 %v740_v50, %v1629_v17  ;;  %v734_v55 = vsel %vm732_vm3, %v733_v35, %v731_v2 }
 0x123   : > { %v884_v38 = vsel %vm882_vm2, %v883_v27, %v881_v1  ;;  %v745_v36 = vand.u32 2147483648, %v1629_v17  ;;  %v895_v4 = vand.u32 2147483648, %v1656_v62  ;;  %vm744_vm6 = vcmp.eq.f32.partialorder %v1629_v17, 0.0 }
 0x124   : > { %v889_v10 = vsub.f32 1.5, %v888_v13  ;;  %v743_v0 = vsel %vm742_vm4, %v1629_v17, %v741_v8  ;;  %v906_v11 = vsub.f32 %v734_v55, %v884_v38  ;;  %vm894_vm7 = vcmp.eq.f32.partialorder %v1656_v62, 0.0 }
 0x125   : > { %v746_v12 = vsel %vm744_vm6, %v745_v36, %v743_v0  ;;  %v918_v29 = vadd.f32 %v909_v63, %v908_v22  ;;  %v924_v37 = vadd.f32 %v921_v54, %v920_v61 }
 0x126   : > { %v890_v14 = vmul.f32 %v1229_v30, %v889_v10  ;;  %v916_v16 = vand.u32 2147483647, %v906_v11 }
 0x127   : > { %v923_v6 = vadd.f32 %v919_v42, %v918_v29 }
 0x128   : > { %v891_v40 = vmul.f32 %v890_v14, %v1656_v62 }
 0x129   : > { %v925_v19 = vadd.f32 %v924_v37, %v923_v6 }
 0x12a   : > { %v893_v3 = vsel %vm892_vm5, %v1656_v62, %v891_v40 }
 0x12b   : > { %v896_v5 = vsel %vm894_vm7, %v895_v4, %v893_v3 }
 0x12c   : > { %v907_v51 = vsub.f32 %v746_v12, %v896_v5 }
 0x12e   : > { %v917_v7 = vand.u32 2147483647, %v907_v51 }
 0x130   : > { %v922_v60 = vadd.f32 %v917_v7, %v916_v16 }
 0x132   : > { %v926_v20 = vadd.f32 %v925_v19, %v922_v60 }
 0x134   : > { %928 = vst [vmem:[%s278_s3] sm:$0xff] %v926_v20 }
 0x135 PF: > { %s12_s13 = sadd.s32 1, %s1268_s13   ;;  %s1768_s9 = smov %s1256_s10 }
 0x136   : > { %p9_p10 = scmp.ge.s32.totalorder %s12_s13, 4   ;;  %s1769_s10 = smov %s1320_s17 }
 0x137   : > { %s1770_s11 = smov %s1264_s12  ;;  %s1771_s12 = smov %s1773_s14 }
 0x138   :  { %11 = sbr.rel (!%p9_p10) target bundleno = 3 (0x3), region = 109 }

</bundles_post_ra>
